<compile_context>
chip_gen: v7x
topology: tpu7x:2x2x1
jax: 0.10.0
libtpu: 0.0.40
codegen_flags: <defaults>
</compile_context>

<pallas_src>
import functools

import jax
import jax.numpy as jnp
from jax import lax
from jax.experimental import pallas as pl
from jax.experimental.pallas import tpu as pltpu

_INV_SQRT2 = 0.7071067811865475


# ---------------------------------------------------------------------------
# In-kernel helpers (all f32)
# ---------------------------------------------------------------------------
def _layernorm(x, gamma, beta, eps=1e-5):
    # PyTorch nn.LayerNorm over the last dim: biased variance, eps=1e-5.
    mean = jnp.mean(x, axis=-1, keepdims=True)
    var = jnp.mean((x - mean) ** 2, axis=-1, keepdims=True)
    return (x - mean) * lax.rsqrt(var + eps) * gamma + beta


def _gelu_exact(x):
    # PyTorch nn.GELU() default: exact erf formulation.
    return 0.5 * x * (1.0 + lax.erf(x * _INV_SQRT2))


# ---------------------------------------------------------------------------
# Fused per-layer kernel: PreNorm->Attention->+x, then PreNorm->FF->+x.
# One grid step = Bt batch elements (full sequences resident in VMEM).
# ---------------------------------------------------------------------------
def transformer_layer_kernel(
    x_ref,                      # (Bt, N, D)     f32 activations
    ln1_g_ref, ln1_b_ref,       # (1, D)         f32
    wqkv_ref,                   # (D, 3*inner)   bf16, q-cols pre-scaled by dh**-0.5
    wo_ref,                     # (inner, D)     bf16
    bo_ref,                     # (1, D)         f32
    ln2_g_ref, ln2_b_ref,       # (1, D)         f32
    w1_ref,                     # (D, mlp)       bf16
    b1_ref,                     # (1, mlp)       f32
    w2_ref,                     # (mlp, D)       bf16
    b2_ref,                     # (1, D)         f32
    o_ref,                      # (Bt, N, D)     f32
    *, heads, dim_head,
):
    f32, bf16 = jnp.float32, jnp.bfloat16
    bt, n, d = x_ref.shape
    inner = heads * dim_head
    rows = bt * n

    x = x_ref[...].reshape(rows, d).astype(f32)                 # (rows, D)

    # ------------------------- Attention sublayer -------------------------
    xn = _layernorm(x, ln1_g_ref[0], ln1_b_ref[0])              # f32
    # Single wide QKV projection: full 3*inner lane width on the MXU.
    qkv = jnp.dot(xn.astype(bf16), wqkv_ref[...],
                  preferred_element_type=f32)                   # (rows, 3*inner) f32

    head_outs = []
    for h in range(heads):                                      # static loop
        c = h * dim_head
        q_h = qkv[:, c:c + dim_head].astype(bf16).reshape(bt, n, dim_head)
        k_h = qkv[:, inner + c:inner + c + dim_head].astype(bf16).reshape(bt, n, dim_head)
        v_h = qkv[:, 2 * inner + c:2 * inner + c + dim_head].astype(bf16).reshape(bt, n, dim_head)

        # Scores: scale already folded into the q projection weights.
        s = jnp.einsum('bnd,bmd->bnm', q_h, k_h, preferred_element_type=f32)
        s = s - jnp.max(s, axis=-1, keepdims=True)
        p = jnp.exp(s)
        p = p * pl.reciprocal(jnp.sum(p, axis=-1, keepdims=True), approx=True)
        o_h = jnp.einsum('bnm,bmd->bnd', p.astype(bf16), v_h,
                         preferred_element_type=f32)            # (bt, n, dh) f32
        head_outs.append(o_h.reshape(rows, dim_head))

    # rearrange('b h n d -> b n (h d)') == lane-concat of per-head outputs, then one
    # full-contraction-width output projection (no (H,N,D) intermediate, no head-sum loop).
    attn_cat = jnp.concatenate(head_outs, axis=-1)              # (rows, inner) f32
    attn_out = jnp.dot(attn_cat.astype(bf16), wo_ref[...],
                       preferred_element_type=f32) + bo_ref[0]

    x2 = x + attn_out                                           # residual, f32

    # ------------------------ FeedForward sublayer ------------------------
    xn2 = _layernorm(x2, ln2_g_ref[0], ln2_b_ref[0])
    hdn = jnp.dot(xn2.astype(bf16), w1_ref[...], preferred_element_type=f32) + b1_ref[0]
    hdn = _gelu_exact(hdn)                                      # exact GELU, f32
    ff = jnp.dot(hdn.astype(bf16), w2_ref[...], preferred_element_type=f32) + b2_ref[0]

    o_ref[...] = (x2 + ff).reshape(bt, n, d).astype(o_ref.dtype)


# ---------------------------------------------------------------------------
# Wrapper: one pallas_call per layer, grid over batch tiles.
# ---------------------------------------------------------------------------
def _pick_batch_tile(B, N, row_target=256):
    bt = max(1, min(B, max(1, row_target // max(N, 1))))
    while B % bt:
        bt -= 1
    # Keep >= 2 grid steps when possible so v7x's two TensorCores both get work.
    while bt > 1 and B // bt < 2:
        bt //= 2
        while B % bt:
            bt -= 1
    return bt


def _vmem_limit_bytes(rows, N, D, heads, dim_head, mlp):
    inner = heads * dim_head
    weights = 2 * (4 * D * inner + 2 * D * mlp)          # bf16 weights (counted once)
    vectors = 4 * (6 * D + 2 * mlp)                      # f32 LN params + biases
    io_tiles = 2 * (2 * 4 * rows * D)                    # double-buffered x / out tiles
    live = 4 * (rows * 3 * inner                         # qkv
                + rows * mlp                             # FF hidden
                + 4 * rows * D                           # xn, attn_out, x2, ff
                + 2 * rows * N)                          # per-head scores/probs (upper bound)
    est = 2 * weights + 2 * vectors + io_tiles + live + (4 << 20)
    # Floor at the scoped default, cap at 48 MiB so the request is valid on v7x (64 MiB).
    return int(min(max(est, 32 << 20), 48 << 20))


def _cost_estimate(B, N, D, heads, dim_head, mlp):
    inner = heads * dim_head
    rows = B * N
    flops = (2 * rows * (3 * D * inner + inner * D + 2 * D * mlp)
             + 2 * B * heads * N * N * dim_head * 2)
    transcendentals = B * heads * N * N + rows * mlp + 2 * rows
    bytes_accessed = (2 * rows * D * 4                     # activations in + out
                      + 2 * (4 * D * inner + 2 * D * mlp)  # bf16 weights
                      + 4 * (6 * D + 2 * mlp))             # f32 LN params + biases
    return pl.CostEstimate(flops=flops, transcendentals=transcendentals,
                           bytes_accessed=bytes_accessed)


def transformer_layer(x, p, *, heads, dim_head):
    B, N, D = x.shape
    mlp = p["w1"].shape[-1]
    inner = heads * dim_head
    bt = _pick_batch_tile(B, N)
    rows = bt * N
    kernel = functools.partial(transformer_layer_kernel, heads=heads, dim_head=dim_head)
    vec = lambda b: (0, 0)        # parameters: whole-array block every step
    return pl.pallas_call(
        kernel,
        out_shape=jax.ShapeDtypeStruct((B, N, D), x.dtype),
        grid=(B // bt,),
        in_specs=[
            pl.BlockSpec((bt, N, D), lambda b: (b, 0, 0)),          # x tile
            pl.BlockSpec((1, D), vec), pl.BlockSpec((1, D), vec),   # ln1 gamma/beta
            pl.BlockSpec((D, 3 * inner), vec),                      # w_qkv (fused)
            pl.BlockSpec((inner, D), vec),                          # w_o
            pl.BlockSpec((1, D), vec),                              # b_o
            pl.BlockSpec((1, D), vec), pl.BlockSpec((1, D), vec),   # ln2 gamma/beta
            pl.BlockSpec((D, mlp), vec),                            # w1
            pl.BlockSpec((1, mlp), vec),                            # b1
            pl.BlockSpec((mlp, D), vec),                            # w2
            pl.BlockSpec((1, D), vec),                              # b2
        ],
        out_specs=pl.BlockSpec((bt, N, D), lambda b: (b, 0, 0)),
        compiler_params=pltpu.CompilerParams(
            dimension_semantics=("parallel",),
            vmem_limit_bytes=_vmem_limit_bytes(rows, N, D, heads, dim_head, mlp)),
        cost_estimate=_cost_estimate(B, N, D, heads, dim_head, mlp),
    )(x, p["ln1_g"], p["ln1_b"], p["w_qkv"], p["w_o"], p["b_o"],
      p["ln2_g"], p["ln2_b"], p["w1"], p["b1"], p["w2"], p["b2"])


def transformer_forward(x, layers, *, heads, dim_head):
    for p in layers:
        x = transformer_layer(x, p, heads=heads, dim_head=dim_head)
    return x


# ---------------------------------------------------------------------------
# Deterministic synthetic parameters (matches module __init__ shapes).
# Weights generated in "y = x @ W" layout (transpose of nn.Linear.weight):
#   to_qkv -> single (dim, 3*inner) bf16 matrix, q columns pre-scaled by dh**-0.5
#   to_out -> (inner, dim) bf16
#   FF     -> (dim, mlp), (mlp, dim) bf16
# LayerNorm params and biases stay f32.
# ---------------------------------------------------------------------------
def init_transformer_params(key, dim, depth, heads, dim_head, mlp_dim):
    inner = heads * dim_head
    scale = dim_head ** -0.5
    layers = []
    for _ in range(depth):
        key, *ks = jax.random.split(key, 8)
        w_qkv = 0.02 * jax.random.normal(ks[0], (dim, 3 * inner), jnp.float32)
        # Fold the softmax scale into the q-projection columns (exact rewrite:
        # (xWq)(xWk)^T * scale == (x(Wq*scale))(xWk)^T).
        w_qkv = w_qkv.at[:, :inner].multiply(scale)
        w_out = 0.02 * jax.random.normal(ks[1], (inner, dim), jnp.float32)
        b_out = 0.01 * jax.random.normal(ks[2], (1, dim), jnp.float32)
        w1 = 0.02 * jax.random.normal(ks[3], (dim, mlp_dim), jnp.float32)
        b1 = 0.01 * jax.random.normal(ks[4], (1, mlp_dim), jnp.float32)
        w2 = 0.02 * jax.random.normal(ks[5], (mlp_dim, dim), jnp.float32)
        b2 = 0.01 * jax.random.normal(ks[6], (1, dim), jnp.float32)
        layers.append({
            "ln1_g": jnp.ones((1, dim), jnp.float32),
            "ln1_b": jnp.zeros((1, dim), jnp.float32),
            "w_qkv": w_qkv.astype(jnp.bfloat16),
            "w_o": w_out.astype(jnp.bfloat16),
            "b_o": b_out,
            "ln2_g": jnp.ones((1, dim), jnp.float32),
            "ln2_b": jnp.zeros((1, dim), jnp.float32),
            "w1": w1.astype(jnp.bfloat16),
            "b1": b1,
            "w2": w2.astype(jnp.bfloat16),
            "b2": b2,
        })
    return layers


# ---------------------------------------------------------------------------
if __name__ == "__main__":
    # Lane-friendly small config: D, inner, mlp_dim multiples of 128; Bt*N = 128 rows
    # per grid step and an even (length-2) grid.
    B, N = 16, 16
    dim, depth, heads, dim_head, mlp_dim = 128, 2, 4, 32, 256

    key = jax.random.PRNGKey(0)
    kx, kp = jax.random.split(key)
    x = jax.random.normal(kx, (B, N, dim), jnp.float32)
    layers = init_transformer_params(kp, dim, depth, heads, dim_head, mlp_dim)

    fwd = jax.jit(functools.partial(transformer_forward, heads=heads, dim_head=dim_head))
    out = jax.block_until_ready(fwd(x, layers))

    assert out.shape == (B, N, dim) and out.dtype == jnp.float32
    assert bool(jnp.all(jnp.isfinite(out)))
    print("KERNEL_OK")
</pallas_src>

<mosaic_0001>
module attributes {stable_mosaic.version = 11 : i64} {
  func.func @transformer_layer_kernel(%arg0: i32, %arg1: memref<8x16x128xf32, #tpu.memory_space<vmem>>, %arg2: memref<1x128xf32, #tpu.memory_space<vmem>>, %arg3: memref<1x128xf32, #tpu.memory_space<vmem>>, %arg4: memref<128x384xbf16, #tpu.memory_space<vmem>>, %arg5: memref<128x128xbf16, #tpu.memory_space<vmem>>, %arg6: memref<1x128xf32, #tpu.memory_space<vmem>>, %arg7: memref<1x128xf32, #tpu.memory_space<vmem>>, %arg8: memref<1x128xf32, #tpu.memory_space<vmem>>, %arg9: memref<128x256xbf16, #tpu.memory_space<vmem>>, %arg10: memref<1x256xf32, #tpu.memory_space<vmem>>, %arg11: memref<256x128xbf16, #tpu.memory_space<vmem>>, %arg12: memref<1x128xf32, #tpu.memory_space<vmem>>, %arg13: memref<8x16x128xf32, #tpu.memory_space<vmem>>) attributes {dimension_semantics = [#tpu.dimension_semantics<parallel>], iteration_bounds = array<i64: 2>, scalar_prefetch = 0 : i64, scratch_operands = 0 : i64, tpu.core_type = #tpu.core_type<tc>, window_params = [{transform_indices = @transform_0, window_bounds = array<i64: 8, 16, 128>}, {pipeline_mode = #tpu.pipeline_mode<synchronous>, transform_indices = @transform_1, window_bounds = array<i64: 1, 128>}, {pipeline_mode = #tpu.pipeline_mode<synchronous>, transform_indices = @transform_2, window_bounds = array<i64: 1, 128>}, {pipeline_mode = #tpu.pipeline_mode<synchronous>, transform_indices = @transform_3, window_bounds = array<i64: 128, 384>}, {pipeline_mode = #tpu.pipeline_mode<synchronous>, transform_indices = @transform_4, window_bounds = array<i64: 128, 128>}, {pipeline_mode = #tpu.pipeline_mode<synchronous>, transform_indices = @transform_5, window_bounds = array<i64: 1, 128>}, {pipeline_mode = #tpu.pipeline_mode<synchronous>, transform_indices = @transform_6, window_bounds = array<i64: 1, 128>}, {pipeline_mode = #tpu.pipeline_mode<synchronous>, transform_indices = @transform_7, window_bounds = array<i64: 1, 128>}, {pipeline_mode = #tpu.pipeline_mode<synchronous>, transform_indices = @transform_8, window_bounds = array<i64: 128, 256>}, {pipeline_mode = #tpu.pipeline_mode<synchronous>, transform_indices = @transform_9, window_bounds = array<i64: 1, 256>}, {pipeline_mode = #tpu.pipeline_mode<synchronous>, transform_indices = @transform_10, window_bounds = array<i64: 256, 128>}, {pipeline_mode = #tpu.pipeline_mode<synchronous>, transform_indices = @transform_11, window_bounds = array<i64: 1, 128>}, {transform_indices = @transform_12, window_bounds = array<i64: 8, 16, 128>}]} {
    %c0 = arith.constant 0 : index
    %c0_0 = arith.constant 0 : index
    %c0_1 = arith.constant 0 : index
    %0 = vector.load %arg1[%c0, %c0_0, %c0_1] : memref<8x16x128xf32, #tpu.memory_space<vmem>>, vector<8x16x128xf32>
    %1 = vector.shape_cast %0 : vector<8x16x128xf32> to vector<128x128xf32>
    %c0_2 = arith.constant 0 : index
    %c0_3 = arith.constant 0 : index
    %2 = vector.load %arg2[%c0_2, %c0_3] : memref<1x128xf32, #tpu.memory_space<vmem>>, vector<1x128xf32>
    %3 = vector.shape_cast %2 : vector<1x128xf32> to vector<128xf32>
    %c0_4 = arith.constant 0 : index
    %c0_5 = arith.constant 0 : index
    %4 = vector.load %arg3[%c0_4, %c0_5] : memref<1x128xf32, #tpu.memory_space<vmem>>, vector<1x128xf32>
    %5 = vector.shape_cast %4 : vector<1x128xf32> to vector<128xf32>
    %cst = arith.constant dense<0.000000e+00> : vector<128xf32>
    %6 = vector.multi_reduction <add>, %1, %cst [1] : vector<128x128xf32> to vector<128xf32>
    %7 = vector.shape_cast %6 : vector<128xf32> to vector<128x1xf32>
    %cst_6 = arith.constant 1.280000e+02 : f32
    %8 = vector.broadcast %cst_6 : f32 to vector<128x1xf32>
    %9 = arith.divf %7, %8 : vector<128x1xf32>
    %10 = vector.broadcast %9 : vector<128x1xf32> to vector<128x128xf32>
    %11 = arith.subf %1, %10 : vector<128x128xf32>
    %12 = arith.mulf %11, %11 : vector<128x128xf32>
    %cst_7 = arith.constant dense<0.000000e+00> : vector<128xf32>
    %13 = vector.multi_reduction <add>, %12, %cst_7 [1] : vector<128x128xf32> to vector<128xf32>
    %14 = vector.shape_cast %13 : vector<128xf32> to vector<128x1xf32>
    %cst_8 = arith.constant 1.280000e+02 : f32
    %15 = vector.broadcast %cst_8 : f32 to vector<128x1xf32>
    %16 = arith.divf %14, %15 : vector<128x1xf32>
    %17 = vector.broadcast %9 : vector<128x1xf32> to vector<128x128xf32>
    %18 = arith.subf %1, %17 : vector<128x128xf32>
    %cst_9 = arith.constant 9.99999974E-6 : f32
    %19 = vector.broadcast %cst_9 : f32 to vector<128x1xf32>
    %20 = arith.addf %16, %19 : vector<128x1xf32>
    %21 = math.rsqrt %20 : vector<128x1xf32>
    %22 = vector.broadcast %21 : vector<128x1xf32> to vector<128x128xf32>
    %23 = arith.mulf %18, %22 : vector<128x128xf32>
    %24 = vector.shape_cast %3 : vector<128xf32> to vector<1x128xf32>
    %25 = vector.broadcast %24 : vector<1x128xf32> to vector<128x128xf32>
    %26 = arith.mulf %23, %25 : vector<128x128xf32>
    %27 = vector.shape_cast %5 : vector<128xf32> to vector<1x128xf32>
    %28 = vector.broadcast %27 : vector<1x128xf32> to vector<128x128xf32>
    %29 = arith.addf %26, %28 : vector<128x128xf32>
    %30 = arith.truncf %29 : vector<128x128xf32> to vector<128x128xbf16>
    %c0_10 = arith.constant 0 : index
    %c0_11 = arith.constant 0 : index
    %31 = vector.load %arg4[%c0_10, %c0_11] : memref<128x384xbf16, #tpu.memory_space<vmem>>, vector<128x384xbf16>
    %cst_12 = arith.constant dense<0.000000e+00> : vector<128x384xf32>
    %32 = tpu.matmul %30, %31, %cst_12 {dimension_numbers = #tpu.dot_dimension_numbers<[1], [0], [0], [1], [0, 0, 1, 1], [], []>} : vector<128x128xbf16>, vector<128x384xbf16>, vector<128x384xf32> -> vector<128x384xf32>
    %33 = vector.extract_strided_slice %32 {offsets = [0, 0], sizes = [128, 32], strides = [1, 1]} : vector<128x384xf32> to vector<128x32xf32>
    %34 = arith.truncf %33 : vector<128x32xf32> to vector<128x32xbf16>
    %35 = vector.shape_cast %34 : vector<128x32xbf16> to vector<8x16x32xbf16>
    %36 = vector.extract_strided_slice %32 {offsets = [0, 128], sizes = [128, 32], strides = [1, 1]} : vector<128x384xf32> to vector<128x32xf32>
    %37 = arith.truncf %36 : vector<128x32xf32> to vector<128x32xbf16>
    %38 = vector.shape_cast %37 : vector<128x32xbf16> to vector<8x16x32xbf16>
    %39 = vector.extract_strided_slice %32 {offsets = [0, 256], sizes = [128, 32], strides = [1, 1]} : vector<128x384xf32> to vector<128x32xf32>
    %40 = arith.truncf %39 : vector<128x32xf32> to vector<128x32xbf16>
    %41 = vector.shape_cast %40 : vector<128x32xbf16> to vector<8x16x32xbf16>
    "tpu.trace_start"() <{level = 10 : i32, message = "bnd,bmd->bnm"}> : () -> ()
    %cst_13 = arith.constant dense<0.000000e+00> : vector<8x16x16xf32>
    %42 = tpu.matmul %35, %38, %cst_13 {dimension_numbers = #tpu.dot_dimension_numbers<[2], [2], [1], [1], [0, 0, 0, 1, 1, 1], [0], [0]>} : vector<8x16x32xbf16>, vector<8x16x32xbf16>, vector<8x16x16xf32> -> vector<8x16x16xf32>
    "tpu.trace_stop"() : () -> ()
    %cst_14 = arith.constant dense<0xFF800000> : vector<8x16xf32>
    %43 = vector.multi_reduction <maximumf>, %42, %cst_14 [2] : vector<8x16x16xf32> to vector<8x16xf32>
    %44 = vector.shape_cast %43 : vector<8x16xf32> to vector<8x16x1xf32>
    %45 = vector.broadcast %44 : vector<8x16x1xf32> to vector<8x16x16xf32>
    %46 = arith.subf %42, %45 : vector<8x16x16xf32>
    %47 = math.exp %46 : vector<8x16x16xf32>
    %cst_15 = arith.constant dense<0.000000e+00> : vector<8x16xf32>
    %48 = vector.multi_reduction <add>, %47, %cst_15 [2] : vector<8x16x16xf32> to vector<8x16xf32>
    %49 = vector.shape_cast %48 : vector<8x16xf32> to vector<8x16x1xf32>
    %50 = tpu.reciprocal %49 {approx = true} : vector<8x16x1xf32> -> vector<8x16x1xf32>
    %51 = vector.broadcast %50 : vector<8x16x1xf32> to vector<8x16x16xf32>
    %52 = arith.mulf %47, %51 : vector<8x16x16xf32>
    %53 = arith.truncf %52 : vector<8x16x16xf32> to vector<8x16x16xbf16>
    "tpu.trace_start"() <{level = 10 : i32, message = "bnm,bmd->bnd"}> : () -> ()
    %cst_16 = arith.constant dense<0.000000e+00> : vector<8x16x32xf32>
    %54 = tpu.matmul %53, %41, %cst_16 {dimension_numbers = #tpu.dot_dimension_numbers<[2], [1], [1], [2], [0, 0, 0, 1, 1, 2], [0], [0]>} : vector<8x16x16xbf16>, vector<8x16x32xbf16>, vector<8x16x32xf32> -> vector<8x16x32xf32>
    "tpu.trace_stop"() : () -> ()
    %55 = vector.shape_cast %54 : vector<8x16x32xf32> to vector<128x32xf32>
    %56 = vector.extract_strided_slice %32 {offsets = [0, 32], sizes = [128, 32], strides = [1, 1]} : vector<128x384xf32> to vector<128x32xf32>
    %57 = arith.truncf %56 : vector<128x32xf32> to vector<128x32xbf16>
    %58 = vector.shape_cast %57 : vector<128x32xbf16> to vector<8x16x32xbf16>
    %59 = vector.extract_strided_slice %32 {offsets = [0, 160], sizes = [128, 32], strides = [1, 1]} : vector<128x384xf32> to vector<128x32xf32>
    %60 = arith.truncf %59 : vector<128x32xf32> to vector<128x32xbf16>
    %61 = vector.shape_cast %60 : vector<128x32xbf16> to vector<8x16x32xbf16>
    %62 = vector.extract_strided_slice %32 {offsets = [0, 288], sizes = [128, 32], strides = [1, 1]} : vector<128x384xf32> to vector<128x32xf32>
    %63 = arith.truncf %62 : vector<128x32xf32> to vector<128x32xbf16>
    %64 = vector.shape_cast %63 : vector<128x32xbf16> to vector<8x16x32xbf16>
    "tpu.trace_start"() <{level = 10 : i32, message = "bnd,bmd->bnm"}> : () -> ()
    %cst_17 = arith.constant dense<0.000000e+00> : vector<8x16x16xf32>
    %65 = tpu.matmul %58, %61, %cst_17 {dimension_numbers = #tpu.dot_dimension_numbers<[2], [2], [1], [1], [0, 0, 0, 1, 1, 1], [0], [0]>} : vector<8x16x32xbf16>, vector<8x16x32xbf16>, vector<8x16x16xf32> -> vector<8x16x16xf32>
    "tpu.trace_stop"() : () -> ()
    %cst_18 = arith.constant dense<0xFF800000> : vector<8x16xf32>
    %66 = vector.multi_reduction <maximumf>, %65, %cst_18 [2] : vector<8x16x16xf32> to vector<8x16xf32>
    %67 = vector.shape_cast %66 : vector<8x16xf32> to vector<8x16x1xf32>
    %68 = vector.broadcast %67 : vector<8x16x1xf32> to vector<8x16x16xf32>
    %69 = arith.subf %65, %68 : vector<8x16x16xf32>
    %70 = math.exp %69 : vector<8x16x16xf32>
    %cst_19 = arith.constant dense<0.000000e+00> : vector<8x16xf32>
    %71 = vector.multi_reduction <add>, %70, %cst_19 [2] : vector<8x16x16xf32> to vector<8x16xf32>
    %72 = vector.shape_cast %71 : vector<8x16xf32> to vector<8x16x1xf32>
    %73 = tpu.reciprocal %72 {approx = true} : vector<8x16x1xf32> -> vector<8x16x1xf32>
    %74 = vector.broadcast %73 : vector<8x16x1xf32> to vector<8x16x16xf32>
    %75 = arith.mulf %70, %74 : vector<8x16x16xf32>
    %76 = arith.truncf %75 : vector<8x16x16xf32> to vector<8x16x16xbf16>
    "tpu.trace_start"() <{level = 10 : i32, message = "bnm,bmd->bnd"}> : () -> ()
    %cst_20 = arith.constant dense<0.000000e+00> : vector<8x16x32xf32>
    %77 = tpu.matmul %76, %64, %cst_20 {dimension_numbers = #tpu.dot_dimension_numbers<[2], [1], [1], [2], [0, 0, 0, 1, 1, 2], [0], [0]>} : vector<8x16x16xbf16>, vector<8x16x32xbf16>, vector<8x16x32xf32> -> vector<8x16x32xf32>
    "tpu.trace_stop"() : () -> ()
    %78 = vector.shape_cast %77 : vector<8x16x32xf32> to vector<128x32xf32>
    %79 = vector.extract_strided_slice %32 {offsets = [0, 64], sizes = [128, 32], strides = [1, 1]} : vector<128x384xf32> to vector<128x32xf32>
    %80 = arith.truncf %79 : vector<128x32xf32> to vector<128x32xbf16>
    %81 = vector.shape_cast %80 : vector<128x32xbf16> to vector<8x16x32xbf16>
    %82 = vector.extract_strided_slice %32 {offsets = [0, 192], sizes = [128, 32], strides = [1, 1]} : vector<128x384xf32> to vector<128x32xf32>
    %83 = arith.truncf %82 : vector<128x32xf32> to vector<128x32xbf16>
    %84 = vector.shape_cast %83 : vector<128x32xbf16> to vector<8x16x32xbf16>
    %85 = vector.extract_strided_slice %32 {offsets = [0, 320], sizes = [128, 32], strides = [1, 1]} : vector<128x384xf32> to vector<128x32xf32>
    %86 = arith.truncf %85 : vector<128x32xf32> to vector<128x32xbf16>
    %87 = vector.shape_cast %86 : vector<128x32xbf16> to vector<8x16x32xbf16>
    "tpu.trace_start"() <{level = 10 : i32, message = "bnd,bmd->bnm"}> : () -> ()
    %cst_21 = arith.constant dense<0.000000e+00> : vector<8x16x16xf32>
    %88 = tpu.matmul %81, %84, %cst_21 {dimension_numbers = #tpu.dot_dimension_numbers<[2], [2], [1], [1], [0, 0, 0, 1, 1, 1], [0], [0]>} : vector<8x16x32xbf16>, vector<8x16x32xbf16>, vector<8x16x16xf32> -> vector<8x16x16xf32>
    "tpu.trace_stop"() : () -> ()
    %cst_22 = arith.constant dense<0xFF800000> : vector<8x16xf32>
    %89 = vector.multi_reduction <maximumf>, %88, %cst_22 [2] : vector<8x16x16xf32> to vector<8x16xf32>
    %90 = vector.shape_cast %89 : vector<8x16xf32> to vector<8x16x1xf32>
    %91 = vector.broadcast %90 : vector<8x16x1xf32> to vector<8x16x16xf32>
    %92 = arith.subf %88, %91 : vector<8x16x16xf32>
    %93 = math.exp %92 : vector<8x16x16xf32>
    %cst_23 = arith.constant dense<0.000000e+00> : vector<8x16xf32>
    %94 = vector.multi_reduction <add>, %93, %cst_23 [2] : vector<8x16x16xf32> to vector<8x16xf32>
    %95 = vector.shape_cast %94 : vector<8x16xf32> to vector<8x16x1xf32>
    %96 = tpu.reciprocal %95 {approx = true} : vector<8x16x1xf32> -> vector<8x16x1xf32>
    %97 = vector.broadcast %96 : vector<8x16x1xf32> to vector<8x16x16xf32>
    %98 = arith.mulf %93, %97 : vector<8x16x16xf32>
    %99 = arith.truncf %98 : vector<8x16x16xf32> to vector<8x16x16xbf16>
    "tpu.trace_start"() <{level = 10 : i32, message = "bnm,bmd->bnd"}> : () -> ()
    %cst_24 = arith.constant dense<0.000000e+00> : vector<8x16x32xf32>
    %100 = tpu.matmul %99, %87, %cst_24 {dimension_numbers = #tpu.dot_dimension_numbers<[2], [1], [1], [2], [0, 0, 0, 1, 1, 2], [0], [0]>} : vector<8x16x16xbf16>, vector<8x16x32xbf16>, vector<8x16x32xf32> -> vector<8x16x32xf32>
    "tpu.trace_stop"() : () -> ()
    %101 = vector.shape_cast %100 : vector<8x16x32xf32> to vector<128x32xf32>
    %102 = vector.extract_strided_slice %32 {offsets = [0, 96], sizes = [128, 32], strides = [1, 1]} : vector<128x384xf32> to vector<128x32xf32>
    %103 = arith.truncf %102 : vector<128x32xf32> to vector<128x32xbf16>
    %104 = vector.shape_cast %103 : vector<128x32xbf16> to vector<8x16x32xbf16>
    %105 = vector.extract_strided_slice %32 {offsets = [0, 224], sizes = [128, 32], strides = [1, 1]} : vector<128x384xf32> to vector<128x32xf32>
    %106 = arith.truncf %105 : vector<128x32xf32> to vector<128x32xbf16>
    %107 = vector.shape_cast %106 : vector<128x32xbf16> to vector<8x16x32xbf16>
    %108 = vector.extract_strided_slice %32 {offsets = [0, 352], sizes = [128, 32], strides = [1, 1]} : vector<128x384xf32> to vector<128x32xf32>
    %109 = arith.truncf %108 : vector<128x32xf32> to vector<128x32xbf16>
    %110 = vector.shape_cast %109 : vector<128x32xbf16> to vector<8x16x32xbf16>
    "tpu.trace_start"() <{level = 10 : i32, message = "bnd,bmd->bnm"}> : () -> ()
    %cst_25 = arith.constant dense<0.000000e+00> : vector<8x16x16xf32>
    %111 = tpu.matmul %104, %107, %cst_25 {dimension_numbers = #tpu.dot_dimension_numbers<[2], [2], [1], [1], [0, 0, 0, 1, 1, 1], [0], [0]>} : vector<8x16x32xbf16>, vector<8x16x32xbf16>, vector<8x16x16xf32> -> vector<8x16x16xf32>
    "tpu.trace_stop"() : () -> ()
    %cst_26 = arith.constant dense<0xFF800000> : vector<8x16xf32>
    %112 = vector.multi_reduction <maximumf>, %111, %cst_26 [2] : vector<8x16x16xf32> to vector<8x16xf32>
    %113 = vector.shape_cast %112 : vector<8x16xf32> to vector<8x16x1xf32>
    %114 = vector.broadcast %113 : vector<8x16x1xf32> to vector<8x16x16xf32>
    %115 = arith.subf %111, %114 : vector<8x16x16xf32>
    %116 = math.exp %115 : vector<8x16x16xf32>
    %cst_27 = arith.constant dense<0.000000e+00> : vector<8x16xf32>
    %117 = vector.multi_reduction <add>, %116, %cst_27 [2] : vector<8x16x16xf32> to vector<8x16xf32>
    %118 = vector.shape_cast %117 : vector<8x16xf32> to vector<8x16x1xf32>
    %119 = tpu.reciprocal %118 {approx = true} : vector<8x16x1xf32> -> vector<8x16x1xf32>
    %120 = vector.broadcast %119 : vector<8x16x1xf32> to vector<8x16x16xf32>
    %121 = arith.mulf %116, %120 : vector<8x16x16xf32>
    %122 = arith.truncf %121 : vector<8x16x16xf32> to vector<8x16x16xbf16>
    "tpu.trace_start"() <{level = 10 : i32, message = "bnm,bmd->bnd"}> : () -> ()
    %cst_28 = arith.constant dense<0.000000e+00> : vector<8x16x32xf32>
    %123 = tpu.matmul %122, %110, %cst_28 {dimension_numbers = #tpu.dot_dimension_numbers<[2], [1], [1], [2], [0, 0, 0, 1, 1, 2], [0], [0]>} : vector<8x16x16xbf16>, vector<8x16x32xbf16>, vector<8x16x32xf32> -> vector<8x16x32xf32>
    "tpu.trace_stop"() : () -> ()
    %124 = vector.shape_cast %123 : vector<8x16x32xf32> to vector<128x32xf32>
    %125 = tpu.concatenate %55, %78, %101, %124 in 1 : vector<128x32xf32>, vector<128x32xf32>, vector<128x32xf32>, vector<128x32xf32> -> vector<128x128xf32>
    %126 = arith.truncf %125 : vector<128x128xf32> to vector<128x128xbf16>
    %c0_29 = arith.constant 0 : index
    %c0_30 = arith.constant 0 : index
    %127 = vector.load %arg5[%c0_29, %c0_30] : memref<128x128xbf16, #tpu.memory_space<vmem>>, vector<128x128xbf16>
    %cst_31 = arith.constant dense<0.000000e+00> : vector<128x128xf32>
    %128 = tpu.matmul %126, %127, %cst_31 {dimension_numbers = #tpu.dot_dimension_numbers<[1], [0], [0], [1], [0, 0, 1, 1], [], []>} : vector<128x128xbf16>, vector<128x128xbf16>, vector<128x128xf32> -> vector<128x128xf32>
    %c0_32 = arith.constant 0 : index
    %c0_33 = arith.constant 0 : index
    %129 = vector.load %arg6[%c0_32, %c0_33] : memref<1x128xf32, #tpu.memory_space<vmem>>, vector<1x128xf32>
    %130 = vector.shape_cast %129 : vector<1x128xf32> to vector<128xf32>
    %131 = vector.shape_cast %130 : vector<128xf32> to vector<1x128xf32>
    %132 = vector.broadcast %131 : vector<1x128xf32> to vector<128x128xf32>
    %133 = arith.addf %128, %132 : vector<128x128xf32>
    %134 = arith.addf %1, %133 : vector<128x128xf32>
    %c0_34 = arith.constant 0 : index
    %c0_35 = arith.constant 0 : index
    %135 = vector.load %arg7[%c0_34, %c0_35] : memref<1x128xf32, #tpu.memory_space<vmem>>, vector<1x128xf32>
    %136 = vector.shape_cast %135 : vector<1x128xf32> to vector<128xf32>
    %c0_36 = arith.constant 0 : index
    %c0_37 = arith.constant 0 : index
    %137 = vector.load %arg8[%c0_36, %c0_37] : memref<1x128xf32, #tpu.memory_space<vmem>>, vector<1x128xf32>
    %138 = vector.shape_cast %137 : vector<1x128xf32> to vector<128xf32>
    %cst_38 = arith.constant dense<0.000000e+00> : vector<128xf32>
    %139 = vector.multi_reduction <add>, %134, %cst_38 [1] : vector<128x128xf32> to vector<128xf32>
    %140 = vector.shape_cast %139 : vector<128xf32> to vector<128x1xf32>
    %cst_39 = arith.constant 1.280000e+02 : f32
    %141 = vector.broadcast %cst_39 : f32 to vector<128x1xf32>
    %142 = arith.divf %140, %141 : vector<128x1xf32>
    %143 = vector.broadcast %142 : vector<128x1xf32> to vector<128x128xf32>
    %144 = arith.subf %134, %143 : vector<128x128xf32>
    %145 = arith.mulf %144, %144 : vector<128x128xf32>
    %cst_40 = arith.constant dense<0.000000e+00> : vector<128xf32>
    %146 = vector.multi_reduction <add>, %145, %cst_40 [1] : vector<128x128xf32> to vector<128xf32>
    %147 = vector.shape_cast %146 : vector<128xf32> to vector<128x1xf32>
    %cst_41 = arith.constant 1.280000e+02 : f32
    %148 = vector.broadcast %cst_41 : f32 to vector<128x1xf32>
    %149 = arith.divf %147, %148 : vector<128x1xf32>
    %150 = vector.broadcast %142 : vector<128x1xf32> to vector<128x128xf32>
    %151 = arith.subf %134, %150 : vector<128x128xf32>
    %cst_42 = arith.constant 9.99999974E-6 : f32
    %152 = vector.broadcast %cst_42 : f32 to vector<128x1xf32>
    %153 = arith.addf %149, %152 : vector<128x1xf32>
    %154 = math.rsqrt %153 : vector<128x1xf32>
    %155 = vector.broadcast %154 : vector<128x1xf32> to vector<128x128xf32>
    %156 = arith.mulf %151, %155 : vector<128x128xf32>
    %157 = vector.shape_cast %136 : vector<128xf32> to vector<1x128xf32>
    %158 = vector.broadcast %157 : vector<1x128xf32> to vector<128x128xf32>
    %159 = arith.mulf %156, %158 : vector<128x128xf32>
    %160 = vector.shape_cast %138 : vector<128xf32> to vector<1x128xf32>
    %161 = vector.broadcast %160 : vector<1x128xf32> to vector<128x128xf32>
    %162 = arith.addf %159, %161 : vector<128x128xf32>
    %163 = arith.truncf %162 : vector<128x128xf32> to vector<128x128xbf16>
    %c0_43 = arith.constant 0 : index
    %c0_44 = arith.constant 0 : index
    %164 = vector.load %arg9[%c0_43, %c0_44] : memref<128x256xbf16, #tpu.memory_space<vmem>>, vector<128x256xbf16>
    %cst_45 = arith.constant dense<0.000000e+00> : vector<128x256xf32>
    %165 = tpu.matmul %163, %164, %cst_45 {dimension_numbers = #tpu.dot_dimension_numbers<[1], [0], [0], [1], [0, 0, 1, 1], [], []>} : vector<128x128xbf16>, vector<128x256xbf16>, vector<128x256xf32> -> vector<128x256xf32>
    %c0_46 = arith.constant 0 : index
    %c0_47 = arith.constant 0 : index
    %166 = vector.load %arg10[%c0_46, %c0_47] : memref<1x256xf32, #tpu.memory_space<vmem>>, vector<1x256xf32>
    %167 = vector.shape_cast %166 : vector<1x256xf32> to vector<256xf32>
    %168 = vector.shape_cast %167 : vector<256xf32> to vector<1x256xf32>
    %169 = vector.broadcast %168 : vector<1x256xf32> to vector<128x256xf32>
    %170 = arith.addf %165, %169 : vector<128x256xf32>
    %cst_48 = arith.constant 5.000000e-01 : f32
    %171 = vector.broadcast %cst_48 : f32 to vector<128x256xf32>
    %172 = arith.mulf %171, %170 : vector<128x256xf32>
    %cst_49 = arith.constant 0.707106769 : f32
    %173 = vector.broadcast %cst_49 : f32 to vector<128x256xf32>
    %174 = arith.mulf %170, %173 : vector<128x256xf32>
    %175 = math.erf %174 : vector<128x256xf32>
    %cst_50 = arith.constant 1.000000e+00 : f32
    %176 = vector.broadcast %cst_50 : f32 to vector<128x256xf32>
    %177 = arith.addf %176, %175 : vector<128x256xf32>
    %178 = arith.mulf %172, %177 : vector<128x256xf32>
    %179 = arith.truncf %178 : vector<128x256xf32> to vector<128x256xbf16>
    %c0_51 = arith.constant 0 : index
    %c0_52 = arith.constant 0 : index
    %180 = vector.load %arg11[%c0_51, %c0_52] : memref<256x128xbf16, #tpu.memory_space<vmem>>, vector<256x128xbf16>
    %cst_53 = arith.constant dense<0.000000e+00> : vector<128x128xf32>
    %181 = tpu.matmul %179, %180, %cst_53 {dimension_numbers = #tpu.dot_dimension_numbers<[1], [0], [0], [1], [0, 0, 1, 1], [], []>} : vector<128x256xbf16>, vector<256x128xbf16>, vector<128x128xf32> -> vector<128x128xf32>
    %c0_54 = arith.constant 0 : index
    %c0_55 = arith.constant 0 : index
    %182 = vector.load %arg12[%c0_54, %c0_55] : memref<1x128xf32, #tpu.memory_space<vmem>>, vector<1x128xf32>
    %183 = vector.shape_cast %182 : vector<1x128xf32> to vector<128xf32>
    %184 = vector.shape_cast %183 : vector<128xf32> to vector<1x128xf32>
    %185 = vector.broadcast %184 : vector<1x128xf32> to vector<128x128xf32>
    %186 = arith.addf %181, %185 : vector<128x128xf32>
    %187 = arith.addf %134, %186 : vector<128x128xf32>
    %188 = vector.shape_cast %187 : vector<128x128xf32> to vector<8x16x128xf32>
    %c0_56 = arith.constant 0 : index
    %c0_57 = arith.constant 0 : index
    %c0_58 = arith.constant 0 : index
    %189 = vector.load %arg13[%c0_56, %c0_57, %c0_58] : memref<8x16x128xf32, #tpu.memory_space<vmem>>, vector<8x16x128xf32>
    tpu.vector_store %arg13[%c0_56, %c0_57, %c0_58], %188 {strides = array<i32>} : memref<8x16x128xf32, #tpu.memory_space<vmem>>, vector<8x16x128xf32>,
    return
  }
  func.func @transform_0(%arg0: i32) -> (i32, i32, i32) {
    %c0_i32 = arith.constant 0 : i32
    %c0_i32_0 = arith.constant 0 : i32
    %c0_i32_1 = arith.constant 0 : i32
    return %arg0, %c0_i32, %c0_i32_0 : i32, i32, i32
  }
  func.func @transform_1(%arg0: i32) -> (i32, i32) {
    %c0_i32 = arith.constant 0 : i32
    %c0_i32_0 = arith.constant 0 : i32
    %c0_i32_1 = arith.constant 0 : i32
    return %c0_i32, %c0_i32_0 : i32, i32
  }
  func.func @transform_2(%arg0: i32) -> (i32, i32) {
    %c0_i32 = arith.constant 0 : i32
    %c0_i32_0 = arith.constant 0 : i32
    %c0_i32_1 = arith.constant 0 : i32
    return %c0_i32, %c0_i32_0 : i32, i32
  }
  func.func @transform_3(%arg0: i32) -> (i32, i32) {
    %c0_i32 = arith.constant 0 : i32
    %c0_i32_0 = arith.constant 0 : i32
    %c0_i32_1 = arith.constant 0 : i32
    return %c0_i32, %c0_i32_0 : i32, i32
  }
  func.func @transform_4(%arg0: i32) -> (i32, i32) {
    %c0_i32 = arith.constant 0 : i32
    %c0_i32_0 = arith.constant 0 : i32
    %c0_i32_1 = arith.constant 0 : i32
    return %c0_i32, %c0_i32_0 : i32, i32
  }
  func.func @transform_5(%arg0: i32) -> (i32, i32) {
    %c0_i32 = arith.constant 0 : i32
    %c0_i32_0 = arith.constant 0 : i32
    %c0_i32_1 = arith.constant 0 : i32
    return %c0_i32, %c0_i32_0 : i32, i32
  }
  func.func @transform_6(%arg0: i32) -> (i32, i32) {
    %c0_i32 = arith.constant 0 : i32
    %c0_i32_0 = arith.constant 0 : i32
    %c0_i32_1 = arith.constant 0 : i32
    return %c0_i32, %c0_i32_0 : i32, i32
  }
  func.func @transform_7(%arg0: i32) -> (i32, i32) {
    %c0_i32 = arith.constant 0 : i32
    %c0_i32_0 = arith.constant 0 : i32
    %c0_i32_1 = arith.constant 0 : i32
    return %c0_i32, %c0_i32_0 : i32, i32
  }
  func.func @transform_8(%arg0: i32) -> (i32, i32) {
    %c0_i32 = arith.constant 0 : i32
    %c0_i32_0 = arith.constant 0 : i32
    %c0_i32_1 = arith.constant 0 : i32
    return %c0_i32, %c0_i32_0 : i32, i32
  }
  func.func @transform_9(%arg0: i32) -> (i32, i32) {
    %c0_i32 = arith.constant 0 : i32
    %c0_i32_0 = arith.constant 0 : i32
    %c0_i32_1 = arith.constant 0 : i32
    return %c0_i32, %c0_i32_0 : i32, i32
  }
  func.func @transform_10(%arg0: i32) -> (i32, i32) {
    %c0_i32 = arith.constant 0 : i32
    %c0_i32_0 = arith.constant 0 : i32
    %c0_i32_1 = arith.constant 0 : i32
    return %c0_i32, %c0_i32_0 : i32, i32
  }
  func.func @transform_11(%arg0: i32) -> (i32, i32) {
    %c0_i32 = arith.constant 0 : i32
    %c0_i32_0 = arith.constant 0 : i32
    %c0_i32_1 = arith.constant 0 : i32
    return %c0_i32, %c0_i32_0 : i32, i32
  }
  func.func @transform_12(%arg0: i32) -> (i32, i32, i32) {
    %c0_i32 = arith.constant 0 : i32
    %c0_i32_0 = arith.constant 0 : i32
    %c0_i32_1 = arith.constant 0 : i32
    return %arg0, %c0_i32, %c0_i32_0 : i32, i32, i32
  }
}

module attributes {stable_mosaic.version = 11 : i64} {
  func.func @transformer_layer_kernel(%arg0: i32, %arg1: memref<8x16x128xf32, #tpu.memory_space<vmem>>, %arg2: memref<1x128xf32, #tpu.memory_space<vmem>>, %arg3: memref<1x128xf32, #tpu.memory_space<vmem>>, %arg4: memref<128x384xbf16, #tpu.memory_space<vmem>>, %arg5: memref<128x128xbf16, #tpu.memory_space<vmem>>, %arg6: memref<1x128xf32, #tpu.memory_space<vmem>>, %arg7: memref<1x128xf32, #tpu.memory_space<vmem>>, %arg8: memref<1x128xf32, #tpu.memory_space<vmem>>, %arg9: memref<128x256xbf16, #tpu.memory_space<vmem>>, %arg10: memref<1x256xf32, #tpu.memory_space<vmem>>, %arg11: memref<256x128xbf16, #tpu.memory_space<vmem>>, %arg12: memref<1x128xf32, #tpu.memory_space<vmem>>, %arg13: memref<8x16x128xf32, #tpu.memory_space<vmem>>) attributes {dimension_semantics = [#tpu.dimension_semantics<parallel>], iteration_bounds = array<i64: 2>, scalar_prefetch = 0 : i64, scratch_operands = 0 : i64, tpu.core_type = #tpu.core_type<tc>, window_params = [{transform_indices = @transform_0, window_bounds = array<i64: 8, 16, 128>}, {pipeline_mode = #tpu.pipeline_mode<synchronous>, transform_indices = @transform_1, window_bounds = array<i64: 1, 128>}, {pipeline_mode = #tpu.pipeline_mode<synchronous>, transform_indices = @transform_2, window_bounds = array<i64: 1, 128>}, {pipeline_mode = #tpu.pipeline_mode<synchronous>, transform_indices = @transform_3, window_bounds = array<i64: 128, 384>}, {pipeline_mode = #tpu.pipeline_mode<synchronous>, transform_indices = @transform_4, window_bounds = array<i64: 128, 128>}, {pipeline_mode = #tpu.pipeline_mode<synchronous>, transform_indices = @transform_5, window_bounds = array<i64: 1, 128>}, {pipeline_mode = #tpu.pipeline_mode<synchronous>, transform_indices = @transform_6, window_bounds = array<i64: 1, 128>}, {pipeline_mode = #tpu.pipeline_mode<synchronous>, transform_indices = @transform_7, window_bounds = array<i64: 1, 128>}, {pipeline_mode = #tpu.pipeline_mode<synchronous>, transform_indices = @transform_8, window_bounds = array<i64: 128, 256>}, {pipeline_mode = #tpu.pipeline_mode<synchronous>, transform_indices = @transform_9, window_bounds = array<i64: 1, 256>}, {pipeline_mode = #tpu.pipeline_mode<synchronous>, transform_indices = @transform_10, window_bounds = array<i64: 256, 128>}, {pipeline_mode = #tpu.pipeline_mode<synchronous>, transform_indices = @transform_11, window_bounds = array<i64: 1, 128>}, {transform_indices = @transform_12, window_bounds = array<i64: 8, 16, 128>}]} {
    %c0 = arith.constant 0 : index
    %c0_0 = arith.constant 0 : index
    %c0_1 = arith.constant 0 : index
    %0 = vector.load %arg1[%c0, %c0_0, %c0_1] : memref<8x16x128xf32, #tpu.memory_space<vmem>>, vector<8x16x128xf32>
    %1 = vector.shape_cast %0 : vector<8x16x128xf32> to vector<128x128xf32>
    %c0_2 = arith.constant 0 : index
    %c0_3 = arith.constant 0 : index
    %2 = vector.load %arg2[%c0_2, %c0_3] : memref<1x128xf32, #tpu.memory_space<vmem>>, vector<1x128xf32>
    %3 = vector.shape_cast %2 : vector<1x128xf32> to vector<128xf32>
    %c0_4 = arith.constant 0 : index
    %c0_5 = arith.constant 0 : index
    %4 = vector.load %arg3[%c0_4, %c0_5] : memref<1x128xf32, #tpu.memory_space<vmem>>, vector<1x128xf32>
    %5 = vector.shape_cast %4 : vector<1x128xf32> to vector<128xf32>
    %cst = arith.constant dense<0.000000e+00> : vector<128xf32>
    %6 = vector.multi_reduction <add>, %1, %cst [1] : vector<128x128xf32> to vector<128xf32>
    %7 = vector.shape_cast %6 : vector<128xf32> to vector<128x1xf32>
    %cst_6 = arith.constant 1.280000e+02 : f32
    %8 = vector.broadcast %cst_6 : f32 to vector<128x1xf32>
    %9 = arith.divf %7, %8 : vector<128x1xf32>
    %10 = vector.broadcast %9 : vector<128x1xf32> to vector<128x128xf32>
    %11 = arith.subf %1, %10 : vector<128x128xf32>
    %12 = arith.mulf %11, %11 : vector<128x128xf32>
    %cst_7 = arith.constant dense<0.000000e+00> : vector<128xf32>
    %13 = vector.multi_reduction <add>, %12, %cst_7 [1] : vector<128x128xf32> to vector<128xf32>
    %14 = vector.shape_cast %13 : vector<128xf32> to vector<128x1xf32>
    %cst_8 = arith.constant 1.280000e+02 : f32
    %15 = vector.broadcast %cst_8 : f32 to vector<128x1xf32>
    %16 = arith.divf %14, %15 : vector<128x1xf32>
    %17 = vector.broadcast %9 : vector<128x1xf32> to vector<128x128xf32>
    %18 = arith.subf %1, %17 : vector<128x128xf32>
    %cst_9 = arith.constant 9.99999974E-6 : f32
    %19 = vector.broadcast %cst_9 : f32 to vector<128x1xf32>
    %20 = arith.addf %16, %19 : vector<128x1xf32>
    %21 = math.rsqrt %20 : vector<128x1xf32>
    %22 = vector.broadcast %21 : vector<128x1xf32> to vector<128x128xf32>
    %23 = arith.mulf %18, %22 : vector<128x128xf32>
    %24 = vector.shape_cast %3 : vector<128xf32> to vector<1x128xf32>
    %25 = vector.broadcast %24 : vector<1x128xf32> to vector<128x128xf32>
    %26 = arith.mulf %23, %25 : vector<128x128xf32>
    %27 = vector.shape_cast %5 : vector<128xf32> to vector<1x128xf32>
    %28 = vector.broadcast %27 : vector<1x128xf32> to vector<128x128xf32>
    %29 = arith.addf %26, %28 : vector<128x128xf32>
    %30 = arith.truncf %29 : vector<128x128xf32> to vector<128x128xbf16>
    %c0_10 = arith.constant 0 : index
    %c0_11 = arith.constant 0 : index
    %31 = vector.load %arg4[%c0_10, %c0_11] : memref<128x384xbf16, #tpu.memory_space<vmem>>, vector<128x384xbf16>
    %cst_12 = arith.constant dense<0.000000e+00> : vector<128x384xf32>
    %32 = tpu.matmul %30, %31, %cst_12 {dimension_numbers = #tpu.dot_dimension_numbers<[1], [0], [0], [1], [0, 0, 1, 1], [], []>} : vector<128x128xbf16>, vector<128x384xbf16>, vector<128x384xf32> -> vector<128x384xf32>
    %33 = vector.extract_strided_slice %32 {offsets = [0, 0], sizes = [128, 32], strides = [1, 1]} : vector<128x384xf32> to vector<128x32xf32>
    %34 = arith.truncf %33 : vector<128x32xf32> to vector<128x32xbf16>
    %35 = vector.shape_cast %34 : vector<128x32xbf16> to vector<8x16x32xbf16>
    %36 = vector.extract_strided_slice %32 {offsets = [0, 128], sizes = [128, 32], strides = [1, 1]} : vector<128x384xf32> to vector<128x32xf32>
    %37 = arith.truncf %36 : vector<128x32xf32> to vector<128x32xbf16>
    %38 = vector.shape_cast %37 : vector<128x32xbf16> to vector<8x16x32xbf16>
    %39 = vector.extract_strided_slice %32 {offsets = [0, 256], sizes = [128, 32], strides = [1, 1]} : vector<128x384xf32> to vector<128x32xf32>
    %40 = arith.truncf %39 : vector<128x32xf32> to vector<128x32xbf16>
    %41 = vector.shape_cast %40 : vector<128x32xbf16> to vector<8x16x32xbf16>
    "tpu.trace_start"() <{level = 10 : i32, message = "bnd,bmd->bnm"}> : () -> ()
    %cst_13 = arith.constant dense<0.000000e+00> : vector<8x16x16xf32>
    %42 = tpu.matmul %35, %38, %cst_13 {dimension_numbers = #tpu.dot_dimension_numbers<[2], [2], [1], [1], [0, 0, 0, 1, 1, 1], [0], [0]>} : vector<8x16x32xbf16>, vector<8x16x32xbf16>, vector<8x16x16xf32> -> vector<8x16x16xf32>
    "tpu.trace_stop"() : () -> ()
    %cst_14 = arith.constant dense<0xFF800000> : vector<8x16xf32>
    %43 = vector.multi_reduction <maximumf>, %42, %cst_14 [2] : vector<8x16x16xf32> to vector<8x16xf32>
    %44 = vector.shape_cast %43 : vector<8x16xf32> to vector<8x16x1xf32>
    %45 = vector.broadcast %44 : vector<8x16x1xf32> to vector<8x16x16xf32>
    %46 = arith.subf %42, %45 : vector<8x16x16xf32>
    %47 = math.exp %46 : vector<8x16x16xf32>
    %cst_15 = arith.constant dense<0.000000e+00> : vector<8x16xf32>
    %48 = vector.multi_reduction <add>, %47, %cst_15 [2] : vector<8x16x16xf32> to vector<8x16xf32>
    %49 = vector.shape_cast %48 : vector<8x16xf32> to vector<8x16x1xf32>
    %50 = tpu.reciprocal %49 {approx = true} : vector<8x16x1xf32> -> vector<8x16x1xf32>
    %51 = vector.broadcast %50 : vector<8x16x1xf32> to vector<8x16x16xf32>
    %52 = arith.mulf %47, %51 : vector<8x16x16xf32>
    %53 = arith.truncf %52 : vector<8x16x16xf32> to vector<8x16x16xbf16>
    "tpu.trace_start"() <{level = 10 : i32, message = "bnm,bmd->bnd"}> : () -> ()
    %cst_16 = arith.constant dense<0.000000e+00> : vector<8x16x32xf32>
    %54 = tpu.matmul %53, %41, %cst_16 {dimension_numbers = #tpu.dot_dimension_numbers<[2], [1], [1], [2], [0, 0, 0, 1, 1, 2], [0], [0]>} : vector<8x16x16xbf16>, vector<8x16x32xbf16>, vector<8x16x32xf32> -> vector<8x16x32xf32>
    "tpu.trace_stop"() : () -> ()
    %55 = vector.shape_cast %54 : vector<8x16x32xf32> to vector<128x32xf32>
    %56 = vector.extract_strided_slice %32 {offsets = [0, 32], sizes = [128, 32], strides = [1, 1]} : vector<128x384xf32> to vector<128x32xf32>
    %57 = arith.truncf %56 : vector<128x32xf32> to vector<128x32xbf16>
    %58 = vector.shape_cast %57 : vector<128x32xbf16> to vector<8x16x32xbf16>
    %59 = vector.extract_strided_slice %32 {offsets = [0, 160], sizes = [128, 32], strides = [1, 1]} : vector<128x384xf32> to vector<128x32xf32>
    %60 = arith.truncf %59 : vector<128x32xf32> to vector<128x32xbf16>
    %61 = vector.shape_cast %60 : vector<128x32xbf16> to vector<8x16x32xbf16>
    %62 = vector.extract_strided_slice %32 {offsets = [0, 288], sizes = [128, 32], strides = [1, 1]} : vector<128x384xf32> to vector<128x32xf32>
    %63 = arith.truncf %62 : vector<128x32xf32> to vector<128x32xbf16>
    %64 = vector.shape_cast %63 : vector<128x32xbf16> to vector<8x16x32xbf16>
    "tpu.trace_start"() <{level = 10 : i32, message = "bnd,bmd->bnm"}> : () -> ()
    %cst_17 = arith.constant dense<0.000000e+00> : vector<8x16x16xf32>
    %65 = tpu.matmul %58, %61, %cst_17 {dimension_numbers = #tpu.dot_dimension_numbers<[2], [2], [1], [1], [0, 0, 0, 1, 1, 1], [0], [0]>} : vector<8x16x32xbf16>, vector<8x16x32xbf16>, vector<8x16x16xf32> -> vector<8x16x16xf32>
    "tpu.trace_stop"() : () -> ()
    %cst_18 = arith.constant dense<0xFF800000> : vector<8x16xf32>
    %66 = vector.multi_reduction <maximumf>, %65, %cst_18 [2] : vector<8x16x16xf32> to vector<8x16xf32>
    %67 = vector.shape_cast %66 : vector<8x16xf32> to vector<8x16x1xf32>
    %68 = vector.broadcast %67 : vector<8x16x1xf32> to vector<8x16x16xf32>
    %69 = arith.subf %65, %68 : vector<8x16x16xf32>
    %70 = math.exp %69 : vector<8x16x16xf32>
    %cst_19 = arith.constant dense<0.000000e+00> : vector<8x16xf32>
    %71 = vector.multi_reduction <add>, %70, %cst_19 [2] : vector<8x16x16xf32> to vector<8x16xf32>
    %72 = vector.shape_cast %71 : vector<8x16xf32> to vector<8x16x1xf32>
    %73 = tpu.reciprocal %72 {approx = true} : vector<8x16x1xf32> -> vector<8x16x1xf32>
    %74 = vector.broadcast %73 : vector<8x16x1xf32> to vector<8x16x16xf32>
    %75 = arith.mulf %70, %74 : vector<8x16x16xf32>
    %76 = arith.truncf %75 : vector<8x16x16xf32> to vector<8x16x16xbf16>
    "tpu.trace_start"() <{level = 10 : i32, message = "bnm,bmd->bnd"}> : () -> ()
    %cst_20 = arith.constant dense<0.000000e+00> : vector<8x16x32xf32>
    %77 = tpu.matmul %76, %64, %cst_20 {dimension_numbers = #tpu.dot_dimension_numbers<[2], [1], [1], [2], [0, 0, 0, 1, 1, 2], [0], [0]>} : vector<8x16x16xbf16>, vector<8x16x32xbf16>, vector<8x16x32xf32> -> vector<8x16x32xf32>
    "tpu.trace_stop"() : () -> ()
    %78 = vector.shape_cast %77 : vector<8x16x32xf32> to vector<128x32xf32>
    %79 = vector.extract_strided_slice %32 {offsets = [0, 64], sizes = [128, 32], strides = [1, 1]} : vector<128x384xf32> to vector<128x32xf32>
    %80 = arith.truncf %79 : vector<128x32xf32> to vector<128x32xbf16>
    %81 = vector.shape_cast %80 : vector<128x32xbf16> to vector<8x16x32xbf16>
    %82 = vector.extract_strided_slice %32 {offsets = [0, 192], sizes = [128, 32], strides = [1, 1]} : vector<128x384xf32> to vector<128x32xf32>
    %83 = arith.truncf %82 : vector<128x32xf32> to vector<128x32xbf16>
    %84 = vector.shape_cast %83 : vector<128x32xbf16> to vector<8x16x32xbf16>
    %85 = vector.extract_strided_slice %32 {offsets = [0, 320], sizes = [128, 32], strides = [1, 1]} : vector<128x384xf32> to vector<128x32xf32>
    %86 = arith.truncf %85 : vector<128x32xf32> to vector<128x32xbf16>
    %87 = vector.shape_cast %86 : vector<128x32xbf16> to vector<8x16x32xbf16>
    "tpu.trace_start"() <{level = 10 : i32, message = "bnd,bmd->bnm"}> : () -> ()
    %cst_21 = arith.constant dense<0.000000e+00> : vector<8x16x16xf32>
    %88 = tpu.matmul %81, %84, %cst_21 {dimension_numbers = #tpu.dot_dimension_numbers<[2], [2], [1], [1], [0, 0, 0, 1, 1, 1], [0], [0]>} : vector<8x16x32xbf16>, vector<8x16x32xbf16>, vector<8x16x16xf32> -> vector<8x16x16xf32>
    "tpu.trace_stop"() : () -> ()
    %cst_22 = arith.constant dense<0xFF800000> : vector<8x16xf32>
    %89 = vector.multi_reduction <maximumf>, %88, %cst_22 [2] : vector<8x16x16xf32> to vector<8x16xf32>
    %90 = vector.shape_cast %89 : vector<8x16xf32> to vector<8x16x1xf32>
    %91 = vector.broadcast %90 : vector<8x16x1xf32> to vector<8x16x16xf32>
    %92 = arith.subf %88, %91 : vector<8x16x16xf32>
    %93 = math.exp %92 : vector<8x16x16xf32>
    %cst_23 = arith.constant dense<0.000000e+00> : vector<8x16xf32>
    %94 = vector.multi_reduction <add>, %93, %cst_23 [2] : vector<8x16x16xf32> to vector<8x16xf32>
    %95 = vector.shape_cast %94 : vector<8x16xf32> to vector<8x16x1xf32>
    %96 = tpu.reciprocal %95 {approx = true} : vector<8x16x1xf32> -> vector<8x16x1xf32>
    %97 = vector.broadcast %96 : vector<8x16x1xf32> to vector<8x16x16xf32>
    %98 = arith.mulf %93, %97 : vector<8x16x16xf32>
    %99 = arith.truncf %98 : vector<8x16x16xf32> to vector<8x16x16xbf16>
    "tpu.trace_start"() <{level = 10 : i32, message = "bnm,bmd->bnd"}> : () -> ()
    %cst_24 = arith.constant dense<0.000000e+00> : vector<8x16x32xf32>
    %100 = tpu.matmul %99, %87, %cst_24 {dimension_numbers = #tpu.dot_dimension_numbers<[2], [1], [1], [2], [0, 0, 0, 1, 1, 2], [0], [0]>} : vector<8x16x16xbf16>, vector<8x16x32xbf16>, vector<8x16x32xf32> -> vector<8x16x32xf32>
    "tpu.trace_stop"() : () -> ()
    %101 = vector.shape_cast %100 : vector<8x16x32xf32> to vector<128x32xf32>
    %102 = vector.extract_strided_slice %32 {offsets = [0, 96], sizes = [128, 32], strides = [1, 1]} : vector<128x384xf32> to vector<128x32xf32>
    %103 = arith.truncf %102 : vector<128x32xf32> to vector<128x32xbf16>
    %104 = vector.shape_cast %103 : vector<128x32xbf16> to vector<8x16x32xbf16>
    %105 = vector.extract_strided_slice %32 {offsets = [0, 224], sizes = [128, 32], strides = [1, 1]} : vector<128x384xf32> to vector<128x32xf32>
    %106 = arith.truncf %105 : vector<128x32xf32> to vector<128x32xbf16>
    %107 = vector.shape_cast %106 : vector<128x32xbf16> to vector<8x16x32xbf16>
    %108 = vector.extract_strided_slice %32 {offsets = [0, 352], sizes = [128, 32], strides = [1, 1]} : vector<128x384xf32> to vector<128x32xf32>
    %109 = arith.truncf %108 : vector<128x32xf32> to vector<128x32xbf16>
    %110 = vector.shape_cast %109 : vector<128x32xbf16> to vector<8x16x32xbf16>
    "tpu.trace_start"() <{level = 10 : i32, message = "bnd,bmd->bnm"}> : () -> ()
    %cst_25 = arith.constant dense<0.000000e+00> : vector<8x16x16xf32>
    %111 = tpu.matmul %104, %107, %cst_25 {dimension_numbers = #tpu.dot_dimension_numbers<[2], [2], [1], [1], [0, 0, 0, 1, 1, 1], [0], [0]>} : vector<8x16x32xbf16>, vector<8x16x32xbf16>, vector<8x16x16xf32> -> vector<8x16x16xf32>
    "tpu.trace_stop"() : () -> ()
    %cst_26 = arith.constant dense<0xFF800000> : vector<8x16xf32>
    %112 = vector.multi_reduction <maximumf>, %111, %cst_26 [2] : vector<8x16x16xf32> to vector<8x16xf32>
    %113 = vector.shape_cast %112 : vector<8x16xf32> to vector<8x16x1xf32>
    %114 = vector.broadcast %113 : vector<8x16x1xf32> to vector<8x16x16xf32>
    %115 = arith.subf %111, %114 : vector<8x16x16xf32>
    %116 = math.exp %115 : vector<8x16x16xf32>
    %cst_27 = arith.constant dense<0.000000e+00> : vector<8x16xf32>
    %117 = vector.multi_reduction <add>, %116, %cst_27 [2] : vector<8x16x16xf32> to vector<8x16xf32>
    %118 = vector.shape_cast %117 : vector<8x16xf32> to vector<8x16x1xf32>
    %119 = tpu.reciprocal %118 {approx = true} : vector<8x16x1xf32> -> vector<8x16x1xf32>
    %120 = vector.broadcast %119 : vector<8x16x1xf32> to vector<8x16x16xf32>
    %121 = arith.mulf %116, %120 : vector<8x16x16xf32>
    %122 = arith.truncf %121 : vector<8x16x16xf32> to vector<8x16x16xbf16>
    "tpu.trace_start"() <{level = 10 : i32, message = "bnm,bmd->bnd"}> : () -> ()
    %cst_28 = arith.constant dense<0.000000e+00> : vector<8x16x32xf32>
    %123 = tpu.matmul %122, %110, %cst_28 {dimension_numbers = #tpu.dot_dimension_numbers<[2], [1], [1], [2], [0, 0, 0, 1, 1, 2], [0], [0]>} : vector<8x16x16xbf16>, vector<8x16x32xbf16>, vector<8x16x32xf32> -> vector<8x16x32xf32>
    "tpu.trace_stop"() : () -> ()
    %124 = vector.shape_cast %123 : vector<8x16x32xf32> to vector<128x32xf32>
    %125 = tpu.concatenate %55, %78, %101, %124 in 1 : vector<128x32xf32>, vector<128x32xf32>, vector<128x32xf32>, vector<128x32xf32> -> vector<128x128xf32>
    %126 = arith.truncf %125 : vector<128x128xf32> to vector<128x128xbf16>
    %c0_29 = arith.constant 0 : index
    %c0_30 = arith.constant 0 : index
    %127 = vector.load %arg5[%c0_29, %c0_30] : memref<128x128xbf16, #tpu.memory_space<vmem>>, vector<128x128xbf16>
    %cst_31 = arith.constant dense<0.000000e+00> : vector<128x128xf32>
    %128 = tpu.matmul %126, %127, %cst_31 {dimension_numbers = #tpu.dot_dimension_numbers<[1], [0], [0], [1], [0, 0, 1, 1], [], []>} : vector<128x128xbf16>, vector<128x128xbf16>, vector<128x128xf32> -> vector<128x128xf32>
    %c0_32 = arith.constant 0 : index
    %c0_33 = arith.constant 0 : index
    %129 = vector.load %arg6[%c0_32, %c0_33] : memref<1x128xf32, #tpu.memory_space<vmem>>, vector<1x128xf32>
    %130 = vector.shape_cast %129 : vector<1x128xf32> to vector<128xf32>
    %131 = vector.shape_cast %130 : vector<128xf32> to vector<1x128xf32>
    %132 = vector.broadcast %131 : vector<1x128xf32> to vector<128x128xf32>
    %133 = arith.addf %128, %132 : vector<128x128xf32>
    %134 = arith.addf %1, %133 : vector<128x128xf32>
    %c0_34 = arith.constant 0 : index
    %c0_35 = arith.constant 0 : index
    %135 = vector.load %arg7[%c0_34, %c0_35] : memref<1x128xf32, #tpu.memory_space<vmem>>, vector<1x128xf32>
    %136 = vector.shape_cast %135 : vector<1x128xf32> to vector<128xf32>
    %c0_36 = arith.constant 0 : index
    %c0_37 = arith.constant 0 : index
    %137 = vector.load %arg8[%c0_36, %c0_37] : memref<1x128xf32, #tpu.memory_space<vmem>>, vector<1x128xf32>
    %138 = vector.shape_cast %137 : vector<1x128xf32> to vector<128xf32>
    %cst_38 = arith.constant dense<0.000000e+00> : vector<128xf32>
    %139 = vector.multi_reduction <add>, %134, %cst_38 [1] : vector<128x128xf32> to vector<128xf32>
    %140 = vector.shape_cast %139 : vector<128xf32> to vector<128x1xf32>
    %cst_39 = arith.constant 1.280000e+02 : f32
    %141 = vector.broadcast %cst_39 : f32 to vector<128x1xf32>
    %142 = arith.divf %140, %141 : vector<128x1xf32>
    %143 = vector.broadcast %142 : vector<128x1xf32> to vector<128x128xf32>
    %144 = arith.subf %134, %143 : vector<128x128xf32>
    %145 = arith.mulf %144, %144 : vector<128x128xf32>
    %cst_40 = arith.constant dense<0.000000e+00> : vector<128xf32>
    %146 = vector.multi_reduction <add>, %145, %cst_40 [1] : vector<128x128xf32> to vector<128xf32>
    %147 = vector.shape_cast %146 : vector<128xf32> to vector<128x1xf32>
    %cst_41 = arith.constant 1.280000e+02 : f32
    %148 = vector.broadcast %cst_41 : f32 to vector<128x1xf32>
    %149 = arith.divf %147, %148 : vector<128x1xf32>
    %150 = vector.broadcast %142 : vector<128x1xf32> to vector<128x128xf32>
    %151 = arith.subf %134, %150 : vector<128x128xf32>
    %cst_42 = arith.constant 9.99999974E-6 : f32
    %152 = vector.broadcast %cst_42 : f32 to vector<128x1xf32>
    %153 = arith.addf %149, %152 : vector<128x1xf32>
    %154 = math.rsqrt %153 : vector<128x1xf32>
    %155 = vector.broadcast %154 : vector<128x1xf32> to vector<128x128xf32>
    %156 = arith.mulf %151, %155 : vector<128x128xf32>
    %157 = vector.shape_cast %136 : vector<128xf32> to vector<1x128xf32>
    %158 = vector.broadcast %157 : vector<1x128xf32> to vector<128x128xf32>
    %159 = arith.mulf %156, %158 : vector<128x128xf32>
    %160 = vector.shape_cast %138 : vector<128xf32> to vector<1x128xf32>
    %161 = vector.broadcast %160 : vector<1x128xf32> to vector<128x128xf32>
    %162 = arith.addf %159, %161 : vector<128x128xf32>
    %163 = arith.truncf %162 : vector<128x128xf32> to vector<128x128xbf16>
    %c0_43 = arith.constant 0 : index
    %c0_44 = arith.constant 0 : index
    %164 = vector.load %arg9[%c0_43, %c0_44] : memref<128x256xbf16, #tpu.memory_space<vmem>>, vector<128x256xbf16>
    %cst_45 = arith.constant dense<0.000000e+00> : vector<128x256xf32>
    %165 = tpu.matmul %163, %164, %cst_45 {dimension_numbers = #tpu.dot_dimension_numbers<[1], [0], [0], [1], [0, 0, 1, 1], [], []>} : vector<128x128xbf16>, vector<128x256xbf16>, vector<128x256xf32> -> vector<128x256xf32>
    %c0_46 = arith.constant 0 : index
    %c0_47 = arith.constant 0 : index
    %166 = vector.load %arg10[%c0_46, %c0_47] : memref<1x256xf32, #tpu.memory_space<vmem>>, vector<1x256xf32>
    %167 = vector.shape_cast %166 : vector<1x256xf32> to vector<256xf32>
    %168 = vector.shape_cast %167 : vector<256xf32> to vector<1x256xf32>
    %169 = vector.broadcast %168 : vector<1x256xf32> to vector<128x256xf32>
    %170 = arith.addf %165, %169 : vector<128x256xf32>
    %cst_48 = arith.constant 5.000000e-01 : f32
    %171 = vector.broadcast %cst_48 : f32 to vector<128x256xf32>
    %172 = arith.mulf %171, %170 : vector<128x256xf32>
    %cst_49 = arith.constant 0.707106769 : f32
    %173 = vector.broadcast %cst_49 : f32 to vector<128x256xf32>
    %174 = arith.mulf %170, %173 : vector<128x256xf32>
    %175 = math.erf %174 : vector<128x256xf32>
    %cst_50 = arith.constant 1.000000e+00 : f32
    %176 = vector.broadcast %cst_50 : f32 to vector<128x256xf32>
    %177 = arith.addf %176, %175 : vector<128x256xf32>
    %178 = arith.mulf %172, %177 : vector<128x256xf32>
    %179 = arith.truncf %178 : vector<128x256xf32> to vector<128x256xbf16>
    %c0_51 = arith.constant 0 : index
    %c0_52 = arith.constant 0 : index
    %180 = vector.load %arg11[%c0_51, %c0_52] : memref<256x128xbf16, #tpu.memory_space<vmem>>, vector<256x128xbf16>
    %cst_53 = arith.constant dense<0.000000e+00> : vector<128x128xf32>
    %181 = tpu.matmul %179, %180, %cst_53 {dimension_numbers = #tpu.dot_dimension_numbers<[1], [0], [0], [1], [0, 0, 1, 1], [], []>} : vector<128x256xbf16>, vector<256x128xbf16>, vector<128x128xf32> -> vector<128x128xf32>
    %c0_54 = arith.constant 0 : index
    %c0_55 = arith.constant 0 : index
    %182 = vector.load %arg12[%c0_54, %c0_55] : memref<1x128xf32, #tpu.memory_space<vmem>>, vector<1x128xf32>
    %183 = vector.shape_cast %182 : vector<1x128xf32> to vector<128xf32>
    %184 = vector.shape_cast %183 : vector<128xf32> to vector<1x128xf32>
    %185 = vector.broadcast %184 : vector<1x128xf32> to vector<128x128xf32>
    %186 = arith.addf %181, %185 : vector<128x128xf32>
    %187 = arith.addf %134, %186 : vector<128x128xf32>
    %188 = vector.shape_cast %187 : vector<128x128xf32> to vector<8x16x128xf32>
    %c0_56 = arith.constant 0 : index
    %c0_57 = arith.constant 0 : index
    %c0_58 = arith.constant 0 : index
    %189 = vector.load %arg13[%c0_56, %c0_57, %c0_58] : memref<8x16x128xf32, #tpu.memory_space<vmem>>, vector<8x16x128xf32>
    tpu.vector_store %arg13[%c0_56, %c0_57, %c0_58], %188 {strides = array<i32>} : memref<8x16x128xf32, #tpu.memory_space<vmem>>, vector<8x16x128xf32>,
    return
  }
  func.func @transform_0(%arg0: i32) -> (i32, i32, i32) {
    %c0_i32 = arith.constant 0 : i32
    %c0_i32_0 = arith.constant 0 : i32
    %c0_i32_1 = arith.constant 0 : i32
    return %arg0, %c0_i32, %c0_i32_0 : i32, i32, i32
  }
  func.func @transform_1(%arg0: i32) -> (i32, i32) {
    %c0_i32 = arith.constant 0 : i32
    %c0_i32_0 = arith.constant 0 : i32
    %c0_i32_1 = arith.constant 0 : i32
    return %c0_i32, %c0_i32_0 : i32, i32
  }
  func.func @transform_2(%arg0: i32) -> (i32, i32) {
    %c0_i32 = arith.constant 0 : i32
    %c0_i32_0 = arith.constant 0 : i32
    %c0_i32_1 = arith.constant 0 : i32
    return %c0_i32, %c0_i32_0 : i32, i32
  }
  func.func @transform_3(%arg0: i32) -> (i32, i32) {
    %c0_i32 = arith.constant 0 : i32
    %c0_i32_0 = arith.constant 0 : i32
    %c0_i32_1 = arith.constant 0 : i32
    return %c0_i32, %c0_i32_0 : i32, i32
  }
  func.func @transform_4(%arg0: i32) -> (i32, i32) {
    %c0_i32 = arith.constant 0 : i32
    %c0_i32_0 = arith.constant 0 : i32
    %c0_i32_1 = arith.constant 0 : i32
    return %c0_i32, %c0_i32_0 : i32, i32
  }
  func.func @transform_5(%arg0: i32) -> (i32, i32) {
    %c0_i32 = arith.constant 0 : i32
    %c0_i32_0 = arith.constant 0 : i32
    %c0_i32_1 = arith.constant 0 : i32
    return %c0_i32, %c0_i32_0 : i32, i32
  }
  func.func @transform_6(%arg0: i32) -> (i32, i32) {
    %c0_i32 = arith.constant 0 : i32
    %c0_i32_0 = arith.constant 0 : i32
    %c0_i32_1 = arith.constant 0 : i32
    return %c0_i32, %c0_i32_0 : i32, i32
  }
  func.func @transform_7(%arg0: i32) -> (i32, i32) {
    %c0_i32 = arith.constant 0 : i32
    %c0_i32_0 = arith.constant 0 : i32
    %c0_i32_1 = arith.constant 0 : i32
    return %c0_i32, %c0_i32_0 : i32, i32
  }
  func.func @transform_8(%arg0: i32) -> (i32, i32) {
    %c0_i32 = arith.constant 0 : i32
    %c0_i32_0 = arith.constant 0 : i32
    %c0_i32_1 = arith.constant 0 : i32
    return %c0_i32, %c0_i32_0 : i32, i32
  }
  func.func @transform_9(%arg0: i32) -> (i32, i32) {
    %c0_i32 = arith.constant 0 : i32
    %c0_i32_0 = arith.constant 0 : i32
    %c0_i32_1 = arith.constant 0 : i32
    return %c0_i32, %c0_i32_0 : i32, i32
  }
  func.func @transform_10(%arg0: i32) -> (i32, i32) {
    %c0_i32 = arith.constant 0 : i32
    %c0_i32_0 = arith.constant 0 : i32
    %c0_i32_1 = arith.constant 0 : i32
    return %c0_i32, %c0_i32_0 : i32, i32
  }
  func.func @transform_11(%arg0: i32) -> (i32, i32) {
    %c0_i32 = arith.constant 0 : i32
    %c0_i32_0 = arith.constant 0 : i32
    %c0_i32_1 = arith.constant 0 : i32
    return %c0_i32, %c0_i32_0 : i32, i32
  }
  func.func @transform_12(%arg0: i32) -> (i32, i32, i32) {
    %c0_i32 = arith.constant 0 : i32
    %c0_i32_0 = arith.constant 0 : i32
    %c0_i32_1 = arith.constant 0 : i32
    return %arg0, %c0_i32, %c0_i32_0 : i32, i32, i32
  }
}

</mosaic_0001>

<bundles_post_ra>
// kernel: transformer_forward.3
= control target key start
LH: loop header
LB: loop body
LE: loop exit
PB: predicated region body
PF: predicated region fallthrough
CT: control target
= control target key end

     0   :  { %s10186_s0 = inlined_call_operand.vmem [shape: f32[16,16,128], index: 0, kind: input, shape index: {}]   ;;  %s10187_s1 = inlined_call_operand.vmem [shape: f32[1,128], index: 1, kind: input, shape index: {}]   ;;  %s10188_s2 = inlined_call_operand.vmem [shape: f32[1,128], index: 2, kind: input, shape index: {}]   ;;  %s10189_s3 = inlined_call_operand.vmem [shape: bf16[128,384], index: 3, kind: input, shape index: {}]   ;;  %s10190_s4 = inlined_call_operand.vmem [shape: bf16[128,128], index: 4, kind: input, shape index: {}]   ;;  %s10191_s5 = inlined_call_operand.vmem [shape: f32[1,128], index: 5, kind: input, shape index: {}]   ;;  %s10192_s6 = inlined_call_operand.vmem [shape: f32[1,128], index: 6, kind: input, shape index: {}]   ;;  %s10193_s7 = inlined_call_operand.vmem [shape: f32[1,128], index: 7, kind: input, shape index: {}]   ;;  %s10194_s8 = inlined_call_operand.vmem [shape: bf16[128,256], index: 8, kind: input, shape index: {}]   ;;  %s10195_s9 = inlined_call_operand.vmem [shape: f32[1,256], index: 9, kind: input, shape index: {}]   ;;  %s10196_s10 = inlined_call_operand.vmem [shape: bf16[256,128], index: 10, kind: input, shape index: {}]   ;;  %s10197_s11 = inlined_call_operand.vmem [shape: f32[1,128], index: 11, kind: input, shape index: {}]   ;;  %s10198_s12 = inlined_call_operand.hbm [shape: f32[16,16,128], index: 12, kind: output, shape index: {}]  }
   0x1   :  { %10214 = sst [smem:[#allocation31_spill]] %s10186_s0 }
   0x2   :  { %17 = vsyncpa [#allocation3], 0 }
   0x3   :  { %19 = vsyncpa [#allocation3 + $0x1], 0  ;;  %s7928_s21 = smov 0   ;;  %s7930_s22 = smov 0  }
   0x4   :  { %s7932_s23 = smov 0   ;;  %s7934_s24 = smov 0  }
   0x5 LB: > { %s7949_s25 = sadd.s32 4294967295, %s7852_s24   ;;  %s6304_s26 = sadd.s32 4294967294, %s7852_s24   ;;  %s7852_s24 = sphi %s7934_s24, %s10287_s24   ;;  %s7848_s23 = sphi %s7932_s23, %s10286_s23   ;;  %s7844_s22 = sphi %s7930_s22, %s10285_s22   ;;  %s7840_s21 = sphi %s7928_s21, %s10284_s21  }
   0x6   : > { %s7953_s27 = sadd.s32 1, %s7852_s24   ;;  %s289_s28 = sadd.s32 1, %s7848_s23 }
   0x7   : > { %s286_s29 = ssub.s32 %s7852_s24, %s7953_s27  ;;  %p299_p0 = scmp.ne.s32.totalorder %s7848_s23, %s7844_s22 }
   0x8   : > { %p287_p1 = scmp.eq.s32.totalorder %s286_s29, 0  ;;  %p300_p2 = scmp.eq.s32.totalorder %s7949_s25, 1 }
   0x9   : > { %p305_p3 = scmp.ne.s32.totalorder %s7844_s22, %s7840_s21  ;;  %p306_p4 = scmp.eq.s32.totalorder %s6304_s26, 1 }
   0xa   : > { %s7964_s30 = scalar_select %p287_p1, %s7848_s23, %s289_s28  }
   0xb   : > { %p7966_p5 = por %p300_p2, %p299_p0  ;;  %p7970_p6 = por %p306_p4, %p305_p3 }
   0xc   : > { %10215 = sst [smem:[#allocation5_spill]] %s7964_s30  ;;  %p6307_p7 = scmp.ge.s32.totalorder %s7852_s24, 1 }
   0xd   : > { %p367_p8 = scmp.lt.s32.totalorder %s7852_s24, 3 }
   0xf   : > { %p368_p9 = pnand %p6307_p7, %p367_p8 }
  0x11   : > { %371 = sbr.rel (%p368_p9) target bundleno = 4506 (0x119a), region = 68 }
  0x18   : > { %s6309_s15 = sshll.u32 %s7949_s25, 3  ;;  %s10218_s0 = sld [smem:[#allocation31_spill]]  ;;  %v7310_v16 = vld [vmem:[%s10189_s3 + $0x4] ss:$12 sps:$4 sm:$0xff]   ;;  %v7312_v17 = vld [vmem:[%s10189_s3] ss:$12 sps:$4 sm:$0xff]  }
  0x19   : > { %p411_p10 = scmp.lt.s32.totalorder %s6309_s15, 15  ;;  %v7313_v18 = vld [vmem:[%s10189_s3 + $0x1c] ss:$12 sps:$4 sm:$0xff]   ;;  %826 = vmatprep.subr.bf16.mxu0 %v7310_v16  ;;  %v7316_v58 = vld [vmem:[%s10189_s3 + $0x18] ss:$12 sps:$4 sm:$0xff]   ;;  %vm7856_vm0 = vmmov 0  }
  0x1a   : > { %v7315_v19 = vld [vmem:[%s10189_s3 + $0x8] ss:$12 sps:$4 sm:$0xff]   ;;  %827 = vmatpush1.bf16.msra.mxu0 %v7312_v17  ;;  %vm1060_vm1 = vcmask 261120   ;;  %vm1437_vm2 = vcmask 130048   ;;  %s7857_s20 = smov 96   ;;  %s7858_s26 = smov 64  }
  0x1b   : > { %s10289_s15 = smov (!%p411_p10, %s6309_s15), 15  ;;  %6679 = vmatprep.subr.bf16.mxu1 %v7315_v19  ;;  %828 = vmatprep.subr.bf16.mxu0 %v7313_v18  ;;  %v7321_v18 = vld [vmem:[%s10189_s3 + $0x4c] ss:$12 sps:$4 sm:$0xff]   ;;  %s10212_s28 = smov 32   ;;  %vm5110_vm3 = vcmask 523264   ;;  %vm5127_vm4 = vcmask 785408  }
  0x1c   : > { %s6452_s16 = sshll.u32 %s10289_s15, 4  ;;  %6680 = vmatpush3.bf16.msra.mxu1 %v7315_v19  ;;  %v7323_v19 = vld [vmem:[%s10189_s3 + $0x38] ss:$12 sps:$4 sm:$0xff]   ;;  %s10249_s29 = smov 32  }
  0x1d   : > { %s7860_s17 = smov [#allocation2]  }
  0x1e   : > { %s7980_s19 = scalar_lea.vmem %s10218_s0, %s6452_s16  ;;  %829 = vmatpush1.bf16.msra.mxu0 %v7316_v58  ;;  %s407_s16 = sand.u32 1, %s7844_s22  }
  0x1f   : > { %v419_v0 = vld [vmem:[%s7980_s19] sm:$0xff]  ;;  %v421_v1 = vld [vmem:[%s7980_s19 + $0x10] sm:$0xff]  ;;  %v420_v2 = vld [vmem:[%s7980_s19 + $0x8] sm:$0xff]  ;;  %s6308_s18 = sshll.u32 %s407_s16, 7 }
  0x20   : > { %437 = vadd.xlane.f32.xlu0 %v419_v0  ;;  %441 = vadd.xlane.f32.xlu1 %v421_v1  ;;  %v422_v3 = vld [vmem:[%s7980_s19 + $0x18] sm:$0xff]  ;;  %v423_v4 = vld [vmem:[%s7980_s19 + $0x20] sm:$0xff]  ;;  %v424_v5 = vld [vmem:[%s7980_s19 + $0x28] sm:$0xff] }
  0x21   : > { %v7989_v6 = vld [vmem:[%s7980_s19 + $0x30] sm:$0xff]  ;;  %v7992_v7 = vld [vmem:[%s7980_s19 + $0x38] sm:$0xff]  ;;  %v7995_v8 = vld [vmem:[%s7980_s19 + $0x40] sm:$0xff] }
  0x22   : > { %v7998_v9 = vld [vmem:[%s7980_s19 + $0x48] sm:$0xff]  ;;  %v8003_v10 = vld [vmem:[%s7980_s19 + $0x50] sm:$0xff]  ;;  %v8006_v11 = vld [vmem:[%s7980_s19 + $0x58] sm:$0xff] }
  0x23   : > { %v8011_v12 = vld [vmem:[%s7980_s19 + $0x60] sm:$0xff]  ;;  %v8014_v13 = vld [vmem:[%s7980_s19 + $0x68] sm:$0xff]  ;;  %v8019_v14 = vld [vmem:[%s7980_s19 + $0x70] sm:$0xff] }
  0x24   : > { %439 = vadd.xlane.f32.xlu0 %v420_v2  ;;  %443 = vadd.xlane.f32.xlu1 %v422_v3  ;;  %v8022_v15 = vld [vmem:[%s7980_s19 + $0x78] sm:$0xff] }
  0x28   : > { %445 = vadd.xlane.f32.xlu0 %v423_v4  ;;  %447 = vadd.xlane.f32.xlu1 %v424_v5 }
  0x2c   : > { %449 = vadd.xlane.f32.xlu0 %v7989_v6  ;;  %451 = vadd.xlane.f32.xlu1 %v7992_v7 }
  0x30   : > { %453 = vadd.xlane.f32.xlu0 %v7995_v8  ;;  %455 = vadd.xlane.f32.xlu1 %v7998_v9 }
  0x34   : > { %457 = vadd.xlane.f32.xlu0 %v8003_v10  ;;  %459 = vadd.xlane.f32.xlu1 %v8006_v11 }
  0x38   : > { %461 = vadd.xlane.f32.xlu0 %v8011_v12  ;;  %463 = vadd.xlane.f32.xlu1 %v8014_v13 }
  0x3c   : > { %465 = vadd.xlane.f32.xlu0 %v8019_v14  ;;  %467 = vadd.xlane.f32.xlu1 %v8022_v15 }
  0xad   : > { %v438_v20 = vpop.xlane.xlu0 %437  ;;  %v442_v21 = vpop.xlane.xlu1 %441 }
  0xae   : > { %v470_v22 = vmul.f32 0.0078125, %v438_v20  ;;  %v472_v23 = vmul.f32 0.0078125, %v442_v21 }
  0xb0   : > { %v8040_v24 = vsub.f32 %v419_v0, %v470_v22  ;;  %v8042_v25 = vsub.f32 %v421_v1, %v472_v23  ;;  %v7317_v0 = vld [vmem:[%s10189_s3 + $0x34] ss:$12 sps:$4 sm:$0xff]  }
  0xb1   : > { %v440_v26 = vpop.xlane.xlu0 %439  ;;  %v444_v27 = vpop.xlane.xlu1 %443  ;;  %v7319_v1 = vld [vmem:[%s10189_s3 + $0x20] ss:$12 sps:$4 sm:$0xff]   ;;  %830 = vmatprep.subr.bf16.mxu0 %v7317_v0  ;;  %v7324_v22 = vld [vmem:[%s10189_s3 + $0x48] ss:$12 sps:$4 sm:$0xff]  }
  0xb2   : > { %v471_v28 = vmul.f32 0.0078125, %v440_v26  ;;  %v502_v29 = vmul.f32 %v8040_v24, %v8040_v24  ;;  %v473_v30 = vmul.f32 0.0078125, %v444_v27  ;;  %v504_v31 = vmul.f32 %v8042_v25, %v8042_v25  ;;  %6681 = vmatprep.subr.bf16.mxu1 %v7319_v1 }
  0xb3   : > { %6682 = vmatpush3.bf16.msra.mxu1 %v7319_v1 }
  0xb4   : > { %518 = vadd.xlane.f32.xlu0 %v502_v29  ;;  %v8048_v32 = vsub.f32 %v420_v2, %v471_v28  ;;  %v8050_v33 = vsub.f32 %v422_v3, %v473_v30  ;;  %6683 = vmatprep.subr.bf16.mxu1 %v7323_v19  ;;  %v7325_v29 = vld [vmem:[%s10189_s3 + $0x64] ss:$12 sps:$4 sm:$0xff]  }
  0xb5   : > { %v446_v34 = vpop.xlane.xlu0 %445  ;;  %v448_v35 = vpop.xlane.xlu1 %447  ;;  %v7327_v30 = vld [vmem:[%s10189_s3 + $0x50] ss:$12 sps:$4 sm:$0xff]  }
  0xb6   : > { %v474_v36 = vmul.f32 0.0078125, %v446_v34  ;;  %v503_v37 = vmul.f32 %v8048_v32, %v8048_v32  ;;  %v475_v38 = vmul.f32 0.0078125, %v448_v35  ;;  %v505_v39 = vmul.f32 %v8050_v33, %v8050_v33  ;;  %v7331_v35 = vld [vmem:[%s10189_s3 + $0x68] ss:$12 sps:$4 sm:$0xff]  }
  0xb7   : > { %6684 = vmatpush3.bf16.msra.mxu1 %v7323_v19 }
  0xb8   : > { %522 = vadd.xlane.f32.xlu0 %v504_v31  ;;  %520 = vadd.xlane.f32.xlu1 %v503_v37  ;;  %v8056_v40 = vsub.f32 %v423_v4, %v474_v36  ;;  %v8058_v41 = vsub.f32 %v424_v5, %v475_v38  ;;  %v7328_v31 = vld [vmem:[%s10189_s3 + $0x60] ss:$12 sps:$4 sm:$0xff]   ;;  %v7332_v36 = vld [vmem:[%s10189_s3 + $0x78] ss:$12 sps:$4 sm:$0xff]  }
  0xb9   : > { %v450_v42 = vpop.xlane.xlu0 %449  ;;  %v452_v43 = vpop.xlane.xlu1 %451  ;;  %6685 = vmatprep.subr.bf16.mxu1 %v7327_v30  ;;  %v7333_v37 = vld [vmem:[%s10189_s3 + $0x94] ss:$12 sps:$4 sm:$0xff]  }
  0xba   : > { %v476_v44 = vmul.f32 0.0078125, %v450_v42  ;;  %v506_v45 = vmul.f32 %v8056_v40, %v8056_v40  ;;  %v477_v46 = vmul.f32 0.0078125, %v452_v43  ;;  %v507_v47 = vmul.f32 %v8058_v41, %v8058_v41  ;;  %v7335_v38 = vld [vmem:[%s10189_s3 + $0x80] ss:$12 sps:$4 sm:$0xff]   ;;  %v7339_v43 = vld [vmem:[%s10189_s3 + $0x98] ss:$12 sps:$4 sm:$0xff]  }
  0xbb   : > { %6686 = vmatpush3.bf16.msra.mxu1 %v7327_v30  ;;  %v7337_v42 = vld [vmem:[%s10189_s3 + $0xac] ss:$12 sps:$4 sm:$0xff]  }
  0xbc   : > { %524 = vadd.xlane.f32.xlu1 %v505_v39  ;;  %526 = vadd.xlane.f32.xlu0 %v506_v45  ;;  %v8065_v48 = vsub.f32 %v7989_v6, %v476_v44  ;;  %v8068_v49 = vsub.f32 %v7992_v7, %v477_v46  ;;  %v7320_v7 = vld [vmem:[%s10189_s3 + $0x30] ss:$12 sps:$4 sm:$0xff]   ;;  %v7340_v44 = vld [vmem:[%s10189_s3 + $0xa8] ss:$12 sps:$4 sm:$0xff]   ;;  %v10199_v46 = vmov 0  }
  0xbd   : > { %v454_v50 = vpop.xlane.xlu0 %453  ;;  %v456_v51 = vpop.xlane.xlu1 %455  ;;  %831 = vmatpush1.bf16.msra.mxu0 %v7320_v7  ;;  %6687 = vmatprep.subr.bf16.mxu1 %v7331_v35  ;;  %v7336_v39 = vld [vmem:[%s10189_s3 + $0x90] ss:$12 sps:$4 sm:$0xff]  }
  0xbe   : > { %v478_v52 = vmul.f32 0.0078125, %v454_v50  ;;  %v508_v53 = vmul.f32 %v8065_v48, %v8065_v48  ;;  %v479_v54 = vmul.f32 0.0078125, %v456_v51  ;;  %v509_v55 = vmul.f32 %v8068_v49, %v8068_v49  ;;  %832 = vmatprep.subr.bf16.mxu0 %v7321_v18  ;;  %v7341_v45 = vld [vmem:[%s10189_s3 + $0xb0] ss:$12 sps:$4 sm:$0xff]   ;;  %858 = vmatprep.mubr.bf16.mxu0 %v10199_v46 }
  0xbf   : > { %6688 = vmatpush3.bf16.msra.mxu1 %v7331_v35 }
  0xc0   : > { %528 = vadd.xlane.f32.xlu1 %v507_v47  ;;  %530 = vadd.xlane.f32.xlu0 %v508_v53  ;;  %v8075_v56 = vsub.f32 %v7995_v8, %v478_v52  ;;  %v8078_v57 = vsub.f32 %v7998_v9, %v479_v54 }
  0xc1   : > { %v458_v59 = vpop.xlane.xlu0 %457  ;;  %v460_v60 = vpop.xlane.xlu1 %459  ;;  %833 = vmatpush1.bf16.msra.mxu0 %v7324_v22  ;;  %6689 = vmatprep.subr.bf16.mxu1 %v7335_v38  ;;  %v8179_v22 = vld [vmem:[%s10187_s1] ss:$0 sm:$0xff] }
  0xc2   : > { %v480_v61 = vmul.f32 0.0078125, %v458_v59  ;;  %v510_v62 = vmul.f32 %v8075_v56, %v8075_v56  ;;  %v481_v63 = vmul.f32 0.0078125, %v460_v60  ;;  %v511_v2 = vmul.f32 %v8078_v57, %v8078_v57  ;;  %834 = vmatprep.subr.bf16.mxu0 %v7325_v29 }
  0xc3   : > { %6690 = vmatpush3.bf16.msra.mxu1 %v7335_v38 }
  0xc4   : > { %532 = vadd.xlane.f32.xlu1 %v509_v55  ;;  %534 = vadd.xlane.f32.xlu0 %v510_v62  ;;  %v8094_v3 = vsub.f32 %v8003_v10, %v480_v61  ;;  %v8097_v4 = vsub.f32 %v8006_v11, %v481_v63 }
  0xc5   : > { %v462_v5 = vpop.xlane.xlu0 %461  ;;  %v464_v6 = vpop.xlane.xlu1 %463  ;;  %835 = vmatpush1.bf16.msra.mxu0 %v7328_v31  ;;  %6691 = vmatprep.subr.bf16.mxu1 %v7339_v43 }
  0xc6   : > { %v482_v8 = vmul.f32 0.0078125, %v462_v5  ;;  %v512_v9 = vmul.f32 %v8094_v3, %v8094_v3  ;;  %v483_v16 = vmul.f32 0.0078125, %v464_v6  ;;  %v513_v10 = vmul.f32 %v8097_v4, %v8097_v4 }
  0xc7   : > { %6692 = vmatpush3.bf16.msra.mxu1 %v7339_v43 }
  0xc8   : > { %536 = vadd.xlane.f32.xlu1 %v511_v2  ;;  %538 = vadd.xlane.f32.xlu0 %v512_v9  ;;  %v8107_v11 = vsub.f32 %v8011_v12, %v482_v8  ;;  %v8110_v17 = vsub.f32 %v8014_v13, %v483_v16 }
  0xc9   : > { %v466_v20 = vpop.xlane.xlu0 %465  ;;  %v468_v21 = vpop.xlane.xlu1 %467  ;;  %6693 = vmatprep.subr.bf16.mxu1 %v7341_v45 }
  0xca   : > { %v484_v23 = vmul.f32 0.0078125, %v466_v20  ;;  %v514_v12 = vmul.f32 %v8107_v11, %v8107_v11  ;;  %v485_v13 = vmul.f32 0.0078125, %v468_v21  ;;  %v515_v26 = vmul.f32 %v8110_v17, %v8110_v17 }
  0xcb   : > { %6694 = vmatpush3.bf16.msra.mxu1 %v7341_v45 }
  0xcc   : > { %540 = vadd.xlane.f32.xlu1 %v513_v10  ;;  %542 = vadd.xlane.f32.xlu0 %v514_v12  ;;  %v8126_v27 = vsub.f32 %v8019_v14, %v484_v23  ;;  %v8129_v28 = vsub.f32 %v8022_v15, %v485_v13  ;;  %v7329_v15 = vld [vmem:[%s10189_s3 + $0x7c] ss:$12 sps:$4 sm:$0xff]  }
  0xcd   : > { %836 = vmatprep.subr.bf16.mxu0 %v7329_v15  ;;  %v8186_v15 = vld [vmem:[%s10188_s2] ss:$0 sm:$0xff] }
  0xce   : > { %v516_v34 = vmul.f32 %v8126_v27, %v8126_v27  ;;  %v517_v14 = vmul.f32 %v8129_v28, %v8129_v28  ;;  %837 = vmatpush1.bf16.msra.mxu0 %v7332_v36 }
  0xcf   : > { %838 = vmatprep.subr.bf16.mxu0 %v7333_v37 }
  0xd0   : > { %544 = vadd.xlane.f32.xlu1 %v515_v26  ;;  %546 = vadd.xlane.f32.xlu0 %v516_v34 }
  0xd2   : > { %839 = vmatpush1.bf16.msra.mxu0 %v7336_v39 }
  0xd3   : > { %840 = vmatprep.subr.bf16.mxu0 %v7337_v42 }
  0xd4   : > { %548 = vadd.xlane.f32.xlu1 %v517_v14 }
  0xd6   : > { %841 = vmatpush1.bf16.msra.mxu0 %v7340_v44 }
 0x141   : > { %v519_v47 = vpop.xlane.xlu0 %518 }
 0x142   : > { %v550_v50 = vmul.f32 0.0078125, %v519_v47 }
 0x144   : > { %v566_v51 = vadd.f32 1e-05, %v550_v50 }
 0x145   : > { %v521_v52 = vpop.xlane.xlu1 %520  ;;  %v523_v53 = vpop.xlane.xlu0 %522 }
 0x146   : > { %7390 = vrsqrt.f32 %v566_v51  ;;  %v551_v54 = vmul.f32 0.0078125, %v521_v52  ;;  %v552_v55 = vmul.f32 0.0078125, %v523_v53 }
 0x148   : > { %v567_v58 = vadd.f32 1e-05, %v551_v54  ;;  %v568_v59 = vadd.f32 1e-05, %v552_v55 }
 0x149   : > { %v525_v60 = vpop.xlane.xlu1 %524  ;;  %v527_v61 = vpop.xlane.xlu0 %526 }
 0x14a   : > { %7392 = vrsqrt.f32 %v567_v58  ;;  %v553_v62 = vmul.f32 0.0078125, %v525_v60  ;;  %v554_v63 = vmul.f32 0.0078125, %v527_v61 }
 0x14b   : > { %7394 = vrsqrt.f32 %v568_v59 }
 0x14c   : > { %v569_v0 = vadd.f32 1e-05, %v553_v62  ;;  %v570_v1 = vadd.f32 1e-05, %v554_v63 }
 0x14d   : > { %v529_v2 = vpop.xlane.xlu1 %528  ;;  %v531_v5 = vpop.xlane.xlu0 %530 }
 0x14e   : > { %7396 = vrsqrt.f32 %v569_v0  ;;  %v555_v6 = vmul.f32 0.0078125, %v529_v2  ;;  %v556_v7 = vmul.f32 0.0078125, %v531_v5 }
 0x14f   : > { %7398 = vrsqrt.f32 %v570_v1 }
 0x150   : > { %v7391_v8 = vpop.eup %7390  ;;  %v571_v9 = vadd.f32 1e-05, %v555_v6  ;;  %v572_v16 = vadd.f32 1e-05, %v556_v7 }
 0x151   : > { %v533_v10 = vpop.xlane.xlu1 %532  ;;  %v535_v18 = vpop.xlane.xlu0 %534  ;;  %v598_v19 = vmul.f32 %v7391_v8, %v8040_v24 }
 0x152   : > { %7400 = vrsqrt.f32 %v571_v9  ;;  %v557_v20 = vmul.f32 0.0078125, %v533_v10  ;;  %v558_v21 = vmul.f32 0.0078125, %v535_v18 }
 0x153   : > { %7402 = vrsqrt.f32 %v572_v16  ;;  %v620_v34 = vmul.f32 %v8179_v22, %v598_v19 }
 0x154   : > { %v7393_v23 = vpop.eup %7392  ;;  %v573_v12 = vadd.f32 1e-05, %v557_v20  ;;  %v574_v13 = vadd.f32 1e-05, %v558_v21 }
 0x155   : > { %v7395_v26 = vpop.eup %7394  ;;  %v537_v29 = vpop.xlane.xlu1 %536  ;;  %v599_v31 = vmul.f32 %v7393_v23, %v8048_v32  ;;  %v642_v45 = vadd.f32 %v8186_v15, %v620_v34 }
 0x156   : > { %v539_v30 = vpop.xlane.xlu0 %538  ;;  %7404 = vrsqrt.f32 %v573_v12  ;;  %v559_v24 = vmul.f32 0.0078125, %v537_v29  ;;  %v600_v35 = vmul.f32 %v7395_v26, %v8042_v25 }
 0x157   : > { %v560_v14 = vmul.f32 0.0078125, %v539_v30  ;;  %7406 = vrsqrt.f32 %v574_v13  ;;  %v621_v36 = vmul.f32 %v8179_v22, %v599_v31 }
 0x158   : > { %v7397_v37 = vpop.eup %7396  ;;  %v575_v38 = vadd.f32 1e-05, %v559_v24  ;;  %v622_v32 = vmul.f32 %v8179_v22, %v600_v35 }
 0x159   : > { %v576_v39 = vadd.f32 1e-05, %v560_v14  ;;  %v7399_v42 = vpop.eup %7398  ;;  %v541_v43 = vpop.xlane.xlu1 %540  ;;  %v643_v47 = vadd.f32 %v8186_v15, %v621_v36  ;;  %v601_v50 = vmul.f32 %v7397_v37, %v8050_v33 }
 0x15a   : > { %v543_v44 = vpop.xlane.xlu0 %542  ;;  %7408 = vrsqrt.f32 %v575_v38  ;;  %v561_v51 = vmul.f32 0.0078125, %v541_v43  ;;  %v602_v54 = vmul.f32 %v7399_v42, %v8056_v40  ;;  %v644_v60 = vadd.f32 %v8186_v15, %v622_v32 }
 0x15b   : > { %v562_v25 = vmul.f32 0.0078125, %v543_v44  ;;  %7410 = vrsqrt.f32 %v576_v39  ;;  %v658_v52 = vpack.c.bf16 %v643_v47, %v642_v45  ;;  %v623_v53 = vmul.f32 %v8179_v22, %v601_v50 }
 0x15c   : > { %v7401_v55 = vpop.eup %7400  ;;  %v577_v58 = vadd.f32 1e-05, %v561_v51  ;;  %v624_v1 = vmul.f32 %v8179_v22, %v602_v54 }
 0x15d   : > { %v578_v59 = vadd.f32 1e-05, %v562_v25  ;;  %v7403_v61 = vpop.eup %7402  ;;  %v545_v62 = vpop.xlane.xlu1 %544  ;;  %859 = vmatmul.mubr.bf16.vlgmr.msra.gmra.mrb[0].mxu0 %v658_v52  ;;  %6695 = vmatprep.mubr.bf16.mxu1 %v658_v52  ;;  %v645_v33 = vadd.f32 %v8186_v15, %v623_v53  ;;  %v603_v0 = vmul.f32 %v7401_v55, %v8058_v41 }
 0x15e   : > { %v547_v63 = vpop.xlane.xlu0 %546  ;;  %7412 = vrsqrt.f32 %v577_v58  ;;  %v563_v2 = vmul.f32 0.0078125, %v545_v62  ;;  %868 = vmatprep.mubr.bf16.mxu0 %v10199_v46  ;;  %v604_v40 = vmul.f32 %v7403_v61, %v8065_v48  ;;  %v646_v19 = vadd.f32 %v8186_v15, %v624_v1 }
 0x15f   : > { %v564_v5 = vmul.f32 0.0078125, %v547_v63  ;;  %7414 = vrsqrt.f32 %v578_v59  ;;  %v659_v6 = vpack.c.bf16 %v645_v33, %v644_v60  ;;  %v625_v7 = vmul.f32 %v8179_v22, %v603_v0 }
 0x160   : > { %v7405_v8 = vpop.eup %7404  ;;  %v579_v9 = vadd.f32 1e-05, %v563_v2  ;;  %v626_v10 = vmul.f32 %v8179_v22, %v604_v40 }
 0x161   : > { %v580_v16 = vadd.f32 1e-05, %v564_v5  ;;  %v7407_v18 = vpop.eup %7406  ;;  %v549_v41 = vpop.xlane.xlu1 %548  ;;  %6696 = vmatmul.mubr.bf16.vlgmr.msra.gmra.mrb[0].mxu1 %v659_v6  ;;  %v647_v20 = vadd.f32 %v8186_v15, %v625_v7  ;;  %v605_v21 = vmul.f32 %v7405_v8, %v8068_v49 }
 0x162   : > { %7416 = vrsqrt.f32 %v579_v9  ;;  %v565_v48 = vmul.f32 0.0078125, %v549_v41  ;;  %v606_v23 = vmul.f32 %v7407_v18, %v8075_v56  ;;  %v648_v30 = vadd.f32 %v8186_v15, %v626_v10 }
 0x163   : > { %7418 = vrsqrt.f32 %v580_v16  ;;  %v660_v12 = vpack.c.bf16 %v647_v20, %v646_v19  ;;  %v627_v13 = vmul.f32 %v8179_v22, %v605_v21 }
 0x164   : > { %v7409_v26 = vpop.eup %7408  ;;  %v581_v29 = vadd.f32 1e-05, %v565_v48  ;;  %v628_v49 = vmul.f32 %v8179_v22, %v606_v23 }
 0x165   : > { %v7411_v31 = vpop.eup %7410  ;;  %869 = vmatmul.mubr.bf16.gmra.mrb[4].mxu0 %v659_v6  ;;  %6699 = vmatprep.mubr.bf16.mxu1 %v660_v12  ;;  %v649_v34 = vadd.f32 %v8186_v15, %v627_v13  ;;  %v607_v24 = vmul.f32 %v7409_v26, %v8078_v57 }
 0x166   : > { %7420 = vrsqrt.f32 %v581_v29  ;;  %878 = vmatprep.mubr.bf16.mxu0 %v10199_v46  ;;  %v608_v56 = vmul.f32 %v7411_v31, %v8094_v3  ;;  %v650_v39 = vadd.f32 %v8186_v15, %v628_v49 }
 0x167   : > { %v661_v14 = vpack.c.bf16 %v649_v34, %v648_v30  ;;  %v629_v35 = vmul.f32 %v8179_v22, %v607_v24 }
 0x168   : > { %v7413_v36 = vpop.eup %7412  ;;  %v630_v37 = vmul.f32 %v8179_v22, %v608_v56 }
 0x169   : > { %v7415_v38 = vpop.eup %7414  ;;  %6700 = vmatmul.mubr.bf16.gmra.mrb[4].mxu1 %v661_v14  ;;  %v651_v32 = vadd.f32 %v8186_v15, %v629_v35  ;;  %v609_v57 = vmul.f32 %v7413_v36, %v8097_v4 }
 0x16a   : > { %v610_v42 = vmul.f32 %v7415_v38, %v8107_v11  ;;  %v652_v45 = vadd.f32 %v8186_v15, %v630_v37 }
 0x16b   : > { %v662_v43 = vpack.c.bf16 %v651_v32, %v650_v39  ;;  %v631_v44 = vmul.f32 %v8179_v22, %v609_v57 }
 0x16c   : > { %v7417_v3 = vpop.eup %7416  ;;  %v632_v25 = vmul.f32 %v8179_v22, %v610_v42 }
 0x16d   : > { %v7419_v47 = vpop.eup %7418  ;;  %879 = vmatmul.mubr.bf16.gmra.mrb[8].mxu0 %v660_v12  ;;  %6703 = vmatprep.mubr.bf16.mxu1 %v662_v43  ;;  %v653_v50 = vadd.f32 %v8186_v15, %v631_v44  ;;  %v611_v51 = vmul.f32 %v7417_v3, %v8110_v17 }
 0x16e   : > { %888 = vmatprep.mubr.bf16.mxu0 %v10199_v46  ;;  %v612_v4 = vmul.f32 %v7419_v47, %v8126_v27  ;;  %v654_v54 = vadd.f32 %v8186_v15, %v632_v25 }
 0x16f   : > { %v663_v11 = vpack.c.bf16 %v653_v50, %v652_v45  ;;  %v633_v52 = vmul.f32 %v8179_v22, %v611_v51 }
 0x170   : > { %v7421_v53 = vpop.eup %7420  ;;  %v634_v59 = vmul.f32 %v8179_v22, %v612_v4 }
 0x171   : > { %6704 = vmatmul.mubr.bf16.gmra.mrb[8].mxu1 %v663_v11  ;;  %v655_v55 = vadd.f32 %v8186_v15, %v633_v52  ;;  %v613_v58 = vmul.f32 %v7421_v53, %v8129_v28  ;;  %v10201_v28 = vmov 0.0  }
 0x172   : > { %v656_v27 = vadd.f32 %v8186_v15, %v634_v59  ;;  %6711 = vmatprep.subr.bf16.mxu1 %v10201_v28  ;;  %6735 = vmatprep.subr.bf16.mxu0 %v10201_v28 }
 0x173   : > { %v664_v17 = vpack.c.bf16 %v655_v55, %v654_v54  ;;  %v635_v60 = vmul.f32 %v8179_v22, %v613_v58 }
 0x175   : > { %889 = vmatmul.mubr.bf16.gmra.mrb[12].mxu0 %v661_v14  ;;  %6707 = vmatprep.mubr.bf16.mxu1 %v664_v17  ;;  %v657_v61 = vadd.f32 %v8186_v15, %v635_v60 }
 0x176   : > { %898 = vmatprep.mubr.bf16.mxu0 %v10199_v46 }
 0x177   : > { %v665_v62 = vpack.c.bf16 %v657_v61, %v656_v27 }
 0x179   : > { %6708 = vmatmul.mubr.bf16.gmra.mrb[12].mxu1 %v665_v62 }
 0x17a   : > { %6713 = vmatprep.mubr.msk.bf16.mxu1 %vm7856_vm0, %v10201_v28 }
 0x17d   : > { %899 = vmatmul.mubr.bf16.gmra.mrb[16].mxu0 %v662_v43 }
 0x17e   : > { %908 = vmatprep.mubr.bf16.mxu0 %v10199_v46 }
 0x185   : > { %909 = vmatmul.mubr.bf16.gmra.mrb[20].mxu0 %v663_v11 }
 0x186   : > { %918 = vmatprep.mubr.bf16.mxu0 %v10199_v46 }
 0x18d   : > { %919 = vmatmul.mubr.bf16.gmra.mrb[24].mxu0 %v664_v17 }
 0x18e   : > { %928 = vmatprep.mubr.bf16.mxu0 %v10199_v46 }
 0x195   : > { %929 = vmatmul.mubr.bf16.gmra.mrb[28].mxu0 %v665_v62 }
 0x196   : > { %6737 = vmatprep.mubr.msk.bf16.mxu0 %vm7856_vm0, %v10201_v28 }
 0x230   : > { %v860_v22 = vpop.f32.mrb[0].mxu0 }
 0x231   : > { %v862_v15 = vpop.f32.mrb[1].mxu0 }
 0x232   : > { %v864_v63 = vpop.f32.mrb[2].mxu0 }
 0x233   : > { %v8246_v33 = vpack.c.bf16 %v864_v63, %v860_v22  ;;  %v866_v0 = vpop.f32.mrb[3].mxu0 }
 0x234   : > { %v8248_v1 = vpack.c.bf16 %v866_v0, %v862_v15  ;;  %v6697_v2 = vpop.f32.mrb[0].mxu1 }
 0x235   : > { %v973_v5 = vpop.f32.mrb[1].mxu1 }
 0x236   : > { %v6698_v40 = vpop.f32.mrb[2].mxu1  ;;  %v1065_v6 = vsel %vm1060_vm1, %v8248_v1, 0 }
 0x237   : > { %v8252_v7 = vpack.c.bf16 %v6698_v40, %v6697_v2  ;;  %v976_v8 = vpop.f32.mrb[3].mxu1  ;;  %6712 = vmatpush3.bf16.xpose.msra.mxu1 %v1065_v6 }
 0x238   : > { %v8254_v9 = vpack.c.bf16 %v976_v8, %v973_v5  ;;  %v870_v16 = vpop.f32.mrb[4].mxu0  ;;  %6717 = vmatprep.subr.bf16.mxu1 %v10201_v28 }
 0x239   : > { %v872_v10 = vpop.f32.mrb[5].mxu0 }
 0x23a   : > { %v874_v18 = vpop.f32.mrb[6].mxu0 }
 0x23b   : > { %v8257_v41 = vpack.c.bf16 %v874_v18, %v870_v16  ;;  %v876_v19 = vpop.f32.mrb[7].mxu0 }
 0x23c   : > { %v8259_v20 = vpack.c.bf16 %v876_v19, %v872_v10  ;;  %v6701_v21 = vpop.f32.mrb[4].mxu1 }
 0x23d   : > { %v989_v48 = vpop.f32.mrb[5].mxu1 }
 0x23e   : > { %v6702_v23 = vpop.f32.mrb[6].mxu1  ;;  %6714 = vmatmul.mubr.msk.bf16.vlgmr.msra.gmra.mrb[16].mxu1 %vm1060_vm1, %v8246_v33  ;;  %v1112_v12 = vsel %vm1060_vm1, %v8259_v20, 0 }
 0x23f   : > { %v8265_v13 = vpack.c.bf16 %v6702_v23, %v6701_v21  ;;  %v992_v26 = vpop.f32.mrb[7].mxu1  ;;  %6718 = vmatpush3.bf16.xpose.msra.mxu1 %v1112_v12  ;;  %6719 = vmatprep.mubr.msk.bf16.mxu1 %vm7856_vm0, %v10201_v28 }
 0x240   : > { %v8269_v29 = vpack.c.bf16 %v992_v26, %v989_v48  ;;  %v880_v30 = vpop.f32.mrb[8].mxu0  ;;  %6723 = vmatprep.subr.bf16.mxu1 %v10201_v28 }
 0x241   : > { %v882_v31 = vpop.f32.mrb[9].mxu0 }
 0x242   : > { %v884_v34 = vpop.f32.mrb[10].mxu0 }
 0x243   : > { %v8272_v24 = vpack.c.bf16 %v884_v34, %v880_v30  ;;  %v886_v49 = vpop.f32.mrb[11].mxu0 }
 0x244   : > { %v8274_v56 = vpack.c.bf16 %v886_v49, %v882_v31  ;;  %v6705_v14 = vpop.f32.mrb[8].mxu1 }
 0x245   : > { %v1005_v35 = vpop.f32.mrb[9].mxu1 }
 0x246   : > { %v6706_v36 = vpop.f32.mrb[10].mxu1  ;;  %6720 = vmatmul.mubr.msk.bf16.vlgmr.msra.gmra.mrb[20].mxu1 %vm1060_vm1, %v8257_v41  ;;  %v1159_v37 = vsel %vm1060_vm1, %v8274_v56, 0 }
 0x247   : > { %v8280_v38 = vpack.c.bf16 %v6706_v36, %v6705_v14  ;;  %v1008_v39 = vpop.f32.mrb[11].mxu1  ;;  %6724 = vmatpush3.bf16.xpose.msra.mxu1 %v1159_v37  ;;  %6725 = vmatprep.mubr.msk.bf16.mxu1 %vm7856_vm0, %v10201_v28 }
 0x248   : > { %v8284_v32 = vpack.c.bf16 %v1008_v39, %v1005_v35  ;;  %v890_v57 = vpop.f32.mrb[12].mxu0  ;;  %6729 = vmatprep.subr.bf16.mxu1 %v10201_v28 }
 0x249   : > { %v892_v42 = vpop.f32.mrb[13].mxu0 }
 0x24a   : > { %v894_v43 = vpop.f32.mrb[14].mxu0 }
 0x24b   : > { %v8287_v44 = vpack.c.bf16 %v894_v43, %v890_v57  ;;  %v896_v3 = vpop.f32.mrb[15].mxu0 }
 0x24c   : > { %v8289_v45 = vpack.c.bf16 %v896_v3, %v892_v42  ;;  %v6709_v47 = vpop.f32.mrb[12].mxu1 }
 0x24d   : > { %v1021_v50 = vpop.f32.mrb[13].mxu1 }
 0x24e   : > { %v6710_v51 = vpop.f32.mrb[14].mxu1  ;;  %6726 = vmatmul.mubr.msk.bf16.vlgmr.msra.gmra.mrb[24].mxu1 %vm1060_vm1, %v8272_v24  ;;  %v1206_v25 = vsel %vm1060_vm1, %v8289_v45, 0 }
 0x24f   : > { %v8295_v4 = vpack.c.bf16 %v6710_v51, %v6709_v47  ;;  %v1024_v11 = vpop.f32.mrb[15].mxu1  ;;  %6730 = vmatpush3.bf16.xpose.msra.mxu1 %v1206_v25  ;;  %6731 = vmatprep.mubr.msk.bf16.mxu1 %vm7856_vm0, %v10201_v28 }
 0x250   : > { %v8299_v52 = vpack.c.bf16 %v1024_v11, %v1021_v50  ;;  %v900_v53 = vpop.f32.mrb[16].mxu0  ;;  %6741 = vmatprep.subr.bf16.mxu1 %v10201_v28 }
 0x251   : > { %v902_v54 = vpop.f32.mrb[17].mxu0 }
 0x252   : > { %v904_v55 = vpop.f32.mrb[18].mxu0 }
 0x253   : > { %v8302_v58 = vpack.c.bf16 %v904_v55, %v900_v53  ;;  %v906_v59 = vpop.f32.mrb[19].mxu0 }
 0x254   : > { %v8304_v17 = vpack.c.bf16 %v906_v59, %v902_v54 }
 0x256   : > { %6732 = vmatmul.mubr.msk.bf16.vlgmr.msra.gmra.mrb[28].mxu1 %vm1060_vm1, %v8287_v44  ;;  %v1253_v60 = vsel %vm1060_vm1, %v8304_v17, 0 }
 0x257   : > { %6736 = vmatpush3.bf16.xpose.msra.mxu0 %v1253_v60  ;;  %6743 = vmatprep.mubr.msk.bf16.mxu1 %vm7856_vm0, %v10201_v28 }
 0x258   : > { %v910_v27 = vpop.f32.mrb[20].mxu0  ;;  %6747 = vmatprep.subr.bf16.mxu0 %v10201_v28 }
 0x259   : > { %v912_v61 = vpop.f32.mrb[21].mxu0 }
 0x25a   : > { %v914_v62 = vpop.f32.mrb[22].mxu0 }
 0x25b   : > { %v8313_v22 = vpack.c.bf16 %v914_v62, %v910_v27  ;;  %v916_v15 = vpop.f32.mrb[23].mxu0 }
 0x25c   : > { %v8315_v63 = vpack.c.bf16 %v916_v15, %v912_v61 }
 0x25e   : > { %6738 = vmatmul.mubr.msk.bf16.vlgmr.msra.gmra.mrb[32].mxu0 %vm1060_vm1, %v8302_v58  ;;  %v1300_v0 = vsel %vm1060_vm1, %v8315_v63, 0 }
 0x25f   : > { %6742 = vmatpush3.bf16.xpose.msra.mxu1 %v1300_v0  ;;  %6749 = vmatprep.mubr.msk.bf16.mxu0 %vm7856_vm0, %v10201_v28 }
 0x260   : > { %v920_v2 = vpop.f32.mrb[24].mxu0  ;;  %6753 = vmatprep.subr.bf16.mxu1 %v10201_v28 }
 0x261   : > { %v922_v5 = vpop.f32.mrb[25].mxu0 }
 0x262   : > { %v924_v40 = vpop.f32.mrb[26].mxu0 }
 0x263   : > { %v8324_v6 = vpack.c.bf16 %v924_v40, %v920_v2  ;;  %v926_v8 = vpop.f32.mrb[27].mxu0 }
 0x264   : > { %v8326_v16 = vpack.c.bf16 %v926_v8, %v922_v5 }
 0x266   : > { %6744 = vmatmul.mubr.msk.bf16.vlgmr.msra.gmra.mrb[32].mxu1 %vm1060_vm1, %v8313_v22  ;;  %v1347_v10 = vsel %vm1060_vm1, %v8326_v16, 0 }
 0x267   : > { %6748 = vmatpush3.bf16.xpose.msra.mxu0 %v1347_v10  ;;  %6755 = vmatprep.mubr.msk.bf16.mxu1 %vm7856_vm0, %v10201_v28 }
 0x268   : > { %v930_v18 = vpop.f32.mrb[28].mxu0  ;;  %6759 = vmatprep.subr.bf16.mxu0 %v10201_v28 }
 0x269   : > { %v932_v19 = vpop.f32.mrb[29].mxu0 }
 0x26a   : > { %v934_v21 = vpop.f32.mrb[30].mxu0 }
 0x26b   : > { %v8335_v48 = vpack.c.bf16 %v934_v21, %v930_v18  ;;  %v936_v23 = vpop.f32.mrb[31].mxu0 }
 0x26c   : > { %v8337_v12 = vpack.c.bf16 %v936_v23, %v932_v19 }
 0x26e   : > { %6750 = vmatmul.mubr.msk.bf16.vlgmr.msra.gmra.mrb[36].mxu0 %vm1060_vm1, %v8324_v6  ;;  %v1394_v26 = vsel %vm1060_vm1, %v8337_v12, 0 }
 0x26f   : > { %6754 = vmatpush3.bf16.xpose.msra.mxu1 %v1394_v26  ;;  %6760 = vmatpush3.bf16.msra.mxu0 %v8254_v9 }
 0x270   : > { %6765 = vmatprep.subr.bf16.mxu1 %v10201_v28  ;;  %6761 = vmatprep.mubr.msk.bf16.mxu0 %vm7856_vm0, %v10201_v28 }
 0x271   : > { %6771 = vmatprep.subr.bf16.mxu0 %v10201_v28 }
 0x276   : > { %6756 = vmatmul.mubr.msk.bf16.vlgmr.msra.gmra.mrb[36].mxu1 %vm1060_vm1, %v8335_v48 }
 0x277   : > { %6766 = vmatpush3.bf16.msra.mxu1 %v8252_v7  ;;  %6767 = vmatprep.mubr.msk.bf16.mxu1 %vm7856_vm0, %v10201_v28 }
 0x278   : > { %6777 = vmatprep.subr.bf16.mxu1 %v10201_v28 }
 0x311   : > { %v8354_v30 = vpop.f32.mrb[16].mxu1 }
 0x312   : > { %v6715_v31 = vpop.f32.mrb[17].mxu1  ;;  %v1438_v34 = vsel %vm1437_vm2, %v8354_v30, -inf }
 0x313   : > { %1439 = vmax.xlane.f32.xlu0 %v1438_v34  ;;  %v8358_v49 = vpop.f32.mrb[18].mxu1 }
 0x314   : > { %v6716_v14 = vpop.f32.mrb[19].mxu1  ;;  %v1441_v35 = vsel %vm1437_vm2, %v8358_v49, -inf }
 0x315   : > { %1442 = vmax.xlane.f32.xlu1 %v1441_v35 }
 0x319   : > { %v8362_v36 = vpop.f32.mrb[20].mxu1 }
 0x31a   : > { %v6721_v37 = vpop.f32.mrb[21].mxu1  ;;  %v1444_v39 = vsel %vm1437_vm2, %v8362_v36, -inf }
 0x31b   : > { %1445 = vmax.xlane.f32.xlu0 %v1444_v39  ;;  %v8366_v57 = vpop.f32.mrb[22].mxu1 }
 0x31c   : > { %v6722_v42 = vpop.f32.mrb[23].mxu1  ;;  %v1447_v43 = vsel %vm1437_vm2, %v8366_v57, -inf }
 0x31d   : > { %1448 = vmax.xlane.f32.xlu1 %v1447_v43 }
 0x321   : > { %v8370_v3 = vpop.f32.mrb[24].mxu1 }
 0x322   : > { %v6727_v47 = vpop.f32.mrb[25].mxu1  ;;  %v1450_v50 = vsel %vm1437_vm2, %v8370_v3, -inf }
 0x323   : > { %1451 = vmax.xlane.f32.xlu0 %v1450_v50  ;;  %v8374_v51 = vpop.f32.mrb[26].mxu1 }
 0x324   : > { %v6728_v25 = vpop.f32.mrb[27].mxu1  ;;  %v1453_v11 = vsel %vm1437_vm2, %v8374_v51, -inf }
 0x325   : > { %1454 = vmax.xlane.f32.xlu1 %v1453_v11 }
 0x329   : > { %v8378_v53 = vpop.f32.mrb[28].mxu1 }
 0x32a   : > { %v6733_v54 = vpop.f32.mrb[29].mxu1  ;;  %v1456_v55 = vsel %vm1437_vm2, %v8378_v53, -inf }
 0x32b   : > { %1457 = vmax.xlane.f32.xlu0 %v1456_v55  ;;  %v8382_v59 = vpop.f32.mrb[30].mxu1 }
 0x32c   : > { %v6734_v60 = vpop.f32.mrb[31].mxu1  ;;  %v1459_v27 = vsel %vm1437_vm2, %v8382_v59, -inf }
 0x32d   : > { %1460 = vmax.xlane.f32.xlu1 %v1459_v27 }
 0x331   : > { %v8386_v61 = vpop.f32.mrb[32].mxu0 }
 0x332   : > { %v6739_v62 = vpop.f32.mrb[33].mxu0  ;;  %v1462_v15 = vsel %vm1437_vm2, %v8386_v61, -inf }
 0x333   : > { %1463 = vmax.xlane.f32.xlu0 %v1462_v15  ;;  %v8390_v0 = vpop.f32.mrb[34].mxu0 }
 0x334   : > { %v6740_v2 = vpop.f32.mrb[35].mxu0  ;;  %v1465_v5 = vsel %vm1437_vm2, %v8390_v0, -inf }
 0x335   : > { %1466 = vmax.xlane.f32.xlu1 %v1465_v5 }
 0x339   : > { %v8394_v40 = vpop.f32.mrb[32].mxu1 }
 0x33a   : > { %v6745_v8 = vpop.f32.mrb[33].mxu1  ;;  %v1468_v10 = vsel %vm1437_vm2, %v8394_v40, -inf }
 0x33b   : > { %v8398_v18 = vpop.f32.mrb[34].mxu1  ;;  %1469 = vmax.xlane.f32.xlu0 %v1468_v10 }
 0x33c   : > { %v6746_v19 = vpop.f32.mrb[35].mxu1  ;;  %v1471_v21 = vsel %vm1437_vm2, %v8398_v18, -inf }
 0x33d   : > { %1472 = vmax.xlane.f32.xlu1 %v1471_v21 }
 0x341   : > { %v8402_v23 = vpop.f32.mrb[36].mxu0 }
 0x342   : > { %v6751_v26 = vpop.f32.mrb[37].mxu0  ;;  %v1474_v31 = vsel %vm1437_vm2, %v8402_v23, -inf }
 0x343   : > { %1475 = vmax.xlane.f32.xlu0 %v1474_v31  ;;  %v8406_v34 = vpop.f32.mrb[38].mxu0 }
 0x344   : > { %v6752_v14 = vpop.f32.mrb[39].mxu0  ;;  %v1477_v35 = vsel %vm1437_vm2, %v8406_v34, -inf }
 0x345   : > { %1478 = vmax.xlane.f32.xlu1 %v1477_v35 }
 0x349   : > { %v8410_v37 = vpop.f32.mrb[36].mxu1 }
 0x34a   : > { %v6757_v39 = vpop.f32.mrb[37].mxu1  ;;  %v1480_v42 = vsel %vm1437_vm2, %v8410_v37, -inf }
 0x34b   : > { %1481 = vmax.xlane.f32.xlu0 %v1480_v42  ;;  %v8414_v43 = vpop.f32.mrb[38].mxu1 }
 0x34c   : > { %v6758_v47 = vpop.f32.mrb[39].mxu1  ;;  %v1483_v50 = vsel %vm1437_vm2, %v8414_v43, -inf }
 0x34d   : > { %1484 = vmax.xlane.f32.xlu1 %v1483_v50 }
 0x3a0   : > { %v1440_v25 = vpop.xlane.xlu0 %1439 }
 0x3a1   : > { %v1486_v11 = vsub.f32 %v8354_v30, %v1440_v25 }
 0x3a2   : > { %v1443_v54 = vpop.xlane.xlu1 %1442 }
 0x3a3   : > { %v1502_v55 = vmul.f32 1.442695, %v1486_v11  ;;  %v1487_v60 = vsub.f32 %v8358_v49, %v1443_v54 }
 0x3a5   : > { %7422 = vpow2.f32 %v1502_v55  ;;  %v1504_v27 = vmul.f32 1.442695, %v1487_v60 }
 0x3a7   : > { %7424 = vpow2.f32 %v1504_v27 }
 0x3a8   : > { %v1446_v62 = vpop.xlane.xlu0 %1445 }
 0x3a9   : > { %v1488_v15 = vsub.f32 %v8362_v36, %v1446_v62 }
 0x3aa   : > { %v1449_v2 = vpop.xlane.xlu1 %1448 }
 0x3ab   : > { %v1506_v5 = vmul.f32 1.442695, %v1488_v15  ;;  %v1489_v8 = vsub.f32 %v8366_v57, %v1449_v2 }
 0x3ad   : > { %7426 = vpow2.f32 %v1506_v5  ;;  %v1508_v10 = vmul.f32 1.442695, %v1489_v8 }
 0x3af   : > { %v8422_v19 = vpop.eup %7422  ;;  %7428 = vpow2.f32 %v1508_v10 }
 0x3b0   : > { %v1452_v30 = vpop.xlane.xlu0 %1451  ;;  %v1534_v21 = vsel %vm1437_vm2, %v8422_v19, 0.0 }
 0x3b1   : > { %v8426_v49 = vpop.eup %7424  ;;  %v1490_v26 = vsub.f32 %v8370_v3, %v1452_v30  ;;  %1535 = vadd.xlane.f32.xlu0 %v1534_v21 }
 0x3b2   : > { %v1455_v31 = vpop.xlane.xlu1 %1454  ;;  %v1537_v36 = vsel %vm1437_vm2, %v8426_v49, 0.0 }
 0x3b3   : > { %v1510_v14 = vmul.f32 1.442695, %v1490_v26  ;;  %v1491_v57 = vsub.f32 %v8374_v51, %v1455_v31  ;;  %1538 = vadd.xlane.f32.xlu1 %v1537_v36 }
 0x3b5   : > { %7430 = vpow2.f32 %v1510_v14  ;;  %v1512_v35 = vmul.f32 1.442695, %v1491_v57 }
 0x3b7   : > { %v8432_v39 = vpop.eup %7426  ;;  %7432 = vpow2.f32 %v1512_v35 }
 0x3b8   : > { %v1458_v42 = vpop.xlane.xlu0 %1457  ;;  %v1540_v47 = vsel %vm1437_vm2, %v8432_v39, 0.0 }
 0x3b9   : > { %v8436_v50 = vpop.eup %7428  ;;  %v1492_v3 = vsub.f32 %v8378_v53, %v1458_v42  ;;  %1541 = vadd.xlane.f32.xlu0 %v1540_v47 }
 0x3ba   : > { %v1461_v25 = vpop.xlane.xlu1 %1460  ;;  %v1543_v11 = vsel %vm1437_vm2, %v8436_v50, 0.0 }
 0x3bb   : > { %v1514_v51 = vmul.f32 1.442695, %v1492_v3  ;;  %v1493_v54 = vsub.f32 %v8382_v59, %v1461_v25  ;;  %1544 = vadd.xlane.f32.xlu1 %v1543_v11 }
 0x3bd   : > { %7434 = vpow2.f32 %v1514_v51  ;;  %v1516_v55 = vmul.f32 1.442695, %v1493_v54 }
 0x3bf   : > { %v8442_v60 = vpop.eup %7430  ;;  %7436 = vpow2.f32 %v1516_v55 }
 0x3c0   : > { %v1464_v27 = vpop.xlane.xlu0 %1463  ;;  %v1546_v62 = vsel %vm1437_vm2, %v8442_v60, 0.0 }
 0x3c1   : > { %v8446_v15 = vpop.eup %7432  ;;  %v1494_v53 = vsub.f32 %v8386_v61, %v1464_v27  ;;  %1547 = vadd.xlane.f32.xlu0 %v1546_v62 }
 0x3c2   : > { %v1467_v2 = vpop.xlane.xlu1 %1466  ;;  %v1549_v5 = vsel %vm1437_vm2, %v8446_v15, 0.0 }
 0x3c3   : > { %v1518_v59 = vmul.f32 1.442695, %v1494_v53  ;;  %v1495_v8 = vsub.f32 %v8390_v0, %v1467_v2  ;;  %1550 = vadd.xlane.f32.xlu1 %v1549_v5 }
 0x3c5   : > { %7438 = vpow2.f32 %v1518_v59  ;;  %v1520_v10 = vmul.f32 1.442695, %v1495_v8 }
 0x3c7   : > { %v8452_v30 = vpop.eup %7434  ;;  %7440 = vpow2.f32 %v1520_v10 }
 0x3c8   : > { %v1470_v21 = vpop.xlane.xlu0 %1469  ;;  %v1552_v26 = vsel %vm1437_vm2, %v8452_v30, 0.0 }
 0x3c9   : > { %v8456_v31 = vpop.eup %7436  ;;  %v1496_v61 = vsub.f32 %v8394_v40, %v1470_v21  ;;  %1553 = vadd.xlane.f32.xlu0 %v1552_v26 }
 0x3ca   : > { %v1473_v36 = vpop.xlane.xlu1 %1472  ;;  %v1555_v14 = vsel %vm1437_vm2, %v8456_v31, 0.0 }
 0x3cb   : > { %v1522_v0 = vmul.f32 1.442695, %v1496_v61  ;;  %v1497_v57 = vsub.f32 %v8398_v18, %v1473_v36  ;;  %1556 = vadd.xlane.f32.xlu1 %v1555_v14 }
 0x3cd   : > { %7442 = vpow2.f32 %v1522_v0  ;;  %v1524_v35 = vmul.f32 1.442695, %v1497_v57 }
 0x3cf   : > { %v8462_v42 = vpop.eup %7438  ;;  %7444 = vpow2.f32 %v1524_v35 }
 0x3d0   : > { %v1476_v47 = vpop.xlane.xlu0 %1475  ;;  %v1558_v3 = vsel %vm1437_vm2, %v8462_v42, 0.0 }
 0x3d1   : > { %v8466_v25 = vpop.eup %7440  ;;  %v1498_v40 = vsub.f32 %v8402_v23, %v1476_v47  ;;  %1559 = vadd.xlane.f32.xlu0 %v1558_v3 }
 0x3d2   : > { %v1479_v11 = vpop.xlane.xlu1 %1478  ;;  %v1561_v51 = vsel %vm1437_vm2, %v8466_v25, 0.0 }
 0x3d3   : > { %v1526_v18 = vmul.f32 1.442695, %v1498_v40  ;;  %v1499_v54 = vsub.f32 %v8406_v34, %v1479_v11  ;;  %1562 = vadd.xlane.f32.xlu1 %v1561_v51 }
 0x3d5   : > { %7446 = vpow2.f32 %v1526_v18  ;;  %v1528_v55 = vmul.f32 1.442695, %v1499_v54 }
 0x3d7   : > { %v8472_v27 = vpop.eup %7442  ;;  %7448 = vpow2.f32 %v1528_v55 }
 0x3d8   : > { %v1482_v62 = vpop.xlane.xlu0 %1481  ;;  %v1564_v53 = vsel %vm1437_vm2, %v8472_v27, 0.0 }
 0x3d9   : > { %v8476_v2 = vpop.eup %7444  ;;  %v1500_v23 = vsub.f32 %v8410_v37, %v1482_v62  ;;  %1565 = vadd.xlane.f32.xlu0 %v1564_v53 }
 0x3da   : > { %v1567_v5 = vsel %vm1437_vm2, %v8476_v2, 0.0  ;;  %v1485_v61 = vpop.xlane.xlu1 %1484 }
 0x3db   : > { %v1530_v59 = vmul.f32 1.442695, %v1500_v23  ;;  %1568 = vadd.xlane.f32.xlu1 %v1567_v5  ;;  %v1501_v36 = vsub.f32 %v8414_v43, %v1485_v61 }
 0x3dd   : > { %7450 = vpow2.f32 %v1530_v59  ;;  %v1532_v14 = vmul.f32 1.442695, %v1501_v36 }
 0x3df   : > { %v8481_v34 = vpop.eup %7446  ;;  %7452 = vpow2.f32 %v1532_v14 }
 0x3e0   : > { %v1570_v8 = vsel %vm1437_vm2, %v8481_v34, 0.0 }
 0x3e1   : > { %v8485_v10 = vpop.eup %7448  ;;  %1571 = vadd.xlane.f32.xlu0 %v1570_v8 }
 0x3e2   : > { %v1573_v21 = vsel %vm1437_vm2, %v8485_v10, 0.0 }
 0x3e3   : > { %1574 = vadd.xlane.f32.xlu1 %v1573_v21 }
 0x3e7   : > { %v8489_v37 = vpop.eup %7450 }
 0x3e8   : > { %v1576_v26 = vsel %vm1437_vm2, %v8489_v37, 0.0 }
 0x3e9   : > { %1577 = vadd.xlane.f32.xlu0 %v1576_v26  ;;  %v8512_v0 = vpop.eup %7452 }
 0x3ea   : > { %v1579_v43 = vsel %vm1437_vm2, %v8512_v0, 0.0 }
 0x3f4   : > { %2031 = vrot.lane.b32.xlu1 %v8259_v20, %s7857_s20 }
 0x3f8   : > { %1975 = vrot.lane.b32.xlu1 %v8246_v33, %s7857_s20 }
 0x3ff   : > { %1978 = vrot.lane.b32.xlu0 %v8248_v1, %s7857_s20 }
 0x403   : > { %2028 = vrot.lane.b32.xlu0 %v8257_v41, %s7857_s20 }
 0x407   : > { %2081 = vrot.lane.b32.xlu0 %v8272_v24, %s7857_s20 }
 0x40b   : > { %2134 = vrot.lane.b32.xlu0 %v8287_v44, %s7857_s20 }
 0x40f   : > { %2187 = vrot.lane.b32.xlu0 %v8302_v58, %s7857_s20 }
 0x413   : > { %2240 = vrot.lane.b32.xlu0 %v8313_v22, %s7857_s20 }
 0x417   : > { %2293 = vrot.lane.b32.xlu0 %v8324_v6, %s7857_s20 }
 0x41c   : > { %1580 = vadd.xlane.f32.xlu1 %v1579_v43 }
 0x42d   : > { %2084 = vrot.lane.b32.xlu1 %v8274_v56, %s7857_s20 }
 0x431   : > { %2137 = vrot.lane.b32.xlu1 %v8289_v45, %s7857_s20 }
 0x435   : > { %2190 = vrot.lane.b32.xlu1 %v8304_v17, %s7857_s20 }
 0x439   : > { %2243 = vrot.lane.b32.xlu1 %v8315_v63, %s7857_s20 }
 0x43d   : > { %2296 = vrot.lane.b32.xlu1 %v8326_v16, %s7857_s20 }
 0x43e   : > { %v1536_v57 = vpop.xlane.xlu0 %1535 }
 0x43f   : > { %7454 = vrcp.f32 %v1536_v57 }
 0x440   : > { %v1539_v35 = vpop.xlane.xlu1 %1538 }
 0x441   : > { %7456 = vrcp.f32 %v1539_v35  ;;  %2349 = vrot.lane.b32.xlu1 %v8337_v12, %s7857_s20 }
 0x445   : > { %2346 = vrot.lane.b32.xlu1 %v8335_v48, %s7857_s20 }
 0x446   : > { %v1542_v47 = vpop.xlane.xlu0 %1541 }
 0x447   : > { %7458 = vrcp.f32 %v1542_v47 }
 0x448   : > { %v1545_v3 = vpop.xlane.xlu1 %1544 }
 0x449   : > { %v7455_v40 = vpop.eup %7454  ;;  %7460 = vrcp.f32 %v1545_v3 }
 0x44a   : > { %v1598_v51 = vmul.f32 %v7455_v40, %v8422_v19 }
 0x44b   : > { %v7457_v11 = vpop.eup %7456 }
 0x44c   : > { %v1599_v18 = vmul.f32 %v7457_v11, %v8426_v49 }
 0x44e   : > { %v1548_v54 = vpop.xlane.xlu0 %1547  ;;  %v1614_v55 = vpack.c.bf16 %v1599_v18, %v1598_v51 }
 0x44f   : > { %7462 = vrcp.f32 %v1548_v54 }
 0x450   : > { %6762 = vmatmul.mubr.msk.bf16.vlgmr.msra.gmra.mrb[40].mxu0 %vm1437_vm2, %v1614_v55  ;;  %v1551_v62 = vpop.xlane.xlu1 %1550 }
 0x451   : > { %v7459_v53 = vpop.eup %7458  ;;  %6772 = vmatpush3.bf16.msra.mxu0 %v8269_v29  ;;  %7464 = vrcp.f32 %v1551_v62  ;;  %6773 = vmatprep.mubr.msk.bf16.mxu0 %vm7856_vm0, %v10201_v28 }
 0x452   : > { %6783 = vmatprep.subr.bf16.mxu0 %v10201_v28  ;;  %v1600_v19 = vmul.f32 %v7459_v53, %v8432_v39 }
 0x453   : > { %v7461_v23 = vpop.eup %7460 }
 0x454   : > { %v1601_v49 = vmul.f32 %v7461_v23, %v8436_v50 }
 0x456   : > { %v1554_v5 = vpop.xlane.xlu0 %1553  ;;  %v1615_v59 = vpack.c.bf16 %v1601_v49, %v1600_v19 }
 0x457   : > { %7466 = vrcp.f32 %v1554_v5 }
 0x458   : > { %6768 = vmatmul.mubr.msk.bf16.vlgmr.msra.gmra.mrb[40].mxu1 %vm1437_vm2, %v1615_v59  ;;  %v1557_v8 = vpop.xlane.xlu1 %1556 }
 0x459   : > { %v7463_v21 = vpop.eup %7462  ;;  %6778 = vmatpush3.bf16.msra.mxu1 %v8265_v13  ;;  %7468 = vrcp.f32 %v1557_v8  ;;  %6779 = vmatprep.mubr.msk.bf16.mxu1 %vm7856_vm0, %v10201_v28 }
 0x45a   : > { %6789 = vmatprep.subr.bf16.mxu1 %v10201_v28  ;;  %v1602_v39 = vmul.f32 %v7463_v21, %v8442_v60 }
 0x45b   : > { %v7465_v26 = vpop.eup %7464 }
 0x45c   : > { %v1603_v50 = vmul.f32 %v7465_v26, %v8446_v15 }
 0x45e   : > { %v1560_v61 = vpop.xlane.xlu0 %1559  ;;  %v1616_v36 = vpack.c.bf16 %v1603_v50, %v1602_v39 }
 0x45f   : > { %7470 = vrcp.f32 %v1560_v61 }
 0x460   : > { %6774 = vmatmul.mubr.msk.bf16.vlgmr.msra.gmra.mrb[44].mxu0 %vm1437_vm2, %v1616_v36  ;;  %v1563_v14 = vpop.xlane.xlu1 %1562 }
 0x461   : > { %v7467_v43 = vpop.eup %7466  ;;  %6784 = vmatpush3.bf16.msra.mxu0 %v8284_v32  ;;  %7472 = vrcp.f32 %v1563_v14  ;;  %6785 = vmatprep.mubr.msk.bf16.mxu0 %vm7856_vm0, %v10201_v28 }
 0x462   : > { %6795 = vmatprep.subr.bf16.mxu0 %v10201_v28  ;;  %v1604_v60 = vmul.f32 %v7467_v43, %v8452_v30 }
 0x463   : > { %v7469_v57 = vpop.eup %7468 }
 0x464   : > { %v1605_v15 = vmul.f32 %v7469_v57, %v8456_v31 }
 0x466   : > { %v1566_v35 = vpop.xlane.xlu0 %1565  ;;  %v1617_v47 = vpack.c.bf16 %v1605_v15, %v1604_v60 }
 0x467   : > { %7474 = vrcp.f32 %v1566_v35 }
 0x468   : > { %6780 = vmatmul.mubr.msk.bf16.vlgmr.msra.gmra.mrb[44].mxu1 %vm1437_vm2, %v1617_v47  ;;  %v1569_v3 = vpop.xlane.xlu1 %1568 }
 0x469   : > { %v7471_v40 = vpop.eup %7470  ;;  %6790 = vmatpush3.bf16.msra.mxu1 %v8280_v38  ;;  %7476 = vrcp.f32 %v1569_v3  ;;  %6791 = vmatprep.mubr.msk.bf16.mxu1 %vm7856_vm0, %v10201_v28 }
 0x46a   : > { %6801 = vmatprep.subr.bf16.mxu1 %v10201_v28  ;;  %v1606_v30 = vmul.f32 %v7471_v40, %v8462_v42 }
 0x46b   : > { %v7473_v11 = vpop.eup %7472 }
 0x46c   : > { %v1607_v31 = vmul.f32 %v7473_v11, %v8466_v25 }
 0x46e   : > { %v1572_v51 = vpop.xlane.xlu0 %1571  ;;  %v1618_v18 = vpack.c.bf16 %v1607_v31, %v1606_v30 }
 0x46f   : > { %7478 = vrcp.f32 %v1572_v51 }
 0x470   : > { %6786 = vmatmul.mubr.msk.bf16.vlgmr.msra.gmra.mrb[48].mxu0 %vm1437_vm2, %v1618_v18  ;;  %v1575_v54 = vpop.xlane.xlu1 %1574 }
 0x471   : > { %v7475_v55 = vpop.eup %7474  ;;  %6796 = vmatpush3.bf16.msra.mxu0 %v8299_v52  ;;  %7480 = vrcp.f32 %v1575_v54  ;;  %6797 = vmatprep.mubr.msk.bf16.mxu0 %vm7856_vm0, %v10201_v28 }
 0x472   : > { %6807 = vmatprep.subr.bf16.mxu0 %v10201_v28  ;;  %v1608_v42 = vmul.f32 %v7475_v55, %v8472_v27 }
 0x473   : > { %v7477_v62 = vpop.eup %7476 }
 0x474   : > { %v1609_v25 = vmul.f32 %v7477_v62, %v8476_v2  ;;  %v2032_v21 = vpop.permute.xlu1 %2031 }
 0x475   : > { %v2037_v40 = vsel %vm1060_vm1, %v2032_v21, 0 }
 0x476   : > { %v1619_v53 = vpack.c.bf16 %v1609_v25, %v1608_v42  ;;  %v1578_v23 = vpop.xlane.xlu0 %1577 }
 0x477   : > { %7482 = vrcp.f32 %v1578_v23 }
 0x478   : > { %6792 = vmatmul.mubr.msk.bf16.vlgmr.msra.gmra.mrb[48].mxu1 %vm1437_vm2, %v1619_v53  ;;  %v1976_v26 = vpop.permute.xlu1 %1975 }
 0x479   : > { %v7479_v19 = vpop.eup %7478  ;;  %6802 = vmatpush3.bf16.msra.mxu1 %v8295_v4  ;;  %6803 = vmatprep.mubr.msk.bf16.mxu1 %vm7856_vm0, %v10201_v28 }
 0x47a   : > { %6813 = vmatprep.subr.bf16.mxu1 %v10201_v28  ;;  %v1610_v5 = vmul.f32 %v7479_v19, %v8481_v34  ;;  %v1979_v27 = vpop.permute.xlu0 %1978 }
 0x47b   : > { %v7481_v49 = vpop.eup %7480  ;;  %v1984_v2 = vsel %vm1060_vm1, %v1979_v27, 0 }
 0x47c   : > { %v1611_v59 = vmul.f32 %v7481_v49, %v8485_v10 }
 0x47e   : > { %v1620_v8 = vpack.c.bf16 %v1611_v59, %v1610_v5  ;;  %v2029_v34 = vpop.permute.xlu0 %2028 }
 0x480   : > { %6798 = vmatmul.mubr.msk.bf16.vlgmr.msra.gmra.mrb[52].mxu0 %vm1437_vm2, %v1620_v8 }
 0x481   : > { %6808 = vmatpush3.bf16.xpose.msra.mxu0 %v1984_v2  ;;  %6809 = vmatprep.mubr.msk.bf16.mxu0 %vm7856_vm0, %v10201_v28  ;;  %v7483_v14 = vpop.eup %7482 }
 0x482   : > { %6819 = vmatprep.subr.bf16.mxu0 %v10201_v28  ;;  %v2082_v39 = vpop.permute.xlu0 %2081  ;;  %v1612_v60 = vmul.f32 %v7483_v14, %v8489_v37 }
 0x486   : > { %v2135_v43 = vpop.permute.xlu0 %2134 }
 0x488   : > { %6810 = vmatmul.mubr.msk.bf16.vlgmr.msra.gmra.mrb[56].mxu0 %vm1060_vm1, %v1976_v26 }
 0x489   : > { %6821 = vmatprep.mubr.msk.bf16.mxu0 %vm7856_vm0, %v10201_v28 }
 0x48a   : > { %v2188_v11 = vpop.permute.xlu0 %2187 }
 0x48e   : > { %v2241_v31 = vpop.permute.xlu0 %2240 }
 0x492   : > { %v2294_v18 = vpop.permute.xlu0 %2293 }
 0x4a9   : > { %v1581_v10 = vpop.xlane.xlu1 %1580 }
 0x4aa   : > { %7484 = vrcp.f32 %v1581_v10 }
 0x4ad   : > { %v2085_v50 = vpop.permute.xlu1 %2084 }
 0x4ae   : > { %v2090_v61 = vsel %vm1060_vm1, %v2085_v50, 0 }
 0x4af   : > { %6820 = vmatpush3.bf16.xpose.msra.mxu0 %v2090_v61 }
 0x4b0   : > { %6831 = vmatprep.subr.bf16.mxu0 %v10201_v28 }
 0x4b1   : > { %v2138_v36 = vpop.permute.xlu1 %2137 }
 0x4b2   : > { %v2143_v51 = vsel %vm1060_vm1, %v2138_v36, 0 }
 0x4b4   : > { %v7485_v57 = vpop.eup %7484 }
 0x4b5   : > { %v1613_v15 = vmul.f32 %v7485_v57, %v8512_v0  ;;  %v2191_v35 = vpop.permute.xlu1 %2190 }
 0x4b6   : > { %v2196_v47 = vsel %vm1060_vm1, %v2191_v35, 0  ;;  %6822 = vmatmul.mubr.msk.bf16.vlgmr.msra.gmra.mrb[60].mxu0 %vm1060_vm1, %v2082_v39 }
 0x4b7   : > { %6832 = vmatpush3.bf16.xpose.msra.mxu0 %v2196_v47  ;;  %v1621_v3 = vpack.c.bf16 %v1613_v15, %v1612_v60  ;;  %6833 = vmatprep.mubr.msk.bf16.mxu0 %vm7856_vm0, %v10201_v28 }
 0x4b8   : > { %6843 = vmatprep.subr.bf16.mxu0 %v10201_v28 }
 0x4b9   : > { %6804 = vmatmul.mubr.msk.bf16.vlgmr.msra.gmra.mrb[52].mxu1 %vm1437_vm2, %v1621_v3  ;;  %v2244_v37 = vpop.permute.xlu1 %2243 }
 0x4ba   : > { %6814 = vmatpush3.bf16.xpose.msra.mxu1 %v2037_v40  ;;  %6815 = vmatprep.mubr.msk.bf16.mxu1 %vm7856_vm0, %v10201_v28  ;;  %v2249_v54 = vsel %vm1060_vm1, %v2244_v37, 0 }
 0x4bb   : > { %6825 = vmatprep.subr.bf16.mxu1 %v10201_v28 }
 0x4bd   : > { %v2297_v0 = vpop.permute.xlu1 %2296 }
 0x4be   : > { %v2302_v30 = vsel %vm1060_vm1, %v2297_v0, 0  ;;  %6834 = vmatmul.mubr.msk.bf16.vlgmr.msra.gmra.mrb[64].mxu0 %vm1060_vm1, %v2188_v11 }
 0x4bf   : > { %6844 = vmatpush3.bf16.xpose.msra.mxu0 %v2302_v30  ;;  %6845 = vmatprep.mubr.msk.bf16.mxu0 %vm7856_vm0, %v10201_v28 }
 0x4c0   : > { %6855 = vmatprep.subr.bf16.mxu0 %v10201_v28 }
 0x4c1   : > { %6816 = vmatmul.mubr.msk.bf16.vlgmr.msra.gmra.mrb[56].mxu1 %vm1060_vm1, %v2029_v34  ;;  %v2350_v55 = vpop.permute.xlu1 %2349 }
 0x4c2   : > { %6826 = vmatpush3.bf16.xpose.msra.mxu1 %v2143_v51  ;;  %6827 = vmatprep.mubr.msk.bf16.mxu1 %vm7856_vm0, %v10201_v28  ;;  %v2355_v62 = vsel %vm1060_vm1, %v2350_v55, 0 }
 0x4c3   : > { %6837 = vmatprep.subr.bf16.mxu1 %v10201_v28 }
 0x4c5   : > { %v2347_v42 = vpop.permute.xlu1 %2346 }
 0x4c6   : > { %6846 = vmatmul.mubr.msk.bf16.vlgmr.msra.gmra.mrb[68].mxu0 %vm1060_vm1, %v2294_v18 }
 0x4c7   : > { %6857 = vmatprep.mubr.msk.bf16.mxu0 %vm7856_vm0, %v10201_v28 }
 0x4c9   : > { %6828 = vmatmul.mubr.msk.bf16.vlgmr.msra.gmra.mrb[60].mxu1 %vm1060_vm1, %v2135_v43 }
 0x4ca   : > { %6838 = vmatpush3.bf16.xpose.msra.mxu1 %v2249_v54  ;;  %6839 = vmatprep.mubr.msk.bf16.mxu1 %vm7856_vm0, %v10201_v28 }
 0x4cb   : > { %6849 = vmatprep.subr.bf16.mxu1 %v10201_v28 }
 0x4d1   : > { %6840 = vmatmul.mubr.msk.bf16.vlgmr.msra.gmra.mrb[64].mxu1 %vm1060_vm1, %v2241_v31 }
 0x4d2   : > { %6850 = vmatpush3.bf16.xpose.msra.mxu1 %v2355_v62  ;;  %6851 = vmatprep.mubr.msk.bf16.mxu1 %vm7856_vm0, %v10201_v28 }
 0x4d3   : > { %6861 = vmatprep.subr.bf16.mxu1 %v10201_v28 }
 0x4d9   : > { %6852 = vmatmul.mubr.msk.bf16.vlgmr.msra.gmra.mrb[68].mxu1 %vm1060_vm1, %v2347_v42 }
 0x4da   : > { %6863 = vmatprep.mubr.msk.bf16.mxu1 %vm7856_vm0, %v10201_v28 }
 0x523   : > { %v8622_v25 = vpop.f32.mrb[40].mxu0 }
 0x524   : > { %10219 = vst [vmem:[#allocation6_spill] sm:$0xff] %v8622_v25  ;;  %v6763_v53 = vpop.f32.mrb[41].mxu0 }
 0x525   : > { %v8624_v23 = vpop.f32.mrb[42].mxu0 }
 0x526   : > { %10220 = vst [vmem:[#allocation7_spill] sm:$0xff] %v8624_v23  ;;  %v6764_v19 = vpop.f32.mrb[43].mxu0 }
 0x52b   : > { %v8626_v49 = vpop.f32.mrb[40].mxu1 }
 0x52c   : > { %10221 = vst [vmem:[#allocation8_spill] sm:$0xff] %v8626_v49  ;;  %v6769_v5 = vpop.f32.mrb[41].mxu1 }
 0x52d   : > { %v8628_v59 = vpop.f32.mrb[42].mxu1 }
 0x52e   : > { %10222 = vst [vmem:[#allocation9_spill] sm:$0xff] %v8628_v59  ;;  %v6770_v27 = vpop.f32.mrb[43].mxu1 }
 0x533   : > { %v8630_v8 = vpop.f32.mrb[44].mxu0 }
 0x534   : > { %10223 = vst [vmem:[#allocation10_spill] sm:$0xff] %v8630_v8  ;;  %v6775_v2 = vpop.f32.mrb[45].mxu0 }
 0x535   : > { %v8632_v21 = vpop.f32.mrb[46].mxu0 }
 0x536   : > { %10224 = vst [vmem:[#allocation11_spill] sm:$0xff] %v8632_v21  ;;  %v6776_v26 = vpop.f32.mrb[47].mxu0 }
 0x53b   : > { %v8634_v34 = vpop.f32.mrb[44].mxu1 }
 0x53c   : > { %10225 = vst [vmem:[#allocation12_spill] sm:$0xff] %v8634_v34  ;;  %v6781_v10 = vpop.f32.mrb[45].mxu1 }
 0x53d   : > { %v8636_v39 = vpop.f32.mrb[46].mxu1 }
 0x53e   : > { %10226 = vst [vmem:[#allocation13_spill] sm:$0xff] %v8636_v39  ;;  %v6782_v50 = vpop.f32.mrb[47].mxu1 }
 0x543   : > { %v8638_v61 = vpop.f32.mrb[48].mxu0 }
 0x544   : > { %10227 = vst [vmem:[#allocation14_spill] sm:$0xff] %v8638_v61  ;;  %v6787_v36 = vpop.f32.mrb[49].mxu0 }
 0x545   : > { %v8640_v14 = vpop.f32.mrb[50].mxu0 }
 0x546   : > { %10228 = vst [vmem:[#allocation15_spill] sm:$0xff] %v8640_v14  ;;  %v6788_v43 = vpop.f32.mrb[51].mxu0 }
 0x54b   : > { %v8642_v57 = vpop.f32.mrb[48].mxu1 }
 0x54c   : > { %10229 = vst [vmem:[#allocation16_spill] sm:$0xff] %v8642_v57  ;;  %v6793_v60 = vpop.f32.mrb[49].mxu1 }
 0x54d   : > { %v8644_v15 = vpop.f32.mrb[50].mxu1 }
 0x54e   : > { %10230 = vst [vmem:[#allocation17_spill] sm:$0xff] %v8644_v15  ;;  %v6794_v35 = vpop.f32.mrb[51].mxu1 }
 0x553   : > { %v8646_v47 = vpop.f32.mrb[52].mxu0 }
 0x554   : > { %10231 = vst [vmem:[#allocation18_spill] sm:$0xff] %v8646_v47  ;;  %v6799_v3 = vpop.f32.mrb[53].mxu0 }
 0x555   : > { %v8648_v40 = vpop.f32.mrb[54].mxu0 }
 0x556   : > { %10232 = vst [vmem:[#allocation19_spill] sm:$0xff] %v8648_v40  ;;  %v6800_v11 = vpop.f32.mrb[55].mxu0 }
 0x55b   : > { %v8650_v37 = vpop.f32.mrb[56].mxu0 }
 0x55c   : > { %v6811_v0 = vpop.f32.mrb[57].mxu0  ;;  %v2398_v30 = vsel %vm1437_vm2, %v8650_v37, -inf }
 0x55d   : > { %2399 = vmax.xlane.f32.xlu0 %v2398_v30  ;;  %v8654_v31 = vpop.f32.mrb[58].mxu0 }
 0x55e   : > { %v6812_v51 = vpop.f32.mrb[59].mxu0  ;;  %v2401_v18 = vsel %vm1437_vm2, %v8654_v31, -inf }
 0x55f   : > { %2402 = vmax.xlane.f32.xlu1 %v2401_v18 }
 0x570   : > { %2631 = vrot.lane.b32.xlu1 %v8252_v7, %s7857_s20 }
 0x574   : > { %2679 = vrot.lane.b32.xlu1 %v8269_v29, %s7857_s20 }
 0x578   : > { %2727 = vrot.lane.b32.xlu1 %v8265_v13, %s7857_s20 }
 0x589   : > { %v8664_v54 = vpop.f32.mrb[60].mxu0 }
 0x58a   : > { %v6823_v55 = vpop.f32.mrb[61].mxu0  ;;  %v2410_v0 = vsel %vm1437_vm2, %v8664_v54, -inf }
 0x58b   : > { %v8666_v62 = vpop.f32.mrb[62].mxu0 }
 0x58c   : > { %v8668_v42 = vpop.f32.mrb[52].mxu1  ;;  %v6824_v53 = vpop.f32.mrb[63].mxu0  ;;  %v2413_v18 = vsel %vm1437_vm2, %v8666_v62, -inf }
 0x58d   : > { %10233 = vst [vmem:[#allocation20_spill] sm:$0xff] %v8668_v42  ;;  %v6805_v19 = vpop.f32.mrb[53].mxu1 }
 0x58e   : > { %v8670_v5 = vpop.f32.mrb[54].mxu1 }
 0x58f   : > { %10234 = vst [vmem:[#allocation21_spill] sm:$0xff] %v8670_v5  ;;  %v6806_v27 = vpop.f32.mrb[55].mxu1 }
 0x591   : > { %v8672_v2 = vpop.f32.mrb[64].mxu0 }
 0x592   : > { %v6835_v26 = vpop.f32.mrb[65].mxu0 }
 0x593   : > { %v8674_v10 = vpop.f32.mrb[66].mxu0 }
 0x594   : > { %v8676_v50 = vpop.f32.mrb[56].mxu1  ;;  %v6836_v36 = vpop.f32.mrb[67].mxu0 }
 0x595   : > { %v6817_v43 = vpop.f32.mrb[57].mxu1  ;;  %v2404_v60 = vsel %vm1437_vm2, %v8676_v50, -inf }
 0x596   : > { %2405 = vmax.xlane.f32.xlu0 %v2404_v60  ;;  %v8680_v35 = vpop.f32.mrb[58].mxu1  ;;  %v2425_v60 = vsel %vm1437_vm2, %v8674_v10, -inf }
 0x597   : > { %v6818_v3 = vpop.f32.mrb[59].mxu1  ;;  %v2407_v27 = vsel %vm1437_vm2, %v8680_v35, -inf }
 0x599   : > { %v8682_v11 = vpop.f32.mrb[68].mxu0 }
 0x59a   : > { %v6847_v30 = vpop.f32.mrb[69].mxu0  ;;  %2411 = vmax.xlane.f32.xlu0 %v2410_v0 }
 0x59b   : > { %v8686_v51 = vpop.f32.mrb[70].mxu0 }
 0x59c   : > { %2414 = vmax.xlane.f32.xlu1 %v2413_v18  ;;  %v8690_v55 = vpop.f32.mrb[60].mxu1  ;;  %v6848_v53 = vpop.f32.mrb[71].mxu0 }
 0x59d   : > { %v6829_v19 = vpop.f32.mrb[61].mxu1 }
 0x59e   : > { %2408 = vmax.xlane.f32.xlu0 %v2407_v27  ;;  %v8694_v26 = vpop.f32.mrb[62].mxu1  ;;  %v2437_v19 = vsel %vm1437_vm2, %v8686_v51, -inf }
 0x59f   : > { %v6830_v36 = vpop.f32.mrb[63].mxu1  ;;  %v2419_v43 = vsel %vm1437_vm2, %v8694_v26, -inf }
 0x5a0   : > { %2420 = vmax.xlane.f32.xlu1 %v2419_v43 }
 0x5a4   : > { %2426 = vmax.xlane.f32.xlu1 %v2425_v60  ;;  %v8700_v3 = vpop.f32.mrb[64].mxu1 }
 0x5a5   : > { %v6841_v0 = vpop.f32.mrb[65].mxu1 }
 0x5a6   : > { %v8702_v30 = vpop.f32.mrb[66].mxu1  ;;  %v2416_v0 = vsel %vm1437_vm2, %v8690_v55, -inf }
 0x5a7   : > { %v6842_v18 = vpop.f32.mrb[67].mxu1  ;;  %v2431_v53 = vsel %vm1437_vm2, %v8702_v30, -inf }
 0x5a8   : > { %2432 = vmax.xlane.f32.xlu1 %v2431_v53  ;;  %v2422_v18 = vsel %vm1437_vm2, %v8672_v2, -inf  ;;  %v2428_v53 = vsel %vm1437_vm2, %v8700_v3, -inf }
 0x5ac   : > { %2438 = vmax.xlane.f32.xlu1 %v2437_v19  ;;  %v8708_v27 = vpop.f32.mrb[68].mxu1  ;;  %v2434_v19 = vsel %vm1437_vm2, %v8682_v11, -inf }
 0x5ad   : > { %v6853_v36 = vpop.f32.mrb[69].mxu1 }
 0x5ae   : > { %v8710_v43 = vpop.f32.mrb[70].mxu1 }
 0x5af   : > { %v6854_v60 = vpop.f32.mrb[71].mxu1  ;;  %v2443_v36 = vsel %vm1437_vm2, %v8710_v43, -inf }
 0x5b0   : > { %v2440_v60 = vsel %vm1437_vm2, %v8708_v27, -inf }
 0x5b4   : > { %2583 = vrot.lane.b32.xlu0 %v8254_v9, %s7857_s20 }
 0x5bd   : > { %2823 = vrot.lane.b32.xlu1 %v8280_v38, %s7857_s20 }
 0x5d3   : > { %2417 = vmax.xlane.f32.xlu0 %v2416_v0 }
 0x5d7   : > { %2423 = vmax.xlane.f32.xlu0 %v2422_v18 }
 0x5db   : > { %2429 = vmax.xlane.f32.xlu0 %v2428_v53 }
 0x5df   : > { %2435 = vmax.xlane.f32.xlu0 %v2434_v19 }
 0x5e1   : > { %2444 = vmax.xlane.f32.xlu1 %v2443_v36 }
 0x5e3   : > { %2441 = vmax.xlane.f32.xlu0 %v2440_v60 }
 0x5ea   : > { %v2400_v53 = vpop.xlane.xlu0 %2399 }
 0x5eb   : > { %v2446_v36 = vsub.f32 %v8650_v37, %v2400_v53 }
 0x5ec   : > { %v2403_v0 = vpop.xlane.xlu1 %2402 }
 0x5ed   : > { %v2447_v18 = vsub.f32 %v8654_v31, %v2403_v0  ;;  %v2462_v60 = vmul.f32 1.442695, %v2446_v36 }
 0x5ef   : > { %v2464_v19 = vmul.f32 1.442695, %v2447_v18 }
 0x5f0   : > { %v2632_v46 = vpop.permute.xlu1 %2631 }
 0x5f1   : > { %6862 = vmatpush3.bf16.msra.mxu1 %v2632_v46  ;;  %7486 = vpow2.f32 %v2464_v19 }
 0x5f2   : > { %2919 = vrot.lane.b32.xlu1 %v8295_v4, %s7857_s20  ;;  %6873 = vmatprep.subr.bf16.mxu1 %v10201_v28  ;;  %7488 = vpow2.f32 %v2462_v60 }
 0x5f4   : > { %v8745_v31 = vpop.permute.xlu1 %2679 }
 0x5f8   : > { %v8748_v18 = vpop.permute.xlu1 %2727 }
 0x5f9   : > { %2775 = vrot.lane.b32.xlu0 %v8284_v32, %s7857_s20 }
 0x5fb   : > { %v8737_v46 = vpop.eup %7486 }
 0x5fc   : > { %v2497_v28 = vsel %vm1437_vm2, %v8737_v46, 0.0  ;;  %v8741_v42 = vpop.eup %7488 }
 0x5fd   : > { %2871 = vrot.lane.b32.xlu0 %v8299_v52, %s7857_s20  ;;  %v2494_v5 = vsel %vm1437_vm2, %v8741_v42, 0.0 }
 0x616   : > { %2498 = vadd.xlane.f32.xlu1 %v2497_v28 }
 0x61c   : > { %2495 = vadd.xlane.f32.xlu0 %v2494_v5 }
 0x623   : > { %v2406_v0 = vpop.xlane.xlu0 %2405 }
 0x624   : > { %v2448_v37 = vsub.f32 %v8676_v50, %v2406_v0 }
 0x626   : > { %v2466_v53 = vmul.f32 1.442695, %v2448_v37 }
 0x627   : > { %v2412_v19 = vpop.xlane.xlu0 %2411 }
 0x628   : > { %7490 = vpow2.f32 %v2466_v53  ;;  %v2450_v36 = vsub.f32 %v8664_v54, %v2412_v19  ;;  %v10235_v53 = vmov 0.0  }
 0x629   : > { %v2415_v60 = vpop.xlane.xlu1 %2414 }
 0x62a   : > { %v2470_v28 = vmul.f32 1.442695, %v2450_v36  ;;  %v2451_v57 = vsub.f32 %v8666_v62, %v2415_v60 }
 0x62b   : > { %v2409_v15 = vpop.xlane.xlu0 %2408 }
 0x62c   : > { %7492 = vpow2.f32 %v2470_v28  ;;  %v2449_v5 = vsub.f32 %v8680_v35, %v2409_v15  ;;  %v2472_v40 = vmul.f32 1.442695, %v2451_v57 }
 0x62d   : > { %v2421_v47 = vpop.xlane.xlu1 %2420 }
 0x62e   : > { %v2468_v61 = vmul.f32 1.442695, %v2449_v5  ;;  %v2453_v50 = vsub.f32 %v8694_v26, %v2421_v47 }
 0x62f   : > { %v2584_v0 = vpop.permute.xlu0 %2583 }
 0x630   : > { %7494 = vpow2.f32 %v2468_v61  ;;  %6856 = vmatpush3.bf16.msra.mxu0 %v2584_v0  ;;  %v2476_v19 = vmul.f32 1.442695, %v2453_v50 }
 0x631   : > { %v2427_v37 = vpop.xlane.xlu1 %2426  ;;  %6867 = vmatprep.subr.bf16.mxu0 %v10235_v53  ;;  %7496 = vpow2.f32 %v2472_v40 }
 0x632   : > { %v8755_v54 = vpop.eup %7490  ;;  %v2455_v62 = vsub.f32 %v8674_v10, %v2427_v37  ;;  %7498 = vpow2.f32 %v2476_v19 }
 0x633   : > { %v2500_v15 = vsel %vm1437_vm2, %v8755_v54, 0.0 }
 0x634   : > { %2501 = vadd.xlane.f32.xlu0 %v2500_v15  ;;  %v2480_v47 = vmul.f32 1.442695, %v2455_v62 }
 0x635   : > { %v2433_v57 = vpop.xlane.xlu1 %2432 }
 0x636   : > { %v8760_v35 = vpop.eup %7492  ;;  %v2457_v61 = vsub.f32 %v8702_v30, %v2433_v57  ;;  %7500 = vpow2.f32 %v2480_v47 }
 0x637   : > { %v2506_v26 = vsel %vm1437_vm2, %v8760_v35, 0.0 }
 0x638   : > { %2507 = vadd.xlane.f32.xlu0 %v2506_v26  ;;  %v2484_v10 = vmul.f32 1.442695, %v2457_v61 }
 0x639   : > { %v2439_v36 = vpop.xlane.xlu1 %2438 }
 0x63a   : > { %v8765_v40 = vpop.eup %7494  ;;  %v2459_v60 = vsub.f32 %v8686_v51, %v2439_v36  ;;  %7502 = vpow2.f32 %v2484_v10 }
 0x63b   : > { %v2503_v28 = vsel %vm1437_vm2, %v8765_v40, 0.0  ;;  %v8770_v5 = vpop.eup %7496 }
 0x63c   : > { %2504 = vadd.xlane.f32.xlu1 %v2503_v28  ;;  %v2488_v50 = vmul.f32 1.442695, %v2459_v60  ;;  %v2509_v30 = vsel %vm1437_vm2, %v8770_v5, 0.0  ;;  %v8774_v0 = vpop.eup %7498 }
 0x63d   : > { %v2515_v37 = vsel %vm1437_vm2, %v8774_v0, 0.0 }
 0x63e   : > { %7504 = vpow2.f32 %v2488_v50 }
 0x640   : > { %2510 = vadd.xlane.f32.xlu1 %v2509_v30  ;;  %v8778_v19 = vpop.eup %7500 }
 0x641   : > { %v2521_v51 = vsel %vm1437_vm2, %v8778_v19, 0.0 }
 0x644   : > { %2516 = vadd.xlane.f32.xlu1 %v2515_v37  ;;  %v8782_v62 = vpop.eup %7502  ;;  %v8795_v37 = vpop.permute.xlu1 %2823 }
 0x645   : > { %v2527_v15 = vsel %vm1437_vm2, %v8782_v62, 0.0 }
 0x648   : > { %2522 = vadd.xlane.f32.xlu1 %v2521_v51  ;;  %v8786_v57 = vpop.eup %7504 }
 0x649   : > { %v2533_v47 = vsel %vm1437_vm2, %v8786_v57, 0.0 }
 0x64c   : > { %2528 = vadd.xlane.f32.xlu1 %v2527_v15 }
 0x650   : > { %2534 = vadd.xlane.f32.xlu1 %v2533_v47 }
 0x660   : > { %v2418_v61 = vpop.xlane.xlu0 %2417 }
 0x661   : > { %v2452_v26 = vsub.f32 %v8690_v55, %v2418_v61  ;;  %3019 = vrot.lane.b32.xlu1 %v8259_v20, %s7858_s26 }
 0x663   : > { %v2474_v36 = vmul.f32 1.442695, %v2452_v26 }
 0x664   : > { %v2424_v10 = vpop.xlane.xlu0 %2423 }
 0x665   : > { %7506 = vpow2.f32 %v2474_v36  ;;  %v2454_v60 = vsub.f32 %v8672_v2, %v2424_v10 }
 0x667   : > { %v2478_v28 = vmul.f32 1.442695, %v2454_v60 }
 0x668   : > { %v2430_v50 = vpop.xlane.xlu0 %2429 }
 0x669   : > { %7508 = vpow2.f32 %v2478_v28  ;;  %v2456_v30 = vsub.f32 %v8700_v3, %v2430_v50 }
 0x66b   : > { %v2482_v51 = vmul.f32 1.442695, %v2456_v30 }
 0x66c   : > { %v2436_v15 = vpop.xlane.xlu0 %2435 }
 0x66d   : > { %7510 = vpow2.f32 %v2482_v51  ;;  %v2458_v55 = vsub.f32 %v8682_v11, %v2436_v15 }
 0x66e   : > { %v2445_v47 = vpop.xlane.xlu1 %2444 }
 0x66f   : > { %v8798_v61 = vpop.eup %7506  ;;  %v2486_v26 = vmul.f32 1.442695, %v2458_v55  ;;  %v2461_v36 = vsub.f32 %v8710_v43, %v2445_v47 }
 0x670   : > { %v2442_v14 = vpop.xlane.xlu0 %2441  ;;  %v2512_v2 = vsel %vm1437_vm2, %v8798_v61, 0.0 }
 0x671   : > { %7512 = vpow2.f32 %v2486_v26  ;;  %v2460_v3 = vsub.f32 %v8708_v27, %v2442_v14  ;;  %2513 = vadd.xlane.f32.xlu0 %v2512_v2  ;;  %v2492_v60 = vmul.f32 1.442695, %v2461_v36 }
 0x672   : > { %v8836_v26 = vpop.permute.xlu1 %2919 }
 0x673   : > { %v8804_v10 = vpop.eup %7508  ;;  %v2490_v28 = vmul.f32 1.442695, %v2460_v3 }
 0x674   : > { %v2518_v11 = vsel %vm1437_vm2, %v8804_v10, 0.0  ;;  %v2776_v47 = vpop.permute.xlu0 %2775 }
 0x675   : > { %7514 = vpow2.f32 %v2490_v28  ;;  %2519 = vadd.xlane.f32.xlu0 %v2518_v11 }
 0x676   : > { %7516 = vpow2.f32 %v2492_v60 }
 0x677   : > { %v8808_v50 = vpop.eup %7510 }
 0x678   : > { %v2524_v43 = vsel %vm1437_vm2, %v8808_v50, 0.0  ;;  %v8842_v36 = vpop.permute.xlu0 %2871 }
 0x679   : > { %2525 = vadd.xlane.f32.xlu0 %v2524_v43 }
 0x67b   : > { %v8812_v30 = vpop.eup %7512 }
 0x67c   : > { %v2530_v14 = vsel %vm1437_vm2, %v8812_v30, 0.0 }
 0x67d   : > { %2531 = vadd.xlane.f32.xlu0 %v2530_v14 }
 0x67f   : > { %v8816_v27 = vpop.eup %7514 }
 0x680   : > { %v2536_v51 = vsel %vm1437_vm2, %v8816_v27, 0.0  ;;  %v8820_v15 = vpop.eup %7516 }
 0x681   : > { %2537 = vadd.xlane.f32.xlu0 %v2536_v51  ;;  %v2539_v55 = vsel %vm1437_vm2, %v8820_v15, 0.0 }
 0x685   : > { %2540 = vadd.xlane.f32.xlu1 %v2539_v55 }
 0x696   : > { %3070 = vrot.lane.b32.xlu1 %v8274_v56, %s7858_s26 }
 0x697   : > { %2968 = vrot.lane.b32.xlu0 %v8248_v1, %s7858_s26 }
 0x69a   : > { %3121 = vrot.lane.b32.xlu1 %v8289_v45, %s7858_s26 }
 0x69b   : > { %2966 = vrot.lane.b32.xlu0 %v8246_v33, %s7858_s26 }
 0x69e   : > { %3172 = vrot.lane.b32.xlu1 %v8304_v17, %s7858_s26 }
 0x69f   : > { %3017 = vrot.lane.b32.xlu0 %v8257_v41, %s7858_s26 }
 0x6a2   : > { %3223 = vrot.lane.b32.xlu1 %v8315_v63, %s7858_s26 }
 0x6a3   : > { %3068 = vrot.lane.b32.xlu0 %v8272_v24, %s7858_s26  ;;  %v2499_v2 = vpop.xlane.xlu1 %2498 }
 0x6a4   : > { %7518 = vrcp.f32 %v2499_v2 }
 0x6a6   : > { %3274 = vrot.lane.b32.xlu1 %v8326_v16, %s7858_s26 }
 0x6a7   : > { %3119 = vrot.lane.b32.xlu0 %v8287_v44, %s7858_s26 }
 0x6a9   : > { %v2496_v3 = vpop.xlane.xlu0 %2495 }
 0x6aa   : > { %7520 = vrcp.f32 %v2496_v3  ;;  %3325 = vrot.lane.b32.xlu1 %v8337_v12, %s7858_s26 }
 0x6ab   : > { %3170 = vrot.lane.b32.xlu0 %v8302_v58, %s7858_s26 }
 0x6ae   : > { %3323 = vrot.lane.b32.xlu1 %v8335_v48, %s7858_s26  ;;  %v7519_v60 = vpop.eup %7518 }
 0x6af   : > { %3221 = vrot.lane.b32.xlu0 %v8313_v22, %s7858_s26  ;;  %v2559_v11 = vmul.f32 %v7519_v60, %v8737_v46 }
 0x6b3   : > { %3272 = vrot.lane.b32.xlu0 %v8324_v6, %s7858_s26 }
 0x6b4   : > { %v7521_v28 = vpop.eup %7520 }
 0x6b5   : > { %v2558_v43 = vmul.f32 %v7521_v28, %v8741_v42 }
 0x6b7   : > { %v2574_v14 = vpack.c.bf16 %v2559_v11, %v2558_v43 }
 0x6b9   : > { %6858 = vmatmul.mubr.msk.bf16.vlgmr.msra.gmra.mrb[72].mxu0 %vm1437_vm2, %v2574_v14 }
 0x6ba   : > { %6868 = vmatpush3.bf16.msra.mxu0 %v8745_v31  ;;  %6869 = vmatprep.mubr.msk.bf16.mxu0 %vm7856_vm0, %v10235_v53 }
 0x6bb   : > { %6879 = vmatprep.subr.bf16.mxu0 %v10235_v53 }
 0x6c1   : > { %v2502_v51 = vpop.xlane.xlu0 %2501 }
 0x6c2   : > { %7522 = vrcp.f32 %v2502_v51 }
 0x6c5   : > { %v2508_v55 = vpop.xlane.xlu0 %2507 }
 0x6c9   : > { %v2505_v2 = vpop.xlane.xlu1 %2504 }
 0x6ca   : > { %7524 = vrcp.f32 %v2505_v2 }
 0x6cb   : > { %7526 = vrcp.f32 %v2508_v55 }
 0x6cc   : > { %v7523_v46 = vpop.eup %7522 }
 0x6cd   : > { %v2511_v3 = vpop.xlane.xlu1 %2510  ;;  %v2560_v60 = vmul.f32 %v7523_v46, %v8755_v54 }
 0x6ce   : > { %7528 = vrcp.f32 %v2511_v3 }
 0x6d1   : > { %v2517_v54 = vpop.xlane.xlu1 %2516 }
 0x6d2   : > { %7530 = vrcp.f32 %v2517_v54 }
 0x6d4   : > { %v7525_v42 = vpop.eup %7524 }
 0x6d5   : > { %v2561_v28 = vmul.f32 %v7525_v42, %v8765_v40  ;;  %v7527_v31 = vpop.eup %7526 }
 0x6d6   : > { %v2562_v14 = vmul.f32 %v7527_v31, %v8760_v35  ;;  %v2523_v35 = vpop.xlane.xlu1 %2522 }
 0x6d7   : > { %v2575_v11 = vpack.c.bf16 %v2561_v28, %v2560_v60 }
 0x6d8   : > { %v7529_v43 = vpop.eup %7528 }
 0x6d9   : > { %v2563_v34 = vmul.f32 %v7529_v43, %v8770_v5  ;;  %6864 = vmatmul.mubr.msk.bf16.vlgmr.msra.gmra.mrb[72].mxu1 %vm1437_vm2, %v2575_v11 }
 0x6da   : > { %6874 = vmatpush3.bf16.msra.mxu1 %v8748_v18  ;;  %6875 = vmatprep.mubr.msk.bf16.mxu1 %vm7856_vm0, %v10235_v53  ;;  %v2529_v18 = vpop.xlane.xlu1 %2528 }
 0x6db   : > { %v2576_v51 = vpack.c.bf16 %v2563_v34, %v2562_v14  ;;  %6885 = vmatprep.subr.bf16.mxu1 %v10235_v53 }
 0x6dc   : > { %v7531_v2 = vpop.eup %7530 }
 0x6dd   : > { %6870 = vmatmul.mubr.msk.bf16.vlgmr.msra.gmra.mrb[76].mxu0 %vm1437_vm2, %v2576_v51  ;;  %v2565_v3 = vmul.f32 %v7531_v2, %v8774_v0 }
 0x6de   : > { %6880 = vmatpush3.bf16.msra.mxu0 %v2776_v47  ;;  %6881 = vmatprep.mubr.msk.bf16.mxu0 %vm7856_vm0, %v10235_v53  ;;  %v2535_v34 = vpop.xlane.xlu1 %2534 }
 0x6df   : > { %6891 = vmatprep.subr.bf16.mxu0 %v10235_v53 }
 0x6e2   : > { %v3020_v43 = vpop.permute.xlu1 %3019 }
 0x6fe   : > { %v2514_v40 = vpop.xlane.xlu0 %2513 }
 0x6ff   : > { %7532 = vrcp.f32 %v2514_v40 }
 0x700   : > { %7534 = vrcp.f32 %v2523_v35 }
 0x702   : > { %v2520_v5 = vpop.xlane.xlu0 %2519 }
 0x703   : > { %7536 = vrcp.f32 %v2520_v5 }
 0x704   : > { %7538 = vrcp.f32 %v2529_v18 }
 0x706   : > { %v2526_v55 = vpop.xlane.xlu0 %2525 }
 0x707   : > { %7540 = vrcp.f32 %v2526_v55 }
 0x708   : > { %7542 = vrcp.f32 %v2535_v34 }
 0x709   : > { %v7533_v47 = vpop.eup %7532 }
 0x70a   : > { %v2564_v46 = vmul.f32 %v7533_v47, %v8798_v61  ;;  %v2532_v42 = vpop.xlane.xlu0 %2531  ;;  %v7535_v60 = vpop.eup %7534 }
 0x70b   : > { %7544 = vrcp.f32 %v2532_v42  ;;  %v2567_v11 = vmul.f32 %v7535_v60, %v8778_v19  ;;  %v3025_v60 = vsel %vm1060_vm1, %v3020_v43, 0 }
 0x70c   : > { %v2577_v28 = vpack.c.bf16 %v2565_v3, %v2564_v46 }
 0x70d   : > { %v7537_v31 = vpop.eup %7536 }
 0x70e   : > { %v2566_v14 = vmul.f32 %v7537_v31, %v8804_v10  ;;  %v2538_v51 = vpop.xlane.xlu0 %2537  ;;  %6876 = vmatmul.mubr.msk.bf16.vlgmr.msra.gmra.mrb[76].mxu1 %vm1437_vm2, %v2577_v28  ;;  %v7539_v54 = vpop.eup %7538 }
 0x70f   : > { %6886 = vmatpush3.bf16.msra.mxu1 %v8795_v37  ;;  %6887 = vmatprep.mubr.msk.bf16.mxu1 %vm7856_vm0, %v10235_v53  ;;  %7546 = vrcp.f32 %v2538_v51  ;;  %v2569_v35 = vmul.f32 %v7539_v54, %v8782_v62 }
 0x710   : > { %v2578_v0 = vpack.c.bf16 %v2567_v11, %v2566_v14  ;;  %6897 = vmatprep.subr.bf16.mxu1 %v10235_v53 }
 0x711   : > { %v7541_v61 = vpop.eup %7540 }
 0x712   : > { %v2568_v19 = vmul.f32 %v7541_v61, %v8808_v50  ;;  %v2969_v40 = vpop.permute.xlu0 %2968  ;;  %6882 = vmatmul.mubr.msk.bf16.vlgmr.msra.gmra.mrb[80].mxu0 %vm1437_vm2, %v2578_v0  ;;  %v2541_v10 = vpop.xlane.xlu1 %2540 }
 0x713   : > { %v7543_v18 = vpop.eup %7542  ;;  %6892 = vmatpush3.bf16.msra.mxu0 %v8842_v36  ;;  %7548 = vrcp.f32 %v2541_v10  ;;  %6893 = vmatprep.mubr.msk.bf16.mxu0 %vm7856_vm0, %v10235_v53  ;;  %v2974_v47 = vsel %vm1060_vm1, %v2969_v40, 0 }
 0x714   : > { %v2579_v37 = vpack.c.bf16 %v2569_v35, %v2568_v19  ;;  %6903 = vmatprep.subr.bf16.mxu0 %v10235_v53  ;;  %v2571_v34 = vmul.f32 %v7543_v18, %v8786_v57 }
 0x715   : > { %v7545_v5 = vpop.eup %7544 }
 0x716   : > { %v2570_v62 = vmul.f32 %v7545_v5, %v8812_v30  ;;  %v2967_v50 = vpop.permute.xlu0 %2966  ;;  %6888 = vmatmul.mubr.msk.bf16.vlgmr.msra.gmra.mrb[80].mxu1 %vm1437_vm2, %v2579_v37  ;;  %v3071_v36 = vpop.permute.xlu1 %3070 }
 0x717   : > { %6898 = vmatpush3.bf16.msra.mxu1 %v8836_v26  ;;  %6899 = vmatprep.mubr.msk.bf16.mxu1 %vm7856_vm0, %v10235_v53  ;;  %v3076_v31 = vsel %vm1060_vm1, %v3071_v36, 0 }
 0x718   : > { %v2580_v55 = vpack.c.bf16 %v2571_v34, %v2570_v62  ;;  %6909 = vmatprep.subr.bf16.mxu1 %v10235_v53 }
 0x719   : > { %v7547_v2 = vpop.eup %7546 }
 0x71a   : > { %6894 = vmatmul.mubr.msk.bf16.vlgmr.msra.gmra.mrb[84].mxu0 %vm1437_vm2, %v2580_v55  ;;  %v3018_v57 = vpop.permute.xlu0 %3017  ;;  %v2572_v26 = vmul.f32 %v7547_v2, %v8816_v27  ;;  %v3122_v46 = vpop.permute.xlu1 %3121 }
 0x71b   : > { %6905 = vmatprep.mubr.msk.bf16.mxu0 %vm7856_vm0, %v10235_v53 }
 0x71c   : > { %6904 = vmatpush3.bf16.xpose.msra.mxu0 %v2974_v47 }
 0x71d   : > { %v7549_v30 = vpop.eup %7548  ;;  %6915 = vmatprep.subr.bf16.mxu0 %v10235_v53 }
 0x71e   : > { %v2573_v3 = vmul.f32 %v7549_v30, %v8820_v15  ;;  %v3069_v28 = vpop.permute.xlu0 %3068  ;;  %v3173_v11 = vpop.permute.xlu1 %3172  ;;  %v3127_v15 = vsel %vm1060_vm1, %v3122_v46, 0 }
 0x71f   : > { %v3178_v14 = vsel %vm1060_vm1, %v3173_v11, 0 }
 0x720   : > { %v2581_v42 = vpack.c.bf16 %v2573_v3, %v2572_v26 }
 0x722   : > { %6900 = vmatmul.mubr.msk.bf16.vlgmr.msra.gmra.mrb[84].mxu1 %vm1437_vm2, %v2581_v42  ;;  %v3120_v27 = vpop.permute.xlu0 %3119  ;;  %v3224_v43 = vpop.permute.xlu1 %3223 }
 0x723   : > { %6906 = vmatmul.mubr.msk.bf16.vlgmr.msra.gmra.mrb[88].mxu0 %vm1060_vm1, %v2967_v50  ;;  %6910 = vmatpush3.bf16.xpose.msra.mxu1 %v3025_v60  ;;  %v3229_v0 = vsel %vm1060_vm1, %v3224_v43, 0 }
 0x724   : > { %6916 = vmatpush3.bf16.xpose.msra.mxu0 %v3076_v31  ;;  %6911 = vmatprep.mubr.msk.bf16.mxu1 %vm7856_vm0, %v10235_v53 }
 0x725   : > { %6917 = vmatprep.mubr.msk.bf16.mxu0 %vm7856_vm0, %v10235_v53  ;;  %6921 = vmatprep.subr.bf16.mxu1 %v10235_v53 }
 0x726   : > { %6927 = vmatprep.subr.bf16.mxu0 %v10235_v53  ;;  %v3171_v51 = vpop.permute.xlu0 %3170  ;;  %v3275_v54 = vpop.permute.xlu1 %3274 }
 0x727   : > { %v3280_v61 = vsel %vm1060_vm1, %v3275_v54, 0 }
 0x72a   : > { %6912 = vmatmul.mubr.msk.bf16.vlgmr.msra.gmra.mrb[88].mxu1 %vm1060_vm1, %v3018_v57  ;;  %v3222_v35 = vpop.permute.xlu0 %3221  ;;  %v3326_v19 = vpop.permute.xlu1 %3325 }
 0x72b   : > { %6918 = vmatmul.mubr.msk.bf16.vlgmr.msra.gmra.mrb[92].mxu0 %vm1060_vm1, %v3069_v28  ;;  %6922 = vmatpush3.bf16.xpose.msra.mxu1 %v3127_v15  ;;  %v3331_v40 = vsel %vm1060_vm1, %v3326_v19, 0 }
 0x72c   : > { %6928 = vmatpush3.bf16.xpose.msra.mxu0 %v3178_v14  ;;  %6923 = vmatprep.mubr.msk.bf16.mxu1 %vm7856_vm0, %v10235_v53 }
 0x72d   : > { %6929 = vmatprep.mubr.msk.bf16.mxu0 %vm7856_vm0, %v10235_v53  ;;  %6933 = vmatprep.subr.bf16.mxu1 %v10235_v53 }
 0x72e   : > { %6939 = vmatprep.subr.bf16.mxu0 %v10235_v53  ;;  %v3273_v10 = vpop.permute.xlu0 %3272  ;;  %v3324_v18 = vpop.permute.xlu1 %3323 }
 0x732   : > { %6924 = vmatmul.mubr.msk.bf16.vlgmr.msra.gmra.mrb[92].mxu1 %vm1060_vm1, %v3120_v27 }
 0x733   : > { %6930 = vmatmul.mubr.msk.bf16.vlgmr.msra.gmra.mrb[96].mxu0 %vm1060_vm1, %v3171_v51  ;;  %6934 = vmatpush3.bf16.xpose.msra.mxu1 %v3229_v0 }
 0x734   : > { %6940 = vmatpush3.bf16.xpose.msra.mxu0 %v3280_v61  ;;  %6935 = vmatprep.mubr.msk.bf16.mxu1 %vm7856_vm0, %v10235_v53 }
 0x735   : > { %6941 = vmatprep.mubr.msk.bf16.mxu0 %vm7856_vm0, %v10235_v53  ;;  %6945 = vmatprep.subr.bf16.mxu1 %v10235_v53 }
 0x736   : > { %6951 = vmatprep.subr.bf16.mxu0 %v10235_v53 }
 0x73a   : > { %6936 = vmatmul.mubr.msk.bf16.vlgmr.msra.gmra.mrb[96].mxu1 %vm1060_vm1, %v3222_v35 }
 0x73b   : > { %6942 = vmatmul.mubr.msk.bf16.vlgmr.msra.gmra.mrb[100].mxu0 %vm1060_vm1, %v3273_v10  ;;  %6946 = vmatpush3.bf16.xpose.msra.mxu1 %v3331_v40 }
 0x73c   : > { %6947 = vmatprep.mubr.msk.bf16.mxu1 %vm7856_vm0, %v10235_v53  ;;  %6957 = vmatprep.subr.bf16.mxu1 %v10235_v53 }
 0x73d   : > { %6953 = vmatprep.mubr.msk.bf16.mxu0 %vm7856_vm0, %v10235_v53 }
 0x742   : > { %6948 = vmatmul.mubr.msk.bf16.vlgmr.msra.gmra.mrb[100].mxu1 %vm1060_vm1, %v3324_v18 }
 0x743   : > { %6959 = vmatprep.mubr.msk.bf16.mxu1 %vm7856_vm0, %v10235_v53 }
 0x78c   : > { %v8949_v37 = vpop.f32.mrb[72].mxu0 }
 0x78d   : > { %v6859_v5 = vpop.f32.mrb[73].mxu0 }
 0x78e   : > { %v8951_v34 = vpop.f32.mrb[74].mxu0 }
 0x78f   : > { %v6860_v50 = vpop.f32.mrb[75].mxu0 }
 0x7ac   : > { %v8955_v36 = vpop.f32.mrb[72].mxu1 }
 0x7ad   : > { %v6865_v55 = vpop.f32.mrb[73].mxu1 }
 0x7ae   : > { %v8957_v2 = vpop.f32.mrb[74].mxu1 }
 0x7af   : > { %v6866_v57 = vpop.f32.mrb[75].mxu1 }
 0x7b0   : > { %v8961_v30 = vpop.f32.mrb[76].mxu0 }
 0x7b1   : > { %v6871_v26 = vpop.f32.mrb[77].mxu0 }
 0x7b2   : > { %v8963_v3 = vpop.f32.mrb[78].mxu0 }
 0x7b3   : > { %v6872_v42 = vpop.f32.mrb[79].mxu0 }
 0x7e1   : > { %v8967_v60 = vpop.f32.mrb[76].mxu1 }
 0x7e2   : > { %10236 = vst [vmem:[#allocation22_spill] sm:$0xff] %v8967_v60  ;;  %v6877_v28 = vpop.f32.mrb[77].mxu1 }
 0x7e3   : > { %v8969_v31 = vpop.f32.mrb[78].mxu1 }
 0x7e4   : > { %v6878_v27 = vpop.f32.mrb[79].mxu1 }
 0x7e5   : > { %v8973_v15 = vpop.f32.mrb[80].mxu0 }
 0x7e6   : > { %10237 = vst [vmem:[#allocation23_spill] sm:$0xff] %v8973_v15  ;;  %v6883_v43 = vpop.f32.mrb[81].mxu0 }
 0x7e7   : > { %v8975_v14 = vpop.f32.mrb[82].mxu0 }
 0x7e8   : > { %10238 = vst [vmem:[#allocation24_spill] sm:$0xff] %v8975_v14  ;;  %v6884_v54 = vpop.f32.mrb[83].mxu0 }
 0x7e9   : > { %v8979_v0 = vpop.f32.mrb[80].mxu1 }
 0x7ea   : > { %10239 = vst [vmem:[#allocation25_spill] sm:$0xff] %v8979_v0  ;;  %v6889_v61 = vpop.f32.mrb[81].mxu1 }
 0x7eb   : > { %v8981_v35 = vpop.f32.mrb[82].mxu1 }
 0x7ec   : > { %10240 = vst [vmem:[#allocation26_spill] sm:$0xff] %v8981_v35  ;;  %v6890_v40 = vpop.f32.mrb[83].mxu1 }
 0x7ed   : > { %v8985_v10 = vpop.f32.mrb[84].mxu0 }
 0x7ee   : > { %10241 = vst [vmem:[#allocation27_spill] sm:$0xff] %v8985_v10  ;;  %v6895_v18 = vpop.f32.mrb[85].mxu0 }
 0x7ef   : > { %v8987_v5 = vpop.f32.mrb[86].mxu0 }
 0x7f0   : > { %10242 = vst [vmem:[#allocation28_spill] sm:$0xff] %v8987_v5  ;;  %v6896_v55 = vpop.f32.mrb[87].mxu0 }
 0x7f5   : > { %v8991_v57 = vpop.f32.mrb[84].mxu1 }
 0x7f6   : > { %10243 = vst [vmem:[#allocation29_spill] sm:$0xff] %v8991_v57  ;;  %v8993_v26 = vpop.f32.mrb[88].mxu0  ;;  %v6901_v42 = vpop.f32.mrb[85].mxu1 }
 0x7f7   : > { %v6907_v28 = vpop.f32.mrb[89].mxu0  ;;  %v3374_v27 = vsel %vm1437_vm2, %v8993_v26, -inf  ;;  %v8997_v43 = vpop.f32.mrb[86].mxu1 }
 0x7f8   : > { %10244 = vst [vmem:[#allocation30_spill] sm:$0xff] %v8997_v43  ;;  %3375 = vmax.xlane.f32.xlu0 %v3374_v27  ;;  %v9001_v61 = vpop.f32.mrb[90].mxu0  ;;  %v6902_v40 = vpop.f32.mrb[87].mxu1 }
 0x7f9   : > { %v6908_v18 = vpop.f32.mrb[91].mxu0  ;;  %v3377_v55 = vsel %vm1437_vm2, %v9001_v61, -inf }
 0x7fa   : > { %3378 = vmax.xlane.f32.xlu1 %v3377_v55 }
 0x7fd   : > { %v9005_v19 = vpop.f32.mrb[88].mxu1 }
 0x7fe   : > { %v9007_v42 = vpop.f32.mrb[92].mxu0  ;;  %v6913_v28 = vpop.f32.mrb[89].mxu1  ;;  %v3380_v50 = vsel %vm1437_vm2, %v9005_v19, -inf }
 0x7ff   : > { %v6919_v27 = vpop.f32.mrb[93].mxu0  ;;  %3381 = vmax.xlane.f32.xlu0 %v3380_v50  ;;  %v9011_v51 = vpop.f32.mrb[90].mxu1  ;;  %v3386_v11 = vsel %vm1437_vm2, %v9007_v42, -inf }
 0x800   : > { %v9013_v54 = vpop.f32.mrb[94].mxu0  ;;  %v6914_v40 = vpop.f32.mrb[91].mxu1  ;;  %v3383_v47 = vsel %vm1437_vm2, %v9011_v51, -inf }
 0x801   : > { %v6920_v18 = vpop.f32.mrb[95].mxu0 }
 0x803   : > { %3387 = vmax.xlane.f32.xlu0 %v3386_v11 }
 0x805   : > { %v9017_v55 = vpop.f32.mrb[92].mxu1 }
 0x806   : > { %v9019_v46 = vpop.f32.mrb[96].mxu0  ;;  %v6925_v28 = vpop.f32.mrb[93].mxu1 }
 0x807   : > { %v6931_v27 = vpop.f32.mrb[97].mxu0  ;;  %3384 = vmax.xlane.f32.xlu0 %v3383_v47  ;;  %v9023_v50 = vpop.f32.mrb[94].mxu1 }
 0x808   : > { %v9025_v62 = vpop.f32.mrb[98].mxu0  ;;  %v6926_v40 = vpop.f32.mrb[95].mxu1 }
 0x809   : > { %v6932_v18 = vpop.f32.mrb[99].mxu0 }
 0x80b   : > { %3605 = vrot.lane.b32.xlu1 %v8252_v7, %s7858_s26 }
 0x80d   : > { %v9029_v11 = vpop.f32.mrb[96].mxu1 }
 0x80e   : > { %v9031_v39 = vpop.f32.mrb[100].mxu0  ;;  %v6937_v8 = vpop.f32.mrb[97].mxu1 }
 0x80f   : > { %3652 = vrot.lane.b32.xlu1 %v8269_v29, %s7858_s26  ;;  %v6943_v28 = vpop.f32.mrb[101].mxu0  ;;  %v9035_v27 = vpop.f32.mrb[98].mxu1  ;;  %v3389_v8 = vsel %vm1437_vm2, %v9013_v54, -inf }
 0x810   : > { %v9037_v47 = vpop.f32.mrb[102].mxu0  ;;  %v6938_v21 = vpop.f32.mrb[99].mxu1  ;;  %v3401_v28 = vsel %vm1437_vm2, %v9025_v62, -inf }
 0x811   : > { %v6944_v49 = vpop.f32.mrb[103].mxu0  ;;  %v3395_v21 = vsel %vm1437_vm2, %v9023_v50, -inf }
 0x812   : > { %v3392_v49 = vsel %vm1437_vm2, %v9017_v55, -inf }
 0x813   : > { %3699 = vrot.lane.b32.xlu1 %v8265_v13, %s7858_s26 }
 0x815   : > { %v9041_v40 = vpop.f32.mrb[100].mxu1 }
 0x816   : > { %v6949_v18 = vpop.f32.mrb[101].mxu1 }
 0x817   : > { %v9043_v59 = vpop.f32.mrb[102].mxu1  ;;  %v3407_v18 = vsel %vm1437_vm2, %v9035_v27, -inf }
 0x818   : > { %v6950_v57 = vpop.f32.mrb[103].mxu1 }
 0x819   : > { %v3398_v57 = vsel %vm1437_vm2, %v9019_v46, -inf }
 0x81d   : > { %3558 = vrot.lane.b32.xlu0 %v8254_v9, %s7858_s26 }
 0x837   : > { %3390 = vmax.xlane.f32.xlu1 %v3389_v8  ;;  %v3404_v8 = vsel %vm1437_vm2, %v9029_v11, -inf }
 0x83b   : > { %3396 = vmax.xlane.f32.xlu1 %v3395_v21  ;;  %v3413_v21 = vsel %vm1437_vm2, %v9037_v47, -inf }
 0x83c   : > { %3393 = vmax.xlane.f32.xlu0 %v3392_v49  ;;  %v3410_v49 = vsel %vm1437_vm2, %v9031_v39, -inf }
 0x83f   : > { %3402 = vmax.xlane.f32.xlu1 %v3401_v28  ;;  %v3416_v28 = vsel %vm1437_vm2, %v9041_v40, -inf }
 0x840   : > { %3399 = vmax.xlane.f32.xlu0 %v3398_v57  ;;  %v3419_v57 = vsel %vm1437_vm2, %v9043_v59, -inf }
 0x843   : > { %3408 = vmax.xlane.f32.xlu1 %v3407_v18 }
 0x844   : > { %3405 = vmax.xlane.f32.xlu0 %v3404_v8 }
 0x847   : > { %3414 = vmax.xlane.f32.xlu1 %v3413_v21 }
 0x848   : > { %3411 = vmax.xlane.f32.xlu0 %v3410_v49 }
 0x84c   : > { %3417 = vmax.xlane.f32.xlu0 %v3416_v28 }
 0x858   : > { %3793 = vrot.lane.b32.xlu1 %v8280_v38, %s7858_s26 }
 0x862   : > { %3746 = vrot.lane.b32.xlu0 %v8284_v32, %s7858_s26 }
 0x866   : > { %3840 = vrot.lane.b32.xlu0 %v8299_v52, %s7858_s26 }
 0x87c   : > { %3420 = vmax.xlane.f32.xlu1 %v3419_v57 }
 0x885   : > { %v3376_v18 = vpop.xlane.xlu0 %3375 }
 0x886   : > { %v3422_v8 = vsub.f32 %v8993_v26, %v3376_v18 }
 0x887   : > { %v3379_v21 = vpop.xlane.xlu1 %3378 }
 0x888   : > { %v3438_v49 = vmul.f32 1.442695, %v3422_v8 }
 0x88a   : > { %7550 = vpow2.f32 %v3438_v49 }
 0x88b   : > { %v3606_v28 = vpop.permute.xlu1 %3605 }
 0x88c   : > { %6958 = vmatpush3.bf16.msra.mxu1 %v3606_v28  ;;  %v3382_v43 = vpop.xlane.xlu0 %3381 }
 0x88d   : > { %v3424_v0 = vsub.f32 %v9005_v19, %v3382_v43  ;;  %3887 = vrot.lane.b32.xlu1 %v8295_v4, %s7858_s26  ;;  %6969 = vmatprep.subr.bf16.mxu1 %v10235_v53 }
 0x88f   : > { %v3442_v35 = vmul.f32 1.442695, %v3424_v0  ;;  %v3423_v0 = vsub.f32 %v9001_v61, %v3379_v21 }
 0x890   : > { %v3388_v10 = vpop.xlane.xlu0 %3387 }
 0x891   : > { %7552 = vpow2.f32 %v3442_v35  ;;  %v3426_v57 = vsub.f32 %v9007_v42, %v3388_v10  ;;  %v3440_v42 = vmul.f32 1.442695, %v3423_v0 }
 0x893   : > { %v3446_v5 = vmul.f32 1.442695, %v3426_v57 }
 0x894   : > { %v9081_v26 = vpop.eup %7550  ;;  %v3385_v18 = vpop.xlane.xlu0 %3384 }
 0x895   : > { %7554 = vpow2.f32 %v3446_v5  ;;  %v3470_v8 = vsel %vm1437_vm2, %v9081_v26, 0.0  ;;  %v3425_v5 = vsub.f32 %v9011_v51, %v3385_v18  ;;  %v9104_v51 = vpop.permute.xlu1 %3652 }
 0x896   : > { %3471 = vadd.xlane.f32.xlu0 %v3470_v8  ;;  %7556 = vpow2.f32 %v3440_v42 }
 0x897   : > { %v3444_v28 = vmul.f32 1.442695, %v3425_v5 }
 0x898   : > { %v3559_v19 = vpop.permute.xlu0 %3558 }
 0x899   : > { %6952 = vmatpush3.bf16.msra.mxu0 %v3559_v19  ;;  %7558 = vpow2.f32 %v3444_v28  ;;  %v9106_v18 = vpop.permute.xlu1 %3699 }
 0x89a   : > { %6963 = vmatprep.subr.bf16.mxu0 %v10235_v53 }
 0x89b   : > { %v9086_v43 = vpop.eup %7552 }
 0x89c   : > { %v3476_v35 = vsel %vm1437_vm2, %v9086_v43, 0.0 }
 0x89d   : > { %3477 = vadd.xlane.f32.xlu0 %v3476_v35 }
 0x89f   : > { %v9091_v10 = vpop.eup %7554 }
 0x8a0   : > { %v3482_v49 = vsel %vm1437_vm2, %v9091_v10, 0.0  ;;  %v9096_v57 = vpop.eup %7556 }
 0x8a1   : > { %3483 = vadd.xlane.f32.xlu0 %v3482_v49  ;;  %v3473_v61 = vsel %vm1437_vm2, %v9096_v57, 0.0 }
 0x8a3   : > { %v9100_v21 = vpop.eup %7558 }
 0x8a4   : > { %v3479_v8 = vsel %vm1437_vm2, %v9100_v21, 0.0 }
 0x8b1   : > { %3474 = vadd.xlane.f32.xlu1 %v3473_v61 }
 0x8b5   : > { %3480 = vadd.xlane.f32.xlu1 %v3479_v8 }
 0x8c4   : > { %v3391_v19 = vpop.xlane.xlu1 %3390 }
 0x8c5   : > { %v3427_v0 = vsub.f32 %v9013_v54, %v3391_v19 }
 0x8c7   : > { %v3448_v35 = vmul.f32 1.442695, %v3427_v0 }
 0x8c8   : > { %v3397_v42 = vpop.xlane.xlu1 %3396 }
 0x8c9   : > { %7560 = vpow2.f32 %v3448_v35  ;;  %v3429_v5 = vsub.f32 %v9023_v50, %v3397_v42  ;;  %v3394_v49 = vpop.xlane.xlu0 %3393 }
 0x8ca   : > { %v3428_v28 = vsub.f32 %v9017_v55, %v3394_v49 }
 0x8cb   : > { %v3452_v61 = vmul.f32 1.442695, %v3429_v5 }
 0x8cc   : > { %v3450_v25 = vmul.f32 1.442695, %v3428_v28  ;;  %v3403_v23 = vpop.xlane.xlu1 %3402 }
 0x8cd   : > { %7562 = vpow2.f32 %v3452_v61  ;;  %v3431_v8 = vsub.f32 %v9025_v62, %v3403_v23  ;;  %v3400_v15 = vpop.xlane.xlu0 %3399 }
 0x8ce   : > { %7564 = vpow2.f32 %v3450_v25  ;;  %v3430_v14 = vsub.f32 %v9019_v46, %v3400_v15 }
 0x8cf   : > { %v3456_v60 = vmul.f32 1.442695, %v3431_v8 }
 0x8d0   : > { %v3454_v54 = vmul.f32 1.442695, %v3430_v14  ;;  %v3409_v19 = vpop.xlane.xlu1 %3408 }
 0x8d1   : > { %7566 = vpow2.f32 %v3456_v60  ;;  %v3433_v0 = vsub.f32 %v9035_v27, %v3409_v19  ;;  %v3406_v50 = vpop.xlane.xlu0 %3405 }
 0x8d2   : > { %7568 = vpow2.f32 %v3454_v54  ;;  %v3432_v55 = vsub.f32 %v9029_v11, %v3406_v50 }
 0x8d3   : > { %v9115_v35 = vpop.eup %7560  ;;  %v3460_v42 = vmul.f32 1.442695, %v3433_v0 }
 0x8d4   : > { %v3458_v5 = vmul.f32 1.442695, %v3432_v55  ;;  %v3415_v49 = vpop.xlane.xlu1 %3414  ;;  %v3485_v25 = vsel %vm1437_vm2, %v9115_v35, 0.0 }
 0x8d5   : > { %7570 = vpow2.f32 %v3460_v42  ;;  %v3435_v23 = vsub.f32 %v9037_v47, %v3415_v49  ;;  %3486 = vadd.xlane.f32.xlu1 %v3485_v25  ;;  %v3412_v62 = vpop.xlane.xlu0 %3411 }
 0x8d6   : > { %7572 = vpow2.f32 %v3458_v5  ;;  %v3434_v46 = vsub.f32 %v9031_v39, %v3412_v62 }
 0x8d7   : > { %v9121_v60 = vpop.eup %7562  ;;  %v3464_v15 = vmul.f32 1.442695, %v3435_v23 }
 0x8d8   : > { %v9123_v14 = vpop.eup %7564  ;;  %v3462_v11 = vmul.f32 1.442695, %v3434_v46  ;;  %v3491_v27 = vsel %vm1437_vm2, %v9121_v60, 0.0 }
 0x8d9   : > { %7574 = vpow2.f32 %v3464_v15  ;;  %3492 = vadd.xlane.f32.xlu1 %v3491_v27  ;;  %v3418_v28 = vpop.xlane.xlu0 %3417  ;;  %v3488_v47 = vsel %vm1437_vm2, %v9123_v14, 0.0  ;;  %v9162_v15 = vpop.permute.xlu1 %3793 }
 0x8da   : > { %7576 = vpow2.f32 %v3462_v11  ;;  %v3436_v61 = vsub.f32 %v9041_v40, %v3418_v28  ;;  %3489 = vadd.xlane.f32.xlu0 %v3488_v47 }
 0x8db   : > { %v9130_v39 = vpop.eup %7566 }
 0x8dc   : > { %v9132_v8 = vpop.eup %7568  ;;  %v3466_v54 = vmul.f32 1.442695, %v3436_v61  ;;  %v3497_v19 = vsel %vm1437_vm2, %v9130_v39, 0.0 }
 0x8dd   : > { %3498 = vadd.xlane.f32.xlu1 %v3497_v19  ;;  %v3494_v0 = vsel %vm1437_vm2, %v9132_v8, 0.0 }
 0x8de   : > { %7578 = vpow2.f32 %v3466_v54  ;;  %3495 = vadd.xlane.f32.xlu0 %v3494_v0 }
 0x8df   : > { %v9138_v50 = vpop.eup %7570 }
 0x8e0   : > { %v9140_v55 = vpop.eup %7572  ;;  %v3503_v40 = vsel %vm1437_vm2, %v9138_v50, 0.0 }
 0x8e1   : > { %3504 = vadd.xlane.f32.xlu1 %v3503_v40  ;;  %v3500_v42 = vsel %vm1437_vm2, %v9140_v55, 0.0 }
 0x8e2   : > { %3501 = vadd.xlane.f32.xlu0 %v3500_v42 }
 0x8e3   : > { %v9146_v5 = vpop.eup %7574 }
 0x8e4   : > { %v9148_v49 = vpop.eup %7576  ;;  %v3509_v25 = vsel %vm1437_vm2, %v9146_v5, 0.0 }
 0x8e5   : > { %3510 = vadd.xlane.f32.xlu1 %v3509_v25  ;;  %v3506_v23 = vsel %vm1437_vm2, %v9148_v49, 0.0 }
 0x8e6   : > { %3507 = vadd.xlane.f32.xlu0 %v3506_v23 }
 0x8e8   : > { %v9154_v62 = vpop.eup %7578 }
 0x8e9   : > { %v3512_v46 = vsel %vm1437_vm2, %v9154_v62, 0.0 }
 0x8ea   : > { %3513 = vadd.xlane.f32.xlu0 %v3512_v46 }
 0x900   : > { %3936 = vrot.lane.b32.xlu0 %v8248_v1, %s10212_s28 }
 0x904   : > { %3934 = vrot.lane.b32.xlu0 %v8246_v33, %s10212_s28 }
 0x908   : > { %4038 = vrot.lane.b32.xlu0 %v8274_v56, %s10212_s28 }
 0x909   : > { %v3421_v11 = vpop.xlane.xlu1 %3420 }
 0x90a   : > { %v3437_v27 = vsub.f32 %v9043_v59, %v3421_v11 }
 0x90c   : > { %v3468_v28 = vmul.f32 1.442695, %v3437_v27  ;;  %4036 = vrot.lane.b32.xlu0 %v8272_v24, %s10212_s28  ;;  %v3747_v24 = vpop.permute.xlu0 %3746 }
 0x90e   : > { %7580 = vpow2.f32 %v3468_v28 }
 0x910   : > { %4140 = vrot.lane.b32.xlu0 %v8304_v17, %s10212_s28  ;;  %v9187_v56 = vpop.permute.xlu0 %3840 }
 0x914   : > { %4138 = vrot.lane.b32.xlu0 %v8302_v58, %s10212_s28  ;;  %v9191_v58 = vpop.permute.xlu1 %3887 }
 0x918   : > { %v9173_v33 = vpop.eup %7580  ;;  %4242 = vrot.lane.b32.xlu0 %v8326_v16, %s10212_s28 }
 0x919   : > { %v3515_v1 = vsel %vm1437_vm2, %v9173_v33, 0.0 }
 0x91a   : > { %3516 = vadd.xlane.f32.xlu1 %v3515_v1 }
 0x91c   : > { %4240 = vrot.lane.b32.xlu0 %v8324_v6, %s10212_s28 }
 0x923   : > { %v3472_v17 = vpop.xlane.xlu0 %3471 }
 0x924   : > { %7582 = vrcp.f32 %v3472_v17 }
 0x92b   : > { %3987 = vrot.lane.b32.xlu1 %v8259_v20, %s10212_s28  ;;  %v3478_v20 = vpop.xlane.xlu0 %3477 }
 0x92f   : > { %3985 = vrot.lane.b32.xlu1 %v8257_v41, %s10212_s28 }
 0x933   : > { %4089 = vrot.lane.b32.xlu1 %v8289_v45, %s10212_s28 }
 0x937   : > { %4087 = vrot.lane.b32.xlu1 %v8287_v44, %s10212_s28  ;;  %v7583_v44 = vpop.eup %7582 }
 0x93b   : > { %4191 = vrot.lane.b32.xlu1 %v8315_v63, %s10212_s28  ;;  %v3534_v63 = vmul.f32 %v7583_v44, %v9081_v26 }
 0x93e   : > { %v3475_v6 = vpop.xlane.xlu1 %3474 }
 0x93f   : > { %7584 = vrcp.f32 %v3475_v6  ;;  %4189 = vrot.lane.b32.xlu1 %v8313_v22, %s10212_s28 }
 0x940   : > { %7586 = vrcp.f32 %v3478_v20 }
 0x942   : > { %v3481_v41 = vpop.xlane.xlu1 %3480 }
 0x943   : > { %7588 = vrcp.f32 %v3481_v41  ;;  %4293 = vrot.lane.b32.xlu1 %v8337_v12, %s10212_s28  ;;  %v3484_v12 = vpop.xlane.xlu0 %3483 }
 0x944   : > { %7590 = vrcp.f32 %v3484_v12 }
 0x947   : > { %4291 = vrot.lane.b32.xlu1 %v8335_v48, %s10212_s28 }
 0x949   : > { %v7585_v45 = vpop.eup %7584 }
 0x94a   : > { %v3535_v16 = vmul.f32 %v7585_v45, %v9096_v57  ;;  %v7587_v59 = vpop.eup %7586 }
 0x94b   : > { %v3536_v22 = vmul.f32 %v7587_v59, %v9086_v43 }
 0x94c   : > { %v3550_v47 = vpack.c.bf16 %v3535_v16, %v3534_v63 }
 0x94d   : > { %v7589_v61 = vpop.eup %7588 }
 0x94e   : > { %v3537_v54 = vmul.f32 %v7589_v61, %v9100_v21  ;;  %6954 = vmatmul.mubr.msk.bf16.vlgmr.msra.gmra.mrb[104].mxu0 %vm1437_vm2, %v3550_v47 }
 0x94f   : > { %6964 = vmatpush3.bf16.msra.mxu0 %v9104_v51  ;;  %6965 = vmatprep.mubr.msk.bf16.mxu0 %vm7856_vm0, %v10235_v53  ;;  %v7591_v51 = vpop.eup %7590 }
 0x950   : > { %v3551_v48 = vpack.c.bf16 %v3537_v54, %v3536_v22  ;;  %6975 = vmatprep.subr.bf16.mxu0 %v10235_v53 }
 0x952   : > { %6960 = vmatmul.mubr.msk.bf16.vlgmr.msra.gmra.mrb[104].mxu1 %vm1437_vm2, %v3551_v48 }
 0x953   : > { %6970 = vmatpush3.bf16.msra.mxu1 %v9106_v18  ;;  %6971 = vmatprep.mubr.msk.bf16.mxu1 %vm7856_vm0, %v10235_v53  ;;  %v3538_v18 = vmul.f32 %v7591_v51, %v9091_v10 }
 0x954   : > { %6981 = vmatprep.subr.bf16.mxu1 %v10235_v53 }
 0x962   : > { %v3487_v26 = vpop.xlane.xlu1 %3486 }
 0x963   : > { %7592 = vrcp.f32 %v3487_v26 }
 0x966   : > { %v3493_v43 = vpop.xlane.xlu1 %3492 }
 0x967   : > { %7594 = vrcp.f32 %v3493_v43  ;;  %v3490_v57 = vpop.xlane.xlu0 %3489 }
 0x968   : > { %7596 = vrcp.f32 %v3490_v57 }
 0x96a   : > { %v3499_v21 = vpop.xlane.xlu1 %3498 }
 0x96b   : > { %7598 = vrcp.f32 %v3499_v21  ;;  %v3496_v19 = vpop.xlane.xlu0 %3495 }
 0x96c   : > { %7600 = vrcp.f32 %v3496_v19 }
 0x96d   : > { %v7593_v0 = vpop.eup %7592 }
 0x96e   : > { %v3539_v40 = vmul.f32 %v7593_v0, %v9115_v35  ;;  %v3505_v42 = vpop.xlane.xlu1 %3504 }
 0x96f   : > { %7602 = vrcp.f32 %v3505_v42  ;;  %v3502_v25 = vpop.xlane.xlu0 %3501 }
 0x970   : > { %7604 = vrcp.f32 %v3502_v25  ;;  %v3552_v23 = vpack.c.bf16 %v3539_v40, %v3538_v18 }
 0x971   : > { %v7595_v46 = vpop.eup %7594 }
 0x972   : > { %v7597_v11 = vpop.eup %7596  ;;  %6966 = vmatmul.mubr.msk.bf16.vlgmr.msra.gmra.mrb[108].mxu0 %vm1437_vm2, %v3552_v23  ;;  %v3511_v27 = vpop.xlane.xlu1 %3510  ;;  %v3541_v28 = vmul.f32 %v7595_v46, %v9121_v60 }
 0x973   : > { %v3540_v1 = vmul.f32 %v7597_v11, %v9123_v14  ;;  %6976 = vmatpush3.bf16.msra.mxu0 %v3747_v24  ;;  %7606 = vrcp.f32 %v3511_v27  ;;  %v3508_v17 = vpop.xlane.xlu0 %3507  ;;  %6977 = vmatprep.mubr.msk.bf16.mxu0 %vm7856_vm0, %v10235_v53 }
 0x974   : > { %7608 = vrcp.f32 %v3508_v17  ;;  %6987 = vmatprep.subr.bf16.mxu0 %v10235_v53 }
 0x975   : > { %v7599_v10 = vpop.eup %7598  ;;  %v3553_v35 = vpack.c.bf16 %v3541_v28, %v3540_v1 }
 0x976   : > { %v7601_v20 = vpop.eup %7600  ;;  %v3543_v6 = vmul.f32 %v7599_v10, %v9130_v39 }
 0x977   : > { %v3542_v41 = vmul.f32 %v7601_v20, %v9132_v8  ;;  %v3514_v44 = vpop.xlane.xlu0 %3513  ;;  %6972 = vmatmul.mubr.msk.bf16.vlgmr.msra.gmra.mrb[108].mxu1 %vm1437_vm2, %v3553_v35 }
 0x978   : > { %6982 = vmatpush3.bf16.msra.mxu1 %v9162_v15  ;;  %6983 = vmatprep.mubr.msk.bf16.mxu1 %vm7856_vm0, %v10235_v53  ;;  %7610 = vrcp.f32 %v3514_v44 }
 0x979   : > { %v7603_v60 = vpop.eup %7602  ;;  %v3554_v14 = vpack.c.bf16 %v3543_v6, %v3542_v41  ;;  %6993 = vmatprep.subr.bf16.mxu1 %v10235_v53 }
 0x97a   : > { %v7605_v24 = vpop.eup %7604  ;;  %v3545_v45 = vmul.f32 %v7603_v60, %v9138_v50 }
 0x97b   : > { %v3544_v63 = vmul.f32 %v7605_v24, %v9140_v55  ;;  %v3937_v39 = vpop.permute.xlu0 %3936  ;;  %6978 = vmatmul.mubr.msk.bf16.vlgmr.msra.gmra.mrb[112].mxu0 %vm1437_vm2, %v3554_v14 }
 0x97c   : > { %6988 = vmatpush3.bf16.msra.mxu0 %v9187_v56  ;;  %6989 = vmatprep.mubr.msk.bf16.mxu0 %vm7856_vm0, %v10235_v53  ;;  %v3942_v61 = vsel %vm1060_vm1, %v3937_v39, 0 }
 0x97d   : > { %v7607_v8 = vpop.eup %7606  ;;  %v3555_v15 = vpack.c.bf16 %v3545_v45, %v3544_v63  ;;  %6999 = vmatprep.subr.bf16.mxu0 %v10235_v53 }
 0x97e   : > { %v7609_v16 = vpop.eup %7608  ;;  %v3547_v59 = vmul.f32 %v7607_v8, %v9146_v5 }
 0x97f   : > { %v3546_v47 = vmul.f32 %v7609_v16, %v9148_v49  ;;  %v3935_v50 = vpop.permute.xlu0 %3934  ;;  %6984 = vmatmul.mubr.msk.bf16.vlgmr.msra.gmra.mrb[112].mxu1 %vm1437_vm2, %v3555_v15 }
 0x980   : > { %6994 = vmatpush3.bf16.msra.mxu1 %v9191_v58  ;;  %6995 = vmatprep.mubr.msk.bf16.mxu1 %vm7856_vm0, %v10235_v53 }
 0x981   : > { %v3556_v55 = vpack.c.bf16 %v3547_v59, %v3546_v47  ;;  %7005 = vmatprep.subr.bf16.mxu1 %v10235_v53 }
 0x982   : > { %v7611_v51 = vpop.eup %7610 }
 0x983   : > { %v4039_v56 = vpop.permute.xlu0 %4038  ;;  %6990 = vmatmul.mubr.msk.bf16.vlgmr.msra.gmra.mrb[116].mxu0 %vm1437_vm2, %v3556_v55  ;;  %v3548_v0 = vmul.f32 %v7611_v51, %v9154_v62 }
 0x984   : > { %7001 = vmatprep.mubr.msk.bf16.mxu0 %vm7856_vm0, %v10235_v53  ;;  %v4044_v49 = vsel %vm1060_vm1, %v4039_v56, 0 }
 0x985   : > { %7000 = vmatpush3.bf16.xpose.msra.mxu0 %v3942_v61 }
 0x986   : > { %7011 = vmatprep.subr.bf16.mxu0 %v10235_v53 }
 0x987   : > { %v4037_v5 = vpop.permute.xlu0 %4036 }
 0x98b   : > { %v4141_v58 = vpop.permute.xlu0 %4140 }
 0x98c   : > { %7002 = vmatmul.mubr.msk.bf16.vlgmr.msra.gmra.mrb[120].mxu0 %vm1060_vm1, %v3935_v50  ;;  %v4146_v54 = vsel %vm1060_vm1, %v4141_v58, 0 }
 0x98d   : > { %7012 = vmatpush3.bf16.xpose.msra.mxu0 %v4044_v49  ;;  %7013 = vmatprep.mubr.msk.bf16.mxu0 %vm7856_vm0, %v10235_v53 }
 0x98e   : > { %7023 = vmatprep.subr.bf16.mxu0 %v10235_v53 }
 0x98f   : > { %v4139_v22 = vpop.permute.xlu0 %4138 }
 0x993   : > { %v4243_v48 = vpop.permute.xlu0 %4242 }
 0x994   : > { %7014 = vmatmul.mubr.msk.bf16.vlgmr.msra.gmra.mrb[124].mxu0 %vm1060_vm1, %v4037_v5  ;;  %v4248_v12 = vsel %vm1060_vm1, %v4243_v48, 0 }
 0x995   : > { %7024 = vmatpush3.bf16.xpose.msra.mxu0 %v4146_v54  ;;  %7025 = vmatprep.mubr.msk.bf16.mxu0 %vm7856_vm0, %v10235_v53 }
 0x996   : > { %7035 = vmatprep.subr.bf16.mxu0 %v10235_v53 }
 0x997   : > { %v4241_v26 = vpop.permute.xlu0 %4240 }
 0x99c   : > { %7026 = vmatmul.mubr.msk.bf16.vlgmr.msra.gmra.mrb[128].mxu0 %vm1060_vm1, %v4139_v22 }
 0x99d   : > { %7036 = vmatpush3.bf16.xpose.msra.mxu0 %v4248_v12  ;;  %7037 = vmatprep.mubr.msk.bf16.mxu0 %vm7856_vm0, %v10235_v53 }
 0x99e   : > { %7047 = vmatprep.subr.bf16.mxu0 %v10235_v53 }
 0x9a4   : > { %7038 = vmatmul.mubr.msk.bf16.vlgmr.msra.gmra.mrb[132].mxu0 %vm1060_vm1, %v4241_v26 }
 0x9a5   : > { %7049 = vmatprep.mubr.msk.bf16.mxu0 %vm7856_vm0, %v10235_v53 }
 0x9a7   : > { %v3517_v43 = vpop.xlane.xlu1 %3516 }
 0x9a8   : > { %7612 = vrcp.f32 %v3517_v43 }
 0x9ab   : > { %v3988_v57 = vpop.permute.xlu1 %3987 }
 0x9ac   : > { %v3993_v25 = vsel %vm1060_vm1, %v3988_v57, 0 }
 0x9af   : > { %v3986_v21 = vpop.permute.xlu1 %3985 }
 0x9b2   : > { %v7613_v19 = vpop.eup %7612 }
 0x9b3   : > { %v3549_v18 = vmul.f32 %v7613_v19, %v9173_v33  ;;  %v4090_v40 = vpop.permute.xlu1 %4089 }
 0x9b4   : > { %v4095_v46 = vsel %vm1060_vm1, %v4090_v40, 0 }
 0x9b5   : > { %v3557_v42 = vpack.c.bf16 %v3549_v18, %v3548_v0 }
 0x9b7   : > { %6996 = vmatmul.mubr.msk.bf16.vlgmr.msra.gmra.mrb[116].mxu1 %vm1437_vm2, %v3557_v42  ;;  %v4088_v23 = vpop.permute.xlu1 %4087 }
 0x9b8   : > { %7006 = vmatpush3.bf16.xpose.msra.mxu1 %v3993_v25  ;;  %7007 = vmatprep.mubr.msk.bf16.mxu1 %vm7856_vm0, %v10235_v53 }
 0x9b9   : > { %7017 = vmatprep.subr.bf16.mxu1 %v10235_v53 }
 0x9bb   : > { %v4192_v62 = vpop.permute.xlu1 %4191 }
 0x9bc   : > { %v4197_v11 = vsel %vm1060_vm1, %v4192_v62, 0 }
 0x9bf   : > { %7008 = vmatmul.mubr.msk.bf16.vlgmr.msra.gmra.mrb[120].mxu1 %vm1060_vm1, %v3986_v21  ;;  %v4190_v33 = vpop.permute.xlu1 %4189 }
 0x9c0   : > { %7018 = vmatpush3.bf16.xpose.msra.mxu1 %v4095_v46  ;;  %7019 = vmatprep.mubr.msk.bf16.mxu1 %vm7856_vm0, %v10235_v53 }
 0x9c1   : > { %7029 = vmatprep.subr.bf16.mxu1 %v10235_v53 }
 0x9c3   : > { %v4294_v27 = vpop.permute.xlu1 %4293 }
 0x9c4   : > { %v4299_v28 = vsel %vm1060_vm1, %v4294_v27, 0 }
 0x9c7   : > { %7020 = vmatmul.mubr.msk.bf16.vlgmr.msra.gmra.mrb[124].mxu1 %vm1060_vm1, %v4088_v23  ;;  %v4292_v1 = vpop.permute.xlu1 %4291 }
 0x9c8   : > { %7030 = vmatpush3.bf16.xpose.msra.mxu1 %v4197_v11  ;;  %7031 = vmatprep.mubr.msk.bf16.mxu1 %vm7856_vm0, %v10235_v53 }
 0x9c9   : > { %7041 = vmatprep.subr.bf16.mxu1 %v10235_v53 }
 0x9cf   : > { %7032 = vmatmul.mubr.msk.bf16.vlgmr.msra.gmra.mrb[128].mxu1 %vm1060_vm1, %v4190_v33 }
 0x9d0   : > { %7042 = vmatpush3.bf16.xpose.msra.mxu1 %v4299_v28  ;;  %7043 = vmatprep.mubr.msk.bf16.mxu1 %vm7856_vm0, %v10235_v53 }
 0x9d1   : > { %7053 = vmatprep.subr.bf16.mxu1 %v10235_v53 }
 0x9d7   : > { %7044 = vmatmul.mubr.msk.bf16.vlgmr.msra.gmra.mrb[132].mxu1 %vm1060_vm1, %v4292_v1 }
 0x9d8   : > { %7055 = vmatprep.mubr.msk.bf16.mxu1 %vm7856_vm0, %v10235_v53 }
 0xa21   : > { %v9292_v17 = vpop.f32.mrb[104].mxu0 }
 0xa22   : > { %v6955_v10 = vpop.f32.mrb[105].mxu0 }
 0xa23   : > { %v9294_v35 = vpop.f32.mrb[106].mxu0 }
 0xa24   : > { %v7200_v20 = vpack.i.bf16 %v9294_v35, %v9292_v17  ;;  %v6956_v6 = vpop.f32.mrb[107].mxu0  ;;  %v10246_v35 = vpack.i.bf16 %v8957_v2, %v8955_v36 }
 0xa25   : > { %v9298_v41 = vpop.f32.mrb[104].mxu1 }
 0xa26   : > { %v6961_v44 = vpop.f32.mrb[105].mxu1 }
 0xa27   : > { %v9300_v60 = vpop.f32.mrb[106].mxu1 }
 0xa28   : > { %v7205_v14 = vpack.i.bf16 %v9300_v60, %v9298_v41  ;;  %v6962_v24 = vpop.f32.mrb[107].mxu1 }
 0xa45   : > { %v9304_v45 = vpop.f32.mrb[108].mxu0 }
 0xa46   : > { %v6967_v63 = vpop.f32.mrb[109].mxu0 }
 0xa47   : > { %v9306_v39 = vpop.f32.mrb[110].mxu0 }
 0xa48   : > { %v7230_v8 = vpack.i.bf16 %v9306_v39, %v9304_v45  ;;  %v6968_v15 = vpop.f32.mrb[111].mxu0  ;;  %v7346_v45 = vld [vmem:[%s10190_s4 + $0x20] sm:$0xff]   ;;  %v7347_v39 = vld [vmem:[%s10190_s4 + $0x28] sm:$0xff]  }
 0xa4a   : > { %v9310_v16 = vpop.f32.mrb[108].mxu1 }
 0xa4b   : > { %v6973_v59 = vpop.f32.mrb[109].mxu1 }
 0xa4c   : > { %v9312_v47 = vpop.f32.mrb[110].mxu1 }
 0xa4d   : > { %v7235_v50 = vpack.i.bf16 %v9312_v47, %v9310_v16  ;;  %v6974_v55 = vpop.f32.mrb[111].mxu1 }
 0xa4e   : > { %v9316_v56 = vpop.f32.mrb[112].mxu0 }
 0xa4f   : > { %v6979_v61 = vpop.f32.mrb[113].mxu0 }
 0xa50   : > { %v9318_v5 = vpop.f32.mrb[114].mxu0 }
 0xa51   : > { %v7260_v49 = vpack.i.bf16 %v9318_v5, %v9316_v56  ;;  %v6980_v58 = vpop.f32.mrb[115].mxu0 }
 0xa52   : > { %v9322_v22 = vpop.f32.mrb[112].mxu1 }
 0xa53   : > { %v6985_v54 = vpop.f32.mrb[113].mxu1 }
 0xa54   : > { %v9324_v48 = vpop.f32.mrb[114].mxu1 }
 0xa55   : > { %v6986_v26 = vpop.f32.mrb[115].mxu1 }
 0xa56   : > { %v9328_v43 = vpop.f32.mrb[116].mxu0 }
 0xa57   : > { %v6991_v57 = vpop.f32.mrb[117].mxu0 }
 0xa58   : > { %v9330_v21 = vpop.f32.mrb[118].mxu0 }
 0xa59   : > { %v6992_v19 = vpop.f32.mrb[119].mxu0 }
 0xa5f   : > { %v9334_v0 = vpop.f32.mrb[120].mxu0 }
 0xa60   : > { %v7003_v18 = vpop.f32.mrb[121].mxu0  ;;  %v4342_v40 = vsel %vm1437_vm2, %v9334_v0, -inf }
 0xa61   : > { %4343 = vmax.xlane.f32.xlu0 %v4342_v40  ;;  %v9338_v42 = vpop.f32.mrb[122].mxu0 }
 0xa62   : > { %v7004_v25 = vpop.f32.mrb[123].mxu0  ;;  %v4345_v23 = vsel %vm1437_vm2, %v9338_v42, -inf }
 0xa63   : > { %4346 = vmax.xlane.f32.xlu1 %v4345_v23 }
 0xa67   : > { %v9342_v46 = vpop.f32.mrb[124].mxu0 }
 0xa68   : > { %v7015_v62 = vpop.f32.mrb[125].mxu0 }
 0xa69   : > { %v9344_v33 = vpop.f32.mrb[126].mxu0 }
 0xa6a   : > { %v7016_v11 = vpop.f32.mrb[127].mxu0  ;;  %v4357_v27 = vsel %vm1437_vm2, %v9344_v33, -inf }
 0xa6b   : > { %4358 = vmax.xlane.f32.xlu1 %v4357_v27 }
 0xa6f   : > { %v9348_v28 = vpop.f32.mrb[128].mxu0 }
 0xa70   : > { %v7027_v1 = vpop.f32.mrb[129].mxu0 }
 0xa71   : > { %v9350_v10 = vpop.f32.mrb[130].mxu0 }
 0xa72   : > { %v7028_v6 = vpop.f32.mrb[131].mxu0 }
 0xa77   : > { %v9352_v44 = vpop.f32.mrb[132].mxu0 }
 0xa78   : > { %v7039_v24 = vpop.f32.mrb[133].mxu0 }
 0xa79   : > { %v9354_v63 = vpop.f32.mrb[134].mxu0 }
 0xa7a   : > { %v7040_v15 = vpop.f32.mrb[135].mxu0 }
 0xa7c   : > { %4573 = vrot.lane.b32.xlu1 %v8252_v7, %s10212_s28  ;;  %v4354_v7 = vsel %vm1437_vm2, %v9342_v46, -inf }
 0xa8a   : > { %v9358_v59 = vpop.f32.mrb[116].mxu1 }
 0xa8b   : > { %v6997_v55 = vpop.f32.mrb[117].mxu1 }
 0xa8c   : > { %v9360_v61 = vpop.f32.mrb[118].mxu1  ;;  %v4369_v55 = vsel %vm1437_vm2, %v9350_v10, -inf }
 0xa8d   : > { %v6998_v54 = vpop.f32.mrb[119].mxu1 }
 0xa92   : > { %v9364_v26 = vpop.f32.mrb[120].mxu1 }
 0xa93   : > { %v7009_v57 = vpop.f32.mrb[121].mxu1  ;;  %v4348_v19 = vsel %vm1437_vm2, %v9364_v26, -inf }
 0xa94   : > { %4349 = vmax.xlane.f32.xlu0 %v4348_v19  ;;  %v9368_v18 = vpop.f32.mrb[122].mxu1 }
 0xa95   : > { %v7010_v40 = vpop.f32.mrb[123].mxu1  ;;  %v4351_v62 = vsel %vm1437_vm2, %v9368_v18, -inf }
 0xa98   : > { %4355 = vmax.xlane.f32.xlu0 %v4354_v7 }
 0xa9a   : > { %v9372_v25 = vpop.f32.mrb[124].mxu1 }
 0xa9b   : > { %v7021_v23 = vpop.f32.mrb[125].mxu1  ;;  %v4360_v1 = vsel %vm1437_vm2, %v9372_v25, -inf }
 0xa9c   : > { %4352 = vmax.xlane.f32.xlu0 %v4351_v62  ;;  %v9376_v11 = vpop.f32.mrb[126].mxu1  ;;  %v4381_v23 = vsel %vm1437_vm2, %v9354_v63, -inf }
 0xa9d   : > { %v7022_v27 = vpop.f32.mrb[127].mxu1  ;;  %v4363_v6 = vsel %vm1437_vm2, %v9376_v11, -inf }
 0xaa0   : > { %4361 = vmax.xlane.f32.xlu0 %v4360_v1  ;;  %4364 = vmax.xlane.f32.xlu1 %v4363_v6  ;;  %v4366_v6 = vsel %vm1437_vm2, %v9348_v28, -inf }
 0xaa2   : > { %v9382_v24 = vpop.f32.mrb[128].mxu1 }
 0xaa3   : > { %v7033_v15 = vpop.f32.mrb[129].mxu1 }
 0xaa4   : > { %4370 = vmax.xlane.f32.xlu1 %v4369_v55  ;;  %v9386_v54 = vpop.f32.mrb[130].mxu1  ;;  %v4372_v15 = vsel %vm1437_vm2, %v9382_v24, -inf  ;;  %v4378_v55 = vsel %vm1437_vm2, %v9352_v44, -inf }
 0xaa5   : > { %v7034_v57 = vpop.f32.mrb[131].mxu1  ;;  %v4375_v19 = vsel %vm1437_vm2, %v9386_v54, -inf }
 0xaa8   : > { %4376 = vmax.xlane.f32.xlu1 %v4375_v19 }
 0xaaa   : > { %v9390_v40 = vpop.f32.mrb[132].mxu1 }
 0xaab   : > { %v7045_v7 = vpop.f32.mrb[133].mxu1  ;;  %v4384_v57 = vsel %vm1437_vm2, %v9390_v40, -inf }
 0xaac   : > { %4382 = vmax.xlane.f32.xlu1 %v4381_v23  ;;  %v9394_v62 = vpop.f32.mrb[134].mxu1 }
 0xaad   : > { %v7046_v27 = vpop.f32.mrb[135].mxu1  ;;  %v4387_v1 = vsel %vm1437_vm2, %v9394_v62, -inf }
 0xab0   : > { %4388 = vmax.xlane.f32.xlu1 %v4387_v1 }
 0xab6   : > { %4526 = vrot.lane.b32.xlu0 %v8254_v9, %s10212_s28 }
 0xad5   : > { %4367 = vmax.xlane.f32.xlu0 %v4366_v6 }
 0xad9   : > { %4373 = vmax.xlane.f32.xlu0 %v4372_v15 }
 0xadd   : > { %4379 = vmax.xlane.f32.xlu0 %v4378_v55 }
 0xae1   : > { %4385 = vmax.xlane.f32.xlu0 %v4384_v57 }
 0xaee   : > { %v4344_v19 = vpop.xlane.xlu0 %4343 }
 0xaef   : > { %v4390_v7 = vsub.f32 %v9334_v0, %v4344_v19 }
 0xaf0   : > { %v4347_v9 = vpop.xlane.xlu1 %4346 }
 0xaf1   : > { %v4406_v23 = vmul.f32 1.442695, %v4390_v7  ;;  %v4391_v27 = vsub.f32 %v9338_v42, %v4347_v9 }
 0xaf3   : > { %7614 = vpow2.f32 %v4406_v23  ;;  %v4408_v1 = vmul.f32 1.442695, %v4391_v27 }
 0xaf5   : > { %7616 = vpow2.f32 %v4408_v1 }
 0xaf8   : > { %v4359_v6 = vpop.xlane.xlu1 %4358 }
 0xaf9   : > { %v4395_v23 = vsub.f32 %v9344_v33, %v4359_v6 }
 0xafc   : > { %v4574_v15 = vpop.permute.xlu1 %4573 }
 0xafd   : > { %v9410_v58 = vpop.eup %7614  ;;  %7054 = vmatpush3.bf16.msra.mxu1 %v4574_v15  ;;  %v4416_v15 = vmul.f32 1.442695, %v4395_v23 }
 0xafe   : > { %v4438_v55 = vsel %vm1437_vm2, %v9410_v58, 0.0  ;;  %7065 = vmatprep.subr.bf16.mxu1 %v10235_v53 }
 0xaff   : > { %v9415_v57 = vpop.eup %7616  ;;  %4439 = vadd.xlane.f32.xlu0 %v4438_v55 }
 0xb00   : > { %v4441_v0 = vsel %vm1437_vm2, %v9415_v57, 0.0 }
 0xb01   : > { %4442 = vadd.xlane.f32.xlu1 %v4441_v0 }
 0xb12   : > { %4667 = vrot.lane.b32.xlu1 %v8265_v13, %s10212_s28 }
 0xb21   : > { %v4350_v42 = vpop.xlane.xlu0 %4349 }
 0xb22   : > { %v4392_v19 = vsub.f32 %v9364_v26, %v4350_v42 }
 0xb24   : > { %v4410_v7 = vmul.f32 1.442695, %v4392_v19 }
 0xb25   : > { %v4356_v9 = vpop.xlane.xlu0 %4355 }
 0xb26   : > { %7618 = vpow2.f32 %v4410_v7  ;;  %v4394_v19 = vsub.f32 %v9342_v46, %v4356_v9 }
 0xb28   : > { %v4414_v7 = vmul.f32 1.442695, %v4394_v19 }
 0xb29   : > { %v4353_v27 = vpop.xlane.xlu0 %4352 }
 0xb2a   : > { %v4393_v1 = vsub.f32 %v9368_v18, %v4353_v27 }
 0xb2c   : > { %v4412_v55 = vmul.f32 1.442695, %v4393_v1 }
 0xb2d   : > { %v4362_v12 = vpop.xlane.xlu0 %4361  ;;  %v4365_v42 = vpop.xlane.xlu1 %4364 }
 0xb2e   : > { %7620 = vpow2.f32 %v4412_v55  ;;  %v4396_v23 = vsub.f32 %v9372_v25, %v4362_v12 }
 0xb2f   : > { %7622 = vpow2.f32 %v4416_v15 }
 0xb30   : > { %v9424_v51 = vpop.eup %7618  ;;  %7624 = vpow2.f32 %v4414_v7  ;;  %v4418_v1 = vmul.f32 1.442695, %v4396_v23 }
 0xb31   : > { %v4527_v0 = vpop.permute.xlu0 %4526  ;;  %v4444_v13 = vsel %vm1437_vm2, %v9424_v51, 0.0  ;;  %v4371_v27 = vpop.xlane.xlu1 %4370 }
 0xb32   : > { %7048 = vmatpush3.bf16.msra.mxu0 %v4527_v0  ;;  %4445 = vadd.xlane.f32.xlu0 %v4444_v13  ;;  %v4399_v15 = vsub.f32 %v9350_v10, %v4371_v27  ;;  %7626 = vpow2.f32 %v4418_v1  ;;  %v4397_v13 = vsub.f32 %v9376_v11, %v4365_v42 }
 0xb33   : > { %7059 = vmatprep.subr.bf16.mxu0 %v10235_v53 }
 0xb34   : > { %v4424_v0 = vmul.f32 1.442695, %v4399_v15  ;;  %v4420_v9 = vmul.f32 1.442695, %v4397_v13 }
 0xb35   : > { %v4377_v55 = vpop.xlane.xlu1 %4376 }
 0xb36   : > { %7628 = vpow2.f32 %v4424_v0  ;;  %v4401_v42 = vsub.f32 %v9386_v54, %v4377_v55 }
 0xb38   : > { %v9429_v26 = vpop.eup %7620  ;;  %v4428_v0 = vmul.f32 1.442695, %v4401_v42 }
 0xb39   : > { %v4447_v33 = vsel %vm1437_vm2, %v9429_v26, 0.0  ;;  %v9433_v18 = vpop.eup %7622 }
 0xb3a   : > { %4448 = vadd.xlane.f32.xlu1 %v4447_v33  ;;  %v4453_v6 = vsel %vm1437_vm2, %v9433_v18, 0.0  ;;  %v4383_v33 = vpop.xlane.xlu1 %4382 }
 0xb3b   : > { %v4403_v12 = vsub.f32 %v9354_v63, %v4383_v33 }
 0xb3d   : > { %v4432_v23 = vmul.f32 1.442695, %v4403_v12 }
 0xb3e   : > { %4454 = vadd.xlane.f32.xlu1 %v4453_v6 }
 0xb48   : > { %4620 = vrot.lane.b32.xlu0 %v8269_v29, %s10212_s28  ;;  %v9443_v29 = vpop.eup %7624 }
 0xb49   : > { %v4450_v10 = vsel %vm1437_vm2, %v9443_v29, 0.0  ;;  %v9449_v7 = vpop.eup %7626 }
 0xb4a   : > { %v4456_v63 = vsel %vm1437_vm2, %v9449_v7, 0.0  ;;  %v9455_v1 = vpop.eup %7628 }
 0xb4b   : > { %v4465_v33 = vsel %vm1437_vm2, %v9455_v1, 0.0 }
 0xb62   : > { %v4368_v6 = vpop.xlane.xlu0 %4367 }
 0xb63   : > { %v4398_v46 = vsub.f32 %v9348_v28, %v4368_v6 }
 0xb65   : > { %v4422_v25 = vmul.f32 1.442695, %v4398_v46 }
 0xb66   : > { %v4374_v19 = vpop.xlane.xlu0 %4373 }
 0xb67   : > { %7630 = vpow2.f32 %v4422_v25  ;;  %v4400_v11 = vsub.f32 %v9382_v24, %v4374_v19  ;;  %4451 = vadd.xlane.f32.xlu0 %v4450_v10 }
 0xb68   : > { %7632 = vpow2.f32 %v4420_v9 }
 0xb69   : > { %v4426_v27 = vmul.f32 1.442695, %v4400_v11 }
 0xb6a   : > { %v4380_v28 = vpop.xlane.xlu0 %4379 }
 0xb6b   : > { %7634 = vpow2.f32 %v4426_v27  ;;  %v4402_v15 = vsub.f32 %v9352_v44, %v4380_v28  ;;  %4457 = vadd.xlane.f32.xlu0 %v4456_v63  ;;  %v4389_v63 = vpop.xlane.xlu1 %4388 }
 0xb6c   : > { %7636 = vpow2.f32 %v4432_v23 }
 0xb6d   : > { %v4430_v13 = vmul.f32 1.442695, %v4402_v15 }
 0xb6e   : > { %v4386_v24 = vpop.xlane.xlu0 %4385 }
 0xb6f   : > { %7638 = vpow2.f32 %v4430_v13  ;;  %v4404_v54 = vsub.f32 %v9390_v40, %v4386_v24  ;;  %4466 = vadd.xlane.f32.xlu0 %v4465_v33  ;;  %v10245_v33 = vpack.i.bf16 %v8951_v34, %v8949_v37 }
 0xb70   : > { %7640 = vpow2.f32 %v4428_v0 }
 0xb71   : > { %v9461_v55 = vpop.eup %7630  ;;  %v4434_v6 = vmul.f32 1.442695, %v4404_v54 }
 0xb72   : > { %v4462_v46 = vsel %vm1437_vm2, %v9461_v55, 0.0  ;;  %v9465_v44 = vpop.eup %7632 }
 0xb73   : > { %7642 = vpow2.f32 %v4434_v6  ;;  %4463 = vadd.xlane.f32.xlu1 %v4462_v46  ;;  %v4459_v40 = vsel %vm1437_vm2, %v9465_v44, 0.0 }
 0xb75   : > { %v9467_v9 = vpop.eup %7634 }
 0xb76   : > { %v4468_v12 = vsel %vm1437_vm2, %v9467_v9, 0.0  ;;  %v9473_v25 = vpop.eup %7636 }
 0xb77   : > { %4469 = vadd.xlane.f32.xlu0 %v4468_v12  ;;  %4460 = vadd.xlane.f32.xlu1 %v4459_v40  ;;  %v4477_v10 = vsel %vm1437_vm2, %v9473_v25, 0.0 }
 0xb79   : > { %v9475_v19 = vpop.eup %7638 }
 0xb7a   : > { %v4474_v11 = vsel %vm1437_vm2, %v9475_v19, 0.0  ;;  %v9481_v42 = vpop.eup %7640 }
 0xb7b   : > { %4478 = vadd.xlane.f32.xlu0 %v4477_v10  ;;  %4475 = vadd.xlane.f32.xlu1 %v4474_v11  ;;  %v4471_v28 = vsel %vm1437_vm2, %v9481_v42, 0.0 }
 0xb7d   : > { %v9483_v23 = vpop.eup %7642 }
 0xb7e   : > { %v4480_v27 = vsel %vm1437_vm2, %v9483_v23, 0.0 }
 0xb7f   : > { %4481 = vadd.xlane.f32.xlu0 %v4480_v27  ;;  %4472 = vadd.xlane.f32.xlu1 %v4471_v28 }
 0xb8c   : > { %v4440_v15 = vpop.xlane.xlu0 %4439 }
 0xb8d   : > { %7644 = vrcp.f32 %v4440_v15 }
 0xb8e   : > { %v4443_v0 = vpop.xlane.xlu1 %4442 }
 0xb8f   : > { %7646 = vrcp.f32 %v4443_v0 }
 0xb90   : > { %4761 = vrot.lane.b32.xlu1 %v8280_v38, %s10212_s28  ;;  %v4405_v38 = vsub.f32 %v9394_v62, %v4389_v63 }
 0xb94   : > { %4808 = vrot.lane.b32.xlu1 %v8299_v52, %s10212_s28 }
 0xb95   : > { %4714 = vrot.lane.b32.xlu0 %v8284_v32, %s10212_s28  ;;  %v4436_v32 = vmul.f32 1.442695, %v4405_v38 }
 0xb97   : > { %v7645_v13 = vpop.eup %7644  ;;  %7648 = vpow2.f32 %v4436_v32 }
 0xb98   : > { %v4502_v54 = vmul.f32 %v7645_v13, %v9410_v58  ;;  %v4668_v58 = vpop.permute.xlu1 %4667 }
 0xb99   : > { %v7647_v24 = vpop.eup %7646  ;;  %7191 = vrot.lane.b32.xlu0 %v10245_v33, %s10212_s28 }
 0xb9a   : > { %v4503_v6 = vmul.f32 %v7647_v24, %v9415_v57 }
 0xb9c   : > { %v4518_v46 = vpack.c.bf16 %v4503_v6, %v4502_v54 }
 0xb9d   : > { %7201 = vrot.lane.b32.xlu0 %v7200_v20, %s7858_s26 }
 0xb9e   : > { %7050 = vmatmul.mubr.msk.bf16.vlgmr.msra.gmra.mrb[136].mxu0 %vm1437_vm2, %v4518_v46 }
 0xb9f   : > { %7061 = vmatprep.mubr.msk.bf16.mxu0 %vm7856_vm0, %v10235_v53 }
 0xba1   : > { %v9509_v52 = vpop.eup %7648 }
 0xba2   : > { %v4483_v37 = vsel %vm1437_vm2, %v9509_v52, 0.0 }
 0xbb8   : > { %4484 = vadd.xlane.f32.xlu1 %v4483_v37 }
 0xbbf   : > { %v4446_v34 = vpop.xlane.xlu0 %4445 }
 0xbc0   : > { %7650 = vrcp.f32 %v4446_v34 }
 0xbc3   : > { %v4621_v57 = vpop.permute.xlu0 %4620 }
 0xbc4   : > { %7060 = vmatpush3.bf16.msra.mxu0 %v4621_v57 }
 0xbc5   : > { %7071 = vmatprep.subr.bf16.mxu0 %v10235_v53 }
 0xbc7   : > { %v4449_v17 = vpop.xlane.xlu1 %4448 }
 0xbc8   : > { %7652 = vrcp.f32 %v4449_v17 }
 0xbc9   : > { %4855 = vrot.lane.b32.xlu1 %v8295_v4, %s10212_s28 }
 0xbca   : > { %v7651_v20 = vpop.eup %7650 }
 0xbcb   : > { %v4504_v12 = vmul.f32 %v7651_v20, %v9424_v51  ;;  %v4455_v4 = vpop.xlane.xlu1 %4454 }
 0xbcc   : > { %7654 = vrcp.f32 %v4455_v4 }
 0xbcd   : > { %7196 = vrot.lane.b32.xlu1 %v10246_v35, %s10212_s28 }
 0xbd1   : > { %7206 = vrot.lane.b32.xlu1 %v7205_v14, %s7858_s26 }
 0xbd2   : > { %v7653_v62 = vpop.eup %7652 }
 0xbd3   : > { %v4505_v40 = vmul.f32 %v7653_v62, %v9429_v26 }
 0xbd5   : > { %v4519_v10 = vpack.c.bf16 %v4505_v40, %v4504_v12 }
 0xbd6   : > { %v7655_v41 = vpop.eup %7654 }
 0xbd7   : > { %7056 = vmatmul.mubr.msk.bf16.vlgmr.msra.gmra.mrb[136].mxu1 %vm1437_vm2, %v4519_v10  ;;  %v4507_v14 = vmul.f32 %v7655_v41, %v9433_v18  ;;  %v10247_v41 = vmov 0  }
 0xbd8   : > { %7066 = vmatpush3.bf16.msra.mxu1 %v4668_v58  ;;  %7067 = vmatprep.mubr.msk.bf16.mxu1 %vm7856_vm0, %v10235_v53 }
 0xbd9   : > { %7077 = vmatprep.subr.bf16.mxu1 %v10235_v53 }
 0xbf4   : > { %v4452_v36 = vpop.xlane.xlu0 %4451 }
 0xbf5   : > { %7656 = vrcp.f32 %v4452_v36 }
 0xbf8   : > { %v4458_v2 = vpop.xlane.xlu0 %4457 }
 0xbfc   : > { %v4467_v26 = vpop.xlane.xlu0 %4466 }
 0xbff   : > { %v7657_v60 = vpop.eup %7656 }
 0xc00   : > { %v4506_v51 = vmul.f32 %v7657_v60, %v9443_v29  ;;  %v4464_v11 = vpop.xlane.xlu1 %4463 }
 0xc01   : > { %7658 = vrcp.f32 %v4464_v11  ;;  %v10248_v11 = vpack.i.bf16 %v8963_v3, %v8961_v30  ;;  %v7344_v30 = vld [vmem:[%s10190_s4 + $0x10] sm:$0xff]   ;;  %v7345_v3 = vld [vmem:[%s10190_s4 + $0x18] sm:$0xff]  }
 0xc02   : > { %v4520_v27 = vpack.c.bf16 %v4507_v14, %v4506_v51  ;;  %7660 = vrcp.f32 %v4467_v26 }
 0xc03   : > { %7662 = vrcp.f32 %v4458_v2 }
 0xc04   : > { %v4470_v28 = vpop.xlane.xlu0 %4469  ;;  %7062 = vmatmul.mubr.msk.bf16.vlgmr.msra.gmra.mrb[140].mxu0 %vm1437_vm2, %v4520_v27  ;;  %v4461_v63 = vpop.xlane.xlu1 %4460  ;;  %v7349_v27 = vld [vmem:[%s10190_s4 + $0x38] sm:$0xff]  }
 0xc05   : > { %7073 = vmatprep.mubr.msk.bf16.mxu0 %vm7856_vm0, %v10235_v53  ;;  %7664 = vrcp.f32 %v4461_v63 }
 0xc08   : > { %v4479_v15 = vpop.xlane.xlu0 %4478  ;;  %v4476_v0 = vpop.xlane.xlu1 %4475 }
 0xc09   : > { %7666 = vrcp.f32 %v4479_v15 }
 0xc0a   : > { %7668 = vrcp.f32 %v4476_v0 }
 0xc0b   : > { %v7659_v18 = vpop.eup %7658  ;;  %7670 = vrcp.f32 %v4470_v28 }
 0xc0c   : > { %v4482_v29 = vpop.xlane.xlu0 %4481  ;;  %v4473_v13 = vpop.xlane.xlu1 %4472  ;;  %v4510_v54 = vmul.f32 %v7659_v18, %v9461_v55 }
 0xc0d   : > { %v7661_v24 = vpop.eup %7660  ;;  %7672 = vrcp.f32 %v4473_v13 }
 0xc0e   : > { %v7663_v33 = vpop.eup %7662  ;;  %v4511_v46 = vmul.f32 %v7661_v24, %v9455_v1  ;;  %7674 = vrcp.f32 %v4482_v29  ;;  %v10250_v29 = vld [vmem:[#allocation22_spill] sm:$0xff] }
 0xc0f   : > { %v7665_v6 = vpop.eup %7664  ;;  %v4508_v37 = vmul.f32 %v7663_v33, %v9449_v7  ;;  %v10251_v13 = vpack.i.bf16 %v8969_v31, %v10250_v29  ;;  %v10266_v29 = vld [vmem:[#allocation29_spill] sm:$0xff] }
 0xc10   : > { %v4715_v38 = vpop.permute.xlu0 %4714  ;;  %v4762_v32 = vpop.permute.xlu1 %4761  ;;  %v4509_v34 = vmul.f32 %v7665_v6, %v9465_v44  ;;  %v4522_v58 = vpack.c.bf16 %v4511_v46, %v4510_v54 }
 0xc11   : > { %7072 = vmatpush3.bf16.msra.mxu0 %v4715_v38 }
 0xc12   : > { %7083 = vmatprep.subr.bf16.mxu0 %v10235_v53  ;;  %v4521_v17 = vpack.c.bf16 %v4509_v34, %v4508_v37  ;;  %v10253_v37 = vld [vmem:[#allocation23_spill] sm:$0xff] }
 0xc13   : > { %v7667_v57 = vpop.eup %7666 }
 0xc14   : > { %v7669_v35 = vpop.eup %7668  ;;  %7074 = vmatmul.mubr.msk.bf16.vlgmr.msra.gmra.mrb[144].mxu0 %vm1437_vm2, %v4522_v58  ;;  %v4809_v55 = vpop.permute.xlu1 %4808  ;;  %7068 = vmatmul.mubr.msk.bf16.vlgmr.msra.gmra.mrb[140].mxu1 %vm1437_vm2, %v4521_v17  ;;  %v4515_v20 = vmul.f32 %v7667_v57, %v9473_v25 }
 0xc15   : > { %7084 = vmatpush3.bf16.msra.mxu0 %v4809_v55  ;;  %v7671_v1 = vpop.eup %7670  ;;  %v4514_v7 = vmul.f32 %v7669_v35, %v9475_v19  ;;  %7078 = vmatpush3.bf16.msra.mxu1 %v4762_v32  ;;  %v7192_v38 = vpop.permute.xlu0 %7191  ;;  %v10252_v32 = vld [vmem:[#allocation24_spill] sm:$0xff]  ;;  %v10255_v55 = vld [vmem:[#allocation7_spill] sm:$0xff] }
 0xc16   : > { %7079 = vmatprep.mubr.msk.bf16.mxu1 %vm7856_vm0, %v10235_v53  ;;  %7085 = vmatprep.mubr.msk.bf16.mxu0 %vm7856_vm0, %v10235_v53  ;;  %v4512_v62 = vmul.f32 %v7671_v1, %v9467_v9  ;;  %v10254_v34 = vpack.i.bf16 %v10252_v32, %v10253_v37  ;;  %v7194_v16 = vunpack.i.h.bf16 %v7192_v38  ;;  %v7193_v47 = vunpack.i.l.bf16 %v7192_v38  ;;  %v10270_v32 = vld [vmem:[#allocation8_spill] sm:$0xff] }
 0xc17   : > { %7089 = vmatprep.subr.bf16.mxu1 %v10235_v53  ;;  %v7673_v44 = vpop.eup %7672  ;;  %v4524_v40 = vpack.c.bf16 %v4515_v20, %v4514_v7  ;;  %v10256_v20 = vld [vmem:[#allocation6_spill] sm:$0xff] }
 0xc18   : > { %v4513_v12 = vmul.f32 %v7673_v44, %v9481_v42  ;;  %v7675_v4 = vpop.eup %7674  ;;  %v5095_v1 = vsel %vm1060_vm1, %v10255_v55, %v7194_v16  ;;  %v5094_v7 = vsel %vm1060_vm1, %v10256_v20, %v7193_v47 }
 0xc19   : > { %v4516_v9 = vmul.f32 %v7675_v4, %v9483_v23  ;;  %v7342_v23 = vld [vmem:[%s10190_s4] sm:$0xff]   ;;  %v7202_v31 = vpop.permute.xlu0 %7201 }
 0xc1a   : > { %v4523_v10 = vpack.c.bf16 %v4513_v12, %v4512_v62  ;;  %7095 = vmatprep.subr.bf16.mxu0 %v7342_v23  ;;  %v7203_v58 = vunpack.i.l.bf16 %v7202_v31 }
 0xc1c   : > { %7086 = vmatmul.mubr.msk.bf16.vlgmr.msra.gmra.mrb[148].mxu0 %vm1437_vm2, %v4524_v40  ;;  %7080 = vmatmul.mubr.msk.bf16.vlgmr.msra.gmra.mrb[144].mxu1 %vm1437_vm2, %v4523_v10  ;;  %v5111_v5 = vsel %vm5110_vm3, %v5094_v7, %v7203_v58 }
 0xc1d   : > { %7091 = vmatprep.mubr.msk.bf16.mxu1 %vm7856_vm0, %v10235_v53  ;;  %7096 = vmatpush3.bf16.msra.mxu0 %v7342_v23  ;;  %v10260_v23 = vld [vmem:[#allocation26_spill] sm:$0xff] }
 0xc45   : > { %v4485_v25 = vpop.xlane.xlu1 %4484 }
 0xc46   : > { %7676 = vrcp.f32 %v4485_v25 }
 0xc49   : > { %v4856_v19 = vpop.permute.xlu1 %4855 }
 0xc4a   : > { %7090 = vmatpush3.bf16.msra.mxu1 %v4856_v19 }
 0xc50   : > { %v7677_v36 = vpop.eup %7676 }
 0xc51   : > { %v4517_v42 = vmul.f32 %v7677_v36, %v9509_v52  ;;  %v7343_v52 = vld [vmem:[%s10190_s4 + $0x8] sm:$0xff]  }
 0xc52   : > { %7097 = vmatprep.subr.bf16.mxu0 %v7343_v52 }
 0xc53   : > { %v4525_v2 = vpack.c.bf16 %v4517_v42, %v4516_v9  ;;  %7098 = vmatpush3.bf16.msra.mxu0 %v7343_v52  ;;  %v10261_v52 = vld [vmem:[#allocation25_spill] sm:$0xff] }
 0xc54   : > { %7099 = vmatprep.subr.bf16.mxu0 %v7344_v30 }
 0xc55   : > { %7092 = vmatmul.mubr.msk.bf16.vlgmr.msra.gmra.mrb[148].mxu1 %vm1437_vm2, %v4525_v2 }
 0xc56   : > { %5706 = vmatprep.mubr.bf16.mxu1 %v10247_v41 }
 0xc57   : > { %7100 = vmatpush3.bf16.msra.mxu0 %v7344_v30  ;;  %v10262_v30 = vpack.i.bf16 %v10260_v23, %v10261_v52 }
 0xc58   : > { %7101 = vmatprep.subr.bf16.mxu0 %v7345_v3 }
 0xc5b   : > { %7102 = vmatpush3.bf16.msra.mxu0 %v7345_v3 }
 0xc5c   : > { %7103 = vmatprep.subr.bf16.mxu0 %v7346_v45 }
 0xc5f   : > { %7104 = vmatpush3.bf16.msra.mxu0 %v7346_v45 }
 0xc60   : > { %7105 = vmatprep.subr.bf16.mxu0 %v7347_v39 }
 0xc63   : > { %7106 = vmatpush3.bf16.msra.mxu0 %v7347_v39 }
 0xc71   : > { %v4566_v60 = vpop.f32.mrb[136].mxu0 }
 0xc72   : > { %v7051_v14 = vpop.f32.mrb[137].mxu0 }
 0xc73   : > { %v4569_v51 = vpop.f32.mrb[138].mxu0 }
 0xc74   : > { %v7210_v53 = vpack.i.bf16 %v4569_v51, %v4566_v60  ;;  %v7052_v26 = vpop.f32.mrb[139].mxu0  ;;  %v10257_v51 = vld [vmem:[#allocation28_spill] sm:$0xff] }
 0xc76   : > { %7211 = vrot.lane.b32.xlu0 %v7210_v53, %s7857_s20  ;;  %v10258_v53 = vld [vmem:[#allocation27_spill] sm:$0xff] }
 0xc77   : > { %v10259_v26 = vpack.i.bf16 %v10257_v51, %v10258_v53 }
 0xc7a   : > { %7221 = vrot.lane.b32.xlu0 %v10248_v11, %s10212_s28  ;;  %s7794_s28 = sshll.u32 %s7860_s17, 4  ;;  %s7795_s28 = int_to_ptr.vmem [resolvable:$false] %s7794_s28 }
 0xc7e   : > { %7231 = vrot.lane.b32.xlu0 %v7230_v8, %s7858_s26  ;;  %v7348_v8 = vld [vmem:[%s10190_s4 + $0x30] sm:$0xff]  }
 0xc7f   : > { %7107 = vmatprep.subr.bf16.mxu0 %v7348_v8 }
 0xc80   : > { %7108 = vmatpush3.bf16.msra.mxu0 %v7348_v8 }
 0xc81   : > { %7109 = vmatprep.subr.bf16.mxu0 %v7349_v27 }
 0xc84   : > { %7110 = vmatpush3.bf16.msra.mxu0 %v7349_v27 }
 0xcaa   : > { %v4613_v28 = vpop.f32.mrb[136].mxu1 }
 0xcab   : > { %v7057_v63 = vpop.f32.mrb[137].mxu1 }
 0xcac   : > { %v4616_v15 = vpop.f32.mrb[138].mxu1 }
 0xcad   : > { %v7215_v0 = vpack.i.bf16 %v4616_v15, %v4613_v28  ;;  %v7058_v18 = vpop.f32.mrb[139].mxu1  ;;  %v10263_v15 = vpack.i.bf16 %v9330_v21, %v9328_v43  ;;  %v7197_v43 = vpop.permute.xlu1 %7196 }
 0xcae   : > { %v10265_v18 = vld [vmem:[#allocation30_spill] sm:$0xff] }
 0xcaf   : > { %7216 = vrot.lane.b32.xlu1 %v7215_v0, %s7857_s20  ;;  %v10264_v0 = vpack.i.bf16 %v9324_v48, %v9322_v22 }
 0xcb1   : > { %v7207_v21 = vpop.permute.xlu1 %7206 }
 0xcb2   : > { %v7209_v22 = vunpack.i.h.bf16 %v7207_v21  ;;  %v7208_v48 = vunpack.i.l.bf16 %v7207_v21 }
 0xcb3   : > { %7226 = vrot.lane.b32.xlu1 %v10251_v13, %s10249_s29  ;;  %v10267_v13 = vpack.i.bf16 %v10265_v18, %v10266_v29  ;;  %v10276_v18 = vld [vmem:[#allocation14_spill] sm:$0xff] }
 0xcb7   : > { %7236 = vrot.lane.b32.xlu1 %v7235_v50, %s7858_s26  ;;  %v7204_v50 = vunpack.i.h.bf16 %v7202_v31 }
 0xcd7   : > { %v4660_v24 = vpop.f32.mrb[140].mxu0 }
 0xcd8   : > { %v7063_v33 = vpop.f32.mrb[141].mxu0 }
 0xcd9   : > { %v4663_v54 = vpop.f32.mrb[142].mxu0  ;;  %v7199_v33 = vunpack.i.h.bf16 %v7197_v43 }
 0xcda   : > { %v7240_v6 = vpack.i.bf16 %v4663_v54, %v4660_v24  ;;  %v7064_v46 = vpop.f32.mrb[143].mxu0  ;;  %v10268_v24 = vpack.i.bf16 %v9360_v61, %v9358_v59  ;;  %v7198_v54 = vunpack.i.l.bf16 %v7197_v43 }
 0xcdb   : > { %v10269_v46 = vld [vmem:[#allocation9_spill] sm:$0xff] }
 0xcdc   : > { %7241 = vrot.lane.b32.xlu0 %v7240_v6, %s7857_s20  ;;  %v5097_v38 = vsel %vm1060_vm1, %v10269_v46, %v7199_v33  ;;  %v5096_v37 = vsel %vm1060_vm1, %v10270_v32, %v7198_v54 }
 0xcdd   : > { %v5113_v16 = vsel %vm5110_vm3, %v5096_v37, %v7208_v48  ;;  %v5114_v59 = vsel %vm5110_vm3, %v5097_v38, %v7209_v22 }
 0xce0   : > { %7251 = vrot.lane.b32.xlu0 %v10254_v34, %s10249_s29 }
 0xce4   : > { %7261 = vrot.lane.b32.xlu0 %v7260_v49, %s7858_s26  ;;  %v5112_v49 = vsel %vm5110_vm3, %v5095_v1, %v7204_v50 }
 0xce7   : > { %v4754_v57 = vpop.f32.mrb[144].mxu0  ;;  %v4707_v17 = vpop.f32.mrb[140].mxu1 }
 0xce8   : > { %v7212_v35 = vpop.permute.xlu0 %7211  ;;  %v7069_v12 = vpop.f32.mrb[141].mxu1 }
 0xce9   : > { %v7214_v44 = vunpack.i.h.bf16 %v7212_v35  ;;  %v7213_v62 = vunpack.i.l.bf16 %v7212_v35  ;;  %v7075_v56 = vpop.f32.mrb[145].mxu0  ;;  %v4710_v40 = vpop.f32.mrb[142].mxu1 }
 0xcea   : > { %v4757_v10 = vpop.f32.mrb[146].mxu0  ;;  %v7245_v25 = vpack.i.bf16 %v4710_v40, %v4707_v17  ;;  %v7070_v4 = vpop.f32.mrb[143].mxu1  ;;  %v10272_v40 = vld [vmem:[#allocation10_spill] sm:$0xff] }
 0xceb   : > { %v7270_v19 = vpack.i.bf16 %v4757_v10, %v4754_v57  ;;  %v7076_v36 = vpop.f32.mrb[147].mxu0  ;;  %v5128_v9 = vsel %vm5127_vm4, %v5111_v5, %v7213_v62  ;;  %v5129_v42 = vsel %vm5127_vm4, %v5112_v49, %v7214_v44  ;;  %v10271_v5 = vld [vmem:[#allocation11_spill] sm:$0xff] }
 0xcec   : > { %v5144_v2 = vpack.c.bf16 %v5129_v42, %v5128_v9  ;;  %7246 = vrot.lane.b32.xlu1 %v7245_v25, %s7857_s20  ;;  %v7222_v1 = vpop.permute.xlu0 %7221 }
 0xced   : > { %7271 = vrot.lane.b32.xlu0 %v7270_v19, %s7857_s20  ;;  %v7224_v7 = vunpack.i.h.bf16 %v7222_v1  ;;  %v7223_v44 = vunpack.i.l.bf16 %v7222_v1 }
 0xcee   : > { %7111 = vmatprep.mubr.bf16.mxu0 %v5144_v2 }
 0xcef   : > { %v4848_v60 = vpop.f32.mrb[148].mxu0  ;;  %v4801_v14 = vpop.f32.mrb[144].mxu1  ;;  %v5099_v49 = vsel %vm1060_vm1, %v10271_v5, %v7224_v7  ;;  %v5098_v10 = vsel %vm1060_vm1, %v10272_v40, %v7223_v44  ;;  %v10277_v44 = vld [vmem:[#allocation19_spill] sm:$0xff]  ;;  %v10279_v5 = vld [vmem:[#allocation17_spill] sm:$0xff]  ;;  %v10280_v40 = vld [vmem:[#allocation16_spill] sm:$0xff] }
 0xcf0   : > { %v7087_v11 = vpop.f32.mrb[149].mxu0  ;;  %7256 = vrot.lane.b32.xlu1 %v10262_v30, %s10249_s29  ;;  %v7081_v3 = vpop.f32.mrb[145].mxu1 }
 0xcf1   : > { %7281 = vrot.lane.b32.xlu0 %v10259_v26, %s10249_s29  ;;  %v4804_v45 = vpop.f32.mrb[146].mxu1  ;;  %v4851_v39 = vpop.f32.mrb[150].mxu0 }
 0xcf2   : > { %v7275_v8 = vpack.i.bf16 %v4804_v45, %v4801_v14  ;;  %v7300_v27 = vpack.i.bf16 %v4851_v39, %v4848_v60  ;;  %v7082_v28 = vpop.f32.mrb[147].mxu1  ;;  %v7088_v63 = vpop.f32.mrb[151].mxu0 }
 0xcf3   : > { %v7232_v20 = vpop.permute.xlu0 %7231  ;;  %v10274_v28 = vld [vmem:[#allocation12_spill] sm:$0xff] }
 0xcf4   : > { %7266 = vrot.lane.b32.xlu1 %v10264_v0, %s7858_s26  ;;  %v7234_v62 = vunpack.i.h.bf16 %v7232_v20  ;;  %v7233_v12 = vunpack.i.l.bf16 %v7232_v20 }
 0xcf5   : > { %7291 = vrot.lane.b32.xlu0 %v10263_v15, %s7858_s26  ;;  %v10275_v15 = vld [vmem:[#allocation15_spill] sm:$0xff] }
 0xcf6   : > { %v5115_v4 = vsel %vm5110_vm3, %v5098_v10, %v7233_v12  ;;  %v5116_v36 = vsel %vm5110_vm3, %v5099_v49, %v7234_v62  ;;  %v10278_v12 = vld [vmem:[#allocation18_spill] sm:$0xff] }
 0xcf8   : > { %7276 = vrot.lane.b32.xlu1 %v7275_v8, %s7857_s20  ;;  %v10273_v8 = vld [vmem:[#allocation13_spill] sm:$0xff] }
 0xcf9   : > { %7301 = vrot.lane.b32.xlu0 %v7300_v27, %s7857_s20 }
 0xcfc   : > { %7286 = vrot.lane.b32.xlu1 %v10267_v13, %s10249_s29  ;;  %s10087_s29 = scalar_lea.vmem [#allocation2], %s6308_s18  ;;  %s7796_s18 = scalar_lea.vmem %s7795_s28, 4096 }
 0xd00   : > { %7296 = vrot.lane.b32.xlu1 %v10268_v24, %s7858_s26  ;;  %s6242_s26 = sshll.u32 %s10087_s29, 4  ;;  %s10138_s26 = int_to_ptr.vmem [resolvable:$true] %s6242_s26 }
 0xd01   : > { %s7790_s30 = scalar_lea.vmem %s10138_s26, 2048  ;;  %p7797_p0 = scmp.lt.s32.totalorder %s10138_s26, %s7795_s28 }
 0xd02   : > { %p7791_p11 = scmp.ne.s32.totalorder %s10138_s26, %s7790_s30  ;;  %p7798_p1 = scmp.lt.s32.totalorder %s7796_s18, %s7790_s30 }
 0xd04   : > { %p7792_p12 = pnand %p7791_p11, %p7966_p5  ;;  %p7799_p2 = por %p7798_p1, %p7797_p0 }
 0xd06   : > { %p7793_p13 = pneg %p7792_p12 }
 0xd08   : > { %p7800_p3 = pnand %p7799_p2, %p7793_p13 }
 0xd21   : > { %v7217_v6 = vpop.permute.xlu1 %7216 }
 0xd22   : > { %v7219_v34 = vunpack.i.h.bf16 %v7217_v6  ;;  %v7218_v31 = vunpack.i.l.bf16 %v7217_v6 }
 0xd24   : > { %v5131_v61 = vsel %vm5127_vm4, %v5114_v59, %v7219_v34  ;;  %v5130_v47 = vsel %vm5127_vm4, %v5113_v16, %v7218_v31 }
 0xd25   : > { %v5145_v50 = vpack.c.bf16 %v5131_v61, %v5130_v47  ;;  %v7227_v60 = vpop.permute.xlu1 %7226 }
 0xd26   : > { %v7229_v26 = vunpack.i.h.bf16 %v7227_v60  ;;  %v7228_v11 = vunpack.i.l.bf16 %v7227_v60 }
 0xd27   : > { %7112 = vmatmul.mubr.bf16.vlgmr.msra.gmra.mrb[152].mxu0 %v5145_v50 }
 0xd28   : > { %v4895_v58 = vpop.f32.mrb[148].mxu1  ;;  %v5101_v27 = vsel %vm1060_vm1, %v10273_v8, %v7229_v26  ;;  %v5100_v63 = vsel %vm1060_vm1, %v10274_v28, %v7228_v11 }
 0xd29   : > { %v7093_v57 = vpop.f32.mrb[149].mxu1  ;;  %v7237_v51 = vpop.permute.xlu1 %7236 }
 0xd2a   : > { %v4898_v17 = vpop.f32.mrb[150].mxu1  ;;  %v7239_v30 = vunpack.i.h.bf16 %v7237_v51  ;;  %v7238_v3 = vunpack.i.l.bf16 %v7237_v51 }
 0xd2b   : > { %v7305_v35 = vpack.i.bf16 %v4898_v17, %v4895_v58  ;;  %v7094_v55 = vpop.f32.mrb[151].mxu1 }
 0xd2c   : > { %v5117_v22 = vsel %vm5110_vm3, %v5100_v63, %v7238_v3  ;;  %v5118_v48 = vsel %vm5110_vm3, %v5101_v27, %v7239_v30 }
 0xd2d   : > { %7306 = vrot.lane.b32.xlu1 %v7305_v35, %s7857_s20  ;;  %s6454_s20 = sshll.u32 %s7949_s25, 11  ;;  %s10145_s25 = scalar_lea.sflag [#allocation3], %s407_s16 }
 0xd2e   : > { %s10136_s15 = scalar_lea.hbm %s10198_s12, %s6454_s20 }
 0xd4e   : > { %v7242_v56 = vpop.permute.xlu0 %7241 }
 0xd4f   : > { %v7244_v25 = vunpack.i.h.bf16 %v7242_v56  ;;  %v7243_v19 = vunpack.i.l.bf16 %v7242_v56 }
 0xd51   : > { %v5132_v9 = vsel %vm5127_vm4, %v5115_v4, %v7243_v19  ;;  %v5133_v42 = vsel %vm5127_vm4, %v5116_v36, %v7244_v25 }
 0xd52   : > { %v5146_v2 = vpack.c.bf16 %v5133_v42, %v5132_v9  ;;  %v7252_v14 = vpop.permute.xlu0 %7251 }
 0xd53   : > { %v7254_v23 = vunpack.i.h.bf16 %v7252_v14  ;;  %v7253_v52 = vunpack.i.l.bf16 %v7252_v14 }
 0xd54   : > { %7115 = vmatprep.mubr.bf16.mxu0 %v5146_v2 }
 0xd55   : > { %v5103_v0 = vsel %vm1060_vm1, %v10275_v15, %v7254_v23  ;;  %v5102_v29 = vsel %vm1060_vm1, %v10276_v18, %v7253_v52  ;;  %v10281_v15 = vld [vmem:[#allocation21_spill] sm:$0xff]  ;;  %v10282_v18 = vld [vmem:[#allocation20_spill] sm:$0xff] }
 0xd56   : > { %v7262_v53 = vpop.permute.xlu0 %7261 }
 0xd57   : > { %v7264_v45 = vunpack.i.h.bf16 %v7262_v53  ;;  %v7263_v39 = vunpack.i.l.bf16 %v7262_v53 }
 0xd59   : > { %v5119_v6 = vsel %vm5110_vm3, %v5102_v29, %v7263_v39  ;;  %v5120_v46 = vsel %vm5110_vm3, %v5103_v0, %v7264_v45 }
 0xd5e   : > { %v7247_v24 = vpop.permute.xlu1 %7246 }
 0xd5f   : > { %v7272_v13 = vpop.permute.xlu0 %7271  ;;  %v7249_v33 = vunpack.i.h.bf16 %v7247_v24  ;;  %v7248_v54 = vunpack.i.l.bf16 %v7247_v24 }
 0xd60   : > { %v7274_v43 = vunpack.i.h.bf16 %v7272_v13  ;;  %v7273_v21 = vunpack.i.l.bf16 %v7272_v13 }
 0xd61   : > { %v5134_v38 = vsel %vm5127_vm4, %v5117_v22, %v7248_v54  ;;  %v5135_v32 = vsel %vm5127_vm4, %v5118_v48, %v7249_v33  ;;  %v9706_v48 = vld [vmem:[%s10191_s5] ss:$0 sm:$0xff] }
 0xd62   : > { %v5136_v37 = vsel %vm5127_vm4, %v5119_v6, %v7273_v21  ;;  %v5137_v34 = vsel %vm5127_vm4, %v5120_v46, %v7274_v43  ;;  %v7257_v16 = vpop.permute.xlu1 %7256  ;;  %v5147_v59 = vpack.c.bf16 %v5135_v32, %v5134_v38 }
 0xd63   : > { %v7282_v31 = vpop.permute.xlu0 %7281  ;;  %v5148_v61 = vpack.c.bf16 %v5137_v34, %v5136_v37  ;;  %v7259_v58 = vunpack.i.h.bf16 %v7257_v16  ;;  %v7258_v57 = vunpack.i.l.bf16 %v7257_v16 }
 0xd64   : > { %7116 = vmatmul.mubr.bf16.gmra.mrb[156].mxu0 %v5147_v59  ;;  %v7284_v47 = vunpack.i.h.bf16 %v7282_v31  ;;  %v7283_v50 = vunpack.i.l.bf16 %v7282_v31  ;;  %v7774_v31 = vld [vmem:[%s7980_s19] sm:$0xff] }
 0xd65   : > { %7119 = vmatprep.mubr.bf16.mxu0 %v5148_v61  ;;  %v5105_v49 = vsel %vm1060_vm1, %v10279_v5, %v7259_v58  ;;  %v5104_v10 = vsel %vm1060_vm1, %v10280_v40, %v7258_v57  ;;  %v7775_v61 = vld [vmem:[%s7980_s19 + $0x8] sm:$0xff] }
 0xd66   : > { %v7267_v35 = vpop.permute.xlu1 %7266  ;;  %v5107_v62 = vsel %vm1060_vm1, %v10277_v44, %v7284_v47  ;;  %v5106_v56 = vsel %vm1060_vm1, %v10278_v12, %v7283_v50  ;;  %v7776_v50 = vld [vmem:[%s7980_s19 + $0x10] sm:$0xff]  ;;  %v7778_v12 = vld [vmem:[%s7980_s19 + $0x20] sm:$0xff]  ;;  %v7779_v40 = vld [vmem:[%s7980_s19 + $0x28] sm:$0xff] }
 0xd67   : > { %v7292_v17 = vpop.permute.xlu0 %7291  ;;  %v7269_v20 = vunpack.i.h.bf16 %v7267_v35  ;;  %v7268_v7 = vunpack.i.l.bf16 %v7267_v35 }
 0xd68   : > { %v7294_v55 = vunpack.i.h.bf16 %v7292_v17  ;;  %v7293_v1 = vunpack.i.l.bf16 %v7292_v17  ;;  %v7777_v17 = vld [vmem:[%s7980_s19 + $0x18] sm:$0xff] }
 0xd69   : > { %v5121_v14 = vsel %vm5110_vm3, %v5104_v10, %v7268_v7  ;;  %v5122_v51 = vsel %vm5110_vm3, %v5105_v49, %v7269_v20 }
 0xd6a   : > { %v7277_v19 = vpop.permute.xlu1 %7276  ;;  %v5123_v2 = vsel %vm5110_vm3, %v5106_v56, %v7293_v1  ;;  %v5124_v60 = vsel %vm5110_vm3, %v5107_v62, %v7294_v55 }
 0xd6b   : > { %v7302_v25 = vpop.permute.xlu0 %7301  ;;  %v7279_v9 = vunpack.i.h.bf16 %v7277_v19  ;;  %v7278_v42 = vunpack.i.l.bf16 %v7277_v19 }
 0xd6c   : > { %v7304_v4 = vunpack.i.h.bf16 %v7302_v25  ;;  %v7303_v36 = vunpack.i.l.bf16 %v7302_v25  ;;  %v7780_v25 = vld [vmem:[%s7980_s19 + $0x30] sm:$0xff] }
 0xd6d   : > { %v5138_v53 = vsel %vm5127_vm4, %v5121_v14, %v7278_v42  ;;  %v5139_v26 = vsel %vm5127_vm4, %v5122_v51, %v7279_v9 }
 0xd6e   : > { %v5140_v11 = vsel %vm5127_vm4, %v5123_v2, %v7303_v36  ;;  %v5141_v23 = vsel %vm5127_vm4, %v5124_v60, %v7304_v4  ;;  %v5149_v52 = vpack.c.bf16 %v5139_v26, %v5138_v53  ;;  %v7287_v3 = vpop.permute.xlu1 %7286  ;;  %v7781_v4 = vld [vmem:[%s7980_s19 + $0x38] sm:$0xff]  ;;  %v7782_v53 = vld [vmem:[%s7980_s19 + $0x40] sm:$0xff] }
 0xd6f   : > { %v5150_v30 = vpack.c.bf16 %v5141_v23, %v5140_v11  ;;  %v7289_v39 = vunpack.i.h.bf16 %v7287_v3  ;;  %v7288_v8 = vunpack.i.l.bf16 %v7287_v3  ;;  %v7784_v3 = vld [vmem:[%s7980_s19 + $0x50] sm:$0xff] }
 0xd70   : > { %7120 = vmatmul.mubr.bf16.gmra.mrb[160].mxu0 %v5149_v52  ;;  %v7783_v52 = vld [vmem:[%s7980_s19 + $0x48] sm:$0xff] }
 0xd71   : > { %7123 = vmatprep.mubr.bf16.mxu0 %v5150_v30  ;;  %v5109_v0 = vsel %vm1060_vm1, %v10281_v15, %v7289_v39  ;;  %v5108_v29 = vsel %vm1060_vm1, %v10282_v18, %v7288_v8  ;;  %v7785_v39 = vld [vmem:[%s7980_s19 + $0x58] sm:$0xff] }
 0xd72   : > { %v7297_v45 = vpop.permute.xlu1 %7296 }
 0xd73   : > { %v7299_v27 = vunpack.i.h.bf16 %v7297_v45  ;;  %v7298_v28 = vunpack.i.l.bf16 %v7297_v45 }
 0xd75   : > { %v5125_v43 = vsel %vm5110_vm3, %v5108_v29, %v7298_v28  ;;  %v5126_v21 = vsel %vm5110_vm3, %v5109_v0, %v7299_v27  ;;  %v7786_v29 = vld [vmem:[%s7980_s19 + $0x60] sm:$0xff] }
 0xd9f   : > { %v7307_v63 = vpop.permute.xlu1 %7306 }
 0xda0   : > { %v7309_v13 = vunpack.i.h.bf16 %v7307_v63  ;;  %v7308_v24 = vunpack.i.l.bf16 %v7307_v63 }
 0xda2   : > { %v5142_v33 = vsel %vm5127_vm4, %v5125_v43, %v7308_v24  ;;  %v5143_v54 = vsel %vm5127_vm4, %v5126_v21, %v7309_v13  ;;  %v7787_v21 = vld [vmem:[%s7980_s19 + $0x68] sm:$0xff] }
 0xda3   : > { %v5151_v22 = vpack.c.bf16 %v5143_v54, %v5142_v33  ;;  %v7788_v54 = vld [vmem:[%s7980_s19 + $0x70] sm:$0xff] }
 0xda5   : > { %7124 = vmatmul.mubr.bf16.gmra.mrb[164].mxu0 %v5151_v22 }
 0xdfa   : > { %v7113_v6 = vpop.f32.mrb[152].mxu0 }
 0xdfb   : > { %v5257_v46 = vpop.f32.mrb[153].mxu0  ;;  %v5266_v34 = vadd.f32 %v7113_v6, %v9706_v48  ;;  %v7789_v6 = vld [vmem:[%s7980_s19 + $0x78] sm:$0xff] }
 0xdfc   : > { %v5258_v38 = vadd.f32 %v9706_v48, %v5257_v46  ;;  %v7114_v32 = vpop.f32.mrb[154].mxu0 }
 0xdfd   : > { %v5260_v37 = vpop.f32.mrb[155].mxu0  ;;  %v9719_v58 = vadd.f32 %v7776_v50, %v5266_v34  ;;  %v5269_v57 = vadd.f32 %v7114_v32, %v9706_v48 }
 0xdfe   : > { %v9711_v16 = vadd.f32 %v7774_v31, %v5258_v38  ;;  %v5261_v59 = vadd.f32 %v9706_v48, %v5260_v37 }
 0xdff   : > { %v9725_v35 = vadd.f32 %v7777_v17, %v5269_v57 }
 0xe00   : > { %v9715_v47 = vadd.f32 %v7775_v61, %v5261_v59  ;;  %5338 = vadd.xlane.f32.xlu0 %v9711_v16 }
 0xe02   : > { %5340 = vadd.xlane.f32.xlu1 %v9715_v47 }
 0xe04   : > { %5342 = vadd.xlane.f32.xlu0 %v9719_v58 }
 0xe08   : > { %5344 = vadd.xlane.f32.xlu0 %v9725_v35 }
 0xe37   : > { %v7117_v55 = vpop.f32.mrb[156].mxu0 }
 0xe38   : > { %v5273_v1 = vpop.f32.mrb[157].mxu0  ;;  %v5282_v62 = vadd.f32 %v7117_v55, %v9706_v48 }
 0xe39   : > { %v5274_v20 = vadd.f32 %v9706_v48, %v5273_v1  ;;  %v7118_v7 = vpop.f32.mrb[158].mxu0 }
 0xe3a   : > { %v5276_v44 = vpop.f32.mrb[159].mxu0  ;;  %v5285_v49 = vadd.f32 %v7118_v7, %v9706_v48  ;;  %v9740_v19 = vadd.f32 %v7780_v25, %v5282_v62  ;;  %v7352_v62 = vld [vmem:[%s10194_s8 + $0x4] ss:$8 sps:$4 sm:$0xff]   ;;  %v7356_v25 = vld [vmem:[%s10194_s8 + $0x20] ss:$8 sps:$4 sm:$0xff]  }
 0xe3b   : > { %v9731_v56 = vadd.f32 %v7778_v12, %v5274_v20  ;;  %v5277_v5 = vadd.f32 %v9706_v48, %v5276_v44  ;;  %v7350_v44 = vld [vmem:[%s10194_s8] ss:$8 sps:$4 sm:$0xff]   ;;  %v7355_v12 = vld [vmem:[%s10194_s8 + $0x14] ss:$8 sps:$4 sm:$0xff]   ;;  %5674 = vmatprep.subr.bf16.mxu1 %v7352_v62 }
 0xe3c   : > { %v9744_v36 = vadd.f32 %v7781_v4, %v5285_v49  ;;  %5675 = vmatpush1.bf16.msra.mxu1 %v7350_v44  ;;  %v7353_v49 = vld [vmem:[%s10194_s8 + $0x10] ss:$8 sps:$4 sm:$0xff]   ;;  %v7361_v4 = vld [vmem:[%s10194_s8 + $0x34] ss:$8 sps:$4 sm:$0xff]  }
 0xe3d   : > { %v9736_v10 = vadd.f32 %v7779_v40, %v5277_v5  ;;  %5346 = vadd.xlane.f32.xlu0 %v9731_v56  ;;  %5676 = vmatprep.subr.bf16.mxu1 %v7355_v12  ;;  %v7358_v40 = vld [vmem:[%s10194_s8 + $0x24] ss:$8 sps:$4 sm:$0xff]  }
 0xe3f   : > { %5348 = vadd.xlane.f32.xlu1 %v9736_v10 }
 0xe40   : > { %5677 = vmatpush1.bf16.msra.mxu1 %v7353_v49 }
 0xe41   : > { %5350 = vadd.xlane.f32.xlu0 %v9740_v19  ;;  %5678 = vmatprep.subr.bf16.mxu1 %v7358_v40 }
 0xe43   : > { %v7121_v9 = vpop.f32.mrb[160].mxu0  ;;  %5352 = vadd.xlane.f32.xlu1 %v9744_v36 }
 0xe44   : > { %v5289_v42 = vpop.f32.mrb[161].mxu0  ;;  %v5298_v51 = vadd.f32 %v7121_v9, %v9706_v48  ;;  %5679 = vmatpush1.bf16.msra.mxu1 %v7356_v25  ;;  %v7359_v9 = vld [vmem:[%s10194_s8 + $0x30] ss:$8 sps:$4 sm:$0xff]  }
 0xe45   : > { %v5290_v2 = vadd.f32 %v9706_v48, %v5289_v42  ;;  %v7122_v60 = vpop.f32.mrb[162].mxu0  ;;  %5680 = vmatprep.subr.bf16.mxu1 %v7361_v4  ;;  %v7364_v42 = vld [vmem:[%s10194_s8 + $0x44] ss:$8 sps:$4 sm:$0xff]  }
 0xe46   : > { %v5292_v14 = vpop.f32.mrb[163].mxu0  ;;  %v5301_v23 = vadd.f32 %v7122_v60, %v9706_v48  ;;  %v9760_v45 = vadd.f32 %v7784_v3, %v5298_v51  ;;  %v7367_v60 = vld [vmem:[%s10194_s8 + $0x54] ss:$8 sps:$4 sm:$0xff]   ;;  %v7368_v51 = vld [vmem:[%s10194_s8 + $0x60] ss:$8 sps:$4 sm:$0xff]  }
 0xe47   : > { %v9751_v26 = vadd.f32 %v7782_v53, %v5290_v2  ;;  %v5293_v11 = vadd.f32 %v9706_v48, %v5292_v14  ;;  %v7362_v2 = vld [vmem:[%s10194_s8 + $0x40] ss:$8 sps:$4 sm:$0xff]   ;;  %v7365_v14 = vld [vmem:[%s10194_s8 + $0x50] ss:$8 sps:$4 sm:$0xff]   ;;  %v7370_v53 = vld [vmem:[%s10194_s8 + $0x64] ss:$8 sps:$4 sm:$0xff]  }
 0xe48   : > { %v9764_v8 = vadd.f32 %v7785_v39, %v5301_v23  ;;  %5681 = vmatpush1.bf16.msra.mxu1 %v7359_v9  ;;  %v7371_v23 = vld [vmem:[%s10194_s8 + $0x70] ss:$8 sps:$4 sm:$0xff]  }
 0xe49   : > { %v9756_v30 = vadd.f32 %v7783_v52, %v5293_v11  ;;  %5354 = vadd.xlane.f32.xlu0 %v9751_v26  ;;  %5682 = vmatprep.subr.bf16.mxu1 %v7364_v42  ;;  %v7373_v11 = vld [vmem:[%s10194_s8 + $0x74] ss:$8 sps:$4 sm:$0xff]  }
 0xe4b   : > { %5356 = vadd.xlane.f32.xlu1 %v9756_v30 }
 0xe4c   : > { %5683 = vmatpush1.bf16.msra.mxu1 %v7362_v2 }
 0xe4d   : > { %5358 = vadd.xlane.f32.xlu0 %v9760_v45  ;;  %5684 = vmatprep.subr.bf16.mxu1 %v7367_v60 }
 0xe4f   : > { %5360 = vadd.xlane.f32.xlu1 %v9764_v8 }
 0xe50   : > { %5685 = vmatpush1.bf16.msra.mxu1 %v7365_v14 }
 0xe51   : > { %5686 = vmatprep.subr.bf16.mxu1 %v7370_v53 }
 0xe54   : > { %5687 = vmatpush1.bf16.msra.mxu1 %v7368_v51 }
 0xe55   : > { %5688 = vmatprep.subr.bf16.mxu1 %v7373_v11 }
 0xe58   : > { %5689 = vmatpush1.bf16.msra.mxu1 %v7371_v23 }
 0xe78   : > { %v7125_v27 = vpop.f32.mrb[164].mxu0 }
 0xe79   : > { %v5305_v28 = vpop.f32.mrb[165].mxu0  ;;  %v5314_v18 = vadd.f32 %v7125_v27, %v9706_v48 }
 0xe7a   : > { %v5306_v63 = vadd.f32 %v9706_v48, %v5305_v28  ;;  %v7126_v15 = vpop.f32.mrb[166].mxu0 }
 0xe7b   : > { %v5308_v0 = vpop.f32.mrb[167].mxu0  ;;  %v5317_v43 = vadd.f32 %v7126_v15, %v9706_v48  ;;  %v9780_v22 = vadd.f32 %v7788_v54, %v5314_v18 }
 0xe7c   : > { %v9771_v13 = vadd.f32 %v7786_v29, %v5306_v63  ;;  %v5309_v24 = vadd.f32 %v9706_v48, %v5308_v0 }
 0xe7d   : > { %v9784_v46 = vadd.f32 %v7789_v6, %v5317_v43 }
 0xe7e   : > { %v9776_v33 = vadd.f32 %v7787_v21, %v5309_v24  ;;  %5362 = vadd.xlane.f32.xlu0 %v9771_v13 }
 0xe80   : > { %5364 = vadd.xlane.f32.xlu1 %v9776_v33 }
 0xe82   : > { %5366 = vadd.xlane.f32.xlu0 %v9780_v22 }
 0xe84   : > { %5368 = vadd.xlane.f32.xlu1 %v9784_v46 }
 0xe8d   : > { %v5339_v38 = vpop.xlane.xlu0 %5338 }
 0xe8e   : > { %v5370_v32 = vmul.f32 0.0078125, %v5339_v38 }
 0xe8f   : > { %v5341_v48 = vpop.xlane.xlu1 %5340 }
 0xe90   : > { %v9789_v37 = vsub.f32 %v9711_v16, %v5370_v32  ;;  %v5371_v34 = vmul.f32 0.0078125, %v5341_v48 }
 0xe91   : > { %v5343_v31 = vpop.xlane.xlu0 %5342 }
 0xe92   : > { %v9792_v59 = vsub.f32 %v9715_v47, %v5371_v34  ;;  %v5372_v61 = vmul.f32 0.0078125, %v5343_v31  ;;  %v5402_v50 = vmul.f32 %v9789_v37, %v9789_v37 }
 0xe94   : > { %v9797_v57 = vsub.f32 %v9719_v58, %v5372_v61  ;;  %5418 = vadd.xlane.f32.xlu0 %v5402_v50  ;;  %v5403_v17 = vmul.f32 %v9792_v59, %v9792_v59 }
 0xe95   : > { %v5345_v55 = vpop.xlane.xlu0 %5344 }
 0xe96   : > { %v5373_v1 = vmul.f32 0.0078125, %v5345_v55  ;;  %5420 = vadd.xlane.f32.xlu1 %v5403_v17  ;;  %v5404_v20 = vmul.f32 %v9797_v57, %v9797_v57 }
 0xe98   : > { %v9804_v7 = vsub.f32 %v9725_v35, %v5373_v1  ;;  %5422 = vadd.xlane.f32.xlu0 %v5404_v20 }
 0xe9a   : > { %v5405_v5 = vmul.f32 %v9804_v7, %v9804_v7 }
 0xe9c   : > { %5424 = vadd.xlane.f32.xlu1 %v5405_v5 }
 0xeca   : > { %v5347_v52 = vpop.xlane.xlu0 %5346 }
 0xecb   : > { %v5374_v3 = vmul.f32 0.0078125, %v5347_v52 }
 0xecc   : > { %v5349_v39 = vpop.xlane.xlu1 %5348 }
 0xecd   : > { %v9857_v27 = vsub.f32 %v9731_v56, %v5374_v3  ;;  %v5375_v28 = vmul.f32 0.0078125, %v5349_v39 }
 0xece   : > { %v5351_v63 = vpop.xlane.xlu0 %5350 }
 0xecf   : > { %v9860_v15 = vsub.f32 %v9736_v10, %v5375_v28  ;;  %v5376_v0 = vmul.f32 0.0078125, %v5351_v63  ;;  %v5406_v18 = vmul.f32 %v9857_v27, %v9857_v27 }
 0xed0   : > { %v5353_v29 = vpop.xlane.xlu1 %5352 }
 0xed1   : > { %v9865_v24 = vsub.f32 %v9740_v19, %v5376_v0  ;;  %v5377_v43 = vmul.f32 0.0078125, %v5353_v29  ;;  %5426 = vadd.xlane.f32.xlu0 %v5406_v18  ;;  %v5407_v21 = vmul.f32 %v9860_v15, %v9860_v15 }
 0xed3   : > { %v9870_v54 = vsub.f32 %v9744_v36, %v5377_v43  ;;  %5428 = vadd.xlane.f32.xlu1 %v5407_v21  ;;  %v5408_v6 = vmul.f32 %v9865_v24, %v9865_v24 }
 0xed5   : > { %5430 = vadd.xlane.f32.xlu0 %v5408_v6  ;;  %v5409_v38 = vmul.f32 %v9870_v54, %v9870_v54 }
 0xed6   : > { %v5355_v32 = vpop.xlane.xlu0 %5354 }
 0xed7   : > { %v5378_v48 = vmul.f32 0.0078125, %v5355_v32  ;;  %5432 = vadd.xlane.f32.xlu1 %v5409_v38 }
 0xed8   : > { %v5357_v34 = vpop.xlane.xlu1 %5356 }
 0xed9   : > { %v9877_v31 = vsub.f32 %v9751_v26, %v5378_v48  ;;  %v5379_v61 = vmul.f32 0.0078125, %v5357_v34 }
 0xeda   : > { %v5359_v50 = vpop.xlane.xlu0 %5358 }
 0xedb   : > { %v9880_v17 = vsub.f32 %v9756_v30, %v5379_v61  ;;  %v5380_v55 = vmul.f32 0.0078125, %v5359_v50  ;;  %v5410_v1 = vmul.f32 %v9877_v31, %v9877_v31 }
 0xedc   : > { %v5361_v20 = vpop.xlane.xlu1 %5360 }
 0xedd   : > { %v9885_v44 = vsub.f32 %v9760_v45, %v5380_v55  ;;  %v5381_v62 = vmul.f32 0.0078125, %v5361_v20  ;;  %5434 = vadd.xlane.f32.xlu0 %v5410_v1  ;;  %v5411_v12 = vmul.f32 %v9880_v17, %v9880_v17  ;;  %v9919_v1 = vld [vmem:[%s10192_s6] ss:$0 sm:$0xff] }
 0xedf   : > { %v9890_v5 = vsub.f32 %v9764_v8, %v5381_v62  ;;  %5436 = vadd.xlane.f32.xlu1 %v5411_v12  ;;  %v5412_v49 = vmul.f32 %v9885_v44, %v9885_v44 }
 0xee1   : > { %5438 = vadd.xlane.f32.xlu0 %v5412_v49  ;;  %v5413_v40 = vmul.f32 %v9890_v5, %v9890_v5 }
 0xee3   : > { %5440 = vadd.xlane.f32.xlu1 %v5413_v40 }
 0xf0b   : > { %v5363_v25 = vpop.xlane.xlu0 %5362 }
 0xf0c   : > { %v5382_v4 = vmul.f32 0.0078125, %v5363_v25  ;;  %v9927_v25 = vld [vmem:[%s10193_s7] ss:$0 sm:$0xff] }
 0xf0d   : > { %v5365_v9 = vpop.xlane.xlu1 %5364 }
 0xf0e   : > { %v9897_v42 = vsub.f32 %v9771_v13, %v5382_v4  ;;  %v5383_v2 = vmul.f32 0.0078125, %v5365_v9 }
 0xf0f   : > { %v5367_v60 = vpop.xlane.xlu0 %5366 }
 0xf10   : > { %v9900_v14 = vsub.f32 %v9776_v33, %v5383_v2  ;;  %v5384_v51 = vmul.f32 0.0078125, %v5367_v60  ;;  %v5414_v53 = vmul.f32 %v9897_v42, %v9897_v42 }
 0xf11   : > { %v5369_v11 = vpop.xlane.xlu1 %5368 }
 0xf12   : > { %v9905_v23 = vsub.f32 %v9780_v22, %v5384_v51  ;;  %v5385_v52 = vmul.f32 0.0078125, %v5369_v11  ;;  %5442 = vadd.xlane.f32.xlu0 %v5414_v53  ;;  %v5415_v3 = vmul.f32 %v9900_v14, %v9900_v14 }
 0xf14   : > { %v9910_v39 = vsub.f32 %v9784_v46, %v5385_v52  ;;  %5444 = vadd.xlane.f32.xlu1 %v5415_v3  ;;  %v5416_v28 = vmul.f32 %v9905_v23, %v9905_v23 }
 0xf16   : > { %5446 = vadd.xlane.f32.xlu0 %v5416_v28  ;;  %v5417_v63 = vmul.f32 %v9910_v39, %v9910_v39 }
 0xf18   : > { %5448 = vadd.xlane.f32.xlu1 %v5417_v63  ;;  %v7376_v63 = vld [vmem:[%s10196_s10 + $0x48] sm:$0xff]  }
 0xf21   : > { %v5419_v0 = vpop.xlane.xlu0 %5418 }
 0xf22   : > { %v5450_v18 = vmul.f32 0.0078125, %v5419_v0  ;;  %v7377_v0 = vld [vmem:[%s10196_s10 + $0x8] sm:$0xff]  }
 0xf23   : > { %v5421_v29 = vpop.xlane.xlu1 %5420 }
 0xf24   : > { %v5466_v43 = vadd.f32 1e-05, %v5450_v18  ;;  %v5451_v21 = vmul.f32 0.0078125, %v5421_v29 }
 0xf25   : > { %v5423_v6 = vpop.xlane.xlu0 %5422 }
 0xf26   : > { %7678 = vrsqrt.f32 %v5466_v43  ;;  %v5467_v38 = vadd.f32 1e-05, %v5451_v21  ;;  %v5452_v32 = vmul.f32 0.0078125, %v5423_v6 }
 0xf28   : > { %7680 = vrsqrt.f32 %v5467_v38  ;;  %v5468_v48 = vadd.f32 1e-05, %v5452_v32 }
 0xf29   : > { %v5425_v34 = vpop.xlane.xlu1 %5424 }
 0xf2a   : > { %7682 = vrsqrt.f32 %v5468_v48  ;;  %v5453_v61 = vmul.f32 0.0078125, %v5425_v34 }
 0xf2c   : > { %v5469_v50 = vadd.f32 1e-05, %v5453_v61 }
 0xf2e   : > { %7684 = vrsqrt.f32 %v5469_v50 }
 0xf30   : > { %v7679_v55 = vpop.eup %7678 }
 0xf31   : > { %v5498_v20 = vmul.f32 %v7679_v55, %v9789_v37 }
 0xf32   : > { %v7681_v62 = vpop.eup %7680 }
 0xf33   : > { %v5499_v12 = vmul.f32 %v7681_v62, %v9792_v59  ;;  %v5520_v49 = vmul.f32 %v9919_v1, %v5498_v20 }
 0xf34   : > { %v7683_v40 = vpop.eup %7682 }
 0xf35   : > { %v5521_v4 = vmul.f32 %v9919_v1, %v5499_v12  ;;  %v5542_v9 = vadd.f32 %v9927_v25, %v5520_v49  ;;  %v5500_v60 = vmul.f32 %v7683_v40, %v9797_v57  ;;  %v7374_v57 = vld [vmem:[%s10196_s10 + $0x40] sm:$0xff]  }
 0xf36   : > { %6615 = vmatprep.subr.bf16.mxu0 %v7374_v57  ;;  %7127 = vmatprep.subr.bf16.mxu1 %v7374_v57 }
 0xf37   : > { %v5543_v2 = vadd.f32 %v9927_v25, %v5521_v4  ;;  %v5522_v53 = vmul.f32 %v9919_v1, %v5500_v60 }
 0xf38   : > { %v7685_v37 = vpop.eup %7684 }
 0xf39   : > { %v5558_v51 = vpack.c.bf16 %v5543_v2, %v5542_v9  ;;  %v5501_v59 = vmul.f32 %v7685_v37, %v9804_v7  ;;  %v5544_v3 = vadd.f32 %v9927_v25, %v5522_v53  ;;  %v7375_v7 = vld [vmem:[%s10196_s10] sm:$0xff]  }
 0xf3a   : > { %6616 = vmatpush3.bf16.msra.mxu0 %v7375_v7 }
 0xf3b   : > { %5707 = vmatmul.mubr.bf16.vlgmr.msra.gmra.mrb[152].mxu1 %v5558_v51  ;;  %v5523_v11 = vmul.f32 %v9919_v1, %v5501_v59  ;;  %6617 = vmatprep.subr.bf16.mxu0 %v7376_v63 }
 0xf3c   : > { %5716 = vmatprep.mubr.bf16.mxu1 %v10247_v41  ;;  %7135 = vmatpush3.bf16.msra.mxu1 %v7375_v7 }
 0xf3d   : > { %v5545_v52 = vadd.f32 %v9927_v25, %v5523_v11  ;;  %7128 = vmatprep.subr.bf16.mxu1 %v7376_v63 }
 0xf3e   : > { %6618 = vmatpush3.bf16.msra.mxu0 %v7377_v0 }
 0xf3f   : > { %v5559_v28 = vpack.c.bf16 %v5545_v52, %v5544_v3 }
 0xf40   : > { %7136 = vmatpush3.bf16.msra.mxu1 %v7377_v0 }
 0xf43   : > { %5717 = vmatmul.mubr.bf16.gmra.mrb[156].mxu1 %v5559_v28 }
 0xf44   : > { %5726 = vmatprep.mubr.bf16.mxu1 %v10247_v41 }
 0xf5e   : > { %v5427_v18 = vpop.xlane.xlu0 %5426 }
 0xf5f   : > { %v5454_v29 = vmul.f32 0.0078125, %v5427_v18 }
 0xf60   : > { %v5429_v43 = vpop.xlane.xlu1 %5428 }
 0xf61   : > { %v5470_v21 = vadd.f32 1e-05, %v5454_v29  ;;  %v5455_v6 = vmul.f32 0.0078125, %v5429_v43 }
 0xf62   : > { %v5431_v38 = vpop.xlane.xlu0 %5430 }
 0xf63   : > { %7686 = vrsqrt.f32 %v5470_v21  ;;  %v5471_v32 = vadd.f32 1e-05, %v5455_v6  ;;  %v5456_v48 = vmul.f32 0.0078125, %v5431_v38 }
 0xf64   : > { %v5433_v34 = vpop.xlane.xlu1 %5432 }
 0xf65   : > { %7688 = vrsqrt.f32 %v5471_v32  ;;  %v5472_v61 = vadd.f32 1e-05, %v5456_v48  ;;  %v5457_v50 = vmul.f32 0.0078125, %v5433_v34 }
 0xf67   : > { %7690 = vrsqrt.f32 %v5472_v61  ;;  %v5473_v55 = vadd.f32 1e-05, %v5457_v50 }
 0xf69   : > { %7692 = vrsqrt.f32 %v5473_v55 }
 0xf6a   : > { %v5435_v20 = vpop.xlane.xlu0 %5434 }
 0xf6b   : > { %v5458_v62 = vmul.f32 0.0078125, %v5435_v20 }
 0xf6c   : > { %v5437_v12 = vpop.xlane.xlu1 %5436 }
 0xf6d   : > { %v7687_v49 = vpop.eup %7686  ;;  %v5474_v40 = vadd.f32 1e-05, %v5458_v62  ;;  %v5459_v4 = vmul.f32 0.0078125, %v5437_v12 }
 0xf6e   : > { %v5439_v9 = vpop.xlane.xlu0 %5438  ;;  %v5502_v2 = vmul.f32 %v7687_v49, %v9857_v27 }
 0xf6f   : > { %v7689_v60 = vpop.eup %7688  ;;  %7694 = vrsqrt.f32 %v5474_v40  ;;  %v5475_v37 = vadd.f32 1e-05, %v5459_v4  ;;  %v5460_v51 = vmul.f32 0.0078125, %v5439_v9 }
 0xf70   : > { %v5441_v59 = vpop.xlane.xlu1 %5440  ;;  %v5503_v53 = vmul.f32 %v7689_v60, %v9860_v15  ;;  %v5524_v11 = vmul.f32 %v9919_v1, %v5502_v2 }
 0xf71   : > { %v7691_v52 = vpop.eup %7690  ;;  %7696 = vrsqrt.f32 %v5475_v37  ;;  %v5461_v3 = vmul.f32 0.0078125, %v5441_v59  ;;  %v5476_v7 = vadd.f32 1e-05, %v5460_v51  ;;  %v7380_v37 = vld [vmem:[%s10196_s10 + $0x58] sm:$0xff]   ;;  %v7382_v59 = vld [vmem:[%s10196_s10 + $0x60] sm:$0xff]  }
 0xf72   : > { %v5525_v28 = vmul.f32 %v9919_v1, %v5503_v53  ;;  %v5546_v0 = vadd.f32 %v9927_v25, %v5524_v11  ;;  %v5504_v18 = vmul.f32 %v7691_v52, %v9865_v24  ;;  %v7381_v51 = vld [vmem:[%s10196_s10 + $0x18] sm:$0xff]   ;;  %v7383_v53 = vld [vmem:[%s10196_s10 + $0x20] sm:$0xff]   ;;  %v7384_v11 = vld [vmem:[%s10196_s10 + $0x68] sm:$0xff]  }
 0xf73   : > { %v7693_v57 = vpop.eup %7692  ;;  %v5477_v63 = vadd.f32 1e-05, %v5461_v3  ;;  %v7385_v52 = vld [vmem:[%s10196_s10 + $0x28] sm:$0xff]  }
 0xf74   : > { %v5547_v27 = vadd.f32 %v9927_v25, %v5525_v28  ;;  %v5505_v29 = vmul.f32 %v7693_v57, %v9870_v54  ;;  %v5526_v21 = vmul.f32 %v9919_v1, %v5504_v18  ;;  %v7386_v57 = vld [vmem:[%s10196_s10 + $0x70] sm:$0xff]  }
 0xf75   : > { %7698 = vrsqrt.f32 %v5477_v63  ;;  %v7387_v63 = vld [vmem:[%s10196_s10 + $0x30] sm:$0xff]  }
 0xf76   : > { %v5560_v15 = vpack.c.bf16 %v5547_v27, %v5546_v0  ;;  %v5527_v43 = vmul.f32 %v9919_v1, %v5505_v29  ;;  %7700 = vrsqrt.f32 %v5476_v7  ;;  %v5548_v48 = vadd.f32 %v9927_v25, %v5526_v21 }
 0xf78   : > { %5727 = vmatmul.mubr.bf16.gmra.mrb[160].mxu1 %v5560_v15  ;;  %v5549_v38 = vadd.f32 %v9927_v25, %v5527_v43  ;;  %v7388_v43 = vld [vmem:[%s10196_s10 + $0x78] sm:$0xff]  }
 0xf79   : > { %v7695_v6 = vpop.eup %7694  ;;  %5736 = vmatprep.mubr.bf16.mxu1 %v10247_v41 }
 0xf7a   : > { %v5506_v24 = vmul.f32 %v7695_v6, %v9877_v31  ;;  %v5561_v34 = vpack.c.bf16 %v5549_v38, %v5548_v48  ;;  %v7389_v6 = vld [vmem:[%s10196_s10 + $0x38] sm:$0xff]  }
 0xf7b   : > { %v7697_v32 = vpop.eup %7696 }
 0xf7c   : > { %v5507_v54 = vmul.f32 %v7697_v32, %v9880_v17  ;;  %v5528_v55 = vmul.f32 %v9919_v1, %v5506_v24 }
 0xf7e   : > { %v5529_v61 = vmul.f32 %v9919_v1, %v5507_v54  ;;  %v5550_v49 = vadd.f32 %v9927_v25, %v5528_v55 }
 0xf7f   : > { %v7699_v50 = vpop.eup %7698 }
 0xf80   : > { %5737 = vmatmul.mubr.bf16.gmra.mrb[164].mxu1 %v5561_v34  ;;  %v7701_v20 = vpop.eup %7700  ;;  %v5551_v62 = vadd.f32 %v9927_v25, %v5529_v61  ;;  %v5509_v12 = vmul.f32 %v7699_v50, %v9890_v5  ;;  %v7378_v5 = vld [vmem:[%s10196_s10 + $0x50] sm:$0xff]  }
 0xf81   : > { %5746 = vmatprep.mubr.bf16.mxu1 %v10247_v41  ;;  %v5508_v31 = vmul.f32 %v7701_v20, %v9885_v44  ;;  %v7379_v44 = vld [vmem:[%s10196_s10 + $0x10] sm:$0xff]   ;;  %6619 = vmatprep.subr.bf16.mxu0 %v7378_v5 }
 0xf82   : > { %v5562_v40 = vpack.c.bf16 %v5551_v62, %v5550_v49  ;;  %v5531_v17 = vmul.f32 %v9919_v1, %v5509_v12  ;;  %6620 = vmatpush3.bf16.msra.mxu0 %v7379_v44  ;;  %7129 = vmatprep.subr.bf16.mxu1 %v7378_v5 }
 0xf83   : > { %v5530_v4 = vmul.f32 %v9919_v1, %v5508_v31  ;;  %7137 = vmatpush3.bf16.msra.mxu1 %v7379_v44  ;;  %6621 = vmatprep.subr.bf16.mxu0 %v7380_v37 }
 0xf84   : > { %v5553_v9 = vadd.f32 %v9927_v25, %v5531_v17  ;;  %7130 = vmatprep.subr.bf16.mxu1 %v7380_v37 }
 0xf85   : > { %v5552_v2 = vadd.f32 %v9927_v25, %v5530_v4 }
 0xf86   : > { %6622 = vmatpush3.bf16.msra.mxu0 %v7381_v51 }
 0xf87   : > { %v5563_v60 = vpack.c.bf16 %v5553_v9, %v5552_v2  ;;  %7138 = vmatpush3.bf16.msra.mxu1 %v7381_v51  ;;  %6623 = vmatprep.subr.bf16.mxu0 %v7382_v59 }
 0xf88   : > { %5747 = vmatmul.mubr.bf16.gmra.mrb[168].mxu1 %v5562_v40  ;;  %7131 = vmatprep.subr.bf16.mxu1 %v7382_v59 }
 0xf89   : > { %5756 = vmatprep.mubr.bf16.mxu1 %v10247_v41 }
 0xf8a   : > { %6624 = vmatpush3.bf16.msra.mxu0 %v7383_v53 }
 0xf8b   : > { %7139 = vmatpush3.bf16.msra.mxu1 %v7383_v53  ;;  %6625 = vmatprep.subr.bf16.mxu0 %v7384_v11 }
 0xf8c   : > { %7132 = vmatprep.subr.bf16.mxu1 %v7384_v11 }
 0xf8e   : > { %6626 = vmatpush3.bf16.msra.mxu0 %v7385_v52 }
 0xf8f   : > { %7140 = vmatpush3.bf16.msra.mxu1 %v7385_v52  ;;  %6627 = vmatprep.subr.bf16.mxu0 %v7386_v57 }
 0xf90   : > { %5757 = vmatmul.mubr.bf16.gmra.mrb[172].mxu1 %v5563_v60  ;;  %7133 = vmatprep.subr.bf16.mxu1 %v7386_v57  ;;  %v5584_v60 = vlaneseq }
 0xf91   : > { %5766 = vmatprep.mubr.bf16.mxu1 %v10247_v41 }
 0xf92   : > { %6628 = vmatpush3.bf16.msra.mxu0 %v7387_v63  ;;  %v5585_v5 = vshrl.u32 %v5584_v60, 7 }
 0xf93   : > { %7141 = vmatpush3.bf16.msra.mxu1 %v7387_v63  ;;  %6629 = vmatprep.subr.bf16.mxu0 %v7388_v43 }
 0xf94   : > { %7134 = vmatprep.subr.bf16.mxu1 %v7388_v43  ;;  %v5586_v44 = vsub.s32 0, %v5585_v5 }
 0xf96   : > { %6630 = vmatpush3.bf16.msra.mxu0 %v7389_v6 }
 0xf97   : > { %7142 = vmatpush3.bf16.msra.mxu1 %v7389_v6 }
 0xf9f   : > { %v5443_v3 = vpop.xlane.xlu0 %5442 }
 0xfa0   : > { %v5462_v28 = vmul.f32 0.0078125, %v5443_v3 }
 0xfa1   : > { %v5445_v7 = vpop.xlane.xlu1 %5444 }
 0xfa2   : > { %v5478_v0 = vadd.f32 1e-05, %v5462_v28  ;;  %v5463_v27 = vmul.f32 0.0078125, %v5445_v7 }
 0xfa3   : > { %v5447_v18 = vpop.xlane.xlu0 %5446 }
 0xfa4   : > { %7702 = vrsqrt.f32 %v5478_v0  ;;  %v5479_v29 = vadd.f32 1e-05, %v5463_v27  ;;  %v5464_v15 = vmul.f32 0.0078125, %v5447_v18 }
 0xfa5   : > { %v5449_v21 = vpop.xlane.xlu1 %5448 }
 0xfa6   : > { %7704 = vrsqrt.f32 %v5479_v29  ;;  %v5480_v38 = vadd.f32 1e-05, %v5464_v15  ;;  %v5465_v32 = vmul.f32 0.0078125, %v5449_v21 }
 0xfa8   : > { %7706 = vrsqrt.f32 %v5480_v38  ;;  %v5481_v48 = vadd.f32 1e-05, %v5465_v32 }
 0xfaa   : > { %7708 = vrsqrt.f32 %v5481_v48 }
 0xfae   : > { %v7703_v24 = vpop.eup %7702 }
 0xfaf   : > { %v5510_v54 = vmul.f32 %v7703_v24, %v9897_v42 }
 0xfb0   : > { %v7705_v34 = vpop.eup %7704 }
 0xfb1   : > { %v5511_v61 = vmul.f32 %v7705_v34, %v9900_v14  ;;  %v5532_v50 = vmul.f32 %v9919_v1, %v5510_v54 }
 0xfb2   : > { %v7707_v55 = vpop.eup %7706 }
 0xfb3   : > { %v5533_v20 = vmul.f32 %v9919_v1, %v5511_v61  ;;  %v5554_v12 = vadd.f32 %v9927_v25, %v5532_v50  ;;  %v5512_v31 = vmul.f32 %v7707_v55, %v9905_v23  ;;  %v5582_v23 = vld [vmem:[%s10195_s9] sm:$0x3] }
 0xfb4   : > { %v7709_v62 = vpop.eup %7708  ;;  %v10032_v37 = vrot.slane %v5582_v23, %v5586_v44 }
 0xfb5   : > { %v5555_v49 = vadd.f32 %v9927_v25, %v5533_v20  ;;  %v5513_v40 = vmul.f32 %v7709_v62, %v9910_v39  ;;  %v5534_v14 = vmul.f32 %v9919_v1, %v5512_v31  ;;  %v5590_v39 = vsub.s32 1, %v5585_v5 }
 0xfb7   : > { %v5564_v17 = vpack.c.bf16 %v5555_v49, %v5554_v12  ;;  %v5535_v42 = vmul.f32 %v9919_v1, %v5513_v40  ;;  %v5556_v9 = vadd.f32 %v9927_v25, %v5534_v14  ;;  %v10034_v51 = vrot.slane %v5582_v23, %v5590_v39 }
 0xfb9   : > { %5767 = vmatmul.mubr.bf16.gmra.mrb[176].mxu1 %v5564_v17  ;;  %v5557_v4 = vadd.f32 %v9927_v25, %v5535_v42 }
 0xfba   : > { %5776 = vmatprep.mubr.bf16.mxu1 %v10247_v41 }
 0xfbb   : > { %v5565_v2 = vpack.c.bf16 %v5557_v4, %v5556_v9 }
 0xfc1   : > { %5777 = vmatmul.mubr.bf16.gmra.mrb[180].mxu1 %v5565_v2 }
0x100e   : > { %v5708_v1 = vpop.f32.mrb[152].mxu1 }
0x100f   : > { %v5709_v41 = vadd.f32 %v5708_v1, %v10032_v37  ;;  %v5710_v59 = vpop.f32.mrb[153].mxu1 }
0x1010   : > { %v5711_v25 = vadd.f32 %v5710_v59, %v10034_v51  ;;  %v5712_v53 = vpop.f32.mrb[154].mxu1 }
0x1011   : > { %v5819_v11 = vmul.f32 0.70710677, %v5709_v41  ;;  %v5713_v52 = vadd.f32 %v5712_v53, %v10032_v37  ;;  %v5714_v3 = vpop.f32.mrb[155].mxu1  ;;  %v5787_v62 = vmul.f32 0.5, %v5709_v41 }
0x1012   : > { %v5820_v28 = vmul.f32 0.70710677, %v5711_v25  ;;  %v5715_v57 = vadd.f32 %v5714_v3, %v10034_v51  ;;  %v5788_v31 = vmul.f32 0.5, %v5711_v25 }
0x1013   : > { %7710 = verf.f32 %v5819_v11  ;;  %v5821_v7 = vmul.f32 0.70710677, %v5713_v52  ;;  %v5789_v12 = vmul.f32 0.5, %v5713_v52 }
0x1014   : > { %7712 = verf.f32 %v5820_v28  ;;  %v5822_v63 = vmul.f32 0.70710677, %v5715_v57  ;;  %v5790_v40 = vmul.f32 0.5, %v5715_v57 }
0x1015   : > { %7714 = verf.f32 %v5821_v7 }
0x1016   : > { %7716 = verf.f32 %v5822_v63  ;;  %v5718_v0 = vpop.f32.mrb[156].mxu1 }
0x1017   : > { %v5719_v27 = vadd.f32 %v5718_v0, %v10032_v37  ;;  %v5720_v18 = vpop.f32.mrb[157].mxu1 }
0x1018   : > { %v5721_v29 = vadd.f32 %v5720_v18, %v10034_v51  ;;  %v5722_v15 = vpop.f32.mrb[158].mxu1 }
0x1019   : > { %v5823_v43 = vmul.f32 0.70710677, %v5719_v27  ;;  %v5723_v21 = vadd.f32 %v5722_v15, %v10032_v37  ;;  %v5724_v6 = vpop.f32.mrb[159].mxu1  ;;  %v5791_v53 = vmul.f32 0.5, %v5719_v27 }
0x101a   : > { %v5824_v38 = vmul.f32 0.70710677, %v5721_v29  ;;  %v5725_v32 = vadd.f32 %v5724_v6, %v10034_v51  ;;  %v5792_v25 = vmul.f32 0.5, %v5721_v29 }
0x101b   : > { %7718 = verf.f32 %v5823_v43  ;;  %v5825_v48 = vmul.f32 0.70710677, %v5723_v21  ;;  %v5793_v41 = vmul.f32 0.5, %v5723_v21 }
0x101c   : > { %7720 = verf.f32 %v5824_v38  ;;  %v5826_v24 = vmul.f32 0.70710677, %v5725_v32  ;;  %v5794_v52 = vmul.f32 0.5, %v5725_v32 }
0x101d   : > { %v7711_v54 = vpop.eup %7710  ;;  %7722 = verf.f32 %v5825_v48 }
0x101e   : > { %v7713_v34 = vpop.eup %7712  ;;  %v5883_v61 = vadd.f32 1.0, %v7711_v54  ;;  %7724 = verf.f32 %v5826_v24 }
0x101f   : > { %v7715_v50 = vpop.eup %7714  ;;  %v5884_v55 = vadd.f32 1.0, %v7713_v34 }
0x1020   : > { %v7717_v20 = vpop.eup %7716  ;;  %v5885_v49 = vadd.f32 1.0, %v7715_v50  ;;  %v5915_v42 = vmul.f32 %v5883_v61, %v5787_v62 }
0x1021   : > { %v5886_v17 = vadd.f32 1.0, %v7717_v20  ;;  %v5916_v4 = vmul.f32 %v5884_v55, %v5788_v31 }
0x1022   : > { %v5917_v14 = vmul.f32 %v5885_v49, %v5789_v12 }
0x1023   : > { %v5918_v9 = vmul.f32 %v5886_v17, %v5790_v40 }
0x1024   : > { %v5947_v2 = vpack.c.bf16 %v5917_v14, %v5915_v42 }
0x1025   : > { %v7719_v60 = vpop.eup %7718  ;;  %v5948_v5 = vpack.c.bf16 %v5918_v9, %v5916_v4 }
0x1026   : > { %v7721_v44 = vpop.eup %7720  ;;  %v5887_v23 = vadd.f32 1.0, %v7719_v60 }
0x1027   : > { %v7723_v39 = vpop.eup %7722  ;;  %v5888_v1 = vadd.f32 1.0, %v7721_v44  ;;  %6130 = vmatprep.mubr.bf16.mxu0 %v5948_v5 }
0x1028   : > { %v7725_v59 = vpop.eup %7724  ;;  %v5889_v11 = vadd.f32 1.0, %v7723_v39  ;;  %6131 = vmatmul.mubr.bf16.vlgmr.msra.gmra.mrb[168].mxu0 %v5947_v2  ;;  %v5919_v28 = vmul.f32 %v5887_v23, %v5791_v53 }
0x1029   : > { %v5890_v3 = vadd.f32 1.0, %v7725_v59  ;;  %v5920_v7 = vmul.f32 %v5888_v1, %v5792_v25 }
0x102a   : > { %v5921_v57 = vmul.f32 %v5889_v11, %v5793_v41 }
0x102b   : > { %v5922_v63 = vmul.f32 %v5890_v3, %v5794_v52 }
0x102c   : > { %v5949_v0 = vpack.c.bf16 %v5921_v57, %v5919_v28 }
0x102d   : > { %v5950_v18 = vpack.c.bf16 %v5922_v63, %v5920_v7 }
0x102f   : > { %6138 = vmatprep.mubr.bf16.mxu0 %v5950_v18 }
0x1030   : > { %6139 = vmatmul.mubr.bf16.gmra.mrb[172].mxu0 %v5949_v0 }
0x104b   : > { %v5728_v15 = vpop.f32.mrb[160].mxu1 }
0x104c   : > { %v5729_v43 = vadd.f32 %v5728_v15, %v10032_v37  ;;  %v5730_v6 = vpop.f32.mrb[161].mxu1 }
0x104d   : > { %v5731_v27 = vadd.f32 %v5730_v6, %v10034_v51  ;;  %v5732_v21 = vpop.f32.mrb[162].mxu1 }
0x104e   : > { %v5827_v38 = vmul.f32 0.70710677, %v5729_v43  ;;  %v5733_v29 = vadd.f32 %v5732_v21, %v10032_v37  ;;  %v5734_v32 = vpop.f32.mrb[163].mxu1  ;;  %v5795_v59 = vmul.f32 0.5, %v5729_v43 }
0x104f   : > { %v5828_v48 = vmul.f32 0.70710677, %v5731_v27  ;;  %v5735_v24 = vadd.f32 %v5734_v32, %v10034_v51  ;;  %v5796_v52 = vmul.f32 0.5, %v5731_v27 }
0x1050   : > { %7726 = verf.f32 %v5827_v38  ;;  %v5829_v54 = vmul.f32 0.70710677, %v5733_v29  ;;  %v5797_v53 = vmul.f32 0.5, %v5733_v29 }
0x1051   : > { %7728 = verf.f32 %v5828_v48  ;;  %v5830_v34 = vmul.f32 0.70710677, %v5735_v24  ;;  %v5798_v3 = vmul.f32 0.5, %v5735_v24 }
0x1052   : > { %7730 = verf.f32 %v5829_v54 }
0x1053   : > { %7732 = verf.f32 %v5830_v34  ;;  %v5738_v61 = vpop.f32.mrb[164].mxu1 }
0x1054   : > { %v5739_v50 = vadd.f32 %v5738_v61, %v10032_v37  ;;  %v5740_v55 = vpop.f32.mrb[165].mxu1 }
0x1055   : > { %v5741_v20 = vadd.f32 %v5740_v55, %v10034_v51  ;;  %v5742_v62 = vpop.f32.mrb[166].mxu1 }
0x1056   : > { %v5831_v12 = vmul.f32 0.70710677, %v5739_v50  ;;  %v5743_v49 = vadd.f32 %v5742_v62, %v10032_v37  ;;  %v5744_v31 = vpop.f32.mrb[167].mxu1 }
0x1057   : > { %v5832_v40 = vmul.f32 0.70710677, %v5741_v20  ;;  %v5745_v17 = vadd.f32 %v5744_v31, %v10034_v51 }
0x1058   : > { %7734 = verf.f32 %v5831_v12  ;;  %v5833_v42 = vmul.f32 0.70710677, %v5743_v49 }
0x1059   : > { %7736 = verf.f32 %v5832_v40  ;;  %v5834_v14 = vmul.f32 0.70710677, %v5745_v17  ;;  %v5799_v40 = vmul.f32 0.5, %v5739_v50 }
0x105a   : > { %v7727_v4 = vpop.eup %7726  ;;  %7738 = verf.f32 %v5833_v42  ;;  %v5801_v42 = vmul.f32 0.5, %v5743_v49 }
0x105b   : > { %v7729_v9 = vpop.eup %7728  ;;  %v5891_v2 = vadd.f32 1.0, %v7727_v4  ;;  %7740 = verf.f32 %v5834_v14  ;;  %v5748_v60 = vpop.f32.mrb[168].mxu1 }
0x105c   : > { %v7731_v5 = vpop.eup %7730  ;;  %v5892_v44 = vadd.f32 1.0, %v7729_v9  ;;  %v10053_v23 = vadd.f32 %v5748_v60, %v10032_v37  ;;  %v5750_v39 = vpop.f32.mrb[169].mxu1  ;;  %v5802_v60 = vmul.f32 0.5, %v5745_v17 }
0x105d   : > { %v7733_v1 = vpop.eup %7732  ;;  %v5893_v41 = vadd.f32 1.0, %v7731_v5  ;;  %v10056_v11 = vadd.f32 %v5750_v39, %v10034_v51  ;;  %v5752_v25 = vpop.f32.mrb[170].mxu1  ;;  %v5923_v63 = vmul.f32 %v5891_v2, %v5795_v59  ;;  %v5800_v2 = vmul.f32 0.5, %v5741_v20 }
0x105e   : > { %v5894_v28 = vadd.f32 1.0, %v7733_v1  ;;  %v5835_v57 = vmul.f32 0.70710677, %v10053_v23  ;;  %v5754_v7 = vpop.f32.mrb[171].mxu1  ;;  %v5753_v15 = vadd.f32 %v5752_v25, %v10032_v37  ;;  %v5924_v6 = vmul.f32 %v5892_v44, %v5796_v52 }
0x105f   : > { %v5925_v0 = vmul.f32 %v5893_v41, %v5797_v53  ;;  %v5836_v18 = vmul.f32 0.70710677, %v10056_v11  ;;  %v5755_v21 = vadd.f32 %v5754_v7, %v10034_v51 }
0x1060   : > { %v5926_v43 = vmul.f32 %v5894_v28, %v5798_v3  ;;  %7742 = verf.f32 %v5835_v57  ;;  %v5837_v38 = vmul.f32 0.70710677, %v5753_v15 }
0x1061   : > { %7744 = verf.f32 %v5836_v18  ;;  %v5951_v29 = vpack.c.bf16 %v5925_v0, %v5923_v63  ;;  %v5838_v32 = vmul.f32 0.70710677, %v5755_v21 }
0x1062   : > { %v7735_v27 = vpop.eup %7734  ;;  %v5952_v48 = vpack.c.bf16 %v5926_v43, %v5924_v6  ;;  %7746 = verf.f32 %v5837_v38  ;;  %v5803_v6 = vmul.f32 0.5, %v10053_v23  ;;  %v5805_v43 = vmul.f32 0.5, %v5753_v15 }
0x1063   : > { %v7737_v24 = vpop.eup %7736  ;;  %v5895_v54 = vadd.f32 1.0, %v7735_v27  ;;  %v5758_v34 = vpop.f32.mrb[172].mxu1  ;;  %7748 = verf.f32 %v5838_v32  ;;  %v5806_v27 = vmul.f32 0.5, %v5755_v21 }
0x1064   : > { %v7739_v61 = vpop.eup %7738  ;;  %v5896_v55 = vadd.f32 1.0, %v7737_v24  ;;  %v5759_v62 = vadd.f32 %v5758_v34, %v10032_v37  ;;  %v5760_v12 = vpop.f32.mrb[173].mxu1  ;;  %6146 = vmatprep.mubr.bf16.mxu0 %v5952_v48 }
0x1065   : > { %v7741_v31 = vpop.eup %7740  ;;  %v5897_v14 = vadd.f32 1.0, %v7739_v61  ;;  %v5761_v4 = vadd.f32 %v5760_v12, %v10034_v51  ;;  %v5762_v9 = vpop.f32.mrb[174].mxu1  ;;  %6147 = vmatmul.mubr.bf16.gmra.mrb[176].mxu0 %v5951_v29  ;;  %v5927_v1 = vmul.f32 %v5895_v54, %v5799_v40  ;;  %v5804_v29 = vmul.f32 0.5, %v10056_v11 }
0x1066   : > { %v5898_v5 = vadd.f32 1.0, %v7741_v31  ;;  %v5839_v44 = vmul.f32 0.70710677, %v5759_v62  ;;  %v5764_v39 = vpop.f32.mrb[175].mxu1  ;;  %v5763_v41 = vadd.f32 %v5762_v9, %v10032_v37  ;;  %v5928_v25 = vmul.f32 %v5896_v55, %v5800_v2 }
0x1067   : > { %v5929_v59 = vmul.f32 %v5897_v14, %v5801_v42  ;;  %v5840_v53 = vmul.f32 0.70710677, %v5761_v4  ;;  %v5765_v50 = vadd.f32 %v5764_v39, %v10034_v51  ;;  %v5807_v23 = vmul.f32 0.5, %v5759_v62 }
0x1068   : > { %v5930_v52 = vmul.f32 %v5898_v5, %v5802_v60  ;;  %7750 = verf.f32 %v5839_v44  ;;  %v5841_v49 = vmul.f32 0.70710677, %v5763_v41  ;;  %v5809_v15 = vmul.f32 0.5, %v5763_v41 }
0x1069   : > { %7752 = verf.f32 %v5840_v53  ;;  %v5953_v3 = vpack.c.bf16 %v5929_v59, %v5927_v1  ;;  %v5842_v57 = vmul.f32 0.70710677, %v5765_v50  ;;  %v5808_v11 = vmul.f32 0.5, %v5761_v4 }
0x106a   : > { %v7743_v28 = vpop.eup %7742  ;;  %v5954_v20 = vpack.c.bf16 %v5930_v52, %v5928_v25  ;;  %7754 = verf.f32 %v5841_v49  ;;  %v5810_v21 = vmul.f32 0.5, %v5765_v50 }
0x106b   : > { %v7745_v17 = vpop.eup %7744  ;;  %v5899_v7 = vadd.f32 1.0, %v7743_v28  ;;  %7756 = verf.f32 %v5842_v57 }
0x106c   : > { %6154 = vmatprep.mubr.bf16.mxu0 %v5954_v20  ;;  %v7747_v63 = vpop.eup %7746  ;;  %v5900_v0 = vadd.f32 1.0, %v7745_v17 }
0x106d   : > { %6155 = vmatmul.mubr.bf16.gmra.mrb[180].mxu0 %v5953_v3  ;;  %v7749_v18 = vpop.eup %7748  ;;  %v5901_v38 = vadd.f32 1.0, %v7747_v63  ;;  %v5931_v48 = vmul.f32 %v5899_v7, %v5803_v6 }
0x106e   : > { %v5902_v32 = vadd.f32 1.0, %v7749_v18  ;;  %v5932_v54 = vmul.f32 %v5900_v0, %v5804_v29 }
0x106f   : > { %v5933_v24 = vmul.f32 %v5901_v38, %v5805_v43 }
0x1070   : > { %v5934_v34 = vmul.f32 %v5902_v32, %v5806_v27 }
0x1071   : > { %v5955_v55 = vpack.c.bf16 %v5933_v24, %v5931_v48 }
0x1072   : > { %v7751_v61 = vpop.eup %7750  ;;  %v5956_v31 = vpack.c.bf16 %v5934_v34, %v5932_v54 }
0x1073   : > { %v7753_v12 = vpop.eup %7752  ;;  %v5903_v40 = vadd.f32 1.0, %v7751_v61 }
0x1074   : > { %v7755_v42 = vpop.eup %7754  ;;  %v5904_v14 = vadd.f32 1.0, %v7753_v12  ;;  %6162 = vmatprep.mubr.bf16.mxu0 %v5956_v31 }
0x1075   : > { %v7757_v9 = vpop.eup %7756  ;;  %v5905_v2 = vadd.f32 1.0, %v7755_v42  ;;  %6163 = vmatmul.mubr.bf16.gmra.mrb[184].mxu0 %v5955_v55  ;;  %v5935_v5 = vmul.f32 %v5903_v40, %v5807_v23 }
0x1076   : > { %v5906_v60 = vadd.f32 1.0, %v7757_v9  ;;  %v5936_v39 = vmul.f32 %v5904_v14, %v5808_v11 }
0x1077   : > { %v5937_v44 = vmul.f32 %v5905_v2, %v5809_v15 }
0x1078   : > { %v5938_v1 = vmul.f32 %v5906_v60, %v5810_v21 }
0x1079   : > { %v5957_v59 = vpack.c.bf16 %v5937_v44, %v5935_v5 }
0x107a   : > { %v5958_v53 = vpack.c.bf16 %v5938_v1, %v5936_v39 }
0x107c   : > { %6170 = vmatprep.mubr.bf16.mxu0 %v5958_v53 }
0x107d   : > { %6171 = vmatmul.mubr.bf16.gmra.mrb[188].mxu0 %v5957_v59 }
0x108c   : > { %v5768_v25 = vpop.f32.mrb[176].mxu1 }
0x108d   : > { %v5769_v52 = vadd.f32 %v5768_v25, %v10032_v37  ;;  %v5770_v49 = vpop.f32.mrb[177].mxu1 }
0x108e   : > { %v5771_v62 = vadd.f32 %v5770_v49, %v10034_v51  ;;  %v5772_v41 = vpop.f32.mrb[178].mxu1 }
0x108f   : > { %v5843_v3 = vmul.f32 0.70710677, %v5769_v52  ;;  %v5773_v4 = vadd.f32 %v5772_v41, %v10032_v37  ;;  %v5774_v50 = vpop.f32.mrb[179].mxu1  ;;  %v5811_v40 = vmul.f32 0.5, %v5769_v52 }
0x1090   : > { %v5844_v28 = vmul.f32 0.70710677, %v5771_v62  ;;  %v5775_v57 = vadd.f32 %v5774_v50, %v10034_v51 }
0x1091   : > { %7758 = verf.f32 %v5843_v3  ;;  %v5845_v20 = vmul.f32 0.70710677, %v5773_v4  ;;  %v5813_v42 = vmul.f32 0.5, %v5773_v4 }
0x1092   : > { %7760 = verf.f32 %v5844_v28  ;;  %v5846_v17 = vmul.f32 0.70710677, %v5775_v57  ;;  %v5814_v9 = vmul.f32 0.5, %v5775_v57 }
0x1093   : > { %7762 = verf.f32 %v5845_v20 }
0x1094   : > { %7764 = verf.f32 %v5846_v17  ;;  %v5778_v7 = vpop.f32.mrb[180].mxu1 }
0x1095   : > { %v5779_v63 = vadd.f32 %v5778_v7, %v10032_v37  ;;  %v5780_v0 = vpop.f32.mrb[181].mxu1 }
0x1096   : > { %v5781_v18 = vadd.f32 %v5780_v0, %v10034_v51  ;;  %v5782_v6 = vpop.f32.mrb[182].mxu1 }
0x1097   : > { %v5847_v43 = vmul.f32 0.70710677, %v5779_v63  ;;  %v5783_v38 = vadd.f32 %v5782_v6, %v10032_v37  ;;  %v5784_v29 = vpop.f32.mrb[183].mxu1  ;;  %v5812_v37 = vmul.f32 0.5, %v5771_v62  ;;  %v5815_v25 = vmul.f32 0.5, %v5779_v63 }
0x1098   : > { %v5848_v27 = vmul.f32 0.70710677, %v5781_v18  ;;  %v5785_v32 = vadd.f32 %v5784_v29, %v10034_v51  ;;  %v5816_v62 = vmul.f32 0.5, %v5781_v18  ;;  %v10080_v63 = vld [vmem:[%s10197_s11] ss:$0 sm:$0xff] }
0x1099   : > { %7766 = verf.f32 %v5847_v43  ;;  %v5849_v48 = vmul.f32 0.70710677, %v5783_v38  ;;  %v5817_v52 = vmul.f32 0.5, %v5783_v38 }
0x109a   : > { %7768 = verf.f32 %v5848_v27  ;;  %v5850_v24 = vmul.f32 0.70710677, %v5785_v32  ;;  %v5818_v41 = vmul.f32 0.5, %v5785_v32 }
0x109b   : > { %v7759_v54 = vpop.eup %7758  ;;  %7770 = verf.f32 %v5849_v48 }
0x109c   : > { %v7761_v34 = vpop.eup %7760  ;;  %v5907_v61 = vadd.f32 1.0, %v7759_v54  ;;  %7772 = verf.f32 %v5850_v24 }
0x109d   : > { %v7763_v55 = vpop.eup %7762  ;;  %v5908_v12 = vadd.f32 1.0, %v7761_v34 }
0x109e   : > { %v7765_v31 = vpop.eup %7764  ;;  %v5909_v14 = vadd.f32 1.0, %v7763_v55  ;;  %v5939_v15 = vmul.f32 %v5907_v61, %v5811_v40 }
0x109f   : > { %v5910_v23 = vadd.f32 1.0, %v7765_v31  ;;  %v5940_v2 = vmul.f32 %v5908_v12, %v5812_v37 }
0x10a0   : > { %v5941_v51 = vmul.f32 %v5909_v14, %v5813_v42 }
0x10a1   : > { %v5942_v11 = vmul.f32 %v5910_v23, %v5814_v9 }
0x10a2   : > { %v5959_v21 = vpack.c.bf16 %v5941_v51, %v5939_v15 }
0x10a3   : > { %v7767_v60 = vpop.eup %7766  ;;  %v5960_v5 = vpack.c.bf16 %v5942_v11, %v5940_v2 }
0x10a4   : > { %v7769_v44 = vpop.eup %7768  ;;  %v5911_v39 = vadd.f32 1.0, %v7767_v60 }
0x10a5   : > { %v7771_v1 = vpop.eup %7770  ;;  %v5912_v59 = vadd.f32 1.0, %v7769_v44  ;;  %6178 = vmatprep.mubr.bf16.mxu1 %v5960_v5 }
0x10a6   : > { %v7773_v53 = vpop.eup %7772  ;;  %v5913_v49 = vadd.f32 1.0, %v7771_v1  ;;  %6179 = vmatmul.mubr.bf16.vlgmr.msra.gmra.mrb[184].mxu1 %v5959_v21  ;;  %v5943_v4 = vmul.f32 %v5911_v39, %v5815_v25 }
0x10a7   : > { %v5914_v3 = vadd.f32 1.0, %v7773_v53  ;;  %v5944_v28 = vmul.f32 %v5912_v59, %v5816_v62 }
0x10a8   : > { %v5945_v50 = vmul.f32 %v5913_v49, %v5817_v52 }
0x10a9   : > { %v5946_v57 = vmul.f32 %v5914_v3, %v5818_v41 }
0x10aa   : > { %v5961_v20 = vpack.c.bf16 %v5945_v50, %v5943_v4 }
0x10ab   : > { %v5962_v17 = vpack.c.bf16 %v5946_v57, %v5944_v28 }
0x10ad   : > { %6186 = vmatprep.mubr.bf16.mxu1 %v5962_v17 }
0x10ae   : > { %6187 = vmatmul.mubr.bf16.gmra.mrb[188].mxu1 %v5961_v20 }
0x10fb   : > { %v6631_v7 = vpop.f32.mrb[168].mxu0 }
0x10fc   : > { %v6632_v0 = vpop.f32.mrb[169].mxu0 }
0x10fd   : > { %v6633_v18 = vadd.f32 %v6632_v0, %v6631_v7  ;;  %v6634_v6 = vpop.f32.mrb[170].mxu0 }
0x10fe   : > { %v6635_v43 = vpop.f32.mrb[171].mxu0 }
0x10ff   : > { %v6133_v38 = vadd.f32 %v6633_v18, %v10080_v63  ;;  %v6636_v29 = vadd.f32 %v6635_v43, %v6634_v6 }
0x1101   : > { %v6195_v27 = vadd.f32 %v6133_v38, %v9711_v16  ;;  %v6136_v32 = vadd.f32 %v6636_v29, %v10080_v63 }
0x1103   : > { %6211 = vst [vmem:[%s10087_s29] sm:$0xff] %v6195_v27  ;;  %v6196_v48 = vadd.f32 %v6136_v32, %v9715_v47  ;;  %v6637_v24 = vpop.f32.mrb[172].mxu0 }
0x1104   : > { %v6638_v54 = vpop.f32.mrb[173].mxu0 }
0x1105   : > { %6212 = vst [vmem:[%s10087_s29 + $0x8] sm:$0xff] %v6196_v48  ;;  %v6639_v34 = vadd.f32 %v6638_v54, %v6637_v24  ;;  %v6640_v61 = vpop.f32.mrb[174].mxu0 }
0x1106   : > { %v6641_v55 = vpop.f32.mrb[175].mxu0 }
0x1107   : > { %v6141_v12 = vadd.f32 %v6639_v34, %v10080_v63  ;;  %v6642_v16 = vadd.f32 %v6641_v55, %v6640_v61 }
0x1109   : > { %v6197_v31 = vadd.f32 %v6141_v12, %v9719_v58  ;;  %v6144_v40 = vadd.f32 %v6642_v16, %v10080_v63 }
0x110b   : > { %6213 = vst [vmem:[%s10087_s29 + $0x10] sm:$0xff] %v6197_v31  ;;  %v6198_v42 = vadd.f32 %v6144_v40, %v9725_v35 }
0x110d   : > { %6214 = vst [vmem:[%s10087_s29 + $0x18] sm:$0xff] %v6198_v42 }
0x1138   : > { %v6643_v47 = vpop.f32.mrb[176].mxu0 }
0x1139   : > { %v6644_v14 = vpop.f32.mrb[177].mxu0 }
0x113a   : > { %v6645_v37 = vadd.f32 %v6644_v14, %v6643_v47  ;;  %v6646_v9 = vpop.f32.mrb[178].mxu0 }
0x113b   : > { %v6647_v23 = vpop.f32.mrb[179].mxu0 }
0x113c   : > { %v6149_v15 = vadd.f32 %v6645_v37, %v10080_v63  ;;  %v6648_v51 = vadd.f32 %v6647_v23, %v6646_v9 }
0x113e   : > { %v6199_v2 = vadd.f32 %v6149_v15, %v9731_v56  ;;  %v6152_v58 = vadd.f32 %v6648_v51, %v10080_v63 }
0x1140   : > { %6215 = vst [vmem:[%s10087_s29 + $0x20] sm:$0xff] %v6199_v2  ;;  %v6200_v11 = vadd.f32 %v6152_v58, %v9736_v10  ;;  %v6649_v21 = vpop.f32.mrb[180].mxu0 }
0x1141   : > { %v6650_v35 = vpop.f32.mrb[181].mxu0 }
0x1142   : > { %6216 = vst [vmem:[%s10087_s29 + $0x28] sm:$0xff] %v6200_v11  ;;  %v6651_v60 = vadd.f32 %v6650_v35, %v6649_v21  ;;  %v6652_v5 = vpop.f32.mrb[182].mxu0 }
0x1143   : > { %v6653_v44 = vpop.f32.mrb[183].mxu0 }
0x1144   : > { %v6157_v39 = vadd.f32 %v6651_v60, %v10080_v63  ;;  %v6654_v1 = vadd.f32 %v6653_v44, %v6652_v5 }
0x1146   : > { %v6201_v59 = vadd.f32 %v6157_v39, %v9740_v19  ;;  %v6160_v56 = vadd.f32 %v6654_v1, %v10080_v63 }
0x1148   : > { %6217 = vst [vmem:[%s10087_s29 + $0x30] sm:$0xff] %v6201_v59  ;;  %v6202_v53 = vadd.f32 %v6160_v56, %v9744_v36  ;;  %v6655_v25 = vpop.f32.mrb[184].mxu0 }
0x1149   : > { %v6656_v10 = vpop.f32.mrb[185].mxu0 }
0x114a   : > { %6218 = vst [vmem:[%s10087_s29 + $0x38] sm:$0xff] %v6202_v53  ;;  %v6657_v52 = vadd.f32 %v6656_v10, %v6655_v25  ;;  %v6658_v49 = vpop.f32.mrb[186].mxu0 }
0x114b   : > { %v6659_v62 = vpop.f32.mrb[187].mxu0 }
0x114c   : > { %v6165_v41 = vadd.f32 %v6657_v52, %v10080_v63  ;;  %v6660_v3 = vadd.f32 %v6659_v62, %v6658_v49 }
0x114e   : > { %v6203_v4 = vadd.f32 %v6165_v41, %v9751_v26  ;;  %v6168_v19 = vadd.f32 %v6660_v3, %v10080_v63 }
0x1150   : > { %6219 = vst [vmem:[%s10087_s29 + $0x40] sm:$0xff] %v6203_v4  ;;  %v6204_v50 = vadd.f32 %v6168_v19, %v9756_v30  ;;  %v6661_v28 = vpop.f32.mrb[188].mxu0 }
0x1151   : > { %v6662_v36 = vpop.f32.mrb[189].mxu0 }
0x1152   : > { %6220 = vst [vmem:[%s10087_s29 + $0x48] sm:$0xff] %v6204_v50  ;;  %v6663_v57 = vadd.f32 %v6662_v36, %v6661_v28  ;;  %v6664_v20 = vpop.f32.mrb[190].mxu0 }
0x1153   : > { %v6665_v17 = vpop.f32.mrb[191].mxu0 }
0x1154   : > { %v6173_v7 = vadd.f32 %v6663_v57, %v10080_v63  ;;  %v6666_v0 = vadd.f32 %v6665_v17, %v6664_v20 }
0x1156   : > { %v6205_v18 = vadd.f32 %v6173_v7, %v9760_v45  ;;  %v6176_v26 = vadd.f32 %v6666_v0, %v10080_v63 }
0x1158   : > { %6221 = vst [vmem:[%s10087_s29 + $0x50] sm:$0xff] %v6205_v18  ;;  %v6206_v6 = vadd.f32 %v6176_v26, %v9764_v8 }
0x115a   : > { %6222 = vst [vmem:[%s10087_s29 + $0x58] sm:$0xff] %v6206_v6 }
0x1179   : > { %v6667_v30 = vpop.f32.mrb[184].mxu1 }
0x117a   : > { %v6668_v43 = vpop.f32.mrb[185].mxu1 }
0x117b   : > { %v6669_v38 = vadd.f32 %v6668_v43, %v6667_v30  ;;  %v6670_v29 = vpop.f32.mrb[186].mxu1 }
0x117c   : > { %v6671_v27 = vpop.f32.mrb[187].mxu1 }
0x117d   : > { %v6181_v32 = vadd.f32 %v6669_v38, %v10080_v63  ;;  %v6672_v48 = vadd.f32 %v6671_v27, %v6670_v29 }
0x117f   : > { %v6207_v24 = vadd.f32 %v6181_v32, %v9771_v13  ;;  %v6184_v45 = vadd.f32 %v6672_v48, %v10080_v63 }
0x1181   : > { %6223 = vst [vmem:[%s10087_s29 + $0x60] sm:$0xff] %v6207_v24  ;;  %v6208_v54 = vadd.f32 %v6184_v45, %v9776_v33  ;;  %v6673_v8 = vpop.f32.mrb[188].mxu1 }
0x1182   : > { %v6674_v34 = vpop.f32.mrb[189].mxu1 }
0x1183   : > { %6224 = vst [vmem:[%s10087_s29 + $0x68] sm:$0xff] %v6208_v54  ;;  %v6675_v61 = vadd.f32 %v6674_v34, %v6673_v8  ;;  %v6676_v55 = vpop.f32.mrb[190].mxu1 }
0x1184   : > { %v6677_v12 = vpop.f32.mrb[191].mxu1 }
0x1185   : > { %v6189_v16 = vadd.f32 %v6675_v61, %v10080_v63  ;;  %v6678_v31 = vadd.f32 %v6677_v12, %v6676_v55 }
0x1187   : > { %v6209_v13 = vadd.f32 %v6189_v16, %v9780_v22  ;;  %v6192_v40 = vadd.f32 %v6678_v31, %v10080_v63 }
0x1189   : > { %6225 = vst [vmem:[%s10087_s29 + $0x70] sm:$0xff] %v6209_v13  ;;  %v6210_v33 = vadd.f32 %v6192_v40, %v9784_v46 }
0x118b   : > { %6226 = vst [vmem:[%s10087_s29 + $0x78] sm:$0xff] %v6210_v33 }
0x118c   : > { %7803 = shalt.err (!%p7800_p3)
}
0x118d   : > { %s7804_s16 = scalar_lea.hbm %s10136_s15, 2048  ;;  %s7808_s19 = scalar_lea.hbm %s10198_s12, 4096 }
0x118e   : > { %p7805_p4 = scmp.ne.s32.totalorder %s10136_s15, %s7804_s16  ;;  %p7809_p9 = scmp.lt.u32.totalorder %s10136_s15, %s10198_s12 }
0x118f   : > { %p7810_p10 = scmp.lt.u32.totalorder %s7808_s19, %s7804_s16  ;;  %p7812_p12 = scmp.lt.u32.totalorder %s7804_s16, %s10136_s15 }
0x1190   : > { %p7806_p7 = pnand %p7805_p4, %p7966_p5 }
0x1191   : > { %p7811_p11 = por %p7810_p10, %p7809_p9 }
0x1192   : > { %p7807_p8 = pneg %p7806_p7 }
0x1193   : > { %p7813_p13 = por %p7812_p12, %p7811_p11 }
0x1195   : > { %p7814_p0 = pnand %p7813_p13, %p7807_p8 }
0x1197   : > { %7817 = shalt.err (!%p7814_p0)
}
0x1198   : > { %s7861_s30 = smov 128   ;;  %s7862_s28 = smov 8  }
0x1199   : > { %7143 = dma.vmem_to_hbm [thread:$0]  (%p7966_p5), %s10138_s26, 2048, %s10136_s15, %s10145_s25, %s7861_s30, %s7861_s30, %s7862_s28  }
0x119a PF: > { %p7149_p1 = scmp.ge.s32.totalorder %s7852_s24, 2  ;;  %s6257_s18 = sand.u32 1, %s7840_s21  }
0x119b   : > { %s6258_s16 = scalar_lea.sflag [#allocation3], %s6257_s18 }
0x119c   : > { %p7146_p2 = pnand %p7149_p1, %p7970_p6 }
0x119e   : > { %7835 = dma.done.wait (!%p7146_p2), %s6258_s16, 2048  }
0x119f   : > { %7837 = vsyncadd (!%p7146_p2), %s6258_s16, 4294965248  ;;  %s10283_s29 = sld [smem:[#allocation5_spill]]  ;;  %p22_p3 = scmp.ge.s32.totalorder %s7953_s27, 4  }
0x11a0   : > { %s10284_s21 = smov %s7844_s22  ;;  %s10285_s22 = smov %s7848_s23 }
0x11a1   : > { %s10287_s24 = smov %s7953_s27  ;;  %24 = sbr.rel (!%p22_p3) target bundleno = 5 (0x5), region = 103 }
0x11a5   : > { %s10286_s23 = smov %s10283_s29 }
0x11a8   :  { %6263 = vsyncpa [#allocation3], 1 }
0x11a9   :  { %6265 = vsyncpa [#allocation3 + $0x1], 1 }

// kernel: transformer_forward.2
= control target key start
LH: loop header
LB: loop body
LE: loop exit
PB: predicated region body
PF: predicated region fallthrough
CT: control target
= control target key end

     0   :  { %s10504_s0 = inlined_call_operand.hbm [shape: f32[16,16,128], index: 0, kind: input, shape index: {}]   ;;  %s10505_s1 = inlined_call_operand.vmem [shape: f32[1,128], index: 1, kind: input, shape index: {}]   ;;  %s10506_s2 = inlined_call_operand.vmem [shape: f32[1,128], index: 2, kind: input, shape index: {}]   ;;  %s10507_s3 = inlined_call_operand.hbm [shape: bf16[128,384], index: 3, kind: input, shape index: {}]   ;;  %s10508_s4 = inlined_call_operand.hbm [shape: bf16[128,128], index: 4, kind: input, shape index: {}]   ;;  %s10509_s5 = inlined_call_operand.vmem [shape: f32[1,128], index: 5, kind: input, shape index: {}]   ;;  %s10510_s6 = inlined_call_operand.vmem [shape: f32[1,128], index: 6, kind: input, shape index: {}]   ;;  %s10511_s7 = inlined_call_operand.vmem [shape: f32[1,128], index: 7, kind: input, shape index: {}]   ;;  %s10512_s8 = inlined_call_operand.hbm [shape: bf16[128,256], index: 8, kind: input, shape index: {}]   ;;  %s10513_s9 = inlined_call_operand.vmem [shape: f32[1,256], index: 9, kind: input, shape index: {}]   ;;  %s10514_s10 = inlined_call_operand.hbm [shape: bf16[256,128], index: 10, kind: input, shape index: {}]   ;;  %s10515_s11 = inlined_call_operand.hbm [shape: f32[1,128], index: 11, kind: input, shape index: {}]   ;;  %s10516_s12 = inlined_call_operand.vmem [shape: f32[16,16,128], index: 12, kind: output, shape index: {}]  }
   0x1   :  { %10536 = sst [smem:[#allocation41_spill]] %s10507_s3 }
   0x2   :  { %10537 = sst [smem:[#allocation42_spill]] %s10510_s6 }
   0x3   :  { %10538 = sst [smem:[#allocation43_spill]] %s10511_s7 }
   0x4   :  { %10539 = sst [smem:[#allocation44_spill]] %s10512_s8 }
   0x5   :  { %10540 = sst [smem:[#allocation45_spill]] %s10513_s9 }
   0x6   :  { %10541 = sst [smem:[#allocation46_spill]] %s10516_s12 }
   0x7   :  { %17 = vsyncpa [#allocation3], 0 }
   0x8   :  { %19 = vsyncpa [#allocation3 + $0x1], 0 }
   0x9   :  { %20 = vsyncpa [#allocation5], 0 }
   0xa   :  { %21 = vsyncpa [#allocation8], 0 }
   0xb   :  { %22 = vsyncpa [#allocation11], 0  ;;  %s8289_s21 = smov 0   ;;  %s8291_s22 = smov 0  }
   0xc   :  { %s8293_s23 = smov 0   ;;  %s8295_s24 = smov 0  }
   0xd LB: > { %s8206_s25 = smov [#allocation4]   ;;  %s10517_s27 = sadd.s32 4294967295, %s8204_s24   ;;  %s8204_s24 = sphi %s8295_s24, %s10626_s24   ;;  %s8200_s23 = sphi %s8293_s23, %s10625_s23   ;;  %s8196_s22 = sphi %s8291_s22, %s10624_s22   ;;  %s8192_s21 = sphi %s8289_s21, %s10623_s21  }
   0xe   : > { %s334_s26 = sshll.u32 %s8206_s25, 4  ;;  %p6438_p0 = scmp.ge.s32.totalorder %s8204_s24, 1  ;;  %s8318_s26 = int_to_ptr.vmem [resolvable:$true] %s334_s26 }
   0xf   : > { %p8313_p1 = scmp.eq.s32.totalorder %s10517_s27, 0  ;;  %p316_p2 = scmp.lt.s32.totalorder %s8204_s24, 3 }
  0x10   : > { %s8207_s30 = smov [#allocation7]   ;;  %s8208_s15 = smov [#allocation6]  }
  0x11   : > { %s10542_s28 = scalar_select %p8313_p1, 1, 0 }
  0x12   : > { %p8320_p3 = pnand %p6438_p0, %p316_p2  ;;  %s369_s13 = sshll.u32 %s8207_s30, 4  ;;  %s8332_s13 = int_to_ptr.vmem [resolvable:$true] %s369_s13 }
  0x13   : > { %s8334_s16 = sshll.u32 %s8208_s15, 4  ;;  %s10545_s3 = sld [smem:[#allocation41_spill]]  ;;  %s348_s16 = int_to_ptr.vmem [resolvable:$true] %s8334_s16 }
  0x14   : > { %s10543_s29 = scalar_select %p8320_p3, 1, 0 }
  0x15   : > { %p7308_p4 = pneg %p8320_p3 }
  0x17   : > { %p8328_p5 = pnand %p7308_p4, %p8313_p1 }
  0x19   : > { %s7988_s19 = scalar_lea.hbm %s10545_s3, 3072  ;;  %p8344_p7 = pneg %p8328_p5 }
  0x1a   : > { %p7989_p6 = scmp.ne.s32.totalorder %s10545_s3, %s7988_s19  ;;  %p7995_p10 = scmp.lt.u32.totalorder %s7988_s19, %s10545_s3 }
  0x1c   : > { %p7991_p8 = pnand %p8344_p7, %p7989_p6 }
  0x1e   : > { %p7992_p9 = pneg %p7991_p8 }
  0x20   : > { %p7997_p11 = pnand %p7995_p10, %p7992_p9 }
  0x22   : > { %8000 = shalt.err (!%p7997_p11)
}
  0x23   : > { %s8001_s17 = scalar_lea.vmem %s8318_s26, 3072  ;;  %p8009_p2 = scmp.lt.s32.totalorder %s8318_s26, %s8318_s26 }
  0x24   : > { %p8002_p12 = scmp.ne.s32.totalorder %s8318_s26, %s8001_s17  ;;  %p8010_p4 = scmp.lt.s32.totalorder %s8001_s17, %s8001_s17 }
  0x26   : > { %p8004_p13 = pnand %p8002_p12, %p8344_p7  ;;  %p8011_p6 = por %p8010_p4, %p8009_p2 }
  0x28   : > { %p8005_p0 = pneg %p8004_p13 }
  0x2a   : > { %p8012_p8 = pnand %p8011_p6, %p8005_p0 }
  0x2c   : > { %8015 = shalt.err (!%p8012_p8)
}
  0x2d   : > { %s8209_s18 = smov 192   ;;  %s8210_s27 = smov 12  }
  0x2e   : > { %7311 = dma.hbm_to_vmem [thread:$0]  (!%p8328_p5), %s10545_s3, 3072, %s8318_s26, [#allocation5], %s8209_s18, %s8209_s18, %s8210_s27  }
  0x2f   : > { %s10547_s8 = sld [smem:[#allocation44_spill]] }
  0x35   : > { %s8016_s12 = scalar_lea.hbm %s10547_s8, 2048 }
  0x36   : > { %p8017_p9 = scmp.ne.s32.totalorder %s10547_s8, %s8016_s12  ;;  %p8023_p12 = scmp.lt.u32.totalorder %s8016_s12, %s10547_s8 }
  0x38   : > { %p8019_p10 = pnand %p8017_p9, %p8344_p7 }
  0x3a   : > { %p8020_p11 = pneg %p8019_p10 }
  0x3c   : > { %p8025_p13 = pnand %p8023_p12, %p8020_p11 }
  0x3e   : > { %8028 = shalt.err (!%p8025_p13)
}
  0x3f   : > { %s8029_s26 = scalar_lea.vmem %s8332_s13, 2048  ;;  %p8037_p6 = scmp.lt.s32.totalorder %s8332_s13, %s8332_s13 }
  0x40   : > { %p8030_p0 = scmp.ne.s32.totalorder %s8332_s13, %s8029_s26  ;;  %p8038_p8 = scmp.lt.s32.totalorder %s8029_s26, %s8029_s26 }
  0x42   : > { %p8032_p2 = pnand %p8030_p0, %p8344_p7  ;;  %p8039_p9 = por %p8038_p8, %p8037_p6 }
  0x44   : > { %p8033_p4 = pneg %p8032_p2 }
  0x46   : > { %p8040_p10 = pnand %p8039_p9, %p8033_p4 }
  0x48   : > { %8043 = shalt.err (!%p8040_p10)
}
  0x49   : > { %s10521_s7 = smov 128   ;;  %s10522_s6 = smov 8  }
  0x4a   : > { %7317 = dma.hbm_to_vmem [thread:$0]  (!%p8328_p5), %s10547_s8, 2048, %s8332_s13, [#allocation8], %s10521_s7, %s10521_s7, %s10522_s6  }
  0x4b   : > { %s8044_s19 = scalar_lea.hbm %s10508_s4, 1024 }
  0x4c   : > { %p8045_p11 = scmp.ne.s32.totalorder %s10508_s4, %s8044_s19  ;;  %p8051_p0 = scmp.lt.u32.totalorder %s8044_s19, %s10508_s4 }
  0x4e   : > { %p8047_p12 = pnand %p8045_p11, %p8344_p7 }
  0x50   : > { %p8048_p13 = pneg %p8047_p12 }
  0x52   : > { %p8053_p2 = pnand %p8051_p0, %p8048_p13 }
  0x54   : > { %8056 = shalt.err (!%p8053_p2)
}
  0x55   : > { %s8057_s26 = scalar_lea.vmem %s348_s16, 1024  ;;  %p8065_p9 = scmp.lt.s32.totalorder %s348_s16, %s348_s16 }
  0x56   : > { %p8058_p4 = scmp.ne.s32.totalorder %s348_s16, %s8057_s26  ;;  %p8066_p10 = scmp.lt.s32.totalorder %s8057_s26, %s8057_s26 }
  0x58   : > { %p8060_p6 = pnand %p8058_p4, %p8344_p7  ;;  %p8067_p3 = por %p8066_p10, %p8065_p9 }
  0x5a   : > { %p8061_p8 = pneg %p8060_p6 }
  0x5c   : > { %p8068_p1 = pnand %p8067_p3, %p8061_p8 }
  0x5e   : > { %8071 = shalt.err (!%p8068_p1)
}
  0x5f   : > { %s8213_s13 = smov 64   ;;  %s8214_s9 = smov 4  }
  0x60   : > { %7314 = dma.hbm_to_vmem [thread:$0]  (!%p8328_p5), %s10508_s4, 1024, %s348_s16, [#allocation5], %s8213_s13, %s8213_s13, %s8214_s9  }
  0x61   : > { %s8215_s27 = smov [#allocation9]   ;;  %s8216_s20 = smov [#allocation10]  }
  0x62   : > { %s385_s19 = sshll.u32 %s8215_s27, 4  ;;  %s399_s25 = sshll.u32 %s8216_s20, 4  ;;  %s386_s19 = int_to_ptr.vmem [resolvable:$true] %s385_s19  ;;  %s400_s25 = int_to_ptr.vmem [resolvable:$true] %s399_s25 }
  0x63   : > { %s8072_s26 = scalar_lea.hbm %s10514_s10, 2048 }
  0x64   : > { %p8073_p1 = scmp.ne.s32.totalorder %s10514_s10, %s8072_s26  ;;  %p8079_p12 = scmp.lt.u32.totalorder %s8072_s26, %s10514_s10 }
  0x66   : > { %p8075_p3 = pnand %p8073_p1, %p8344_p7 }
  0x68   : > { %p8076_p11 = pneg %p8075_p3 }
  0x6a   : > { %p8081_p13 = pnand %p8079_p12, %p8076_p11 }
  0x6c   : > { %8084 = shalt.err (!%p8081_p13)
}
  0x6d   : > { %s8085_s16 = scalar_lea.vmem %s386_s19, 2048  ;;  %p8093_p6 = scmp.lt.s32.totalorder %s386_s19, %s386_s19 }
  0x6e   : > { %p8086_p0 = scmp.ne.s32.totalorder %s386_s19, %s8085_s16  ;;  %p8094_p8 = scmp.lt.s32.totalorder %s8085_s16, %s8085_s16 }
  0x70   : > { %p8088_p2 = pnand %p8086_p0, %p8344_p7  ;;  %p8095_p9 = por %p8094_p8, %p8093_p6 }
  0x72   : > { %p8089_p4 = pneg %p8088_p2 }
  0x74   : > { %p8096_p10 = pnand %p8095_p9, %p8089_p4 }
  0x76   : > { %8099 = shalt.err (!%p8096_p10)
}
  0x77   : > { %7320 = dma.hbm_to_vmem [thread:$0]  (!%p8328_p5), %s10514_s10, 2048, %s386_s19, [#allocation8], %s8213_s13, %s8213_s13, %s8214_s9  }
  0x78   : > { %s8100_s12 = scalar_lea.hbm %s10515_s11, 16 }
  0x79   : > { %p8101_p1 = scmp.ne.s32.totalorder %s10515_s11, %s8100_s12  ;;  %p8107_p12 = scmp.lt.u32.totalorder %s8100_s12, %s10515_s11 }
  0x7b   : > { %p8103_p3 = pnand %p8101_p1, %p8344_p7 }
  0x7d   : > { %p8104_p11 = pneg %p8103_p3 }
  0x7f   : > { %p8109_p13 = pnand %p8107_p12, %p8104_p11 }
  0x81   : > { %8112 = shalt.err (!%p8109_p13)
}
  0x82   : > { %s8113_s17 = scalar_lea.vmem %s400_s25, 16  ;;  %s8120_s13 = scalar_lea.vmem %s400_s25, 32 }
  0x83   : > { %p8114_p0 = scmp.ne.s32.totalorder %s400_s25, %s8113_s17  ;;  %p8121_p6 = scmp.lt.s32.totalorder %s400_s25, %s400_s25 }
  0x84   : > { %p8122_p8 = scmp.lt.s32.totalorder %s8120_s13, %s8113_s17 }
  0x85   : > { %p8116_p2 = pnand %p8114_p0, %p8344_p7 }
  0x86   : > { %p8123_p9 = por %p8122_p8, %p8121_p6 }
  0x87   : > { %p8117_p4 = pneg %p8116_p2 }
  0x89   : > { %p8124_p10 = pnand %p8123_p9, %p8117_p4 }
  0x8b   : > { %8127 = shalt.err (!%p8124_p10)
}
  0x8c   : > { %7323 = dma.hbm_to_vmem [thread:$0]  (!%p8328_p5), %s10515_s11, 16, %s400_s25, [#allocation11]  }
  0x8d   : > { %s8447_s30 = sadd.s32 1, %s8204_s24   ;;  %s35_s26 = sadd.s32 1, %s8200_s23 }
  0x8e   : > { %s32_s14 = ssub.s32 %s8204_s24, %s8447_s30  ;;  %p42_p1 = scmp.ne.s32.totalorder %s8200_s23, %s8196_s22 }
  0x8f   : > { %p33_p7 = scmp.eq.s32.totalorder %s32_s14, 0  ;;  %p43_p3 = scmp.eq.s32.totalorder %s8204_s24, 0 }
  0x90   : > { %p48_p11 = scmp.ne.s32.totalorder %s8196_s22, %s8192_s21  ;;  %p10548_p13 = scmp.ne.s32.totalorder %s10542_s28, 0 }
  0x91   : > { %s8458_s16 = scalar_select %p33_p7, %s8200_s23, %s35_s26  }
  0x92   : > { %p44_p12 = por %p43_p3, %p42_p1  ;;  %p8462_p0 = por %p10548_p13, %p48_p11 }
  0x93   : > { %p7333_p2 = scmp.lt.s32.totalorder %s8204_s24, 2  ;;  %s410_s6 = sand.u32 1, %s8200_s23  }
  0x94   : > { %s6445_s25 = sshll.u32 %s410_s6, 7  ;;  %s6596_s3 = sshll.u32 %s8204_s24, 11 }
  0x95   : > { %s8472_s18 = scalar_lea.hbm %s10504_s0, %s6596_s3  ;;  %s414_s21 = scalar_lea.vmem [#allocation2], %s6445_s25 }
  0x96   : > { %s422_s27 = sshll.u32 %s414_s21, 4  ;;  %p8476_p5 = pnand %p7333_p2, %p44_p12  ;;  %s8474_s27 = int_to_ptr.vmem [resolvable:$true] %s422_s27 }
  0x97   : > { %s8480_s15 = scalar_lea.sflag [#allocation3], %s410_s6  ;;  %s8128_s17 = scalar_lea.hbm %s8472_s18, 2048 }
  0x98   : > { %p8129_p4 = scmp.ne.s32.totalorder %s8472_s18, %s8128_s17  ;;  %p8130_p6 = pneg %p8476_p5 }
  0x99   : > { %s8133_s19 = scalar_lea.hbm %s10504_s0, 4096  ;;  %p8134_p10 = scmp.lt.u32.totalorder %s8472_s18, %s10504_s0 }
  0x9a   : > { %p8131_p8 = pnand %p8130_p6, %p8129_p4  ;;  %p8135_p7 = scmp.lt.u32.totalorder %s8133_s19, %s8128_s17 }
  0x9b   : > { %p8137_p3 = scmp.lt.u32.totalorder %s8128_s17, %s8472_s18 }
  0x9c   : > { %p8132_p9 = pneg %p8131_p8  ;;  %p8136_p1 = por %p8135_p7, %p8134_p10 }
  0x9e   : > { %p8138_p11 = por %p8137_p3, %p8136_p1 }
  0xa0   : > { %p8139_p12 = pnand %p8138_p11, %p8132_p9 }
  0xa2   : > { %8142 = shalt.err (!%p8139_p12)
}
  0xa3   : > { %s8143_s6 = scalar_lea.vmem %s8474_s27, 2048  ;;  %s8217_s25 = smov [#allocation2]  }
  0xa4   : > { %p8144_p13 = scmp.ne.s32.totalorder %s8474_s27, %s8143_s6  ;;  %s8148_s3 = sshll.u32 %s8217_s25, 4  ;;  %s8149_s3 = int_to_ptr.vmem [resolvable:$false] %s8148_s3 }
  0xa5   : > { %s8150_s8 = scalar_lea.vmem %s8149_s3, 4096  ;;  %p8151_p8 = scmp.lt.s32.totalorder %s8474_s27, %s8149_s3 }
  0xa6   : > { %p8146_p2 = pnand %p8144_p13, %p8130_p6  ;;  %p8152_p10 = scmp.lt.s32.totalorder %s8150_s8, %s8143_s6 }
  0xa8   : > { %p8147_p4 = pneg %p8146_p2  ;;  %p8153_p7 = por %p8152_p10, %p8151_p8 }
  0xaa   : > { %p8154_p1 = pnand %p8153_p7, %p8147_p4 }
  0xac   : > { %8157 = shalt.err (!%p8154_p1)
}
  0xad   : > { %s10551_s12 = smov 8   ;;  %s10552_s21 = smov 128  }
  0xae   : > { %7327 = dma.hbm_to_vmem [thread:$0]  (!%p8476_p5), %s8472_s18, 2048, %s8474_s27, %s8480_s15, %s10552_s21, %s10552_s21, %s10551_s12  }
  0xaf   : > { %p10553_p6 = scmp.ne.s32.totalorder %s10543_s29, 0 }
  0xb1   : > { %434 = sbr.rel (%p10553_p6) target bundleno = 4656 (0x1230), region = 68 }
  0xb8   : > { %s436_s17 = sand.u32 1, %s8196_s22  }
  0xb9   : > { %s6450_s13 = sshll.u32 %s436_s17, 7  ;;  %s437_s9 = scalar_lea.sflag [#allocation3], %s436_s17 }
  0xba   : > { %s8514_s19 = scalar_lea.vmem [#allocation2], %s6450_s13 }
  0xbb   : > { %8175 = dma.done.wait (%p8462_p0), %s437_s9, 2048  }
  0xbc   : > { %8177 = vsyncadd (%p8462_p0), %s437_s9, 4294965248  ;;  %p10554_p9 = scmp.ne.s32.totalorder %s10542_s28, 0 }
  0xbe   : > { %8179 = dma.done.wait (%p10554_p9), [#allocation5], 4096  }
  0xbf   : > { %8181 = vsyncadd (%p10554_p9), [#allocation5], 4294963200 }
  0xc0   : > { %8183 = dma.done.wait (%p10554_p9), [#allocation8], 4096  }
  0xc1   : > { %8185 = vsyncadd (%p10554_p9), [#allocation8], 4294963200 }
  0xc2   : > { %8187 = dma.done.wait (%p10554_p9), [#allocation11], 16  }
  0xc3   : > { %8189 = vsyncadd (%p10554_p9), [#allocation11], 4294967280  ;;  %v511_v0 = vld [vmem:[%s8514_s19] sm:$0xff]  ;;  %v513_v1 = vld [vmem:[%s8514_s19 + $0x10] sm:$0xff]  ;;  %vm8220_vm0 = vmmov 0   ;;  %vm1152_vm1 = vcmask 261120  }
  0xc4   : > { %529 = vadd.xlane.f32.xlu0 %v511_v0  ;;  %533 = vadd.xlane.f32.xlu1 %v513_v1  ;;  %v512_v2 = vld [vmem:[%s8514_s19 + $0x8] sm:$0xff]  ;;  %v514_v3 = vld [vmem:[%s8514_s19 + $0x18] sm:$0xff]  ;;  %v515_v4 = vld [vmem:[%s8514_s19 + $0x20] sm:$0xff]  ;;  %vm1529_vm2 = vcmask 130048   ;;  %s8221_s27 = smov 96   ;;  %s8222_s20 = smov 64  }
  0xc5   : > { %v516_v5 = vld [vmem:[%s8514_s19 + $0x28] sm:$0xff]  ;;  %v8539_v6 = vld [vmem:[%s8514_s19 + $0x30] sm:$0xff]  ;;  %v8542_v7 = vld [vmem:[%s8514_s19 + $0x38] sm:$0xff]  ;;  %s8223_s15 = smov 32   ;;  %vm5202_vm3 = vcmask 523264   ;;  %vm5219_vm4 = vcmask 785408  }
  0xc6   : > { %v8545_v8 = vld [vmem:[%s8514_s19 + $0x40] sm:$0xff]  ;;  %v8548_v9 = vld [vmem:[%s8514_s19 + $0x48] sm:$0xff]  ;;  %v8553_v10 = vld [vmem:[%s8514_s19 + $0x50] sm:$0xff]  ;;  %s10618_s3 = sld [smem:[#allocation42_spill]]  ;;  %s10619_s21 = sld [smem:[#allocation43_spill]] }
  0xc7   : > { %v8556_v11 = vld [vmem:[%s8514_s19 + $0x58] sm:$0xff]  ;;  %v8561_v12 = vld [vmem:[%s8514_s19 + $0x60] sm:$0xff]  ;;  %v8564_v13 = vld [vmem:[%s8514_s19 + $0x68] sm:$0xff]  ;;  %s10620_s9 = sld [smem:[#allocation45_spill]] }
  0xc8   : > { %531 = vadd.xlane.f32.xlu0 %v512_v2  ;;  %535 = vadd.xlane.f32.xlu1 %v514_v3  ;;  %v8569_v14 = vld [vmem:[%s8514_s19 + $0x70] sm:$0xff]  ;;  %v8572_v15 = vld [vmem:[%s8514_s19 + $0x78] sm:$0xff]  ;;  %v7510_v17 = vld [vmem:[#allocation4] ss:$12 sps:$4 sm:$0xff]  }
  0xc9   : > { %v7508_v16 = vld [vmem:[#allocation4 + $0x4] ss:$12 sps:$4 sm:$0xff]   ;;  %v7511_v18 = vld [vmem:[#allocation4 + $0x1c] ss:$12 sps:$4 sm:$0xff]  }
  0xca   : > { %v7513_v19 = vld [vmem:[#allocation4 + $0x8] ss:$12 sps:$4 sm:$0xff]   ;;  %918 = vmatprep.subr.bf16.mxu0 %v7508_v16  ;;  %v7514_v58 = vld [vmem:[#allocation4 + $0x18] ss:$12 sps:$4 sm:$0xff]  }
  0xcb   : > { %919 = vmatpush1.bf16.msra.mxu0 %v7510_v17  ;;  %6822 = vmatprep.subr.bf16.mxu1 %v7513_v19 }
  0xcc   : > { %537 = vadd.xlane.f32.xlu0 %v515_v4  ;;  %539 = vadd.xlane.f32.xlu1 %v516_v5 }
  0xcd   : > { %920 = vmatprep.subr.bf16.mxu0 %v7511_v18  ;;  %6823 = vmatpush3.bf16.msra.mxu1 %v7513_v19  ;;  %v7519_v18 = vld [vmem:[#allocation4 + $0x4c] ss:$12 sps:$4 sm:$0xff]  }
  0xce   : > { %v7521_v19 = vld [vmem:[#allocation4 + $0x38] ss:$12 sps:$4 sm:$0xff]  }
  0xcf   : > { %921 = vmatpush1.bf16.msra.mxu0 %v7514_v58 }
  0xd0   : > { %541 = vadd.xlane.f32.xlu0 %v8539_v6  ;;  %543 = vadd.xlane.f32.xlu1 %v8542_v7 }
  0xd4   : > { %545 = vadd.xlane.f32.xlu0 %v8545_v8  ;;  %547 = vadd.xlane.f32.xlu1 %v8548_v9 }
  0xd8   : > { %549 = vadd.xlane.f32.xlu0 %v8553_v10  ;;  %551 = vadd.xlane.f32.xlu1 %v8556_v11 }
  0xdc   : > { %553 = vadd.xlane.f32.xlu0 %v8561_v12  ;;  %555 = vadd.xlane.f32.xlu1 %v8564_v13 }
  0xe0   : > { %557 = vadd.xlane.f32.xlu0 %v8569_v14  ;;  %559 = vadd.xlane.f32.xlu1 %v8572_v15 }
 0x151   : > { %v530_v20 = vpop.xlane.xlu0 %529  ;;  %v534_v21 = vpop.xlane.xlu1 %533 }
 0x152   : > { %v562_v22 = vmul.f32 0.0078125, %v530_v20  ;;  %v564_v23 = vmul.f32 0.0078125, %v534_v21 }
 0x154   : > { %v8578_v24 = vsub.f32 %v511_v0, %v562_v22  ;;  %v8580_v25 = vsub.f32 %v513_v1, %v564_v23  ;;  %v7515_v0 = vld [vmem:[#allocation4 + $0x34] ss:$12 sps:$4 sm:$0xff]  }
 0x155   : > { %v532_v26 = vpop.xlane.xlu0 %531  ;;  %v536_v27 = vpop.xlane.xlu1 %535  ;;  %v7517_v1 = vld [vmem:[#allocation4 + $0x20] ss:$12 sps:$4 sm:$0xff]   ;;  %922 = vmatprep.subr.bf16.mxu0 %v7515_v0  ;;  %v7522_v22 = vld [vmem:[#allocation4 + $0x48] ss:$12 sps:$4 sm:$0xff]  }
 0x156   : > { %v563_v28 = vmul.f32 0.0078125, %v532_v26  ;;  %v594_v29 = vmul.f32 %v8578_v24, %v8578_v24  ;;  %v565_v30 = vmul.f32 0.0078125, %v536_v27  ;;  %v596_v31 = vmul.f32 %v8580_v25, %v8580_v25  ;;  %6824 = vmatprep.subr.bf16.mxu1 %v7517_v1 }
 0x157   : > { %6825 = vmatpush3.bf16.msra.mxu1 %v7517_v1 }
 0x158   : > { %610 = vadd.xlane.f32.xlu0 %v594_v29  ;;  %v8586_v32 = vsub.f32 %v512_v2, %v563_v28  ;;  %v8588_v33 = vsub.f32 %v514_v3, %v565_v30  ;;  %6826 = vmatprep.subr.bf16.mxu1 %v7521_v19  ;;  %v7523_v29 = vld [vmem:[#allocation4 + $0x64] ss:$12 sps:$4 sm:$0xff]  }
 0x159   : > { %v538_v34 = vpop.xlane.xlu0 %537  ;;  %v540_v35 = vpop.xlane.xlu1 %539  ;;  %v7525_v30 = vld [vmem:[#allocation4 + $0x50] ss:$12 sps:$4 sm:$0xff]  }
 0x15a   : > { %v566_v36 = vmul.f32 0.0078125, %v538_v34  ;;  %v595_v37 = vmul.f32 %v8586_v32, %v8586_v32  ;;  %v567_v38 = vmul.f32 0.0078125, %v540_v35  ;;  %v597_v39 = vmul.f32 %v8588_v33, %v8588_v33 }
 0x15b   : > { %6827 = vmatpush3.bf16.msra.mxu1 %v7521_v19 }
 0x15c   : > { %614 = vadd.xlane.f32.xlu0 %v596_v31  ;;  %612 = vadd.xlane.f32.xlu1 %v595_v37  ;;  %v8594_v40 = vsub.f32 %v515_v4, %v566_v36  ;;  %v8596_v41 = vsub.f32 %v516_v5, %v567_v38  ;;  %v7526_v31 = vld [vmem:[#allocation4 + $0x60] ss:$12 sps:$4 sm:$0xff]   ;;  %v7529_v36 = vld [vmem:[#allocation4 + $0x68] ss:$12 sps:$4 sm:$0xff]   ;;  %v7530_v37 = vld [vmem:[#allocation4 + $0x78] ss:$12 sps:$4 sm:$0xff]  }
 0x15d   : > { %v542_v42 = vpop.xlane.xlu0 %541  ;;  %v544_v43 = vpop.xlane.xlu1 %543  ;;  %6828 = vmatprep.subr.bf16.mxu1 %v7525_v30  ;;  %v7533_v38 = vld [vmem:[#allocation4 + $0x80] ss:$12 sps:$4 sm:$0xff]  }
 0x15e   : > { %v568_v44 = vmul.f32 0.0078125, %v542_v42  ;;  %v598_v45 = vmul.f32 %v8594_v40, %v8594_v40  ;;  %v569_v46 = vmul.f32 0.0078125, %v544_v43  ;;  %v599_v47 = vmul.f32 %v8596_v41, %v8596_v41  ;;  %v7535_v42 = vld [vmem:[#allocation4 + $0xac] ss:$12 sps:$4 sm:$0xff]  }
 0x15f   : > { %6829 = vmatpush3.bf16.msra.mxu1 %v7525_v30  ;;  %v7537_v43 = vld [vmem:[#allocation4 + $0x98] ss:$12 sps:$4 sm:$0xff]  }
 0x160   : > { %616 = vadd.xlane.f32.xlu1 %v597_v39  ;;  %618 = vadd.xlane.f32.xlu0 %v598_v45  ;;  %v8603_v48 = vsub.f32 %v8539_v6, %v568_v44  ;;  %v8606_v49 = vsub.f32 %v8542_v7, %v569_v46  ;;  %v7518_v7 = vld [vmem:[#allocation4 + $0x30] ss:$12 sps:$4 sm:$0xff]   ;;  %v7538_v44 = vld [vmem:[#allocation4 + $0xa8] ss:$12 sps:$4 sm:$0xff]   ;;  %v10523_v46 = vmov 0  }
 0x161   : > { %v546_v50 = vpop.xlane.xlu0 %545  ;;  %v548_v51 = vpop.xlane.xlu1 %547  ;;  %923 = vmatpush1.bf16.msra.mxu0 %v7518_v7  ;;  %6830 = vmatprep.subr.bf16.mxu1 %v7529_v36  ;;  %v7534_v39 = vld [vmem:[#allocation4 + $0x90] ss:$12 sps:$4 sm:$0xff]  }
 0x162   : > { %v570_v52 = vmul.f32 0.0078125, %v546_v50  ;;  %v600_v53 = vmul.f32 %v8603_v48, %v8603_v48  ;;  %v571_v54 = vmul.f32 0.0078125, %v548_v51  ;;  %v601_v55 = vmul.f32 %v8606_v49, %v8606_v49  ;;  %924 = vmatprep.subr.bf16.mxu0 %v7519_v18  ;;  %v7539_v45 = vld [vmem:[#allocation4 + $0xb0] ss:$12 sps:$4 sm:$0xff]   ;;  %950 = vmatprep.mubr.bf16.mxu0 %v10523_v46 }
 0x163   : > { %6831 = vmatpush3.bf16.msra.mxu1 %v7529_v36 }
 0x164   : > { %620 = vadd.xlane.f32.xlu1 %v599_v47  ;;  %622 = vadd.xlane.f32.xlu0 %v600_v53  ;;  %v8613_v56 = vsub.f32 %v8545_v8, %v570_v52  ;;  %v8616_v57 = vsub.f32 %v8548_v9, %v571_v54 }
 0x165   : > { %v550_v59 = vpop.xlane.xlu0 %549  ;;  %v552_v60 = vpop.xlane.xlu1 %551  ;;  %925 = vmatpush1.bf16.msra.mxu0 %v7522_v22  ;;  %6832 = vmatprep.subr.bf16.mxu1 %v7533_v38  ;;  %v8657_v22 = vld [vmem:[%s10505_s1] ss:$0 sm:$0xff] }
 0x166   : > { %v572_v61 = vmul.f32 0.0078125, %v550_v59  ;;  %v602_v62 = vmul.f32 %v8613_v56, %v8613_v56  ;;  %v573_v63 = vmul.f32 0.0078125, %v552_v60  ;;  %v603_v2 = vmul.f32 %v8616_v57, %v8616_v57  ;;  %926 = vmatprep.subr.bf16.mxu0 %v7523_v29 }
 0x167   : > { %6833 = vmatpush3.bf16.msra.mxu1 %v7533_v38 }
 0x168   : > { %624 = vadd.xlane.f32.xlu1 %v601_v55  ;;  %626 = vadd.xlane.f32.xlu0 %v602_v62  ;;  %v8623_v3 = vsub.f32 %v8553_v10, %v572_v61  ;;  %v8626_v4 = vsub.f32 %v8556_v11, %v573_v63 }
 0x169   : > { %v554_v5 = vpop.xlane.xlu0 %553  ;;  %v556_v6 = vpop.xlane.xlu1 %555  ;;  %927 = vmatpush1.bf16.msra.mxu0 %v7526_v31  ;;  %6834 = vmatprep.subr.bf16.mxu1 %v7537_v43 }
 0x16a   : > { %v574_v8 = vmul.f32 0.0078125, %v554_v5  ;;  %v604_v9 = vmul.f32 %v8623_v3, %v8623_v3  ;;  %v575_v16 = vmul.f32 0.0078125, %v556_v6  ;;  %v605_v10 = vmul.f32 %v8626_v4, %v8626_v4 }
 0x16b   : > { %6835 = vmatpush3.bf16.msra.mxu1 %v7537_v43 }
 0x16c   : > { %628 = vadd.xlane.f32.xlu1 %v603_v2  ;;  %630 = vadd.xlane.f32.xlu0 %v604_v9  ;;  %v8633_v11 = vsub.f32 %v8561_v12, %v574_v8  ;;  %v8636_v17 = vsub.f32 %v8564_v13, %v575_v16 }
 0x16d   : > { %v558_v20 = vpop.xlane.xlu0 %557  ;;  %v560_v21 = vpop.xlane.xlu1 %559  ;;  %6836 = vmatprep.subr.bf16.mxu1 %v7539_v45 }
 0x16e   : > { %v576_v23 = vmul.f32 0.0078125, %v558_v20  ;;  %v606_v26 = vmul.f32 %v8633_v11, %v8633_v11  ;;  %v577_v27 = vmul.f32 0.0078125, %v560_v21  ;;  %v607_v12 = vmul.f32 %v8636_v17, %v8636_v17 }
 0x16f   : > { %6837 = vmatpush3.bf16.msra.mxu1 %v7539_v45 }
 0x170   : > { %632 = vadd.xlane.f32.xlu1 %v605_v10  ;;  %634 = vadd.xlane.f32.xlu0 %v606_v26  ;;  %v8643_v13 = vsub.f32 %v8569_v14, %v576_v23  ;;  %v8646_v28 = vsub.f32 %v8572_v15, %v577_v27  ;;  %v7527_v14 = vld [vmem:[#allocation4 + $0x7c] ss:$12 sps:$4 sm:$0xff]   ;;  %v7531_v15 = vld [vmem:[#allocation4 + $0x94] ss:$12 sps:$4 sm:$0xff]  }
 0x171   : > { %928 = vmatprep.subr.bf16.mxu0 %v7527_v14  ;;  %v8664_v14 = vld [vmem:[%s10506_s2] ss:$0 sm:$0xff] }
 0x172   : > { %v608_v34 = vmul.f32 %v8643_v13, %v8643_v13  ;;  %v609_v35 = vmul.f32 %v8646_v28, %v8646_v28  ;;  %929 = vmatpush1.bf16.msra.mxu0 %v7530_v37 }
 0x173   : > { %930 = vmatprep.subr.bf16.mxu0 %v7531_v15 }
 0x174   : > { %636 = vadd.xlane.f32.xlu1 %v607_v12  ;;  %638 = vadd.xlane.f32.xlu0 %v608_v34 }
 0x176   : > { %931 = vmatpush1.bf16.msra.mxu0 %v7534_v39 }
 0x177   : > { %932 = vmatprep.subr.bf16.mxu0 %v7535_v42 }
 0x178   : > { %640 = vadd.xlane.f32.xlu1 %v609_v35 }
 0x17a   : > { %933 = vmatpush1.bf16.msra.mxu0 %v7538_v44 }
 0x1e5   : > { %v611_v47 = vpop.xlane.xlu0 %610 }
 0x1e6   : > { %v642_v50 = vmul.f32 0.0078125, %v611_v47 }
 0x1e8   : > { %v658_v51 = vadd.f32 1e-05, %v642_v50 }
 0x1e9   : > { %v613_v52 = vpop.xlane.xlu1 %612  ;;  %v615_v53 = vpop.xlane.xlu0 %614 }
 0x1ea   : > { %7588 = vrsqrt.f32 %v658_v51  ;;  %v643_v54 = vmul.f32 0.0078125, %v613_v52  ;;  %v644_v55 = vmul.f32 0.0078125, %v615_v53 }
 0x1ec   : > { %v659_v58 = vadd.f32 1e-05, %v643_v54  ;;  %v660_v59 = vadd.f32 1e-05, %v644_v55 }
 0x1ed   : > { %v617_v60 = vpop.xlane.xlu1 %616  ;;  %v619_v61 = vpop.xlane.xlu0 %618 }
 0x1ee   : > { %7590 = vrsqrt.f32 %v659_v58  ;;  %v645_v62 = vmul.f32 0.0078125, %v617_v60  ;;  %v646_v63 = vmul.f32 0.0078125, %v619_v61 }
 0x1ef   : > { %7592 = vrsqrt.f32 %v660_v59 }
 0x1f0   : > { %v661_v0 = vadd.f32 1e-05, %v645_v62  ;;  %v662_v1 = vadd.f32 1e-05, %v646_v63 }
 0x1f1   : > { %v621_v2 = vpop.xlane.xlu1 %620  ;;  %v623_v5 = vpop.xlane.xlu0 %622 }
 0x1f2   : > { %7594 = vrsqrt.f32 %v661_v0  ;;  %v647_v6 = vmul.f32 0.0078125, %v621_v2  ;;  %v648_v7 = vmul.f32 0.0078125, %v623_v5 }
 0x1f3   : > { %7596 = vrsqrt.f32 %v662_v1 }
 0x1f4   : > { %v7589_v8 = vpop.eup %7588  ;;  %v663_v9 = vadd.f32 1e-05, %v647_v6  ;;  %v664_v16 = vadd.f32 1e-05, %v648_v7 }
 0x1f5   : > { %v625_v10 = vpop.xlane.xlu1 %624  ;;  %v627_v18 = vpop.xlane.xlu0 %626  ;;  %v690_v19 = vmul.f32 %v7589_v8, %v8578_v24 }
 0x1f6   : > { %7598 = vrsqrt.f32 %v663_v9  ;;  %v649_v20 = vmul.f32 0.0078125, %v625_v10  ;;  %v650_v21 = vmul.f32 0.0078125, %v627_v18 }
 0x1f7   : > { %7600 = vrsqrt.f32 %v664_v16  ;;  %v712_v34 = vmul.f32 %v8657_v22, %v690_v19 }
 0x1f8   : > { %v7591_v23 = vpop.eup %7590  ;;  %v665_v26 = vadd.f32 1e-05, %v649_v20  ;;  %v666_v27 = vadd.f32 1e-05, %v650_v21 }
 0x1f9   : > { %v7593_v12 = vpop.eup %7592  ;;  %v629_v29 = vpop.xlane.xlu1 %628  ;;  %v691_v31 = vmul.f32 %v7591_v23, %v8586_v32  ;;  %v734_v45 = vadd.f32 %v8664_v14, %v712_v34 }
 0x1fa   : > { %v631_v30 = vpop.xlane.xlu0 %630  ;;  %7602 = vrsqrt.f32 %v665_v26  ;;  %v651_v24 = vmul.f32 0.0078125, %v629_v29  ;;  %v692_v36 = vmul.f32 %v7593_v12, %v8580_v25 }
 0x1fb   : > { %v652_v35 = vmul.f32 0.0078125, %v631_v30  ;;  %7604 = vrsqrt.f32 %v666_v27  ;;  %v713_v37 = vmul.f32 %v8657_v22, %v691_v31 }
 0x1fc   : > { %v7595_v15 = vpop.eup %7594  ;;  %v667_v38 = vadd.f32 1e-05, %v651_v24  ;;  %v714_v32 = vmul.f32 %v8657_v22, %v692_v36 }
 0x1fd   : > { %v668_v39 = vadd.f32 1e-05, %v652_v35  ;;  %v7597_v42 = vpop.eup %7596  ;;  %v633_v43 = vpop.xlane.xlu1 %632  ;;  %v735_v47 = vadd.f32 %v8664_v14, %v713_v37  ;;  %v693_v50 = vmul.f32 %v7595_v15, %v8588_v33 }
 0x1fe   : > { %v635_v44 = vpop.xlane.xlu0 %634  ;;  %7606 = vrsqrt.f32 %v667_v38  ;;  %v653_v51 = vmul.f32 0.0078125, %v633_v43  ;;  %v694_v54 = vmul.f32 %v7597_v42, %v8594_v40  ;;  %v736_v60 = vadd.f32 %v8664_v14, %v714_v32 }
 0x1ff   : > { %v654_v25 = vmul.f32 0.0078125, %v635_v44  ;;  %7608 = vrsqrt.f32 %v668_v39  ;;  %v750_v52 = vpack.c.bf16 %v735_v47, %v734_v45  ;;  %v715_v53 = vmul.f32 %v8657_v22, %v693_v50 }
 0x200   : > { %v7599_v55 = vpop.eup %7598  ;;  %v669_v58 = vadd.f32 1e-05, %v653_v51  ;;  %v716_v1 = vmul.f32 %v8657_v22, %v694_v54 }
 0x201   : > { %v670_v59 = vadd.f32 1e-05, %v654_v25  ;;  %v7601_v61 = vpop.eup %7600  ;;  %v637_v62 = vpop.xlane.xlu1 %636  ;;  %951 = vmatmul.mubr.bf16.vlgmr.msra.gmra.mrb[0].mxu0 %v750_v52  ;;  %6838 = vmatprep.mubr.bf16.mxu1 %v750_v52  ;;  %v737_v33 = vadd.f32 %v8664_v14, %v715_v53  ;;  %v695_v0 = vmul.f32 %v7599_v55, %v8596_v41 }
 0x202   : > { %v639_v63 = vpop.xlane.xlu0 %638  ;;  %7610 = vrsqrt.f32 %v669_v58  ;;  %v655_v2 = vmul.f32 0.0078125, %v637_v62  ;;  %960 = vmatprep.mubr.bf16.mxu0 %v10523_v46  ;;  %v696_v40 = vmul.f32 %v7601_v61, %v8603_v48  ;;  %v738_v19 = vadd.f32 %v8664_v14, %v716_v1 }
 0x203   : > { %v656_v5 = vmul.f32 0.0078125, %v639_v63  ;;  %7612 = vrsqrt.f32 %v670_v59  ;;  %v751_v6 = vpack.c.bf16 %v737_v33, %v736_v60  ;;  %v717_v7 = vmul.f32 %v8657_v22, %v695_v0 }
 0x204   : > { %v7603_v8 = vpop.eup %7602  ;;  %v671_v9 = vadd.f32 1e-05, %v655_v2  ;;  %v718_v10 = vmul.f32 %v8657_v22, %v696_v40 }
 0x205   : > { %v672_v16 = vadd.f32 1e-05, %v656_v5  ;;  %v7605_v18 = vpop.eup %7604  ;;  %v641_v41 = vpop.xlane.xlu1 %640  ;;  %6839 = vmatmul.mubr.bf16.vlgmr.msra.gmra.mrb[0].mxu1 %v751_v6  ;;  %v739_v20 = vadd.f32 %v8664_v14, %v717_v7  ;;  %v697_v21 = vmul.f32 %v7603_v8, %v8606_v49 }
 0x206   : > { %7614 = vrsqrt.f32 %v671_v9  ;;  %v657_v48 = vmul.f32 0.0078125, %v641_v41  ;;  %v698_v23 = vmul.f32 %v7605_v18, %v8613_v56  ;;  %v740_v30 = vadd.f32 %v8664_v14, %v718_v10 }
 0x207   : > { %7616 = vrsqrt.f32 %v672_v16  ;;  %v752_v26 = vpack.c.bf16 %v739_v20, %v738_v19  ;;  %v719_v27 = vmul.f32 %v8657_v22, %v697_v21 }
 0x208   : > { %v7607_v12 = vpop.eup %7606  ;;  %v673_v29 = vadd.f32 1e-05, %v657_v48  ;;  %v720_v49 = vmul.f32 %v8657_v22, %v698_v23 }
 0x209   : > { %v7609_v31 = vpop.eup %7608  ;;  %961 = vmatmul.mubr.bf16.gmra.mrb[4].mxu0 %v751_v6  ;;  %6842 = vmatprep.mubr.bf16.mxu1 %v752_v26  ;;  %v741_v34 = vadd.f32 %v8664_v14, %v719_v27  ;;  %v699_v24 = vmul.f32 %v7607_v12, %v8616_v57 }
 0x20a   : > { %7618 = vrsqrt.f32 %v673_v29  ;;  %970 = vmatprep.mubr.bf16.mxu0 %v10523_v46  ;;  %v700_v56 = vmul.f32 %v7609_v31, %v8623_v3  ;;  %v742_v39 = vadd.f32 %v8664_v14, %v720_v49 }
 0x20b   : > { %v753_v35 = vpack.c.bf16 %v741_v34, %v740_v30  ;;  %v721_v36 = vmul.f32 %v8657_v22, %v699_v24 }
 0x20c   : > { %v7611_v37 = vpop.eup %7610  ;;  %v722_v15 = vmul.f32 %v8657_v22, %v700_v56 }
 0x20d   : > { %v7613_v38 = vpop.eup %7612  ;;  %6843 = vmatmul.mubr.bf16.gmra.mrb[4].mxu1 %v753_v35  ;;  %v743_v32 = vadd.f32 %v8664_v14, %v721_v36  ;;  %v701_v57 = vmul.f32 %v7611_v37, %v8626_v4 }
 0x20e   : > { %v702_v42 = vmul.f32 %v7613_v38, %v8633_v11  ;;  %v744_v45 = vadd.f32 %v8664_v14, %v722_v15 }
 0x20f   : > { %v754_v43 = vpack.c.bf16 %v743_v32, %v742_v39  ;;  %v723_v44 = vmul.f32 %v8657_v22, %v701_v57 }
 0x210   : > { %v7615_v3 = vpop.eup %7614  ;;  %v724_v25 = vmul.f32 %v8657_v22, %v702_v42 }
 0x211   : > { %v7617_v47 = vpop.eup %7616  ;;  %971 = vmatmul.mubr.bf16.gmra.mrb[8].mxu0 %v752_v26  ;;  %6846 = vmatprep.mubr.bf16.mxu1 %v754_v43  ;;  %v745_v50 = vadd.f32 %v8664_v14, %v723_v44  ;;  %v703_v51 = vmul.f32 %v7615_v3, %v8636_v17 }
 0x212   : > { %980 = vmatprep.mubr.bf16.mxu0 %v10523_v46  ;;  %v704_v4 = vmul.f32 %v7617_v47, %v8643_v13  ;;  %v746_v54 = vadd.f32 %v8664_v14, %v724_v25 }
 0x213   : > { %v755_v11 = vpack.c.bf16 %v745_v50, %v744_v45  ;;  %v725_v52 = vmul.f32 %v8657_v22, %v703_v51 }
 0x214   : > { %v7619_v53 = vpop.eup %7618  ;;  %v726_v59 = vmul.f32 %v8657_v22, %v704_v4 }
 0x215   : > { %6847 = vmatmul.mubr.bf16.gmra.mrb[8].mxu1 %v755_v11  ;;  %v747_v55 = vadd.f32 %v8664_v14, %v725_v52  ;;  %v705_v58 = vmul.f32 %v7619_v53, %v8646_v28  ;;  %v10525_v28 = vmov 0.0  }
 0x216   : > { %v748_v13 = vadd.f32 %v8664_v14, %v726_v59  ;;  %6854 = vmatprep.subr.bf16.mxu1 %v10525_v28  ;;  %6878 = vmatprep.subr.bf16.mxu0 %v10525_v28 }
 0x217   : > { %v756_v17 = vpack.c.bf16 %v747_v55, %v746_v54  ;;  %v727_v60 = vmul.f32 %v8657_v22, %v705_v58 }
 0x219   : > { %981 = vmatmul.mubr.bf16.gmra.mrb[12].mxu0 %v753_v35  ;;  %6850 = vmatprep.mubr.bf16.mxu1 %v756_v17  ;;  %v749_v61 = vadd.f32 %v8664_v14, %v727_v60 }
 0x21a   : > { %990 = vmatprep.mubr.bf16.mxu0 %v10523_v46 }
 0x21b   : > { %v757_v62 = vpack.c.bf16 %v749_v61, %v748_v13 }
 0x21d   : > { %6851 = vmatmul.mubr.bf16.gmra.mrb[12].mxu1 %v757_v62 }
 0x21e   : > { %6856 = vmatprep.mubr.msk.bf16.mxu1 %vm8220_vm0, %v10525_v28 }
 0x221   : > { %991 = vmatmul.mubr.bf16.gmra.mrb[16].mxu0 %v754_v43 }
 0x222   : > { %1000 = vmatprep.mubr.bf16.mxu0 %v10523_v46 }
 0x229   : > { %1001 = vmatmul.mubr.bf16.gmra.mrb[20].mxu0 %v755_v11 }
 0x22a   : > { %1010 = vmatprep.mubr.bf16.mxu0 %v10523_v46 }
 0x231   : > { %1011 = vmatmul.mubr.bf16.gmra.mrb[24].mxu0 %v756_v17 }
 0x232   : > { %1020 = vmatprep.mubr.bf16.mxu0 %v10523_v46 }
 0x239   : > { %1021 = vmatmul.mubr.bf16.gmra.mrb[28].mxu0 %v757_v62 }
 0x23a   : > { %6880 = vmatprep.mubr.msk.bf16.mxu0 %vm8220_vm0, %v10525_v28 }
 0x2d4   : > { %v952_v22 = vpop.f32.mrb[0].mxu0 }
 0x2d5   : > { %v954_v14 = vpop.f32.mrb[1].mxu0 }
 0x2d6   : > { %v956_v63 = vpop.f32.mrb[2].mxu0 }
 0x2d7   : > { %v8724_v33 = vpack.c.bf16 %v956_v63, %v952_v22  ;;  %v958_v0 = vpop.f32.mrb[3].mxu0 }
 0x2d8   : > { %v8726_v1 = vpack.c.bf16 %v958_v0, %v954_v14  ;;  %v6840_v2 = vpop.f32.mrb[0].mxu1 }
 0x2d9   : > { %v1065_v5 = vpop.f32.mrb[1].mxu1 }
 0x2da   : > { %v6841_v40 = vpop.f32.mrb[2].mxu1  ;;  %v1157_v6 = vsel %vm1152_vm1, %v8726_v1, 0 }
 0x2db   : > { %v8730_v7 = vpack.c.bf16 %v6841_v40, %v6840_v2  ;;  %v1068_v8 = vpop.f32.mrb[3].mxu1  ;;  %6855 = vmatpush3.bf16.xpose.msra.mxu1 %v1157_v6 }
 0x2dc   : > { %v8732_v9 = vpack.c.bf16 %v1068_v8, %v1065_v5  ;;  %v962_v16 = vpop.f32.mrb[4].mxu0  ;;  %6860 = vmatprep.subr.bf16.mxu1 %v10525_v28 }
 0x2dd   : > { %v964_v10 = vpop.f32.mrb[5].mxu0 }
 0x2de   : > { %v966_v18 = vpop.f32.mrb[6].mxu0 }
 0x2df   : > { %v8735_v41 = vpack.c.bf16 %v966_v18, %v962_v16  ;;  %v968_v19 = vpop.f32.mrb[7].mxu0 }
 0x2e0   : > { %v8737_v20 = vpack.c.bf16 %v968_v19, %v964_v10  ;;  %v6844_v21 = vpop.f32.mrb[4].mxu1 }
 0x2e1   : > { %v1081_v48 = vpop.f32.mrb[5].mxu1 }
 0x2e2   : > { %v6845_v23 = vpop.f32.mrb[6].mxu1  ;;  %6857 = vmatmul.mubr.msk.bf16.vlgmr.msra.gmra.mrb[16].mxu1 %vm1152_vm1, %v8724_v33  ;;  %v1204_v26 = vsel %vm1152_vm1, %v8737_v20, 0 }
 0x2e3   : > { %v8743_v27 = vpack.c.bf16 %v6845_v23, %v6844_v21  ;;  %v1084_v12 = vpop.f32.mrb[7].mxu1  ;;  %6861 = vmatpush3.bf16.xpose.msra.mxu1 %v1204_v26  ;;  %6862 = vmatprep.mubr.msk.bf16.mxu1 %vm8220_vm0, %v10525_v28 }
 0x2e4   : > { %v8747_v29 = vpack.c.bf16 %v1084_v12, %v1081_v48  ;;  %v972_v30 = vpop.f32.mrb[8].mxu0  ;;  %6866 = vmatprep.subr.bf16.mxu1 %v10525_v28 }
 0x2e5   : > { %v974_v31 = vpop.f32.mrb[9].mxu0 }
 0x2e6   : > { %v976_v34 = vpop.f32.mrb[10].mxu0 }
 0x2e7   : > { %v8750_v24 = vpack.c.bf16 %v976_v34, %v972_v30  ;;  %v978_v49 = vpop.f32.mrb[11].mxu0 }
 0x2e8   : > { %v8752_v56 = vpack.c.bf16 %v978_v49, %v974_v31  ;;  %v6848_v35 = vpop.f32.mrb[8].mxu1 }
 0x2e9   : > { %v1097_v36 = vpop.f32.mrb[9].mxu1 }
 0x2ea   : > { %v6849_v37 = vpop.f32.mrb[10].mxu1  ;;  %6863 = vmatmul.mubr.msk.bf16.vlgmr.msra.gmra.mrb[20].mxu1 %vm1152_vm1, %v8735_v41  ;;  %v1251_v15 = vsel %vm1152_vm1, %v8752_v56, 0 }
 0x2eb   : > { %v8758_v38 = vpack.c.bf16 %v6849_v37, %v6848_v35  ;;  %v1100_v39 = vpop.f32.mrb[11].mxu1  ;;  %6867 = vmatpush3.bf16.xpose.msra.mxu1 %v1251_v15  ;;  %6868 = vmatprep.mubr.msk.bf16.mxu1 %vm8220_vm0, %v10525_v28 }
 0x2ec   : > { %v8762_v32 = vpack.c.bf16 %v1100_v39, %v1097_v36  ;;  %v982_v57 = vpop.f32.mrb[12].mxu0  ;;  %6872 = vmatprep.subr.bf16.mxu1 %v10525_v28 }
 0x2ed   : > { %v984_v42 = vpop.f32.mrb[13].mxu0 }
 0x2ee   : > { %v986_v43 = vpop.f32.mrb[14].mxu0 }
 0x2ef   : > { %v8765_v44 = vpack.c.bf16 %v986_v43, %v982_v57  ;;  %v988_v3 = vpop.f32.mrb[15].mxu0 }
 0x2f0   : > { %v8767_v45 = vpack.c.bf16 %v988_v3, %v984_v42  ;;  %v6852_v47 = vpop.f32.mrb[12].mxu1 }
 0x2f1   : > { %v1113_v50 = vpop.f32.mrb[13].mxu1 }
 0x2f2   : > { %v6853_v51 = vpop.f32.mrb[14].mxu1  ;;  %6869 = vmatmul.mubr.msk.bf16.vlgmr.msra.gmra.mrb[24].mxu1 %vm1152_vm1, %v8750_v24  ;;  %v1298_v25 = vsel %vm1152_vm1, %v8767_v45, 0 }
 0x2f3   : > { %v8773_v4 = vpack.c.bf16 %v6853_v51, %v6852_v47  ;;  %v1116_v11 = vpop.f32.mrb[15].mxu1  ;;  %6873 = vmatpush3.bf16.xpose.msra.mxu1 %v1298_v25  ;;  %6874 = vmatprep.mubr.msk.bf16.mxu1 %vm8220_vm0, %v10525_v28 }
 0x2f4   : > { %v8777_v52 = vpack.c.bf16 %v1116_v11, %v1113_v50  ;;  %v992_v53 = vpop.f32.mrb[16].mxu0  ;;  %6884 = vmatprep.subr.bf16.mxu1 %v10525_v28 }
 0x2f5   : > { %v994_v54 = vpop.f32.mrb[17].mxu0 }
 0x2f6   : > { %v996_v55 = vpop.f32.mrb[18].mxu0 }
 0x2f7   : > { %v8780_v58 = vpack.c.bf16 %v996_v55, %v992_v53  ;;  %v998_v59 = vpop.f32.mrb[19].mxu0 }
 0x2f8   : > { %v8782_v17 = vpack.c.bf16 %v998_v59, %v994_v54 }
 0x2fa   : > { %6875 = vmatmul.mubr.msk.bf16.vlgmr.msra.gmra.mrb[28].mxu1 %vm1152_vm1, %v8765_v44  ;;  %v1345_v60 = vsel %vm1152_vm1, %v8782_v17, 0 }
 0x2fb   : > { %6879 = vmatpush3.bf16.xpose.msra.mxu0 %v1345_v60  ;;  %6886 = vmatprep.mubr.msk.bf16.mxu1 %vm8220_vm0, %v10525_v28 }
 0x2fc   : > { %v1002_v13 = vpop.f32.mrb[20].mxu0  ;;  %6890 = vmatprep.subr.bf16.mxu0 %v10525_v28 }
 0x2fd   : > { %v1004_v61 = vpop.f32.mrb[21].mxu0 }
 0x2fe   : > { %v1006_v62 = vpop.f32.mrb[22].mxu0 }
 0x2ff   : > { %v8791_v22 = vpack.c.bf16 %v1006_v62, %v1002_v13  ;;  %v1008_v14 = vpop.f32.mrb[23].mxu0 }
 0x300   : > { %v8793_v63 = vpack.c.bf16 %v1008_v14, %v1004_v61 }
 0x302   : > { %6881 = vmatmul.mubr.msk.bf16.vlgmr.msra.gmra.mrb[32].mxu0 %vm1152_vm1, %v8780_v58  ;;  %v1392_v0 = vsel %vm1152_vm1, %v8793_v63, 0 }
 0x303   : > { %6885 = vmatpush3.bf16.xpose.msra.mxu1 %v1392_v0  ;;  %6892 = vmatprep.mubr.msk.bf16.mxu0 %vm8220_vm0, %v10525_v28 }
 0x304   : > { %v1012_v2 = vpop.f32.mrb[24].mxu0  ;;  %6896 = vmatprep.subr.bf16.mxu1 %v10525_v28 }
 0x305   : > { %v1014_v5 = vpop.f32.mrb[25].mxu0 }
 0x306   : > { %v1016_v40 = vpop.f32.mrb[26].mxu0 }
 0x307   : > { %v8802_v6 = vpack.c.bf16 %v1016_v40, %v1012_v2  ;;  %v1018_v8 = vpop.f32.mrb[27].mxu0 }
 0x308   : > { %v8804_v16 = vpack.c.bf16 %v1018_v8, %v1014_v5 }
 0x30a   : > { %6887 = vmatmul.mubr.msk.bf16.vlgmr.msra.gmra.mrb[32].mxu1 %vm1152_vm1, %v8791_v22  ;;  %v1439_v10 = vsel %vm1152_vm1, %v8804_v16, 0 }
 0x30b   : > { %6891 = vmatpush3.bf16.xpose.msra.mxu0 %v1439_v10  ;;  %6898 = vmatprep.mubr.msk.bf16.mxu1 %vm8220_vm0, %v10525_v28 }
 0x30c   : > { %v1022_v18 = vpop.f32.mrb[28].mxu0  ;;  %6902 = vmatprep.subr.bf16.mxu0 %v10525_v28 }
 0x30d   : > { %v1024_v19 = vpop.f32.mrb[29].mxu0 }
 0x30e   : > { %v1026_v21 = vpop.f32.mrb[30].mxu0 }
 0x30f   : > { %v8813_v48 = vpack.c.bf16 %v1026_v21, %v1022_v18  ;;  %v1028_v23 = vpop.f32.mrb[31].mxu0 }
 0x310   : > { %v8815_v26 = vpack.c.bf16 %v1028_v23, %v1024_v19 }
 0x312   : > { %6893 = vmatmul.mubr.msk.bf16.vlgmr.msra.gmra.mrb[36].mxu0 %vm1152_vm1, %v8802_v6  ;;  %v1486_v12 = vsel %vm1152_vm1, %v8815_v26, 0 }
 0x313   : > { %6897 = vmatpush3.bf16.xpose.msra.mxu1 %v1486_v12  ;;  %6903 = vmatpush3.bf16.msra.mxu0 %v8732_v9 }
 0x314   : > { %6908 = vmatprep.subr.bf16.mxu1 %v10525_v28  ;;  %6904 = vmatprep.mubr.msk.bf16.mxu0 %vm8220_vm0, %v10525_v28 }
 0x315   : > { %6914 = vmatprep.subr.bf16.mxu0 %v10525_v28 }
 0x31a   : > { %6899 = vmatmul.mubr.msk.bf16.vlgmr.msra.gmra.mrb[36].mxu1 %vm1152_vm1, %v8813_v48 }
 0x31b   : > { %6909 = vmatpush3.bf16.msra.mxu1 %v8730_v7  ;;  %6910 = vmatprep.mubr.msk.bf16.mxu1 %vm8220_vm0, %v10525_v28 }
 0x31c   : > { %6920 = vmatprep.subr.bf16.mxu1 %v10525_v28 }
 0x3b5   : > { %v8832_v30 = vpop.f32.mrb[16].mxu1 }
 0x3b6   : > { %v6858_v31 = vpop.f32.mrb[17].mxu1  ;;  %v1530_v34 = vsel %vm1529_vm2, %v8832_v30, -inf }
 0x3b7   : > { %1531 = vmax.xlane.f32.xlu0 %v1530_v34  ;;  %v8836_v49 = vpop.f32.mrb[18].mxu1 }
 0x3b8   : > { %v6859_v35 = vpop.f32.mrb[19].mxu1  ;;  %v1533_v36 = vsel %vm1529_vm2, %v8836_v49, -inf }
 0x3b9   : > { %1534 = vmax.xlane.f32.xlu1 %v1533_v36 }
 0x3bd   : > { %v8840_v37 = vpop.f32.mrb[20].mxu1 }
 0x3be   : > { %v6864_v15 = vpop.f32.mrb[21].mxu1  ;;  %v1536_v39 = vsel %vm1529_vm2, %v8840_v37, -inf }
 0x3bf   : > { %1537 = vmax.xlane.f32.xlu0 %v1536_v39  ;;  %v8844_v57 = vpop.f32.mrb[22].mxu1 }
 0x3c0   : > { %v6865_v42 = vpop.f32.mrb[23].mxu1  ;;  %v1539_v43 = vsel %vm1529_vm2, %v8844_v57, -inf }
 0x3c1   : > { %1540 = vmax.xlane.f32.xlu1 %v1539_v43 }
 0x3c5   : > { %v8848_v3 = vpop.f32.mrb[24].mxu1 }
 0x3c6   : > { %v6870_v47 = vpop.f32.mrb[25].mxu1  ;;  %v1542_v50 = vsel %vm1529_vm2, %v8848_v3, -inf }
 0x3c7   : > { %1543 = vmax.xlane.f32.xlu0 %v1542_v50  ;;  %v8852_v51 = vpop.f32.mrb[26].mxu1 }
 0x3c8   : > { %v6871_v25 = vpop.f32.mrb[27].mxu1  ;;  %v1545_v11 = vsel %vm1529_vm2, %v8852_v51, -inf }
 0x3c9   : > { %1546 = vmax.xlane.f32.xlu1 %v1545_v11 }
 0x3cd   : > { %v8856_v53 = vpop.f32.mrb[28].mxu1 }
 0x3ce   : > { %v6876_v54 = vpop.f32.mrb[29].mxu1  ;;  %v1548_v55 = vsel %vm1529_vm2, %v8856_v53, -inf }
 0x3cf   : > { %1549 = vmax.xlane.f32.xlu0 %v1548_v55  ;;  %v8860_v59 = vpop.f32.mrb[30].mxu1 }
 0x3d0   : > { %v6877_v60 = vpop.f32.mrb[31].mxu1  ;;  %v1551_v13 = vsel %vm1529_vm2, %v8860_v59, -inf }
 0x3d1   : > { %1552 = vmax.xlane.f32.xlu1 %v1551_v13 }
 0x3d5   : > { %v8864_v61 = vpop.f32.mrb[32].mxu0 }
 0x3d6   : > { %v6882_v62 = vpop.f32.mrb[33].mxu0  ;;  %v1554_v14 = vsel %vm1529_vm2, %v8864_v61, -inf }
 0x3d7   : > { %1555 = vmax.xlane.f32.xlu0 %v1554_v14  ;;  %v8868_v0 = vpop.f32.mrb[34].mxu0 }
 0x3d8   : > { %v6883_v2 = vpop.f32.mrb[35].mxu0  ;;  %v1557_v5 = vsel %vm1529_vm2, %v8868_v0, -inf }
 0x3d9   : > { %1558 = vmax.xlane.f32.xlu1 %v1557_v5 }
 0x3dd   : > { %v8872_v40 = vpop.f32.mrb[32].mxu1 }
 0x3de   : > { %v6888_v8 = vpop.f32.mrb[33].mxu1  ;;  %v1560_v10 = vsel %vm1529_vm2, %v8872_v40, -inf }
 0x3df   : > { %v8876_v18 = vpop.f32.mrb[34].mxu1  ;;  %1561 = vmax.xlane.f32.xlu0 %v1560_v10 }
 0x3e0   : > { %v6889_v19 = vpop.f32.mrb[35].mxu1  ;;  %v1563_v21 = vsel %vm1529_vm2, %v8876_v18, -inf }
 0x3e1   : > { %1564 = vmax.xlane.f32.xlu1 %v1563_v21 }
 0x3e5   : > { %v8880_v23 = vpop.f32.mrb[36].mxu0 }
 0x3e6   : > { %v6894_v12 = vpop.f32.mrb[37].mxu0  ;;  %v1566_v31 = vsel %vm1529_vm2, %v8880_v23, -inf }
 0x3e7   : > { %1567 = vmax.xlane.f32.xlu0 %v1566_v31  ;;  %v8884_v34 = vpop.f32.mrb[38].mxu0 }
 0x3e8   : > { %v6895_v35 = vpop.f32.mrb[39].mxu0  ;;  %v1569_v36 = vsel %vm1529_vm2, %v8884_v34, -inf }
 0x3e9   : > { %1570 = vmax.xlane.f32.xlu1 %v1569_v36 }
 0x3ed   : > { %v8888_v15 = vpop.f32.mrb[36].mxu1 }
 0x3ee   : > { %v6900_v39 = vpop.f32.mrb[37].mxu1  ;;  %v1572_v42 = vsel %vm1529_vm2, %v8888_v15, -inf }
 0x3ef   : > { %1573 = vmax.xlane.f32.xlu0 %v1572_v42  ;;  %v8892_v43 = vpop.f32.mrb[38].mxu1 }
 0x3f0   : > { %v6901_v47 = vpop.f32.mrb[39].mxu1  ;;  %v1575_v50 = vsel %vm1529_vm2, %v8892_v43, -inf }
 0x3f1   : > { %1576 = vmax.xlane.f32.xlu1 %v1575_v50 }
 0x444   : > { %v1532_v25 = vpop.xlane.xlu0 %1531 }
 0x445   : > { %v1578_v11 = vsub.f32 %v8832_v30, %v1532_v25 }
 0x446   : > { %v1535_v54 = vpop.xlane.xlu1 %1534 }
 0x447   : > { %v1594_v55 = vmul.f32 1.442695, %v1578_v11  ;;  %v1579_v60 = vsub.f32 %v8836_v49, %v1535_v54 }
 0x449   : > { %7620 = vpow2.f32 %v1594_v55  ;;  %v1596_v13 = vmul.f32 1.442695, %v1579_v60 }
 0x44b   : > { %7622 = vpow2.f32 %v1596_v13 }
 0x44c   : > { %v1538_v62 = vpop.xlane.xlu0 %1537 }
 0x44d   : > { %v1580_v14 = vsub.f32 %v8840_v37, %v1538_v62 }
 0x44e   : > { %v1541_v2 = vpop.xlane.xlu1 %1540 }
 0x44f   : > { %v1598_v5 = vmul.f32 1.442695, %v1580_v14  ;;  %v1581_v8 = vsub.f32 %v8844_v57, %v1541_v2 }
 0x451   : > { %7624 = vpow2.f32 %v1598_v5  ;;  %v1600_v10 = vmul.f32 1.442695, %v1581_v8 }
 0x453   : > { %v8900_v19 = vpop.eup %7620  ;;  %7626 = vpow2.f32 %v1600_v10 }
 0x454   : > { %v1544_v30 = vpop.xlane.xlu0 %1543  ;;  %v1626_v21 = vsel %vm1529_vm2, %v8900_v19, 0.0 }
 0x455   : > { %v8904_v49 = vpop.eup %7622  ;;  %v1582_v12 = vsub.f32 %v8848_v3, %v1544_v30  ;;  %1627 = vadd.xlane.f32.xlu0 %v1626_v21 }
 0x456   : > { %v1547_v31 = vpop.xlane.xlu1 %1546  ;;  %v1629_v37 = vsel %vm1529_vm2, %v8904_v49, 0.0 }
 0x457   : > { %v1602_v35 = vmul.f32 1.442695, %v1582_v12  ;;  %v1583_v57 = vsub.f32 %v8852_v51, %v1547_v31  ;;  %1630 = vadd.xlane.f32.xlu1 %v1629_v37 }
 0x459   : > { %7628 = vpow2.f32 %v1602_v35  ;;  %v1604_v36 = vmul.f32 1.442695, %v1583_v57 }
 0x45b   : > { %v8910_v39 = vpop.eup %7624  ;;  %7630 = vpow2.f32 %v1604_v36 }
 0x45c   : > { %v1550_v42 = vpop.xlane.xlu0 %1549  ;;  %v1632_v47 = vsel %vm1529_vm2, %v8910_v39, 0.0 }
 0x45d   : > { %v8914_v50 = vpop.eup %7626  ;;  %v1584_v3 = vsub.f32 %v8856_v53, %v1550_v42  ;;  %1633 = vadd.xlane.f32.xlu0 %v1632_v47 }
 0x45e   : > { %v1553_v25 = vpop.xlane.xlu1 %1552  ;;  %v1635_v11 = vsel %vm1529_vm2, %v8914_v50, 0.0 }
 0x45f   : > { %v1606_v51 = vmul.f32 1.442695, %v1584_v3  ;;  %v1585_v54 = vsub.f32 %v8860_v59, %v1553_v25  ;;  %1636 = vadd.xlane.f32.xlu1 %v1635_v11 }
 0x461   : > { %7632 = vpow2.f32 %v1606_v51  ;;  %v1608_v55 = vmul.f32 1.442695, %v1585_v54 }
 0x463   : > { %v8920_v60 = vpop.eup %7628  ;;  %7634 = vpow2.f32 %v1608_v55 }
 0x464   : > { %v1556_v13 = vpop.xlane.xlu0 %1555  ;;  %v1638_v62 = vsel %vm1529_vm2, %v8920_v60, 0.0 }
 0x465   : > { %v8924_v14 = vpop.eup %7630  ;;  %v1586_v53 = vsub.f32 %v8864_v61, %v1556_v13  ;;  %1639 = vadd.xlane.f32.xlu0 %v1638_v62 }
 0x466   : > { %v1559_v2 = vpop.xlane.xlu1 %1558  ;;  %v1641_v5 = vsel %vm1529_vm2, %v8924_v14, 0.0 }
 0x467   : > { %v1610_v59 = vmul.f32 1.442695, %v1586_v53  ;;  %v1587_v8 = vsub.f32 %v8868_v0, %v1559_v2  ;;  %1642 = vadd.xlane.f32.xlu1 %v1641_v5 }
 0x469   : > { %7636 = vpow2.f32 %v1610_v59  ;;  %v1612_v10 = vmul.f32 1.442695, %v1587_v8 }
 0x46b   : > { %v8930_v30 = vpop.eup %7632  ;;  %7638 = vpow2.f32 %v1612_v10 }
 0x46c   : > { %v1562_v21 = vpop.xlane.xlu0 %1561  ;;  %v1644_v12 = vsel %vm1529_vm2, %v8930_v30, 0.0 }
 0x46d   : > { %v8934_v31 = vpop.eup %7634  ;;  %v1588_v61 = vsub.f32 %v8872_v40, %v1562_v21  ;;  %1645 = vadd.xlane.f32.xlu0 %v1644_v12 }
 0x46e   : > { %v1565_v37 = vpop.xlane.xlu1 %1564  ;;  %v1647_v35 = vsel %vm1529_vm2, %v8934_v31, 0.0 }
 0x46f   : > { %v1614_v0 = vmul.f32 1.442695, %v1588_v61  ;;  %v1589_v57 = vsub.f32 %v8876_v18, %v1565_v37  ;;  %1648 = vadd.xlane.f32.xlu1 %v1647_v35 }
 0x471   : > { %7640 = vpow2.f32 %v1614_v0  ;;  %v1616_v36 = vmul.f32 1.442695, %v1589_v57 }
 0x473   : > { %v8940_v42 = vpop.eup %7636  ;;  %7642 = vpow2.f32 %v1616_v36 }
 0x474   : > { %v1568_v47 = vpop.xlane.xlu0 %1567  ;;  %v1650_v3 = vsel %vm1529_vm2, %v8940_v42, 0.0 }
 0x475   : > { %v8944_v25 = vpop.eup %7638  ;;  %v1590_v40 = vsub.f32 %v8880_v23, %v1568_v47  ;;  %1651 = vadd.xlane.f32.xlu0 %v1650_v3 }
 0x476   : > { %v1571_v11 = vpop.xlane.xlu1 %1570  ;;  %v1653_v51 = vsel %vm1529_vm2, %v8944_v25, 0.0 }
 0x477   : > { %v1618_v18 = vmul.f32 1.442695, %v1590_v40  ;;  %v1591_v54 = vsub.f32 %v8884_v34, %v1571_v11  ;;  %1654 = vadd.xlane.f32.xlu1 %v1653_v51 }
 0x479   : > { %7644 = vpow2.f32 %v1618_v18  ;;  %v1620_v55 = vmul.f32 1.442695, %v1591_v54 }
 0x47b   : > { %v8950_v13 = vpop.eup %7640  ;;  %7646 = vpow2.f32 %v1620_v55 }
 0x47c   : > { %v1574_v62 = vpop.xlane.xlu0 %1573  ;;  %v1656_v53 = vsel %vm1529_vm2, %v8950_v13, 0.0 }
 0x47d   : > { %v8954_v2 = vpop.eup %7642  ;;  %v1592_v23 = vsub.f32 %v8888_v15, %v1574_v62  ;;  %1657 = vadd.xlane.f32.xlu0 %v1656_v53 }
 0x47e   : > { %v1659_v5 = vsel %vm1529_vm2, %v8954_v2, 0.0  ;;  %v1577_v61 = vpop.xlane.xlu1 %1576 }
 0x47f   : > { %v1622_v59 = vmul.f32 1.442695, %v1592_v23  ;;  %1660 = vadd.xlane.f32.xlu1 %v1659_v5  ;;  %v1593_v37 = vsub.f32 %v8892_v43, %v1577_v61 }
 0x481   : > { %7648 = vpow2.f32 %v1622_v59  ;;  %v1624_v35 = vmul.f32 1.442695, %v1593_v37 }
 0x483   : > { %v8959_v34 = vpop.eup %7644  ;;  %7650 = vpow2.f32 %v1624_v35 }
 0x484   : > { %v1662_v8 = vsel %vm1529_vm2, %v8959_v34, 0.0 }
 0x485   : > { %v8963_v10 = vpop.eup %7646  ;;  %1663 = vadd.xlane.f32.xlu0 %v1662_v8 }
 0x486   : > { %v1665_v21 = vsel %vm1529_vm2, %v8963_v10, 0.0 }
 0x487   : > { %1666 = vadd.xlane.f32.xlu1 %v1665_v21 }
 0x48b   : > { %v8967_v15 = vpop.eup %7648 }
 0x48c   : > { %v1668_v12 = vsel %vm1529_vm2, %v8967_v15, 0.0 }
 0x48d   : > { %1669 = vadd.xlane.f32.xlu0 %v1668_v12  ;;  %v8990_v0 = vpop.eup %7650 }
 0x48e   : > { %v1671_v43 = vsel %vm1529_vm2, %v8990_v0, 0.0 }
 0x498   : > { %2123 = vrot.lane.b32.xlu1 %v8737_v20, %s8221_s27 }
 0x49c   : > { %2067 = vrot.lane.b32.xlu1 %v8724_v33, %s8221_s27 }
 0x4a3   : > { %2070 = vrot.lane.b32.xlu0 %v8726_v1, %s8221_s27 }
 0x4a7   : > { %2120 = vrot.lane.b32.xlu0 %v8735_v41, %s8221_s27 }
 0x4ab   : > { %2173 = vrot.lane.b32.xlu0 %v8750_v24, %s8221_s27 }
 0x4af   : > { %2226 = vrot.lane.b32.xlu0 %v8765_v44, %s8221_s27 }
 0x4b3   : > { %2279 = vrot.lane.b32.xlu0 %v8780_v58, %s8221_s27 }
 0x4b7   : > { %2332 = vrot.lane.b32.xlu0 %v8791_v22, %s8221_s27 }
 0x4bb   : > { %2385 = vrot.lane.b32.xlu0 %v8802_v6, %s8221_s27 }
 0x4c0   : > { %1672 = vadd.xlane.f32.xlu1 %v1671_v43 }
 0x4d1   : > { %2176 = vrot.lane.b32.xlu1 %v8752_v56, %s8221_s27 }
 0x4d5   : > { %2229 = vrot.lane.b32.xlu1 %v8767_v45, %s8221_s27 }
 0x4d9   : > { %2282 = vrot.lane.b32.xlu1 %v8782_v17, %s8221_s27 }
 0x4dd   : > { %2335 = vrot.lane.b32.xlu1 %v8793_v63, %s8221_s27 }
 0x4e1   : > { %2388 = vrot.lane.b32.xlu1 %v8804_v16, %s8221_s27 }
 0x4e2   : > { %v1628_v57 = vpop.xlane.xlu0 %1627 }
 0x4e3   : > { %7652 = vrcp.f32 %v1628_v57 }
 0x4e4   : > { %v1631_v36 = vpop.xlane.xlu1 %1630 }
 0x4e5   : > { %7654 = vrcp.f32 %v1631_v36  ;;  %2441 = vrot.lane.b32.xlu1 %v8815_v26, %s8221_s27 }
 0x4e9   : > { %2438 = vrot.lane.b32.xlu1 %v8813_v48, %s8221_s27 }
 0x4ea   : > { %v1634_v47 = vpop.xlane.xlu0 %1633 }
 0x4eb   : > { %7656 = vrcp.f32 %v1634_v47 }
 0x4ec   : > { %v1637_v3 = vpop.xlane.xlu1 %1636 }
 0x4ed   : > { %v7653_v40 = vpop.eup %7652  ;;  %7658 = vrcp.f32 %v1637_v3 }
 0x4ee   : > { %v1690_v51 = vmul.f32 %v7653_v40, %v8900_v19 }
 0x4ef   : > { %v7655_v11 = vpop.eup %7654 }
 0x4f0   : > { %v1691_v18 = vmul.f32 %v7655_v11, %v8904_v49 }
 0x4f2   : > { %v1640_v54 = vpop.xlane.xlu0 %1639  ;;  %v1706_v55 = vpack.c.bf16 %v1691_v18, %v1690_v51 }
 0x4f3   : > { %7660 = vrcp.f32 %v1640_v54 }
 0x4f4   : > { %6905 = vmatmul.mubr.msk.bf16.vlgmr.msra.gmra.mrb[40].mxu0 %vm1529_vm2, %v1706_v55  ;;  %v1643_v62 = vpop.xlane.xlu1 %1642 }
 0x4f5   : > { %v7657_v53 = vpop.eup %7656  ;;  %6915 = vmatpush3.bf16.msra.mxu0 %v8747_v29  ;;  %7662 = vrcp.f32 %v1643_v62  ;;  %6916 = vmatprep.mubr.msk.bf16.mxu0 %vm8220_vm0, %v10525_v28 }
 0x4f6   : > { %6926 = vmatprep.subr.bf16.mxu0 %v10525_v28  ;;  %v1692_v19 = vmul.f32 %v7657_v53, %v8910_v39 }
 0x4f7   : > { %v7659_v23 = vpop.eup %7658 }
 0x4f8   : > { %v1693_v49 = vmul.f32 %v7659_v23, %v8914_v50 }
 0x4fa   : > { %v1646_v5 = vpop.xlane.xlu0 %1645  ;;  %v1707_v59 = vpack.c.bf16 %v1693_v49, %v1692_v19 }
 0x4fb   : > { %7664 = vrcp.f32 %v1646_v5 }
 0x4fc   : > { %6911 = vmatmul.mubr.msk.bf16.vlgmr.msra.gmra.mrb[40].mxu1 %vm1529_vm2, %v1707_v59  ;;  %v1649_v8 = vpop.xlane.xlu1 %1648 }
 0x4fd   : > { %v7661_v21 = vpop.eup %7660  ;;  %6921 = vmatpush3.bf16.msra.mxu1 %v8743_v27  ;;  %7666 = vrcp.f32 %v1649_v8  ;;  %6922 = vmatprep.mubr.msk.bf16.mxu1 %vm8220_vm0, %v10525_v28 }
 0x4fe   : > { %6932 = vmatprep.subr.bf16.mxu1 %v10525_v28  ;;  %v1694_v39 = vmul.f32 %v7661_v21, %v8920_v60 }
 0x4ff   : > { %v7663_v12 = vpop.eup %7662 }
 0x500   : > { %v1695_v50 = vmul.f32 %v7663_v12, %v8924_v14 }
 0x502   : > { %v1652_v61 = vpop.xlane.xlu0 %1651  ;;  %v1708_v37 = vpack.c.bf16 %v1695_v50, %v1694_v39 }
 0x503   : > { %7668 = vrcp.f32 %v1652_v61 }
 0x504   : > { %6917 = vmatmul.mubr.msk.bf16.vlgmr.msra.gmra.mrb[44].mxu0 %vm1529_vm2, %v1708_v37  ;;  %v1655_v35 = vpop.xlane.xlu1 %1654 }
 0x505   : > { %v7665_v43 = vpop.eup %7664  ;;  %6927 = vmatpush3.bf16.msra.mxu0 %v8762_v32  ;;  %7670 = vrcp.f32 %v1655_v35  ;;  %6928 = vmatprep.mubr.msk.bf16.mxu0 %vm8220_vm0, %v10525_v28 }
 0x506   : > { %6938 = vmatprep.subr.bf16.mxu0 %v10525_v28  ;;  %v1696_v60 = vmul.f32 %v7665_v43, %v8930_v30 }
 0x507   : > { %v7667_v57 = vpop.eup %7666 }
 0x508   : > { %v1697_v14 = vmul.f32 %v7667_v57, %v8934_v31 }
 0x50a   : > { %v1658_v36 = vpop.xlane.xlu0 %1657  ;;  %v1709_v47 = vpack.c.bf16 %v1697_v14, %v1696_v60 }
 0x50b   : > { %7672 = vrcp.f32 %v1658_v36 }
 0x50c   : > { %6923 = vmatmul.mubr.msk.bf16.vlgmr.msra.gmra.mrb[44].mxu1 %vm1529_vm2, %v1709_v47  ;;  %v1661_v3 = vpop.xlane.xlu1 %1660 }
 0x50d   : > { %v7669_v40 = vpop.eup %7668  ;;  %6933 = vmatpush3.bf16.msra.mxu1 %v8758_v38  ;;  %7674 = vrcp.f32 %v1661_v3  ;;  %6934 = vmatprep.mubr.msk.bf16.mxu1 %vm8220_vm0, %v10525_v28 }
 0x50e   : > { %6944 = vmatprep.subr.bf16.mxu1 %v10525_v28  ;;  %v1698_v30 = vmul.f32 %v7669_v40, %v8940_v42 }
 0x50f   : > { %v7671_v11 = vpop.eup %7670 }
 0x510   : > { %v1699_v31 = vmul.f32 %v7671_v11, %v8944_v25 }
 0x512   : > { %v1664_v51 = vpop.xlane.xlu0 %1663  ;;  %v1710_v18 = vpack.c.bf16 %v1699_v31, %v1698_v30 }
 0x513   : > { %7676 = vrcp.f32 %v1664_v51 }
 0x514   : > { %6929 = vmatmul.mubr.msk.bf16.vlgmr.msra.gmra.mrb[48].mxu0 %vm1529_vm2, %v1710_v18  ;;  %v1667_v54 = vpop.xlane.xlu1 %1666 }
 0x515   : > { %v7673_v55 = vpop.eup %7672  ;;  %6939 = vmatpush3.bf16.msra.mxu0 %v8777_v52  ;;  %7678 = vrcp.f32 %v1667_v54  ;;  %6940 = vmatprep.mubr.msk.bf16.mxu0 %vm8220_vm0, %v10525_v28 }
 0x516   : > { %6950 = vmatprep.subr.bf16.mxu0 %v10525_v28  ;;  %v1700_v42 = vmul.f32 %v7673_v55, %v8950_v13 }
 0x517   : > { %v7675_v62 = vpop.eup %7674 }
 0x518   : > { %v1701_v25 = vmul.f32 %v7675_v62, %v8954_v2  ;;  %v2124_v21 = vpop.permute.xlu1 %2123 }
 0x519   : > { %v2129_v40 = vsel %vm1152_vm1, %v2124_v21, 0 }
 0x51a   : > { %v1711_v53 = vpack.c.bf16 %v1701_v25, %v1700_v42  ;;  %v1670_v23 = vpop.xlane.xlu0 %1669 }
 0x51b   : > { %7680 = vrcp.f32 %v1670_v23 }
 0x51c   : > { %6935 = vmatmul.mubr.msk.bf16.vlgmr.msra.gmra.mrb[48].mxu1 %vm1529_vm2, %v1711_v53  ;;  %v2068_v12 = vpop.permute.xlu1 %2067 }
 0x51d   : > { %v7677_v19 = vpop.eup %7676  ;;  %6945 = vmatpush3.bf16.msra.mxu1 %v8773_v4  ;;  %6946 = vmatprep.mubr.msk.bf16.mxu1 %vm8220_vm0, %v10525_v28 }
 0x51e   : > { %6956 = vmatprep.subr.bf16.mxu1 %v10525_v28  ;;  %v1702_v5 = vmul.f32 %v7677_v19, %v8959_v34  ;;  %v2071_v13 = vpop.permute.xlu0 %2070 }
 0x51f   : > { %v7679_v49 = vpop.eup %7678  ;;  %v2076_v2 = vsel %vm1152_vm1, %v2071_v13, 0 }
 0x520   : > { %v1703_v59 = vmul.f32 %v7679_v49, %v8963_v10 }
 0x522   : > { %v1712_v8 = vpack.c.bf16 %v1703_v59, %v1702_v5  ;;  %v2121_v34 = vpop.permute.xlu0 %2120 }
 0x524   : > { %6941 = vmatmul.mubr.msk.bf16.vlgmr.msra.gmra.mrb[52].mxu0 %vm1529_vm2, %v1712_v8 }
 0x525   : > { %6951 = vmatpush3.bf16.xpose.msra.mxu0 %v2076_v2  ;;  %6952 = vmatprep.mubr.msk.bf16.mxu0 %vm8220_vm0, %v10525_v28  ;;  %v7681_v35 = vpop.eup %7680 }
 0x526   : > { %6962 = vmatprep.subr.bf16.mxu0 %v10525_v28  ;;  %v2174_v39 = vpop.permute.xlu0 %2173  ;;  %v1704_v60 = vmul.f32 %v7681_v35, %v8967_v15 }
 0x52a   : > { %v2227_v43 = vpop.permute.xlu0 %2226 }
 0x52c   : > { %6953 = vmatmul.mubr.msk.bf16.vlgmr.msra.gmra.mrb[56].mxu0 %vm1152_vm1, %v2068_v12 }
 0x52d   : > { %6964 = vmatprep.mubr.msk.bf16.mxu0 %vm8220_vm0, %v10525_v28 }
 0x52e   : > { %v2280_v11 = vpop.permute.xlu0 %2279 }
 0x532   : > { %v2333_v31 = vpop.permute.xlu0 %2332 }
 0x536   : > { %v2386_v18 = vpop.permute.xlu0 %2385 }
 0x54d   : > { %v1673_v10 = vpop.xlane.xlu1 %1672 }
 0x54e   : > { %7682 = vrcp.f32 %v1673_v10 }
 0x551   : > { %v2177_v50 = vpop.permute.xlu1 %2176 }
 0x552   : > { %v2182_v61 = vsel %vm1152_vm1, %v2177_v50, 0 }
 0x553   : > { %6963 = vmatpush3.bf16.xpose.msra.mxu0 %v2182_v61 }
 0x554   : > { %6974 = vmatprep.subr.bf16.mxu0 %v10525_v28 }
 0x555   : > { %v2230_v37 = vpop.permute.xlu1 %2229 }
 0x556   : > { %v2235_v51 = vsel %vm1152_vm1, %v2230_v37, 0 }
 0x558   : > { %v7683_v57 = vpop.eup %7682 }
 0x559   : > { %v1705_v14 = vmul.f32 %v7683_v57, %v8990_v0  ;;  %v2283_v36 = vpop.permute.xlu1 %2282 }
 0x55a   : > { %v2288_v47 = vsel %vm1152_vm1, %v2283_v36, 0  ;;  %6965 = vmatmul.mubr.msk.bf16.vlgmr.msra.gmra.mrb[60].mxu0 %vm1152_vm1, %v2174_v39 }
 0x55b   : > { %6975 = vmatpush3.bf16.xpose.msra.mxu0 %v2288_v47  ;;  %v1713_v3 = vpack.c.bf16 %v1705_v14, %v1704_v60  ;;  %6976 = vmatprep.mubr.msk.bf16.mxu0 %vm8220_vm0, %v10525_v28 }
 0x55c   : > { %6986 = vmatprep.subr.bf16.mxu0 %v10525_v28 }
 0x55d   : > { %6947 = vmatmul.mubr.msk.bf16.vlgmr.msra.gmra.mrb[52].mxu1 %vm1529_vm2, %v1713_v3  ;;  %v2336_v15 = vpop.permute.xlu1 %2335 }
 0x55e   : > { %6957 = vmatpush3.bf16.xpose.msra.mxu1 %v2129_v40  ;;  %6958 = vmatprep.mubr.msk.bf16.mxu1 %vm8220_vm0, %v10525_v28  ;;  %v2341_v54 = vsel %vm1152_vm1, %v2336_v15, 0 }
 0x55f   : > { %6968 = vmatprep.subr.bf16.mxu1 %v10525_v28 }
 0x561   : > { %v2389_v0 = vpop.permute.xlu1 %2388 }
 0x562   : > { %v2394_v30 = vsel %vm1152_vm1, %v2389_v0, 0  ;;  %6977 = vmatmul.mubr.msk.bf16.vlgmr.msra.gmra.mrb[64].mxu0 %vm1152_vm1, %v2280_v11 }
 0x563   : > { %6987 = vmatpush3.bf16.xpose.msra.mxu0 %v2394_v30  ;;  %6988 = vmatprep.mubr.msk.bf16.mxu0 %vm8220_vm0, %v10525_v28 }
 0x564   : > { %6998 = vmatprep.subr.bf16.mxu0 %v10525_v28 }
 0x565   : > { %6959 = vmatmul.mubr.msk.bf16.vlgmr.msra.gmra.mrb[56].mxu1 %vm1152_vm1, %v2121_v34  ;;  %v2442_v55 = vpop.permute.xlu1 %2441 }
 0x566   : > { %6969 = vmatpush3.bf16.xpose.msra.mxu1 %v2235_v51  ;;  %6970 = vmatprep.mubr.msk.bf16.mxu1 %vm8220_vm0, %v10525_v28  ;;  %v2447_v62 = vsel %vm1152_vm1, %v2442_v55, 0 }
 0x567   : > { %6980 = vmatprep.subr.bf16.mxu1 %v10525_v28 }
 0x569   : > { %v2439_v42 = vpop.permute.xlu1 %2438 }
 0x56a   : > { %6989 = vmatmul.mubr.msk.bf16.vlgmr.msra.gmra.mrb[68].mxu0 %vm1152_vm1, %v2386_v18 }
 0x56b   : > { %7000 = vmatprep.mubr.msk.bf16.mxu0 %vm8220_vm0, %v10525_v28 }
 0x56d   : > { %6971 = vmatmul.mubr.msk.bf16.vlgmr.msra.gmra.mrb[60].mxu1 %vm1152_vm1, %v2227_v43 }
 0x56e   : > { %6981 = vmatpush3.bf16.xpose.msra.mxu1 %v2341_v54  ;;  %6982 = vmatprep.mubr.msk.bf16.mxu1 %vm8220_vm0, %v10525_v28 }
 0x56f   : > { %6992 = vmatprep.subr.bf16.mxu1 %v10525_v28 }
 0x575   : > { %6983 = vmatmul.mubr.msk.bf16.vlgmr.msra.gmra.mrb[64].mxu1 %vm1152_vm1, %v2333_v31 }
 0x576   : > { %6993 = vmatpush3.bf16.xpose.msra.mxu1 %v2447_v62  ;;  %6994 = vmatprep.mubr.msk.bf16.mxu1 %vm8220_vm0, %v10525_v28 }
 0x577   : > { %7004 = vmatprep.subr.bf16.mxu1 %v10525_v28 }
 0x57d   : > { %6995 = vmatmul.mubr.msk.bf16.vlgmr.msra.gmra.mrb[68].mxu1 %vm1152_vm1, %v2439_v42 }
 0x57e   : > { %7006 = vmatprep.mubr.msk.bf16.mxu1 %vm8220_vm0, %v10525_v28 }
 0x5c7   : > { %v9100_v25 = vpop.f32.mrb[40].mxu0 }
 0x5c8   : > { %10555 = vst [vmem:[#allocation16_spill] sm:$0xff] %v9100_v25  ;;  %v6906_v53 = vpop.f32.mrb[41].mxu0 }
 0x5c9   : > { %v9102_v23 = vpop.f32.mrb[42].mxu0 }
 0x5ca   : > { %10556 = vst [vmem:[#allocation17_spill] sm:$0xff] %v9102_v23  ;;  %v6907_v19 = vpop.f32.mrb[43].mxu0 }
 0x5cf   : > { %v9104_v49 = vpop.f32.mrb[40].mxu1 }
 0x5d0   : > { %10557 = vst [vmem:[#allocation18_spill] sm:$0xff] %v9104_v49  ;;  %v6912_v5 = vpop.f32.mrb[41].mxu1 }
 0x5d1   : > { %v9106_v59 = vpop.f32.mrb[42].mxu1 }
 0x5d2   : > { %10558 = vst [vmem:[#allocation19_spill] sm:$0xff] %v9106_v59  ;;  %v6913_v13 = vpop.f32.mrb[43].mxu1 }
 0x5d7   : > { %v9108_v8 = vpop.f32.mrb[44].mxu0 }
 0x5d8   : > { %10559 = vst [vmem:[#allocation20_spill] sm:$0xff] %v9108_v8  ;;  %v6918_v2 = vpop.f32.mrb[45].mxu0 }
 0x5d9   : > { %v9110_v21 = vpop.f32.mrb[46].mxu0 }
 0x5da   : > { %10560 = vst [vmem:[#allocation21_spill] sm:$0xff] %v9110_v21  ;;  %v6919_v12 = vpop.f32.mrb[47].mxu0 }
 0x5df   : > { %v9112_v34 = vpop.f32.mrb[44].mxu1 }
 0x5e0   : > { %10561 = vst [vmem:[#allocation22_spill] sm:$0xff] %v9112_v34  ;;  %v6924_v10 = vpop.f32.mrb[45].mxu1 }
 0x5e1   : > { %v9114_v39 = vpop.f32.mrb[46].mxu1 }
 0x5e2   : > { %10562 = vst [vmem:[#allocation23_spill] sm:$0xff] %v9114_v39  ;;  %v6925_v50 = vpop.f32.mrb[47].mxu1 }
 0x5e7   : > { %v9116_v61 = vpop.f32.mrb[48].mxu0 }
 0x5e8   : > { %10563 = vst [vmem:[#allocation24_spill] sm:$0xff] %v9116_v61  ;;  %v6930_v37 = vpop.f32.mrb[49].mxu0 }
 0x5e9   : > { %v9118_v35 = vpop.f32.mrb[50].mxu0 }
 0x5ea   : > { %10564 = vst [vmem:[#allocation25_spill] sm:$0xff] %v9118_v35  ;;  %v6931_v43 = vpop.f32.mrb[51].mxu0 }
 0x5ef   : > { %v9120_v57 = vpop.f32.mrb[48].mxu1 }
 0x5f0   : > { %10565 = vst [vmem:[#allocation26_spill] sm:$0xff] %v9120_v57  ;;  %v6936_v60 = vpop.f32.mrb[49].mxu1 }
 0x5f1   : > { %v9122_v14 = vpop.f32.mrb[50].mxu1 }
 0x5f2   : > { %10566 = vst [vmem:[#allocation27_spill] sm:$0xff] %v9122_v14  ;;  %v6937_v36 = vpop.f32.mrb[51].mxu1 }
 0x5f7   : > { %v9124_v47 = vpop.f32.mrb[52].mxu0 }
 0x5f8   : > { %10567 = vst [vmem:[#allocation28_spill] sm:$0xff] %v9124_v47  ;;  %v6942_v3 = vpop.f32.mrb[53].mxu0 }
 0x5f9   : > { %v9126_v40 = vpop.f32.mrb[54].mxu0 }
 0x5fa   : > { %10568 = vst [vmem:[#allocation29_spill] sm:$0xff] %v9126_v40  ;;  %v6943_v11 = vpop.f32.mrb[55].mxu0 }
 0x5ff   : > { %v9128_v15 = vpop.f32.mrb[56].mxu0 }
 0x600   : > { %v6954_v0 = vpop.f32.mrb[57].mxu0  ;;  %v2490_v30 = vsel %vm1529_vm2, %v9128_v15, -inf }
 0x601   : > { %2491 = vmax.xlane.f32.xlu0 %v2490_v30  ;;  %v9132_v31 = vpop.f32.mrb[58].mxu0 }
 0x602   : > { %v6955_v51 = vpop.f32.mrb[59].mxu0  ;;  %v2493_v18 = vsel %vm1529_vm2, %v9132_v31, -inf }
 0x603   : > { %2494 = vmax.xlane.f32.xlu1 %v2493_v18 }
 0x614   : > { %2723 = vrot.lane.b32.xlu1 %v8730_v7, %s8221_s27 }
 0x618   : > { %2771 = vrot.lane.b32.xlu1 %v8747_v29, %s8221_s27 }
 0x61c   : > { %2819 = vrot.lane.b32.xlu1 %v8743_v27, %s8221_s27 }
 0x62d   : > { %v9142_v54 = vpop.f32.mrb[60].mxu0 }
 0x62e   : > { %v6966_v55 = vpop.f32.mrb[61].mxu0  ;;  %v2502_v0 = vsel %vm1529_vm2, %v9142_v54, -inf }
 0x62f   : > { %v9144_v62 = vpop.f32.mrb[62].mxu0 }
 0x630   : > { %v9146_v42 = vpop.f32.mrb[52].mxu1  ;;  %v6967_v53 = vpop.f32.mrb[63].mxu0  ;;  %v2505_v18 = vsel %vm1529_vm2, %v9144_v62, -inf }
 0x631   : > { %10569 = vst [vmem:[#allocation30_spill] sm:$0xff] %v9146_v42  ;;  %v6948_v19 = vpop.f32.mrb[53].mxu1 }
 0x632   : > { %v9148_v5 = vpop.f32.mrb[54].mxu1 }
 0x633   : > { %10570 = vst [vmem:[#allocation31_spill] sm:$0xff] %v9148_v5  ;;  %v6949_v13 = vpop.f32.mrb[55].mxu1 }
 0x635   : > { %v9150_v2 = vpop.f32.mrb[64].mxu0 }
 0x636   : > { %v6978_v12 = vpop.f32.mrb[65].mxu0 }
 0x637   : > { %v9152_v10 = vpop.f32.mrb[66].mxu0 }
 0x638   : > { %v9154_v50 = vpop.f32.mrb[56].mxu1  ;;  %v6979_v37 = vpop.f32.mrb[67].mxu0 }
 0x639   : > { %v6960_v43 = vpop.f32.mrb[57].mxu1  ;;  %v2496_v60 = vsel %vm1529_vm2, %v9154_v50, -inf }
 0x63a   : > { %2497 = vmax.xlane.f32.xlu0 %v2496_v60  ;;  %v9158_v36 = vpop.f32.mrb[58].mxu1  ;;  %v2517_v60 = vsel %vm1529_vm2, %v9152_v10, -inf }
 0x63b   : > { %v6961_v3 = vpop.f32.mrb[59].mxu1  ;;  %v2499_v13 = vsel %vm1529_vm2, %v9158_v36, -inf }
 0x63d   : > { %v9160_v11 = vpop.f32.mrb[68].mxu0 }
 0x63e   : > { %v6990_v30 = vpop.f32.mrb[69].mxu0  ;;  %2503 = vmax.xlane.f32.xlu0 %v2502_v0 }
 0x63f   : > { %v9164_v51 = vpop.f32.mrb[70].mxu0 }
 0x640   : > { %2506 = vmax.xlane.f32.xlu1 %v2505_v18  ;;  %v9168_v55 = vpop.f32.mrb[60].mxu1  ;;  %v6991_v53 = vpop.f32.mrb[71].mxu0 }
 0x641   : > { %v6972_v19 = vpop.f32.mrb[61].mxu1 }
 0x642   : > { %2500 = vmax.xlane.f32.xlu0 %v2499_v13  ;;  %v9172_v12 = vpop.f32.mrb[62].mxu1  ;;  %v2529_v19 = vsel %vm1529_vm2, %v9164_v51, -inf }
 0x643   : > { %v6973_v37 = vpop.f32.mrb[63].mxu1  ;;  %v2511_v43 = vsel %vm1529_vm2, %v9172_v12, -inf }
 0x644   : > { %2512 = vmax.xlane.f32.xlu1 %v2511_v43 }
 0x648   : > { %2518 = vmax.xlane.f32.xlu1 %v2517_v60  ;;  %v9178_v3 = vpop.f32.mrb[64].mxu1 }
 0x649   : > { %v6984_v0 = vpop.f32.mrb[65].mxu1 }
 0x64a   : > { %v9180_v30 = vpop.f32.mrb[66].mxu1  ;;  %v2508_v0 = vsel %vm1529_vm2, %v9168_v55, -inf }
 0x64b   : > { %v6985_v18 = vpop.f32.mrb[67].mxu1  ;;  %v2523_v53 = vsel %vm1529_vm2, %v9180_v30, -inf }
 0x64c   : > { %2524 = vmax.xlane.f32.xlu1 %v2523_v53  ;;  %v2514_v18 = vsel %vm1529_vm2, %v9150_v2, -inf  ;;  %v2520_v53 = vsel %vm1529_vm2, %v9178_v3, -inf }
 0x650   : > { %2530 = vmax.xlane.f32.xlu1 %v2529_v19  ;;  %v9186_v13 = vpop.f32.mrb[68].mxu1  ;;  %v2526_v19 = vsel %vm1529_vm2, %v9160_v11, -inf }
 0x651   : > { %v6996_v37 = vpop.f32.mrb[69].mxu1 }
 0x652   : > { %v9188_v43 = vpop.f32.mrb[70].mxu1 }
 0x653   : > { %v6997_v60 = vpop.f32.mrb[71].mxu1  ;;  %v2535_v37 = vsel %vm1529_vm2, %v9188_v43, -inf }
 0x654   : > { %v2532_v60 = vsel %vm1529_vm2, %v9186_v13, -inf }
 0x658   : > { %2675 = vrot.lane.b32.xlu0 %v8732_v9, %s8221_s27 }
 0x661   : > { %2915 = vrot.lane.b32.xlu1 %v8758_v38, %s8221_s27 }
 0x677   : > { %2509 = vmax.xlane.f32.xlu0 %v2508_v0 }
 0x67b   : > { %2515 = vmax.xlane.f32.xlu0 %v2514_v18 }
 0x67f   : > { %2521 = vmax.xlane.f32.xlu0 %v2520_v53 }
 0x683   : > { %2527 = vmax.xlane.f32.xlu0 %v2526_v19 }
 0x685   : > { %2536 = vmax.xlane.f32.xlu1 %v2535_v37 }
 0x687   : > { %2533 = vmax.xlane.f32.xlu0 %v2532_v60 }
 0x68e   : > { %v2492_v53 = vpop.xlane.xlu0 %2491 }
 0x68f   : > { %v2538_v37 = vsub.f32 %v9128_v15, %v2492_v53 }
 0x690   : > { %v2495_v0 = vpop.xlane.xlu1 %2494 }
 0x691   : > { %v2539_v18 = vsub.f32 %v9132_v31, %v2495_v0  ;;  %v2554_v60 = vmul.f32 1.442695, %v2538_v37 }
 0x693   : > { %v2556_v19 = vmul.f32 1.442695, %v2539_v18 }
 0x694   : > { %v2724_v46 = vpop.permute.xlu1 %2723 }
 0x695   : > { %7005 = vmatpush3.bf16.msra.mxu1 %v2724_v46  ;;  %7684 = vpow2.f32 %v2556_v19 }
 0x696   : > { %3011 = vrot.lane.b32.xlu1 %v8773_v4, %s8221_s27  ;;  %7016 = vmatprep.subr.bf16.mxu1 %v10525_v28  ;;  %7686 = vpow2.f32 %v2554_v60 }
 0x698   : > { %v9223_v31 = vpop.permute.xlu1 %2771 }
 0x69c   : > { %v9226_v18 = vpop.permute.xlu1 %2819 }
 0x69d   : > { %2867 = vrot.lane.b32.xlu0 %v8762_v32, %s8221_s27 }
 0x69f   : > { %v9215_v46 = vpop.eup %7684 }
 0x6a0   : > { %v2589_v28 = vsel %vm1529_vm2, %v9215_v46, 0.0  ;;  %v9219_v42 = vpop.eup %7686 }
 0x6a1   : > { %2963 = vrot.lane.b32.xlu0 %v8777_v52, %s8221_s27  ;;  %v2586_v5 = vsel %vm1529_vm2, %v9219_v42, 0.0 }
 0x6ba   : > { %2590 = vadd.xlane.f32.xlu1 %v2589_v28 }
 0x6c0   : > { %2587 = vadd.xlane.f32.xlu0 %v2586_v5 }
 0x6c7   : > { %v2498_v0 = vpop.xlane.xlu0 %2497 }
 0x6c8   : > { %v2540_v15 = vsub.f32 %v9154_v50, %v2498_v0 }
 0x6ca   : > { %v2558_v53 = vmul.f32 1.442695, %v2540_v15 }
 0x6cb   : > { %v2504_v19 = vpop.xlane.xlu0 %2503 }
 0x6cc   : > { %7688 = vpow2.f32 %v2558_v53  ;;  %v2542_v37 = vsub.f32 %v9142_v54, %v2504_v19  ;;  %v10571_v53 = vmov 0.0  }
 0x6cd   : > { %v2507_v60 = vpop.xlane.xlu1 %2506 }
 0x6ce   : > { %v2562_v28 = vmul.f32 1.442695, %v2542_v37  ;;  %v2543_v57 = vsub.f32 %v9144_v62, %v2507_v60 }
 0x6cf   : > { %v2501_v14 = vpop.xlane.xlu0 %2500 }
 0x6d0   : > { %7690 = vpow2.f32 %v2562_v28  ;;  %v2541_v5 = vsub.f32 %v9158_v36, %v2501_v14  ;;  %v2564_v40 = vmul.f32 1.442695, %v2543_v57 }
 0x6d1   : > { %v2513_v47 = vpop.xlane.xlu1 %2512 }
 0x6d2   : > { %v2560_v61 = vmul.f32 1.442695, %v2541_v5  ;;  %v2545_v50 = vsub.f32 %v9172_v12, %v2513_v47 }
 0x6d3   : > { %v2676_v0 = vpop.permute.xlu0 %2675 }
 0x6d4   : > { %7692 = vpow2.f32 %v2560_v61  ;;  %6999 = vmatpush3.bf16.msra.mxu0 %v2676_v0  ;;  %v2568_v19 = vmul.f32 1.442695, %v2545_v50 }
 0x6d5   : > { %v2519_v15 = vpop.xlane.xlu1 %2518  ;;  %7010 = vmatprep.subr.bf16.mxu0 %v10571_v53  ;;  %7694 = vpow2.f32 %v2564_v40 }
 0x6d6   : > { %v9233_v54 = vpop.eup %7688  ;;  %v2547_v62 = vsub.f32 %v9152_v10, %v2519_v15  ;;  %7696 = vpow2.f32 %v2568_v19 }
 0x6d7   : > { %v2592_v14 = vsel %vm1529_vm2, %v9233_v54, 0.0 }
 0x6d8   : > { %2593 = vadd.xlane.f32.xlu0 %v2592_v14  ;;  %v2572_v47 = vmul.f32 1.442695, %v2547_v62 }
 0x6d9   : > { %v2525_v57 = vpop.xlane.xlu1 %2524 }
 0x6da   : > { %v9238_v36 = vpop.eup %7690  ;;  %v2549_v61 = vsub.f32 %v9180_v30, %v2525_v57  ;;  %7698 = vpow2.f32 %v2572_v47 }
 0x6db   : > { %v2598_v12 = vsel %vm1529_vm2, %v9238_v36, 0.0 }
 0x6dc   : > { %2599 = vadd.xlane.f32.xlu0 %v2598_v12  ;;  %v2576_v10 = vmul.f32 1.442695, %v2549_v61 }
 0x6dd   : > { %v2531_v37 = vpop.xlane.xlu1 %2530 }
 0x6de   : > { %v9243_v40 = vpop.eup %7692  ;;  %v2551_v60 = vsub.f32 %v9164_v51, %v2531_v37  ;;  %7700 = vpow2.f32 %v2576_v10 }
 0x6df   : > { %v2595_v28 = vsel %vm1529_vm2, %v9243_v40, 0.0  ;;  %v9248_v5 = vpop.eup %7694 }
 0x6e0   : > { %2596 = vadd.xlane.f32.xlu1 %v2595_v28  ;;  %v2580_v50 = vmul.f32 1.442695, %v2551_v60  ;;  %v2601_v30 = vsel %vm1529_vm2, %v9248_v5, 0.0  ;;  %v9252_v0 = vpop.eup %7696 }
 0x6e1   : > { %v2607_v15 = vsel %vm1529_vm2, %v9252_v0, 0.0 }
 0x6e2   : > { %7702 = vpow2.f32 %v2580_v50 }
 0x6e4   : > { %2602 = vadd.xlane.f32.xlu1 %v2601_v30  ;;  %v9256_v19 = vpop.eup %7698 }
 0x6e5   : > { %v2613_v51 = vsel %vm1529_vm2, %v9256_v19, 0.0 }
 0x6e8   : > { %2608 = vadd.xlane.f32.xlu1 %v2607_v15  ;;  %v9260_v62 = vpop.eup %7700  ;;  %v9273_v15 = vpop.permute.xlu1 %2915 }
 0x6e9   : > { %v2619_v14 = vsel %vm1529_vm2, %v9260_v62, 0.0 }
 0x6ec   : > { %2614 = vadd.xlane.f32.xlu1 %v2613_v51  ;;  %v9264_v57 = vpop.eup %7702 }
 0x6ed   : > { %v2625_v47 = vsel %vm1529_vm2, %v9264_v57, 0.0 }
 0x6f0   : > { %2620 = vadd.xlane.f32.xlu1 %v2619_v14 }
 0x6f4   : > { %2626 = vadd.xlane.f32.xlu1 %v2625_v47 }
 0x704   : > { %v2510_v61 = vpop.xlane.xlu0 %2509 }
 0x705   : > { %v2544_v12 = vsub.f32 %v9168_v55, %v2510_v61  ;;  %3111 = vrot.lane.b32.xlu1 %v8737_v20, %s8222_s20 }
 0x707   : > { %v2566_v37 = vmul.f32 1.442695, %v2544_v12 }
 0x708   : > { %v2516_v10 = vpop.xlane.xlu0 %2515 }
 0x709   : > { %7704 = vpow2.f32 %v2566_v37  ;;  %v2546_v60 = vsub.f32 %v9150_v2, %v2516_v10 }
 0x70b   : > { %v2570_v28 = vmul.f32 1.442695, %v2546_v60 }
 0x70c   : > { %v2522_v50 = vpop.xlane.xlu0 %2521 }
 0x70d   : > { %7706 = vpow2.f32 %v2570_v28  ;;  %v2548_v30 = vsub.f32 %v9178_v3, %v2522_v50 }
 0x70f   : > { %v2574_v51 = vmul.f32 1.442695, %v2548_v30 }
 0x710   : > { %v2528_v14 = vpop.xlane.xlu0 %2527 }
 0x711   : > { %7708 = vpow2.f32 %v2574_v51  ;;  %v2550_v55 = vsub.f32 %v9160_v11, %v2528_v14 }
 0x712   : > { %v2537_v47 = vpop.xlane.xlu1 %2536 }
 0x713   : > { %v9276_v61 = vpop.eup %7704  ;;  %v2578_v12 = vmul.f32 1.442695, %v2550_v55  ;;  %v2553_v37 = vsub.f32 %v9188_v43, %v2537_v47 }
 0x714   : > { %v2534_v35 = vpop.xlane.xlu0 %2533  ;;  %v2604_v2 = vsel %vm1529_vm2, %v9276_v61, 0.0 }
 0x715   : > { %7710 = vpow2.f32 %v2578_v12  ;;  %v2552_v3 = vsub.f32 %v9186_v13, %v2534_v35  ;;  %2605 = vadd.xlane.f32.xlu0 %v2604_v2  ;;  %v2584_v60 = vmul.f32 1.442695, %v2553_v37 }
 0x716   : > { %v9314_v12 = vpop.permute.xlu1 %3011 }
 0x717   : > { %v9282_v10 = vpop.eup %7706  ;;  %v2582_v28 = vmul.f32 1.442695, %v2552_v3 }
 0x718   : > { %v2610_v11 = vsel %vm1529_vm2, %v9282_v10, 0.0  ;;  %v2868_v47 = vpop.permute.xlu0 %2867 }
 0x719   : > { %7712 = vpow2.f32 %v2582_v28  ;;  %2611 = vadd.xlane.f32.xlu0 %v2610_v11 }
 0x71a   : > { %7714 = vpow2.f32 %v2584_v60 }
 0x71b   : > { %v9286_v50 = vpop.eup %7708 }
 0x71c   : > { %v2616_v43 = vsel %vm1529_vm2, %v9286_v50, 0.0  ;;  %v9320_v37 = vpop.permute.xlu0 %2963 }
 0x71d   : > { %2617 = vadd.xlane.f32.xlu0 %v2616_v43 }
 0x71f   : > { %v9290_v30 = vpop.eup %7710 }
 0x720   : > { %v2622_v35 = vsel %vm1529_vm2, %v9290_v30, 0.0 }
 0x721   : > { %2623 = vadd.xlane.f32.xlu0 %v2622_v35 }
 0x723   : > { %v9294_v13 = vpop.eup %7712 }
 0x724   : > { %v2628_v51 = vsel %vm1529_vm2, %v9294_v13, 0.0  ;;  %v9298_v14 = vpop.eup %7714 }
 0x725   : > { %2629 = vadd.xlane.f32.xlu0 %v2628_v51  ;;  %v2631_v55 = vsel %vm1529_vm2, %v9298_v14, 0.0 }
 0x729   : > { %2632 = vadd.xlane.f32.xlu1 %v2631_v55 }
 0x73a   : > { %3162 = vrot.lane.b32.xlu1 %v8752_v56, %s8222_s20 }
 0x73b   : > { %3060 = vrot.lane.b32.xlu0 %v8726_v1, %s8222_s20 }
 0x73e   : > { %3213 = vrot.lane.b32.xlu1 %v8767_v45, %s8222_s20 }
 0x73f   : > { %3058 = vrot.lane.b32.xlu0 %v8724_v33, %s8222_s20 }
 0x742   : > { %3264 = vrot.lane.b32.xlu1 %v8782_v17, %s8222_s20 }
 0x743   : > { %3109 = vrot.lane.b32.xlu0 %v8735_v41, %s8222_s20 }
 0x746   : > { %3315 = vrot.lane.b32.xlu1 %v8793_v63, %s8222_s20 }
 0x747   : > { %3160 = vrot.lane.b32.xlu0 %v8750_v24, %s8222_s20  ;;  %v2591_v2 = vpop.xlane.xlu1 %2590 }
 0x748   : > { %7716 = vrcp.f32 %v2591_v2 }
 0x74a   : > { %3366 = vrot.lane.b32.xlu1 %v8804_v16, %s8222_s20 }
 0x74b   : > { %3211 = vrot.lane.b32.xlu0 %v8765_v44, %s8222_s20 }
 0x74d   : > { %v2588_v3 = vpop.xlane.xlu0 %2587 }
 0x74e   : > { %7718 = vrcp.f32 %v2588_v3  ;;  %3417 = vrot.lane.b32.xlu1 %v8815_v26, %s8222_s20 }
 0x74f   : > { %3262 = vrot.lane.b32.xlu0 %v8780_v58, %s8222_s20 }
 0x752   : > { %3415 = vrot.lane.b32.xlu1 %v8813_v48, %s8222_s20  ;;  %v7717_v60 = vpop.eup %7716 }
 0x753   : > { %3313 = vrot.lane.b32.xlu0 %v8791_v22, %s8222_s20  ;;  %v2651_v11 = vmul.f32 %v7717_v60, %v9215_v46 }
 0x757   : > { %3364 = vrot.lane.b32.xlu0 %v8802_v6, %s8222_s20 }
 0x758   : > { %v7719_v28 = vpop.eup %7718 }
 0x759   : > { %v2650_v43 = vmul.f32 %v7719_v28, %v9219_v42 }
 0x75b   : > { %v2666_v35 = vpack.c.bf16 %v2651_v11, %v2650_v43 }
 0x75d   : > { %7001 = vmatmul.mubr.msk.bf16.vlgmr.msra.gmra.mrb[72].mxu0 %vm1529_vm2, %v2666_v35 }
 0x75e   : > { %7011 = vmatpush3.bf16.msra.mxu0 %v9223_v31  ;;  %7012 = vmatprep.mubr.msk.bf16.mxu0 %vm8220_vm0, %v10571_v53 }
 0x75f   : > { %7022 = vmatprep.subr.bf16.mxu0 %v10571_v53 }
 0x765   : > { %v2594_v51 = vpop.xlane.xlu0 %2593 }
 0x766   : > { %7720 = vrcp.f32 %v2594_v51 }
 0x769   : > { %v2600_v55 = vpop.xlane.xlu0 %2599 }
 0x76d   : > { %v2597_v2 = vpop.xlane.xlu1 %2596 }
 0x76e   : > { %7722 = vrcp.f32 %v2597_v2 }
 0x76f   : > { %7724 = vrcp.f32 %v2600_v55 }
 0x770   : > { %v7721_v46 = vpop.eup %7720 }
 0x771   : > { %v2603_v3 = vpop.xlane.xlu1 %2602  ;;  %v2652_v60 = vmul.f32 %v7721_v46, %v9233_v54 }
 0x772   : > { %7726 = vrcp.f32 %v2603_v3 }
 0x775   : > { %v2609_v54 = vpop.xlane.xlu1 %2608 }
 0x776   : > { %7728 = vrcp.f32 %v2609_v54 }
 0x778   : > { %v7723_v42 = vpop.eup %7722 }
 0x779   : > { %v2653_v28 = vmul.f32 %v7723_v42, %v9243_v40  ;;  %v7725_v31 = vpop.eup %7724 }
 0x77a   : > { %v2654_v35 = vmul.f32 %v7725_v31, %v9238_v36  ;;  %v2615_v36 = vpop.xlane.xlu1 %2614 }
 0x77b   : > { %v2667_v11 = vpack.c.bf16 %v2653_v28, %v2652_v60 }
 0x77c   : > { %v7727_v43 = vpop.eup %7726 }
 0x77d   : > { %v2655_v34 = vmul.f32 %v7727_v43, %v9248_v5  ;;  %7007 = vmatmul.mubr.msk.bf16.vlgmr.msra.gmra.mrb[72].mxu1 %vm1529_vm2, %v2667_v11 }
 0x77e   : > { %7017 = vmatpush3.bf16.msra.mxu1 %v9226_v18  ;;  %7018 = vmatprep.mubr.msk.bf16.mxu1 %vm8220_vm0, %v10571_v53  ;;  %v2621_v18 = vpop.xlane.xlu1 %2620 }
 0x77f   : > { %v2668_v51 = vpack.c.bf16 %v2655_v34, %v2654_v35  ;;  %7028 = vmatprep.subr.bf16.mxu1 %v10571_v53 }
 0x780   : > { %v7729_v2 = vpop.eup %7728 }
 0x781   : > { %7013 = vmatmul.mubr.msk.bf16.vlgmr.msra.gmra.mrb[76].mxu0 %vm1529_vm2, %v2668_v51  ;;  %v2657_v3 = vmul.f32 %v7729_v2, %v9252_v0 }
 0x782   : > { %7023 = vmatpush3.bf16.msra.mxu0 %v2868_v47  ;;  %7024 = vmatprep.mubr.msk.bf16.mxu0 %vm8220_vm0, %v10571_v53  ;;  %v2627_v34 = vpop.xlane.xlu1 %2626 }
 0x783   : > { %7034 = vmatprep.subr.bf16.mxu0 %v10571_v53 }
 0x786   : > { %v3112_v43 = vpop.permute.xlu1 %3111 }
 0x7a2   : > { %v2606_v40 = vpop.xlane.xlu0 %2605 }
 0x7a3   : > { %7730 = vrcp.f32 %v2606_v40 }
 0x7a4   : > { %7732 = vrcp.f32 %v2615_v36 }
 0x7a6   : > { %v2612_v5 = vpop.xlane.xlu0 %2611 }
 0x7a7   : > { %7734 = vrcp.f32 %v2612_v5 }
 0x7a8   : > { %7736 = vrcp.f32 %v2621_v18 }
 0x7aa   : > { %v2618_v55 = vpop.xlane.xlu0 %2617 }
 0x7ab   : > { %7738 = vrcp.f32 %v2618_v55 }
 0x7ac   : > { %7740 = vrcp.f32 %v2627_v34 }
 0x7ad   : > { %v7731_v47 = vpop.eup %7730 }
 0x7ae   : > { %v2656_v46 = vmul.f32 %v7731_v47, %v9276_v61  ;;  %v2624_v42 = vpop.xlane.xlu0 %2623  ;;  %v7733_v60 = vpop.eup %7732 }
 0x7af   : > { %7742 = vrcp.f32 %v2624_v42  ;;  %v2659_v11 = vmul.f32 %v7733_v60, %v9256_v19  ;;  %v3117_v60 = vsel %vm1152_vm1, %v3112_v43, 0 }
 0x7b0   : > { %v2669_v28 = vpack.c.bf16 %v2657_v3, %v2656_v46 }
 0x7b1   : > { %v7735_v31 = vpop.eup %7734 }
 0x7b2   : > { %v2658_v35 = vmul.f32 %v7735_v31, %v9282_v10  ;;  %v2630_v51 = vpop.xlane.xlu0 %2629  ;;  %7019 = vmatmul.mubr.msk.bf16.vlgmr.msra.gmra.mrb[76].mxu1 %vm1529_vm2, %v2669_v28  ;;  %v7737_v54 = vpop.eup %7736 }
 0x7b3   : > { %7029 = vmatpush3.bf16.msra.mxu1 %v9273_v15  ;;  %7030 = vmatprep.mubr.msk.bf16.mxu1 %vm8220_vm0, %v10571_v53  ;;  %7744 = vrcp.f32 %v2630_v51  ;;  %v2661_v36 = vmul.f32 %v7737_v54, %v9260_v62 }
 0x7b4   : > { %v2670_v0 = vpack.c.bf16 %v2659_v11, %v2658_v35  ;;  %7040 = vmatprep.subr.bf16.mxu1 %v10571_v53 }
 0x7b5   : > { %v7739_v61 = vpop.eup %7738 }
 0x7b6   : > { %v2660_v19 = vmul.f32 %v7739_v61, %v9286_v50  ;;  %v3061_v40 = vpop.permute.xlu0 %3060  ;;  %7025 = vmatmul.mubr.msk.bf16.vlgmr.msra.gmra.mrb[80].mxu0 %vm1529_vm2, %v2670_v0  ;;  %v2633_v10 = vpop.xlane.xlu1 %2632 }
 0x7b7   : > { %v7741_v18 = vpop.eup %7740  ;;  %7035 = vmatpush3.bf16.msra.mxu0 %v9320_v37  ;;  %7746 = vrcp.f32 %v2633_v10  ;;  %7036 = vmatprep.mubr.msk.bf16.mxu0 %vm8220_vm0, %v10571_v53  ;;  %v3066_v47 = vsel %vm1152_vm1, %v3061_v40, 0 }
 0x7b8   : > { %v2671_v15 = vpack.c.bf16 %v2661_v36, %v2660_v19  ;;  %7046 = vmatprep.subr.bf16.mxu0 %v10571_v53  ;;  %v2663_v34 = vmul.f32 %v7741_v18, %v9264_v57 }
 0x7b9   : > { %v7743_v5 = vpop.eup %7742 }
 0x7ba   : > { %v2662_v62 = vmul.f32 %v7743_v5, %v9290_v30  ;;  %v3059_v50 = vpop.permute.xlu0 %3058  ;;  %7031 = vmatmul.mubr.msk.bf16.vlgmr.msra.gmra.mrb[80].mxu1 %vm1529_vm2, %v2671_v15  ;;  %v3163_v37 = vpop.permute.xlu1 %3162 }
 0x7bb   : > { %7041 = vmatpush3.bf16.msra.mxu1 %v9314_v12  ;;  %7042 = vmatprep.mubr.msk.bf16.mxu1 %vm8220_vm0, %v10571_v53  ;;  %v3168_v31 = vsel %vm1152_vm1, %v3163_v37, 0 }
 0x7bc   : > { %v2672_v55 = vpack.c.bf16 %v2663_v34, %v2662_v62  ;;  %7052 = vmatprep.subr.bf16.mxu1 %v10571_v53 }
 0x7bd   : > { %v7745_v2 = vpop.eup %7744 }
 0x7be   : > { %7037 = vmatmul.mubr.msk.bf16.vlgmr.msra.gmra.mrb[84].mxu0 %vm1529_vm2, %v2672_v55  ;;  %v3110_v57 = vpop.permute.xlu0 %3109  ;;  %v2664_v12 = vmul.f32 %v7745_v2, %v9294_v13  ;;  %v3214_v46 = vpop.permute.xlu1 %3213 }
 0x7bf   : > { %7048 = vmatprep.mubr.msk.bf16.mxu0 %vm8220_vm0, %v10571_v53 }
 0x7c0   : > { %7047 = vmatpush3.bf16.xpose.msra.mxu0 %v3066_v47 }
 0x7c1   : > { %v7747_v30 = vpop.eup %7746  ;;  %7058 = vmatprep.subr.bf16.mxu0 %v10571_v53 }
 0x7c2   : > { %v2665_v3 = vmul.f32 %v7747_v30, %v9298_v14  ;;  %v3161_v28 = vpop.permute.xlu0 %3160  ;;  %v3265_v11 = vpop.permute.xlu1 %3264  ;;  %v3219_v14 = vsel %vm1152_vm1, %v3214_v46, 0 }
 0x7c3   : > { %v3270_v35 = vsel %vm1152_vm1, %v3265_v11, 0 }
 0x7c4   : > { %v2673_v42 = vpack.c.bf16 %v2665_v3, %v2664_v12 }
 0x7c6   : > { %7043 = vmatmul.mubr.msk.bf16.vlgmr.msra.gmra.mrb[84].mxu1 %vm1529_vm2, %v2673_v42  ;;  %v3212_v13 = vpop.permute.xlu0 %3211  ;;  %v3316_v43 = vpop.permute.xlu1 %3315 }
 0x7c7   : > { %7049 = vmatmul.mubr.msk.bf16.vlgmr.msra.gmra.mrb[88].mxu0 %vm1152_vm1, %v3059_v50  ;;  %7053 = vmatpush3.bf16.xpose.msra.mxu1 %v3117_v60  ;;  %v3321_v0 = vsel %vm1152_vm1, %v3316_v43, 0 }
 0x7c8   : > { %7059 = vmatpush3.bf16.xpose.msra.mxu0 %v3168_v31  ;;  %7054 = vmatprep.mubr.msk.bf16.mxu1 %vm8220_vm0, %v10571_v53 }
 0x7c9   : > { %7060 = vmatprep.mubr.msk.bf16.mxu0 %vm8220_vm0, %v10571_v53  ;;  %7064 = vmatprep.subr.bf16.mxu1 %v10571_v53 }
 0x7ca   : > { %7070 = vmatprep.subr.bf16.mxu0 %v10571_v53  ;;  %v3263_v51 = vpop.permute.xlu0 %3262  ;;  %v3367_v54 = vpop.permute.xlu1 %3366 }
 0x7cb   : > { %v3372_v61 = vsel %vm1152_vm1, %v3367_v54, 0 }
 0x7ce   : > { %7055 = vmatmul.mubr.msk.bf16.vlgmr.msra.gmra.mrb[88].mxu1 %vm1152_vm1, %v3110_v57  ;;  %v3314_v36 = vpop.permute.xlu0 %3313  ;;  %v3418_v19 = vpop.permute.xlu1 %3417 }
 0x7cf   : > { %7061 = vmatmul.mubr.msk.bf16.vlgmr.msra.gmra.mrb[92].mxu0 %vm1152_vm1, %v3161_v28  ;;  %7065 = vmatpush3.bf16.xpose.msra.mxu1 %v3219_v14  ;;  %v3423_v40 = vsel %vm1152_vm1, %v3418_v19, 0 }
 0x7d0   : > { %7071 = vmatpush3.bf16.xpose.msra.mxu0 %v3270_v35  ;;  %7066 = vmatprep.mubr.msk.bf16.mxu1 %vm8220_vm0, %v10571_v53 }
 0x7d1   : > { %7072 = vmatprep.mubr.msk.bf16.mxu0 %vm8220_vm0, %v10571_v53  ;;  %7076 = vmatprep.subr.bf16.mxu1 %v10571_v53 }
 0x7d2   : > { %7082 = vmatprep.subr.bf16.mxu0 %v10571_v53  ;;  %v3365_v10 = vpop.permute.xlu0 %3364  ;;  %v3416_v18 = vpop.permute.xlu1 %3415 }
 0x7d6   : > { %7067 = vmatmul.mubr.msk.bf16.vlgmr.msra.gmra.mrb[92].mxu1 %vm1152_vm1, %v3212_v13 }
 0x7d7   : > { %7073 = vmatmul.mubr.msk.bf16.vlgmr.msra.gmra.mrb[96].mxu0 %vm1152_vm1, %v3263_v51  ;;  %7077 = vmatpush3.bf16.xpose.msra.mxu1 %v3321_v0 }
 0x7d8   : > { %7083 = vmatpush3.bf16.xpose.msra.mxu0 %v3372_v61  ;;  %7078 = vmatprep.mubr.msk.bf16.mxu1 %vm8220_vm0, %v10571_v53 }
 0x7d9   : > { %7084 = vmatprep.mubr.msk.bf16.mxu0 %vm8220_vm0, %v10571_v53  ;;  %7088 = vmatprep.subr.bf16.mxu1 %v10571_v53 }
 0x7da   : > { %7094 = vmatprep.subr.bf16.mxu0 %v10571_v53 }
 0x7de   : > { %7079 = vmatmul.mubr.msk.bf16.vlgmr.msra.gmra.mrb[96].mxu1 %vm1152_vm1, %v3314_v36 }
 0x7df   : > { %7085 = vmatmul.mubr.msk.bf16.vlgmr.msra.gmra.mrb[100].mxu0 %vm1152_vm1, %v3365_v10  ;;  %7089 = vmatpush3.bf16.xpose.msra.mxu1 %v3423_v40 }
 0x7e0   : > { %7090 = vmatprep.mubr.msk.bf16.mxu1 %vm8220_vm0, %v10571_v53  ;;  %7100 = vmatprep.subr.bf16.mxu1 %v10571_v53 }
 0x7e1   : > { %7096 = vmatprep.mubr.msk.bf16.mxu0 %vm8220_vm0, %v10571_v53 }
 0x7e6   : > { %7091 = vmatmul.mubr.msk.bf16.vlgmr.msra.gmra.mrb[100].mxu1 %vm1152_vm1, %v3416_v18 }
 0x7e7   : > { %7102 = vmatprep.mubr.msk.bf16.mxu1 %vm8220_vm0, %v10571_v53 }
 0x830   : > { %v9427_v15 = vpop.f32.mrb[72].mxu0 }
 0x831   : > { %v7002_v5 = vpop.f32.mrb[73].mxu0 }
 0x832   : > { %v9429_v34 = vpop.f32.mrb[74].mxu0 }
 0x833   : > { %v7003_v50 = vpop.f32.mrb[75].mxu0 }
 0x850   : > { %v9433_v37 = vpop.f32.mrb[72].mxu1 }
 0x851   : > { %v7008_v55 = vpop.f32.mrb[73].mxu1 }
 0x852   : > { %v9435_v2 = vpop.f32.mrb[74].mxu1 }
 0x853   : > { %v7009_v57 = vpop.f32.mrb[75].mxu1 }
 0x854   : > { %v9439_v30 = vpop.f32.mrb[76].mxu0 }
 0x855   : > { %v7014_v12 = vpop.f32.mrb[77].mxu0 }
 0x856   : > { %v9441_v3 = vpop.f32.mrb[78].mxu0 }
 0x857   : > { %v7015_v42 = vpop.f32.mrb[79].mxu0 }
 0x885   : > { %v9445_v60 = vpop.f32.mrb[76].mxu1 }
 0x886   : > { %10572 = vst [vmem:[#allocation32_spill] sm:$0xff] %v9445_v60  ;;  %v7020_v28 = vpop.f32.mrb[77].mxu1 }
 0x887   : > { %v9447_v31 = vpop.f32.mrb[78].mxu1 }
 0x888   : > { %v7021_v13 = vpop.f32.mrb[79].mxu1 }
 0x889   : > { %v9451_v14 = vpop.f32.mrb[80].mxu0 }
 0x88a   : > { %10573 = vst [vmem:[#allocation33_spill] sm:$0xff] %v9451_v14  ;;  %v7026_v43 = vpop.f32.mrb[81].mxu0 }
 0x88b   : > { %v9453_v35 = vpop.f32.mrb[82].mxu0 }
 0x88c   : > { %10574 = vst [vmem:[#allocation34_spill] sm:$0xff] %v9453_v35  ;;  %v7027_v54 = vpop.f32.mrb[83].mxu0 }
 0x88d   : > { %v9457_v0 = vpop.f32.mrb[80].mxu1 }
 0x88e   : > { %10575 = vst [vmem:[#allocation35_spill] sm:$0xff] %v9457_v0  ;;  %v7032_v61 = vpop.f32.mrb[81].mxu1 }
 0x88f   : > { %v9459_v36 = vpop.f32.mrb[82].mxu1 }
 0x890   : > { %10576 = vst [vmem:[#allocation36_spill] sm:$0xff] %v9459_v36  ;;  %v7033_v40 = vpop.f32.mrb[83].mxu1 }
 0x891   : > { %v9463_v10 = vpop.f32.mrb[84].mxu0 }
 0x892   : > { %10577 = vst [vmem:[#allocation37_spill] sm:$0xff] %v9463_v10  ;;  %v7038_v18 = vpop.f32.mrb[85].mxu0 }
 0x893   : > { %v9465_v5 = vpop.f32.mrb[86].mxu0 }
 0x894   : > { %10578 = vst [vmem:[#allocation38_spill] sm:$0xff] %v9465_v5  ;;  %v7039_v55 = vpop.f32.mrb[87].mxu0 }
 0x899   : > { %v9469_v57 = vpop.f32.mrb[84].mxu1 }
 0x89a   : > { %10579 = vst [vmem:[#allocation39_spill] sm:$0xff] %v9469_v57  ;;  %v9471_v12 = vpop.f32.mrb[88].mxu0  ;;  %v7044_v42 = vpop.f32.mrb[85].mxu1 }
 0x89b   : > { %v7050_v28 = vpop.f32.mrb[89].mxu0  ;;  %v3466_v13 = vsel %vm1529_vm2, %v9471_v12, -inf  ;;  %v9475_v43 = vpop.f32.mrb[86].mxu1 }
 0x89c   : > { %10580 = vst [vmem:[#allocation40_spill] sm:$0xff] %v9475_v43  ;;  %3467 = vmax.xlane.f32.xlu0 %v3466_v13  ;;  %v9479_v61 = vpop.f32.mrb[90].mxu0  ;;  %v7045_v40 = vpop.f32.mrb[87].mxu1 }
 0x89d   : > { %v7051_v18 = vpop.f32.mrb[91].mxu0  ;;  %v3469_v55 = vsel %vm1529_vm2, %v9479_v61, -inf }
 0x89e   : > { %3470 = vmax.xlane.f32.xlu1 %v3469_v55 }
 0x8a1   : > { %v9483_v19 = vpop.f32.mrb[88].mxu1 }
 0x8a2   : > { %v9485_v42 = vpop.f32.mrb[92].mxu0  ;;  %v7056_v28 = vpop.f32.mrb[89].mxu1  ;;  %v3472_v50 = vsel %vm1529_vm2, %v9483_v19, -inf }
 0x8a3   : > { %v7062_v13 = vpop.f32.mrb[93].mxu0  ;;  %3473 = vmax.xlane.f32.xlu0 %v3472_v50  ;;  %v9489_v51 = vpop.f32.mrb[90].mxu1  ;;  %v3478_v11 = vsel %vm1529_vm2, %v9485_v42, -inf }
 0x8a4   : > { %v9491_v54 = vpop.f32.mrb[94].mxu0  ;;  %v7057_v40 = vpop.f32.mrb[91].mxu1  ;;  %v3475_v47 = vsel %vm1529_vm2, %v9489_v51, -inf }
 0x8a5   : > { %v7063_v18 = vpop.f32.mrb[95].mxu0 }
 0x8a7   : > { %3479 = vmax.xlane.f32.xlu0 %v3478_v11 }
 0x8a9   : > { %v9495_v55 = vpop.f32.mrb[92].mxu1 }
 0x8aa   : > { %v9497_v46 = vpop.f32.mrb[96].mxu0  ;;  %v7068_v28 = vpop.f32.mrb[93].mxu1 }
 0x8ab   : > { %v7074_v13 = vpop.f32.mrb[97].mxu0  ;;  %3476 = vmax.xlane.f32.xlu0 %v3475_v47  ;;  %v9501_v50 = vpop.f32.mrb[94].mxu1 }
 0x8ac   : > { %v9503_v62 = vpop.f32.mrb[98].mxu0  ;;  %v7069_v40 = vpop.f32.mrb[95].mxu1 }
 0x8ad   : > { %v7075_v18 = vpop.f32.mrb[99].mxu0 }
 0x8af   : > { %3697 = vrot.lane.b32.xlu1 %v8730_v7, %s8222_s20 }
 0x8b1   : > { %v9507_v11 = vpop.f32.mrb[96].mxu1 }
 0x8b2   : > { %v9509_v39 = vpop.f32.mrb[100].mxu0  ;;  %v7080_v8 = vpop.f32.mrb[97].mxu1 }
 0x8b3   : > { %3744 = vrot.lane.b32.xlu1 %v8747_v29, %s8222_s20  ;;  %v7086_v28 = vpop.f32.mrb[101].mxu0  ;;  %v9513_v13 = vpop.f32.mrb[98].mxu1  ;;  %v3481_v8 = vsel %vm1529_vm2, %v9491_v54, -inf }
 0x8b4   : > { %v9515_v47 = vpop.f32.mrb[102].mxu0  ;;  %v7081_v21 = vpop.f32.mrb[99].mxu1  ;;  %v3493_v28 = vsel %vm1529_vm2, %v9503_v62, -inf }
 0x8b5   : > { %v7087_v49 = vpop.f32.mrb[103].mxu0  ;;  %v3487_v21 = vsel %vm1529_vm2, %v9501_v50, -inf }
 0x8b6   : > { %v3484_v49 = vsel %vm1529_vm2, %v9495_v55, -inf }
 0x8b7   : > { %3791 = vrot.lane.b32.xlu1 %v8743_v27, %s8222_s20 }
 0x8b9   : > { %v9519_v40 = vpop.f32.mrb[100].mxu1 }
 0x8ba   : > { %v7092_v18 = vpop.f32.mrb[101].mxu1 }
 0x8bb   : > { %v9521_v59 = vpop.f32.mrb[102].mxu1  ;;  %v3499_v18 = vsel %vm1529_vm2, %v9513_v13, -inf }
 0x8bc   : > { %v7093_v57 = vpop.f32.mrb[103].mxu1 }
 0x8bd   : > { %v3490_v57 = vsel %vm1529_vm2, %v9497_v46, -inf }
 0x8c1   : > { %3650 = vrot.lane.b32.xlu0 %v8732_v9, %s8222_s20 }
 0x8db   : > { %3482 = vmax.xlane.f32.xlu1 %v3481_v8  ;;  %v3496_v8 = vsel %vm1529_vm2, %v9507_v11, -inf }
 0x8df   : > { %3488 = vmax.xlane.f32.xlu1 %v3487_v21  ;;  %v3505_v21 = vsel %vm1529_vm2, %v9515_v47, -inf }
 0x8e0   : > { %3485 = vmax.xlane.f32.xlu0 %v3484_v49  ;;  %v3502_v49 = vsel %vm1529_vm2, %v9509_v39, -inf }
 0x8e3   : > { %3494 = vmax.xlane.f32.xlu1 %v3493_v28  ;;  %v3508_v28 = vsel %vm1529_vm2, %v9519_v40, -inf }
 0x8e4   : > { %3491 = vmax.xlane.f32.xlu0 %v3490_v57  ;;  %v3511_v57 = vsel %vm1529_vm2, %v9521_v59, -inf }
 0x8e7   : > { %3500 = vmax.xlane.f32.xlu1 %v3499_v18 }
 0x8e8   : > { %3497 = vmax.xlane.f32.xlu0 %v3496_v8 }
 0x8eb   : > { %3506 = vmax.xlane.f32.xlu1 %v3505_v21 }
 0x8ec   : > { %3503 = vmax.xlane.f32.xlu0 %v3502_v49 }
 0x8f0   : > { %3509 = vmax.xlane.f32.xlu0 %v3508_v28 }
 0x8fc   : > { %3885 = vrot.lane.b32.xlu1 %v8758_v38, %s8222_s20 }
 0x906   : > { %3838 = vrot.lane.b32.xlu0 %v8762_v32, %s8222_s20 }
 0x90a   : > { %3932 = vrot.lane.b32.xlu0 %v8777_v52, %s8222_s20 }
 0x920   : > { %3512 = vmax.xlane.f32.xlu1 %v3511_v57 }
 0x929   : > { %v3468_v18 = vpop.xlane.xlu0 %3467 }
 0x92a   : > { %v3514_v8 = vsub.f32 %v9471_v12, %v3468_v18 }
 0x92b   : > { %v3471_v21 = vpop.xlane.xlu1 %3470 }
 0x92c   : > { %v3530_v49 = vmul.f32 1.442695, %v3514_v8 }
 0x92e   : > { %7748 = vpow2.f32 %v3530_v49 }
 0x92f   : > { %v3698_v28 = vpop.permute.xlu1 %3697 }
 0x930   : > { %7101 = vmatpush3.bf16.msra.mxu1 %v3698_v28  ;;  %v3474_v43 = vpop.xlane.xlu0 %3473 }
 0x931   : > { %v3516_v0 = vsub.f32 %v9483_v19, %v3474_v43  ;;  %3979 = vrot.lane.b32.xlu1 %v8773_v4, %s8222_s20  ;;  %7112 = vmatprep.subr.bf16.mxu1 %v10571_v53 }
 0x933   : > { %v3534_v36 = vmul.f32 1.442695, %v3516_v0  ;;  %v3515_v0 = vsub.f32 %v9479_v61, %v3471_v21 }
 0x934   : > { %v3480_v10 = vpop.xlane.xlu0 %3479 }
 0x935   : > { %7750 = vpow2.f32 %v3534_v36  ;;  %v3518_v57 = vsub.f32 %v9485_v42, %v3480_v10  ;;  %v3532_v42 = vmul.f32 1.442695, %v3515_v0 }
 0x937   : > { %v3538_v5 = vmul.f32 1.442695, %v3518_v57 }
 0x938   : > { %v9559_v12 = vpop.eup %7748  ;;  %v3477_v18 = vpop.xlane.xlu0 %3476 }
 0x939   : > { %7752 = vpow2.f32 %v3538_v5  ;;  %v3562_v8 = vsel %vm1529_vm2, %v9559_v12, 0.0  ;;  %v3517_v5 = vsub.f32 %v9489_v51, %v3477_v18  ;;  %v9582_v51 = vpop.permute.xlu1 %3744 }
 0x93a   : > { %3563 = vadd.xlane.f32.xlu0 %v3562_v8  ;;  %7754 = vpow2.f32 %v3532_v42 }
 0x93b   : > { %v3536_v28 = vmul.f32 1.442695, %v3517_v5 }
 0x93c   : > { %v3651_v19 = vpop.permute.xlu0 %3650 }
 0x93d   : > { %7095 = vmatpush3.bf16.msra.mxu0 %v3651_v19  ;;  %7756 = vpow2.f32 %v3536_v28  ;;  %v9584_v18 = vpop.permute.xlu1 %3791 }
 0x93e   : > { %7106 = vmatprep.subr.bf16.mxu0 %v10571_v53 }
 0x93f   : > { %v9564_v43 = vpop.eup %7750 }
 0x940   : > { %v3568_v36 = vsel %vm1529_vm2, %v9564_v43, 0.0 }
 0x941   : > { %3569 = vadd.xlane.f32.xlu0 %v3568_v36 }
 0x943   : > { %v9569_v10 = vpop.eup %7752 }
 0x944   : > { %v3574_v49 = vsel %vm1529_vm2, %v9569_v10, 0.0  ;;  %v9574_v57 = vpop.eup %7754 }
 0x945   : > { %3575 = vadd.xlane.f32.xlu0 %v3574_v49  ;;  %v3565_v61 = vsel %vm1529_vm2, %v9574_v57, 0.0 }
 0x947   : > { %v9578_v21 = vpop.eup %7756 }
 0x948   : > { %v3571_v8 = vsel %vm1529_vm2, %v9578_v21, 0.0 }
 0x955   : > { %3566 = vadd.xlane.f32.xlu1 %v3565_v61 }
 0x959   : > { %3572 = vadd.xlane.f32.xlu1 %v3571_v8 }
 0x968   : > { %v3483_v19 = vpop.xlane.xlu1 %3482 }
 0x969   : > { %v3519_v0 = vsub.f32 %v9491_v54, %v3483_v19 }
 0x96b   : > { %v3540_v36 = vmul.f32 1.442695, %v3519_v0 }
 0x96c   : > { %v3489_v42 = vpop.xlane.xlu1 %3488 }
 0x96d   : > { %7758 = vpow2.f32 %v3540_v36  ;;  %v3521_v5 = vsub.f32 %v9501_v50, %v3489_v42  ;;  %v3486_v49 = vpop.xlane.xlu0 %3485 }
 0x96e   : > { %v3520_v28 = vsub.f32 %v9495_v55, %v3486_v49 }
 0x96f   : > { %v3544_v61 = vmul.f32 1.442695, %v3521_v5 }
 0x970   : > { %v3542_v25 = vmul.f32 1.442695, %v3520_v28  ;;  %v3495_v23 = vpop.xlane.xlu1 %3494 }
 0x971   : > { %7760 = vpow2.f32 %v3544_v61  ;;  %v3523_v8 = vsub.f32 %v9503_v62, %v3495_v23  ;;  %v3492_v14 = vpop.xlane.xlu0 %3491 }
 0x972   : > { %7762 = vpow2.f32 %v3542_v25  ;;  %v3522_v35 = vsub.f32 %v9497_v46, %v3492_v14 }
 0x973   : > { %v3548_v60 = vmul.f32 1.442695, %v3523_v8 }
 0x974   : > { %v3546_v54 = vmul.f32 1.442695, %v3522_v35  ;;  %v3501_v19 = vpop.xlane.xlu1 %3500 }
 0x975   : > { %7764 = vpow2.f32 %v3548_v60  ;;  %v3525_v0 = vsub.f32 %v9513_v13, %v3501_v19  ;;  %v3498_v50 = vpop.xlane.xlu0 %3497 }
 0x976   : > { %7766 = vpow2.f32 %v3546_v54  ;;  %v3524_v55 = vsub.f32 %v9507_v11, %v3498_v50 }
 0x977   : > { %v9593_v36 = vpop.eup %7758  ;;  %v3552_v42 = vmul.f32 1.442695, %v3525_v0 }
 0x978   : > { %v3550_v5 = vmul.f32 1.442695, %v3524_v55  ;;  %v3507_v49 = vpop.xlane.xlu1 %3506  ;;  %v3577_v25 = vsel %vm1529_vm2, %v9593_v36, 0.0 }
 0x979   : > { %7768 = vpow2.f32 %v3552_v42  ;;  %v3527_v23 = vsub.f32 %v9515_v47, %v3507_v49  ;;  %3578 = vadd.xlane.f32.xlu1 %v3577_v25  ;;  %v3504_v62 = vpop.xlane.xlu0 %3503 }
 0x97a   : > { %7770 = vpow2.f32 %v3550_v5  ;;  %v3526_v46 = vsub.f32 %v9509_v39, %v3504_v62 }
 0x97b   : > { %v9599_v60 = vpop.eup %7760  ;;  %v3556_v14 = vmul.f32 1.442695, %v3527_v23 }
 0x97c   : > { %v9601_v35 = vpop.eup %7762  ;;  %v3554_v11 = vmul.f32 1.442695, %v3526_v46  ;;  %v3583_v13 = vsel %vm1529_vm2, %v9599_v60, 0.0 }
 0x97d   : > { %7772 = vpow2.f32 %v3556_v14  ;;  %3584 = vadd.xlane.f32.xlu1 %v3583_v13  ;;  %v3510_v28 = vpop.xlane.xlu0 %3509  ;;  %v3580_v47 = vsel %vm1529_vm2, %v9601_v35, 0.0  ;;  %v9640_v14 = vpop.permute.xlu1 %3885 }
 0x97e   : > { %7774 = vpow2.f32 %v3554_v11  ;;  %v3528_v61 = vsub.f32 %v9519_v40, %v3510_v28  ;;  %3581 = vadd.xlane.f32.xlu0 %v3580_v47 }
 0x97f   : > { %v9608_v39 = vpop.eup %7764 }
 0x980   : > { %v9610_v8 = vpop.eup %7766  ;;  %v3558_v54 = vmul.f32 1.442695, %v3528_v61  ;;  %v3589_v19 = vsel %vm1529_vm2, %v9608_v39, 0.0 }
 0x981   : > { %3590 = vadd.xlane.f32.xlu1 %v3589_v19  ;;  %v3586_v0 = vsel %vm1529_vm2, %v9610_v8, 0.0 }
 0x982   : > { %7776 = vpow2.f32 %v3558_v54  ;;  %3587 = vadd.xlane.f32.xlu0 %v3586_v0 }
 0x983   : > { %v9616_v50 = vpop.eup %7768 }
 0x984   : > { %v9618_v55 = vpop.eup %7770  ;;  %v3595_v40 = vsel %vm1529_vm2, %v9616_v50, 0.0 }
 0x985   : > { %3596 = vadd.xlane.f32.xlu1 %v3595_v40  ;;  %v3592_v42 = vsel %vm1529_vm2, %v9618_v55, 0.0 }
 0x986   : > { %3593 = vadd.xlane.f32.xlu0 %v3592_v42 }
 0x987   : > { %v9624_v5 = vpop.eup %7772 }
 0x988   : > { %v9626_v49 = vpop.eup %7774  ;;  %v3601_v25 = vsel %vm1529_vm2, %v9624_v5, 0.0 }
 0x989   : > { %3602 = vadd.xlane.f32.xlu1 %v3601_v25  ;;  %v3598_v23 = vsel %vm1529_vm2, %v9626_v49, 0.0 }
 0x98a   : > { %3599 = vadd.xlane.f32.xlu0 %v3598_v23 }
 0x98c   : > { %v9632_v62 = vpop.eup %7776 }
 0x98d   : > { %v3604_v46 = vsel %vm1529_vm2, %v9632_v62, 0.0 }
 0x98e   : > { %3605 = vadd.xlane.f32.xlu0 %v3604_v46 }
 0x9a4   : > { %4028 = vrot.lane.b32.xlu0 %v8726_v1, %s8223_s15 }
 0x9a8   : > { %4026 = vrot.lane.b32.xlu0 %v8724_v33, %s8223_s15 }
 0x9ac   : > { %4130 = vrot.lane.b32.xlu0 %v8752_v56, %s8223_s15 }
 0x9ad   : > { %v3513_v11 = vpop.xlane.xlu1 %3512 }
 0x9ae   : > { %v3529_v13 = vsub.f32 %v9521_v59, %v3513_v11 }
 0x9b0   : > { %v3560_v28 = vmul.f32 1.442695, %v3529_v13  ;;  %4128 = vrot.lane.b32.xlu0 %v8750_v24, %s8223_s15  ;;  %v3839_v24 = vpop.permute.xlu0 %3838 }
 0x9b2   : > { %7778 = vpow2.f32 %v3560_v28 }
 0x9b4   : > { %4232 = vrot.lane.b32.xlu0 %v8782_v17, %s8223_s15  ;;  %v9665_v56 = vpop.permute.xlu0 %3932 }
 0x9b8   : > { %4230 = vrot.lane.b32.xlu0 %v8780_v58, %s8223_s15  ;;  %v9669_v58 = vpop.permute.xlu1 %3979 }
 0x9bc   : > { %v9651_v33 = vpop.eup %7778  ;;  %4334 = vrot.lane.b32.xlu0 %v8804_v16, %s8223_s15 }
 0x9bd   : > { %v3607_v1 = vsel %vm1529_vm2, %v9651_v33, 0.0 }
 0x9be   : > { %3608 = vadd.xlane.f32.xlu1 %v3607_v1 }
 0x9c0   : > { %4332 = vrot.lane.b32.xlu0 %v8802_v6, %s8223_s15 }
 0x9c7   : > { %v3564_v17 = vpop.xlane.xlu0 %3563 }
 0x9c8   : > { %7780 = vrcp.f32 %v3564_v17 }
 0x9cf   : > { %4079 = vrot.lane.b32.xlu1 %v8737_v20, %s8223_s15  ;;  %v3570_v20 = vpop.xlane.xlu0 %3569 }
 0x9d3   : > { %4077 = vrot.lane.b32.xlu1 %v8735_v41, %s8223_s15 }
 0x9d7   : > { %4181 = vrot.lane.b32.xlu1 %v8767_v45, %s8223_s15 }
 0x9db   : > { %4179 = vrot.lane.b32.xlu1 %v8765_v44, %s8223_s15  ;;  %v7781_v44 = vpop.eup %7780 }
 0x9df   : > { %4283 = vrot.lane.b32.xlu1 %v8793_v63, %s8223_s15  ;;  %v3626_v63 = vmul.f32 %v7781_v44, %v9559_v12 }
 0x9e2   : > { %v3567_v6 = vpop.xlane.xlu1 %3566 }
 0x9e3   : > { %7782 = vrcp.f32 %v3567_v6  ;;  %4281 = vrot.lane.b32.xlu1 %v8791_v22, %s8223_s15 }
 0x9e4   : > { %7784 = vrcp.f32 %v3570_v20 }
 0x9e6   : > { %v3573_v41 = vpop.xlane.xlu1 %3572 }
 0x9e7   : > { %7786 = vrcp.f32 %v3573_v41  ;;  %4385 = vrot.lane.b32.xlu1 %v8815_v26, %s8223_s15  ;;  %v3576_v26 = vpop.xlane.xlu0 %3575 }
 0x9e8   : > { %7788 = vrcp.f32 %v3576_v26 }
 0x9eb   : > { %4383 = vrot.lane.b32.xlu1 %v8813_v48, %s8223_s15 }
 0x9ed   : > { %v7783_v45 = vpop.eup %7782 }
 0x9ee   : > { %v3627_v16 = vmul.f32 %v7783_v45, %v9574_v57  ;;  %v7785_v59 = vpop.eup %7784 }
 0x9ef   : > { %v3628_v22 = vmul.f32 %v7785_v59, %v9564_v43 }
 0x9f0   : > { %v3642_v47 = vpack.c.bf16 %v3627_v16, %v3626_v63 }
 0x9f1   : > { %v7787_v61 = vpop.eup %7786 }
 0x9f2   : > { %v3629_v54 = vmul.f32 %v7787_v61, %v9578_v21  ;;  %7097 = vmatmul.mubr.msk.bf16.vlgmr.msra.gmra.mrb[104].mxu0 %vm1529_vm2, %v3642_v47 }
 0x9f3   : > { %7107 = vmatpush3.bf16.msra.mxu0 %v9582_v51  ;;  %7108 = vmatprep.mubr.msk.bf16.mxu0 %vm8220_vm0, %v10571_v53  ;;  %v7789_v51 = vpop.eup %7788 }
 0x9f4   : > { %v3643_v48 = vpack.c.bf16 %v3629_v54, %v3628_v22  ;;  %7118 = vmatprep.subr.bf16.mxu0 %v10571_v53 }
 0x9f6   : > { %7103 = vmatmul.mubr.msk.bf16.vlgmr.msra.gmra.mrb[104].mxu1 %vm1529_vm2, %v3643_v48 }
 0x9f7   : > { %7113 = vmatpush3.bf16.msra.mxu1 %v9584_v18  ;;  %7114 = vmatprep.mubr.msk.bf16.mxu1 %vm8220_vm0, %v10571_v53  ;;  %v3630_v18 = vmul.f32 %v7789_v51, %v9569_v10 }
 0x9f8   : > { %7124 = vmatprep.subr.bf16.mxu1 %v10571_v53 }
 0xa06   : > { %v3579_v12 = vpop.xlane.xlu1 %3578 }
 0xa07   : > { %7790 = vrcp.f32 %v3579_v12 }
 0xa0a   : > { %v3585_v43 = vpop.xlane.xlu1 %3584 }
 0xa0b   : > { %7792 = vrcp.f32 %v3585_v43  ;;  %v3582_v57 = vpop.xlane.xlu0 %3581 }
 0xa0c   : > { %7794 = vrcp.f32 %v3582_v57 }
 0xa0e   : > { %v3591_v21 = vpop.xlane.xlu1 %3590 }
 0xa0f   : > { %7796 = vrcp.f32 %v3591_v21  ;;  %v3588_v19 = vpop.xlane.xlu0 %3587 }
 0xa10   : > { %7798 = vrcp.f32 %v3588_v19 }
 0xa11   : > { %v7791_v0 = vpop.eup %7790 }
 0xa12   : > { %v3631_v40 = vmul.f32 %v7791_v0, %v9593_v36  ;;  %v3597_v42 = vpop.xlane.xlu1 %3596 }
 0xa13   : > { %7800 = vrcp.f32 %v3597_v42  ;;  %v3594_v25 = vpop.xlane.xlu0 %3593 }
 0xa14   : > { %7802 = vrcp.f32 %v3594_v25  ;;  %v3644_v23 = vpack.c.bf16 %v3631_v40, %v3630_v18 }
 0xa15   : > { %v7793_v46 = vpop.eup %7792 }
 0xa16   : > { %v7795_v11 = vpop.eup %7794  ;;  %7109 = vmatmul.mubr.msk.bf16.vlgmr.msra.gmra.mrb[108].mxu0 %vm1529_vm2, %v3644_v23  ;;  %v3603_v13 = vpop.xlane.xlu1 %3602  ;;  %v3633_v28 = vmul.f32 %v7793_v46, %v9599_v60 }
 0xa17   : > { %v3632_v1 = vmul.f32 %v7795_v11, %v9601_v35  ;;  %7119 = vmatpush3.bf16.msra.mxu0 %v3839_v24  ;;  %7804 = vrcp.f32 %v3603_v13  ;;  %v3600_v17 = vpop.xlane.xlu0 %3599  ;;  %7120 = vmatprep.mubr.msk.bf16.mxu0 %vm8220_vm0, %v10571_v53 }
 0xa18   : > { %7806 = vrcp.f32 %v3600_v17  ;;  %7130 = vmatprep.subr.bf16.mxu0 %v10571_v53 }
 0xa19   : > { %v7797_v10 = vpop.eup %7796  ;;  %v3645_v36 = vpack.c.bf16 %v3633_v28, %v3632_v1 }
 0xa1a   : > { %v7799_v20 = vpop.eup %7798  ;;  %v3635_v6 = vmul.f32 %v7797_v10, %v9608_v39 }
 0xa1b   : > { %v3634_v41 = vmul.f32 %v7799_v20, %v9610_v8  ;;  %v3606_v44 = vpop.xlane.xlu0 %3605  ;;  %7115 = vmatmul.mubr.msk.bf16.vlgmr.msra.gmra.mrb[108].mxu1 %vm1529_vm2, %v3645_v36 }
 0xa1c   : > { %7125 = vmatpush3.bf16.msra.mxu1 %v9640_v14  ;;  %7126 = vmatprep.mubr.msk.bf16.mxu1 %vm8220_vm0, %v10571_v53  ;;  %7808 = vrcp.f32 %v3606_v44 }
 0xa1d   : > { %v7801_v60 = vpop.eup %7800  ;;  %v3646_v35 = vpack.c.bf16 %v3635_v6, %v3634_v41  ;;  %7136 = vmatprep.subr.bf16.mxu1 %v10571_v53 }
 0xa1e   : > { %v7803_v24 = vpop.eup %7802  ;;  %v3637_v45 = vmul.f32 %v7801_v60, %v9616_v50 }
 0xa1f   : > { %v3636_v63 = vmul.f32 %v7803_v24, %v9618_v55  ;;  %v4029_v39 = vpop.permute.xlu0 %4028  ;;  %7121 = vmatmul.mubr.msk.bf16.vlgmr.msra.gmra.mrb[112].mxu0 %vm1529_vm2, %v3646_v35 }
 0xa20   : > { %7131 = vmatpush3.bf16.msra.mxu0 %v9665_v56  ;;  %7132 = vmatprep.mubr.msk.bf16.mxu0 %vm8220_vm0, %v10571_v53  ;;  %v4034_v61 = vsel %vm1152_vm1, %v4029_v39, 0 }
 0xa21   : > { %v7805_v8 = vpop.eup %7804  ;;  %v3647_v14 = vpack.c.bf16 %v3637_v45, %v3636_v63  ;;  %7142 = vmatprep.subr.bf16.mxu0 %v10571_v53 }
 0xa22   : > { %v7807_v16 = vpop.eup %7806  ;;  %v3639_v59 = vmul.f32 %v7805_v8, %v9624_v5 }
 0xa23   : > { %v3638_v47 = vmul.f32 %v7807_v16, %v9626_v49  ;;  %v4027_v50 = vpop.permute.xlu0 %4026  ;;  %7127 = vmatmul.mubr.msk.bf16.vlgmr.msra.gmra.mrb[112].mxu1 %vm1529_vm2, %v3647_v14 }
 0xa24   : > { %7137 = vmatpush3.bf16.msra.mxu1 %v9669_v58  ;;  %7138 = vmatprep.mubr.msk.bf16.mxu1 %vm8220_vm0, %v10571_v53 }
 0xa25   : > { %v3648_v55 = vpack.c.bf16 %v3639_v59, %v3638_v47  ;;  %7148 = vmatprep.subr.bf16.mxu1 %v10571_v53 }
 0xa26   : > { %v7809_v51 = vpop.eup %7808 }
 0xa27   : > { %v4131_v56 = vpop.permute.xlu0 %4130  ;;  %7133 = vmatmul.mubr.msk.bf16.vlgmr.msra.gmra.mrb[116].mxu0 %vm1529_vm2, %v3648_v55  ;;  %v3640_v0 = vmul.f32 %v7809_v51, %v9632_v62 }
 0xa28   : > { %7144 = vmatprep.mubr.msk.bf16.mxu0 %vm8220_vm0, %v10571_v53  ;;  %v4136_v49 = vsel %vm1152_vm1, %v4131_v56, 0 }
 0xa29   : > { %7143 = vmatpush3.bf16.xpose.msra.mxu0 %v4034_v61 }
 0xa2a   : > { %7154 = vmatprep.subr.bf16.mxu0 %v10571_v53 }
 0xa2b   : > { %v4129_v5 = vpop.permute.xlu0 %4128 }
 0xa2f   : > { %v4233_v58 = vpop.permute.xlu0 %4232 }
 0xa30   : > { %7145 = vmatmul.mubr.msk.bf16.vlgmr.msra.gmra.mrb[120].mxu0 %vm1152_vm1, %v4027_v50  ;;  %v4238_v54 = vsel %vm1152_vm1, %v4233_v58, 0 }
 0xa31   : > { %7155 = vmatpush3.bf16.xpose.msra.mxu0 %v4136_v49  ;;  %7156 = vmatprep.mubr.msk.bf16.mxu0 %vm8220_vm0, %v10571_v53 }
 0xa32   : > { %7166 = vmatprep.subr.bf16.mxu0 %v10571_v53 }
 0xa33   : > { %v4231_v22 = vpop.permute.xlu0 %4230 }
 0xa37   : > { %v4335_v48 = vpop.permute.xlu0 %4334 }
 0xa38   : > { %7157 = vmatmul.mubr.msk.bf16.vlgmr.msra.gmra.mrb[124].mxu0 %vm1152_vm1, %v4129_v5  ;;  %v4340_v26 = vsel %vm1152_vm1, %v4335_v48, 0 }
 0xa39   : > { %7167 = vmatpush3.bf16.xpose.msra.mxu0 %v4238_v54  ;;  %7168 = vmatprep.mubr.msk.bf16.mxu0 %vm8220_vm0, %v10571_v53 }
 0xa3a   : > { %7178 = vmatprep.subr.bf16.mxu0 %v10571_v53 }
 0xa3b   : > { %v4333_v12 = vpop.permute.xlu0 %4332 }
 0xa40   : > { %7169 = vmatmul.mubr.msk.bf16.vlgmr.msra.gmra.mrb[128].mxu0 %vm1152_vm1, %v4231_v22 }
 0xa41   : > { %7179 = vmatpush3.bf16.xpose.msra.mxu0 %v4340_v26  ;;  %7180 = vmatprep.mubr.msk.bf16.mxu0 %vm8220_vm0, %v10571_v53 }
 0xa42   : > { %7190 = vmatprep.subr.bf16.mxu0 %v10571_v53 }
 0xa48   : > { %7181 = vmatmul.mubr.msk.bf16.vlgmr.msra.gmra.mrb[132].mxu0 %vm1152_vm1, %v4333_v12 }
 0xa49   : > { %7192 = vmatprep.mubr.msk.bf16.mxu0 %vm8220_vm0, %v10571_v53 }
 0xa4b   : > { %v3609_v43 = vpop.xlane.xlu1 %3608 }
 0xa4c   : > { %7810 = vrcp.f32 %v3609_v43 }
 0xa4f   : > { %v4080_v57 = vpop.permute.xlu1 %4079 }
 0xa50   : > { %v4085_v25 = vsel %vm1152_vm1, %v4080_v57, 0 }
 0xa53   : > { %v4078_v21 = vpop.permute.xlu1 %4077 }
 0xa56   : > { %v7811_v19 = vpop.eup %7810 }
 0xa57   : > { %v3641_v18 = vmul.f32 %v7811_v19, %v9651_v33  ;;  %v4182_v40 = vpop.permute.xlu1 %4181 }
 0xa58   : > { %v4187_v46 = vsel %vm1152_vm1, %v4182_v40, 0 }
 0xa59   : > { %v3649_v42 = vpack.c.bf16 %v3641_v18, %v3640_v0 }
 0xa5b   : > { %7139 = vmatmul.mubr.msk.bf16.vlgmr.msra.gmra.mrb[116].mxu1 %vm1529_vm2, %v3649_v42  ;;  %v4180_v23 = vpop.permute.xlu1 %4179 }
 0xa5c   : > { %7149 = vmatpush3.bf16.xpose.msra.mxu1 %v4085_v25  ;;  %7150 = vmatprep.mubr.msk.bf16.mxu1 %vm8220_vm0, %v10571_v53 }
 0xa5d   : > { %7160 = vmatprep.subr.bf16.mxu1 %v10571_v53 }
 0xa5f   : > { %v4284_v62 = vpop.permute.xlu1 %4283 }
 0xa60   : > { %v4289_v11 = vsel %vm1152_vm1, %v4284_v62, 0 }
 0xa63   : > { %7151 = vmatmul.mubr.msk.bf16.vlgmr.msra.gmra.mrb[120].mxu1 %vm1152_vm1, %v4078_v21  ;;  %v4282_v33 = vpop.permute.xlu1 %4281 }
 0xa64   : > { %7161 = vmatpush3.bf16.xpose.msra.mxu1 %v4187_v46  ;;  %7162 = vmatprep.mubr.msk.bf16.mxu1 %vm8220_vm0, %v10571_v53 }
 0xa65   : > { %7172 = vmatprep.subr.bf16.mxu1 %v10571_v53 }
 0xa67   : > { %v4386_v13 = vpop.permute.xlu1 %4385 }
 0xa68   : > { %v4391_v28 = vsel %vm1152_vm1, %v4386_v13, 0 }
 0xa6b   : > { %7163 = vmatmul.mubr.msk.bf16.vlgmr.msra.gmra.mrb[124].mxu1 %vm1152_vm1, %v4180_v23  ;;  %v4384_v1 = vpop.permute.xlu1 %4383 }
 0xa6c   : > { %7173 = vmatpush3.bf16.xpose.msra.mxu1 %v4289_v11  ;;  %7174 = vmatprep.mubr.msk.bf16.mxu1 %vm8220_vm0, %v10571_v53 }
 0xa6d   : > { %7184 = vmatprep.subr.bf16.mxu1 %v10571_v53 }
 0xa73   : > { %7175 = vmatmul.mubr.msk.bf16.vlgmr.msra.gmra.mrb[128].mxu1 %vm1152_vm1, %v4282_v33 }
 0xa74   : > { %7185 = vmatpush3.bf16.xpose.msra.mxu1 %v4391_v28  ;;  %7186 = vmatprep.mubr.msk.bf16.mxu1 %vm8220_vm0, %v10571_v53 }
 0xa75   : > { %7196 = vmatprep.subr.bf16.mxu1 %v10571_v53 }
 0xa7b   : > { %7187 = vmatmul.mubr.msk.bf16.vlgmr.msra.gmra.mrb[132].mxu1 %vm1152_vm1, %v4384_v1 }
 0xa7c   : > { %7198 = vmatprep.mubr.msk.bf16.mxu1 %vm8220_vm0, %v10571_v53 }
 0xac5   : > { %v9770_v17 = vpop.f32.mrb[104].mxu0 }
 0xac6   : > { %v7098_v10 = vpop.f32.mrb[105].mxu0 }
 0xac7   : > { %v9772_v36 = vpop.f32.mrb[106].mxu0 }
 0xac8   : > { %v7398_v20 = vpack.i.bf16 %v9772_v36, %v9770_v17  ;;  %v7099_v6 = vpop.f32.mrb[107].mxu0  ;;  %v10582_v36 = vpack.i.bf16 %v9435_v2, %v9433_v37 }
 0xac9   : > { %v9776_v41 = vpop.f32.mrb[104].mxu1 }
 0xaca   : > { %v7104_v44 = vpop.f32.mrb[105].mxu1 }
 0xacb   : > { %v9778_v60 = vpop.f32.mrb[106].mxu1 }
 0xacc   : > { %v7403_v35 = vpack.i.bf16 %v9778_v60, %v9776_v41  ;;  %v7105_v24 = vpop.f32.mrb[107].mxu1 }
 0xae9   : > { %v9782_v45 = vpop.f32.mrb[108].mxu0 }
 0xaea   : > { %v7110_v63 = vpop.f32.mrb[109].mxu0 }
 0xaeb   : > { %v9784_v39 = vpop.f32.mrb[110].mxu0 }
 0xaec   : > { %v7428_v8 = vpack.i.bf16 %v9784_v39, %v9782_v45  ;;  %v7111_v14 = vpop.f32.mrb[111].mxu0  ;;  %v7547_v45 = vld [vmem:[#allocation6 + $0x38] sm:$0xff]  }
 0xaee   : > { %v9788_v16 = vpop.f32.mrb[108].mxu1 }
 0xaef   : > { %v7116_v59 = vpop.f32.mrb[109].mxu1 }
 0xaf0   : > { %v9790_v47 = vpop.f32.mrb[110].mxu1 }
 0xaf1   : > { %v7433_v50 = vpack.i.bf16 %v9790_v47, %v9788_v16  ;;  %v7117_v55 = vpop.f32.mrb[111].mxu1 }
 0xaf2   : > { %v9794_v56 = vpop.f32.mrb[112].mxu0 }
 0xaf3   : > { %v7122_v61 = vpop.f32.mrb[113].mxu0 }
 0xaf4   : > { %v9796_v5 = vpop.f32.mrb[114].mxu0 }
 0xaf5   : > { %v7458_v49 = vpack.i.bf16 %v9796_v5, %v9794_v56  ;;  %v7123_v58 = vpop.f32.mrb[115].mxu0 }
 0xaf6   : > { %v9800_v22 = vpop.f32.mrb[112].mxu1 }
 0xaf7   : > { %v7128_v54 = vpop.f32.mrb[113].mxu1 }
 0xaf8   : > { %v9802_v48 = vpop.f32.mrb[114].mxu1 }
 0xaf9   : > { %v7129_v12 = vpop.f32.mrb[115].mxu1 }
 0xafa   : > { %v9806_v43 = vpop.f32.mrb[116].mxu0 }
 0xafb   : > { %v7134_v57 = vpop.f32.mrb[117].mxu0 }
 0xafc   : > { %v9808_v21 = vpop.f32.mrb[118].mxu0 }
 0xafd   : > { %v7135_v19 = vpop.f32.mrb[119].mxu0 }
 0xb03   : > { %v9812_v0 = vpop.f32.mrb[120].mxu0 }
 0xb04   : > { %v7146_v18 = vpop.f32.mrb[121].mxu0  ;;  %v4434_v40 = vsel %vm1529_vm2, %v9812_v0, -inf }
 0xb05   : > { %4435 = vmax.xlane.f32.xlu0 %v4434_v40  ;;  %v9816_v42 = vpop.f32.mrb[122].mxu0 }
 0xb06   : > { %v7147_v25 = vpop.f32.mrb[123].mxu0  ;;  %v4437_v23 = vsel %vm1529_vm2, %v9816_v42, -inf }
 0xb07   : > { %4438 = vmax.xlane.f32.xlu1 %v4437_v23 }
 0xb0b   : > { %v9820_v46 = vpop.f32.mrb[124].mxu0 }
 0xb0c   : > { %v7158_v62 = vpop.f32.mrb[125].mxu0 }
 0xb0d   : > { %v9822_v33 = vpop.f32.mrb[126].mxu0 }
 0xb0e   : > { %v7159_v11 = vpop.f32.mrb[127].mxu0  ;;  %v4449_v13 = vsel %vm1529_vm2, %v9822_v33, -inf }
 0xb0f   : > { %4450 = vmax.xlane.f32.xlu1 %v4449_v13 }
 0xb13   : > { %v9826_v28 = vpop.f32.mrb[128].mxu0 }
 0xb14   : > { %v7170_v1 = vpop.f32.mrb[129].mxu0 }
 0xb15   : > { %v9828_v10 = vpop.f32.mrb[130].mxu0 }
 0xb16   : > { %v7171_v6 = vpop.f32.mrb[131].mxu0 }
 0xb1b   : > { %v9830_v44 = vpop.f32.mrb[132].mxu0 }
 0xb1c   : > { %v7182_v24 = vpop.f32.mrb[133].mxu0 }
 0xb1d   : > { %v9832_v63 = vpop.f32.mrb[134].mxu0 }
 0xb1e   : > { %v7183_v14 = vpop.f32.mrb[135].mxu0 }
 0xb20   : > { %4665 = vrot.lane.b32.xlu1 %v8730_v7, %s8223_s15  ;;  %v4446_v7 = vsel %vm1529_vm2, %v9820_v46, -inf }
 0xb2e   : > { %v9836_v59 = vpop.f32.mrb[116].mxu1 }
 0xb2f   : > { %v7140_v55 = vpop.f32.mrb[117].mxu1 }
 0xb30   : > { %v9838_v61 = vpop.f32.mrb[118].mxu1  ;;  %v4461_v55 = vsel %vm1529_vm2, %v9828_v10, -inf }
 0xb31   : > { %v7141_v54 = vpop.f32.mrb[119].mxu1 }
 0xb36   : > { %v9842_v12 = vpop.f32.mrb[120].mxu1 }
 0xb37   : > { %v7152_v57 = vpop.f32.mrb[121].mxu1  ;;  %v4440_v19 = vsel %vm1529_vm2, %v9842_v12, -inf }
 0xb38   : > { %4441 = vmax.xlane.f32.xlu0 %v4440_v19  ;;  %v9846_v18 = vpop.f32.mrb[122].mxu1 }
 0xb39   : > { %v7153_v40 = vpop.f32.mrb[123].mxu1  ;;  %v4443_v62 = vsel %vm1529_vm2, %v9846_v18, -inf }
 0xb3c   : > { %4447 = vmax.xlane.f32.xlu0 %v4446_v7 }
 0xb3e   : > { %v9850_v25 = vpop.f32.mrb[124].mxu1 }
 0xb3f   : > { %v7164_v23 = vpop.f32.mrb[125].mxu1  ;;  %v4452_v1 = vsel %vm1529_vm2, %v9850_v25, -inf }
 0xb40   : > { %4444 = vmax.xlane.f32.xlu0 %v4443_v62  ;;  %v9854_v11 = vpop.f32.mrb[126].mxu1  ;;  %v4473_v23 = vsel %vm1529_vm2, %v9832_v63, -inf }
 0xb41   : > { %v7165_v13 = vpop.f32.mrb[127].mxu1  ;;  %v4455_v6 = vsel %vm1529_vm2, %v9854_v11, -inf }
 0xb44   : > { %4453 = vmax.xlane.f32.xlu0 %v4452_v1  ;;  %4456 = vmax.xlane.f32.xlu1 %v4455_v6  ;;  %v4458_v6 = vsel %vm1529_vm2, %v9826_v28, -inf }
 0xb46   : > { %v9860_v24 = vpop.f32.mrb[128].mxu1 }
 0xb47   : > { %v7176_v14 = vpop.f32.mrb[129].mxu1 }
 0xb48   : > { %4462 = vmax.xlane.f32.xlu1 %v4461_v55  ;;  %v9864_v54 = vpop.f32.mrb[130].mxu1  ;;  %v4464_v14 = vsel %vm1529_vm2, %v9860_v24, -inf  ;;  %v4470_v55 = vsel %vm1529_vm2, %v9830_v44, -inf }
 0xb49   : > { %v7177_v57 = vpop.f32.mrb[131].mxu1  ;;  %v4467_v19 = vsel %vm1529_vm2, %v9864_v54, -inf }
 0xb4c   : > { %4468 = vmax.xlane.f32.xlu1 %v4467_v19 }
 0xb4e   : > { %v9868_v40 = vpop.f32.mrb[132].mxu1 }
 0xb4f   : > { %v7188_v7 = vpop.f32.mrb[133].mxu1  ;;  %v4476_v57 = vsel %vm1529_vm2, %v9868_v40, -inf }
 0xb50   : > { %4474 = vmax.xlane.f32.xlu1 %v4473_v23  ;;  %v9872_v62 = vpop.f32.mrb[134].mxu1 }
 0xb51   : > { %v7189_v13 = vpop.f32.mrb[135].mxu1  ;;  %v4479_v1 = vsel %vm1529_vm2, %v9872_v62, -inf }
 0xb54   : > { %4480 = vmax.xlane.f32.xlu1 %v4479_v1 }
 0xb5a   : > { %4618 = vrot.lane.b32.xlu0 %v8732_v9, %s8223_s15 }
 0xb79   : > { %4459 = vmax.xlane.f32.xlu0 %v4458_v6 }
 0xb7d   : > { %4465 = vmax.xlane.f32.xlu0 %v4464_v14 }
 0xb81   : > { %4471 = vmax.xlane.f32.xlu0 %v4470_v55 }
 0xb85   : > { %4477 = vmax.xlane.f32.xlu0 %v4476_v57 }
 0xb92   : > { %v4436_v19 = vpop.xlane.xlu0 %4435 }
 0xb93   : > { %v4482_v7 = vsub.f32 %v9812_v0, %v4436_v19 }
 0xb94   : > { %v4439_v9 = vpop.xlane.xlu1 %4438 }
 0xb95   : > { %v4498_v23 = vmul.f32 1.442695, %v4482_v7  ;;  %v4483_v13 = vsub.f32 %v9816_v42, %v4439_v9 }
 0xb97   : > { %7812 = vpow2.f32 %v4498_v23  ;;  %v4500_v1 = vmul.f32 1.442695, %v4483_v13 }
 0xb99   : > { %7814 = vpow2.f32 %v4500_v1 }
 0xb9c   : > { %v4451_v6 = vpop.xlane.xlu1 %4450 }
 0xb9d   : > { %v4487_v23 = vsub.f32 %v9822_v33, %v4451_v6 }
 0xba0   : > { %v4666_v14 = vpop.permute.xlu1 %4665 }
 0xba1   : > { %v9888_v58 = vpop.eup %7812  ;;  %7197 = vmatpush3.bf16.msra.mxu1 %v4666_v14  ;;  %v4508_v14 = vmul.f32 1.442695, %v4487_v23 }
 0xba2   : > { %v4530_v55 = vsel %vm1529_vm2, %v9888_v58, 0.0  ;;  %7208 = vmatprep.subr.bf16.mxu1 %v10571_v53 }
 0xba3   : > { %v9893_v57 = vpop.eup %7814  ;;  %4531 = vadd.xlane.f32.xlu0 %v4530_v55 }
 0xba4   : > { %v4533_v0 = vsel %vm1529_vm2, %v9893_v57, 0.0 }
 0xba5   : > { %4534 = vadd.xlane.f32.xlu1 %v4533_v0 }
 0xbb6   : > { %4759 = vrot.lane.b32.xlu1 %v8743_v27, %s8223_s15 }
 0xbc5   : > { %v4442_v42 = vpop.xlane.xlu0 %4441 }
 0xbc6   : > { %v4484_v19 = vsub.f32 %v9842_v12, %v4442_v42 }
 0xbc8   : > { %v4502_v7 = vmul.f32 1.442695, %v4484_v19 }
 0xbc9   : > { %v4448_v9 = vpop.xlane.xlu0 %4447 }
 0xbca   : > { %7816 = vpow2.f32 %v4502_v7  ;;  %v4486_v19 = vsub.f32 %v9820_v46, %v4448_v9 }
 0xbcc   : > { %v4506_v7 = vmul.f32 1.442695, %v4486_v19 }
 0xbcd   : > { %v4445_v13 = vpop.xlane.xlu0 %4444 }
 0xbce   : > { %v4485_v1 = vsub.f32 %v9846_v18, %v4445_v13 }
 0xbd0   : > { %v4504_v55 = vmul.f32 1.442695, %v4485_v1 }
 0xbd1   : > { %v4454_v26 = vpop.xlane.xlu0 %4453  ;;  %v4457_v42 = vpop.xlane.xlu1 %4456 }
 0xbd2   : > { %7818 = vpow2.f32 %v4504_v55  ;;  %v4488_v23 = vsub.f32 %v9850_v25, %v4454_v26 }
 0xbd3   : > { %7820 = vpow2.f32 %v4508_v14 }
 0xbd4   : > { %v9902_v51 = vpop.eup %7816  ;;  %7822 = vpow2.f32 %v4506_v7  ;;  %v4510_v1 = vmul.f32 1.442695, %v4488_v23 }
 0xbd5   : > { %v4619_v0 = vpop.permute.xlu0 %4618  ;;  %v4536_v27 = vsel %vm1529_vm2, %v9902_v51, 0.0  ;;  %v4463_v13 = vpop.xlane.xlu1 %4462 }
 0xbd6   : > { %7191 = vmatpush3.bf16.msra.mxu0 %v4619_v0  ;;  %4537 = vadd.xlane.f32.xlu0 %v4536_v27  ;;  %v4491_v14 = vsub.f32 %v9828_v10, %v4463_v13  ;;  %7824 = vpow2.f32 %v4510_v1  ;;  %v4489_v27 = vsub.f32 %v9854_v11, %v4457_v42 }
 0xbd7   : > { %7202 = vmatprep.subr.bf16.mxu0 %v10571_v53 }
 0xbd8   : > { %v4516_v0 = vmul.f32 1.442695, %v4491_v14  ;;  %v4512_v9 = vmul.f32 1.442695, %v4489_v27 }
 0xbd9   : > { %v4469_v55 = vpop.xlane.xlu1 %4468 }
 0xbda   : > { %7826 = vpow2.f32 %v4516_v0  ;;  %v4493_v42 = vsub.f32 %v9864_v54, %v4469_v55 }
 0xbdc   : > { %v9907_v12 = vpop.eup %7818  ;;  %v4520_v0 = vmul.f32 1.442695, %v4493_v42 }
 0xbdd   : > { %v4539_v33 = vsel %vm1529_vm2, %v9907_v12, 0.0  ;;  %v9911_v18 = vpop.eup %7820 }
 0xbde   : > { %4540 = vadd.xlane.f32.xlu1 %v4539_v33  ;;  %v4545_v6 = vsel %vm1529_vm2, %v9911_v18, 0.0  ;;  %v4475_v33 = vpop.xlane.xlu1 %4474 }
 0xbdf   : > { %v4495_v26 = vsub.f32 %v9832_v63, %v4475_v33 }
 0xbe1   : > { %v4524_v23 = vmul.f32 1.442695, %v4495_v26 }
 0xbe2   : > { %4546 = vadd.xlane.f32.xlu1 %v4545_v6 }
 0xbec   : > { %4712 = vrot.lane.b32.xlu0 %v8747_v29, %s8223_s15  ;;  %v9921_v29 = vpop.eup %7822 }
 0xbed   : > { %v4542_v10 = vsel %vm1529_vm2, %v9921_v29, 0.0  ;;  %v9927_v7 = vpop.eup %7824 }
 0xbee   : > { %v4548_v63 = vsel %vm1529_vm2, %v9927_v7, 0.0  ;;  %v9933_v1 = vpop.eup %7826 }
 0xbef   : > { %v4557_v33 = vsel %vm1529_vm2, %v9933_v1, 0.0 }
 0xc06   : > { %v4460_v6 = vpop.xlane.xlu0 %4459 }
 0xc07   : > { %v4490_v46 = vsub.f32 %v9826_v28, %v4460_v6 }
 0xc09   : > { %v4514_v25 = vmul.f32 1.442695, %v4490_v46 }
 0xc0a   : > { %v4466_v19 = vpop.xlane.xlu0 %4465 }
 0xc0b   : > { %7828 = vpow2.f32 %v4514_v25  ;;  %v4492_v11 = vsub.f32 %v9860_v24, %v4466_v19  ;;  %4543 = vadd.xlane.f32.xlu0 %v4542_v10 }
 0xc0c   : > { %7830 = vpow2.f32 %v4512_v9 }
 0xc0d   : > { %v4518_v13 = vmul.f32 1.442695, %v4492_v11 }
 0xc0e   : > { %v4472_v28 = vpop.xlane.xlu0 %4471 }
 0xc0f   : > { %7832 = vpow2.f32 %v4518_v13  ;;  %v4494_v14 = vsub.f32 %v9830_v44, %v4472_v28  ;;  %4549 = vadd.xlane.f32.xlu0 %v4548_v63  ;;  %v4481_v63 = vpop.xlane.xlu1 %4480 }
 0xc10   : > { %7834 = vpow2.f32 %v4524_v23 }
 0xc11   : > { %v4522_v27 = vmul.f32 1.442695, %v4494_v14 }
 0xc12   : > { %v4478_v24 = vpop.xlane.xlu0 %4477 }
 0xc13   : > { %7836 = vpow2.f32 %v4522_v27  ;;  %v4496_v54 = vsub.f32 %v9868_v40, %v4478_v24  ;;  %4558 = vadd.xlane.f32.xlu0 %v4557_v33  ;;  %v10581_v33 = vpack.i.bf16 %v9429_v34, %v9427_v15 }
 0xc14   : > { %7838 = vpow2.f32 %v4520_v0 }
 0xc15   : > { %v9939_v55 = vpop.eup %7828  ;;  %v4526_v6 = vmul.f32 1.442695, %v4496_v54 }
 0xc16   : > { %v4554_v46 = vsel %vm1529_vm2, %v9939_v55, 0.0  ;;  %v9943_v44 = vpop.eup %7830 }
 0xc17   : > { %7840 = vpow2.f32 %v4526_v6  ;;  %4555 = vadd.xlane.f32.xlu1 %v4554_v46  ;;  %v4551_v40 = vsel %vm1529_vm2, %v9943_v44, 0.0 }
 0xc19   : > { %v9945_v9 = vpop.eup %7832 }
 0xc1a   : > { %v4560_v26 = vsel %vm1529_vm2, %v9945_v9, 0.0  ;;  %v9951_v25 = vpop.eup %7834 }
 0xc1b   : > { %4561 = vadd.xlane.f32.xlu0 %v4560_v26  ;;  %4552 = vadd.xlane.f32.xlu1 %v4551_v40  ;;  %v4569_v10 = vsel %vm1529_vm2, %v9951_v25, 0.0 }
 0xc1d   : > { %v9953_v19 = vpop.eup %7836 }
 0xc1e   : > { %v4566_v11 = vsel %vm1529_vm2, %v9953_v19, 0.0  ;;  %v9959_v42 = vpop.eup %7838 }
 0xc1f   : > { %4570 = vadd.xlane.f32.xlu0 %v4569_v10  ;;  %4567 = vadd.xlane.f32.xlu1 %v4566_v11  ;;  %v4563_v28 = vsel %vm1529_vm2, %v9959_v42, 0.0 }
 0xc21   : > { %v9961_v23 = vpop.eup %7840 }
 0xc22   : > { %v4572_v13 = vsel %vm1529_vm2, %v9961_v23, 0.0 }
 0xc23   : > { %4573 = vadd.xlane.f32.xlu0 %v4572_v13  ;;  %4564 = vadd.xlane.f32.xlu1 %v4563_v28 }
 0xc30   : > { %v4532_v14 = vpop.xlane.xlu0 %4531 }
 0xc31   : > { %7842 = vrcp.f32 %v4532_v14 }
 0xc32   : > { %v4535_v0 = vpop.xlane.xlu1 %4534 }
 0xc33   : > { %7844 = vrcp.f32 %v4535_v0 }
 0xc34   : > { %4853 = vrot.lane.b32.xlu1 %v8758_v38, %s8223_s15  ;;  %v4497_v38 = vsub.f32 %v9872_v62, %v4481_v63 }
 0xc38   : > { %4900 = vrot.lane.b32.xlu1 %v8777_v52, %s8223_s15 }
 0xc39   : > { %4806 = vrot.lane.b32.xlu0 %v8762_v32, %s8223_s15  ;;  %v4528_v32 = vmul.f32 1.442695, %v4497_v38 }
 0xc3b   : > { %v7843_v27 = vpop.eup %7842  ;;  %7846 = vpow2.f32 %v4528_v32 }
 0xc3c   : > { %v4594_v54 = vmul.f32 %v7843_v27, %v9888_v58  ;;  %v4760_v58 = vpop.permute.xlu1 %4759 }
 0xc3d   : > { %v7845_v24 = vpop.eup %7844  ;;  %7389 = vrot.lane.b32.xlu0 %v10581_v33, %s8223_s15 }
 0xc3e   : > { %v4595_v6 = vmul.f32 %v7845_v24, %v9893_v57 }
 0xc40   : > { %v4610_v46 = vpack.c.bf16 %v4595_v6, %v4594_v54 }
 0xc41   : > { %7399 = vrot.lane.b32.xlu0 %v7398_v20, %s8222_s20 }
 0xc42   : > { %7193 = vmatmul.mubr.msk.bf16.vlgmr.msra.gmra.mrb[136].mxu0 %vm1529_vm2, %v4610_v46 }
 0xc43   : > { %7204 = vmatprep.mubr.msk.bf16.mxu0 %vm8220_vm0, %v10571_v53 }
 0xc45   : > { %v9987_v52 = vpop.eup %7846 }
 0xc46   : > { %v4575_v15 = vsel %vm1529_vm2, %v9987_v52, 0.0 }
 0xc5c   : > { %4576 = vadd.xlane.f32.xlu1 %v4575_v15 }
 0xc63   : > { %v4538_v34 = vpop.xlane.xlu0 %4537 }
 0xc64   : > { %7848 = vrcp.f32 %v4538_v34 }
 0xc67   : > { %v4713_v57 = vpop.permute.xlu0 %4712 }
 0xc68   : > { %7203 = vmatpush3.bf16.msra.mxu0 %v4713_v57 }
 0xc69   : > { %7214 = vmatprep.subr.bf16.mxu0 %v10571_v53 }
 0xc6b   : > { %v4541_v17 = vpop.xlane.xlu1 %4540 }
 0xc6c   : > { %7850 = vrcp.f32 %v4541_v17 }
 0xc6d   : > { %4947 = vrot.lane.b32.xlu1 %v8773_v4, %s8223_s15 }
 0xc6e   : > { %v7849_v20 = vpop.eup %7848 }
 0xc6f   : > { %v4596_v26 = vmul.f32 %v7849_v20, %v9902_v51  ;;  %v4547_v4 = vpop.xlane.xlu1 %4546 }
 0xc70   : > { %7852 = vrcp.f32 %v4547_v4 }
 0xc71   : > { %7394 = vrot.lane.b32.xlu1 %v10582_v36, %s8223_s15 }
 0xc75   : > { %7404 = vrot.lane.b32.xlu1 %v7403_v35, %s8222_s20 }
 0xc76   : > { %v7851_v62 = vpop.eup %7850 }
 0xc77   : > { %v4597_v40 = vmul.f32 %v7851_v62, %v9907_v12 }
 0xc79   : > { %v4611_v10 = vpack.c.bf16 %v4597_v40, %v4596_v26 }
 0xc7a   : > { %v7853_v41 = vpop.eup %7852 }
 0xc7b   : > { %7199 = vmatmul.mubr.msk.bf16.vlgmr.msra.gmra.mrb[136].mxu1 %vm1529_vm2, %v4611_v10  ;;  %v4599_v35 = vmul.f32 %v7853_v41, %v9911_v18  ;;  %v10583_v41 = vmov 0  }
 0xc7c   : > { %7209 = vmatpush3.bf16.msra.mxu1 %v4760_v58  ;;  %7210 = vmatprep.mubr.msk.bf16.mxu1 %vm8220_vm0, %v10571_v53 }
 0xc7d   : > { %7220 = vmatprep.subr.bf16.mxu1 %v10571_v53 }
 0xc98   : > { %v4544_v37 = vpop.xlane.xlu0 %4543 }
 0xc99   : > { %7854 = vrcp.f32 %v4544_v37 }
 0xc9c   : > { %v4550_v2 = vpop.xlane.xlu0 %4549 }
 0xca0   : > { %v4559_v12 = vpop.xlane.xlu0 %4558 }
 0xca3   : > { %v7855_v60 = vpop.eup %7854 }
 0xca4   : > { %v4598_v51 = vmul.f32 %v7855_v60, %v9921_v29  ;;  %v4556_v11 = vpop.xlane.xlu1 %4555 }
 0xca5   : > { %7856 = vrcp.f32 %v4556_v11  ;;  %v10584_v11 = vpack.i.bf16 %v9441_v3, %v9439_v30  ;;  %v7545_v30 = vld [vmem:[#allocation6 + $0x28] sm:$0xff]   ;;  %v7546_v3 = vld [vmem:[#allocation6 + $0x30] sm:$0xff]  }
 0xca6   : > { %v4612_v13 = vpack.c.bf16 %v4599_v35, %v4598_v51  ;;  %7858 = vrcp.f32 %v4559_v12 }
 0xca7   : > { %7860 = vrcp.f32 %v4550_v2 }
 0xca8   : > { %v4562_v28 = vpop.xlane.xlu0 %4561  ;;  %7205 = vmatmul.mubr.msk.bf16.vlgmr.msra.gmra.mrb[140].mxu0 %vm1529_vm2, %v4612_v13  ;;  %v4553_v63 = vpop.xlane.xlu1 %4552  ;;  %v7542_v13 = vld [vmem:[#allocation6 + $0x10] sm:$0xff]  }
 0xca9   : > { %7216 = vmatprep.mubr.msk.bf16.mxu0 %vm8220_vm0, %v10571_v53  ;;  %7862 = vrcp.f32 %v4553_v63  ;;  %v7544_v63 = vld [vmem:[#allocation6 + $0x20] sm:$0xff]  }
 0xcac   : > { %v4571_v14 = vpop.xlane.xlu0 %4570  ;;  %v4568_v0 = vpop.xlane.xlu1 %4567 }
 0xcad   : > { %7864 = vrcp.f32 %v4571_v14 }
 0xcae   : > { %7866 = vrcp.f32 %v4568_v0 }
 0xcaf   : > { %v7857_v18 = vpop.eup %7856  ;;  %7868 = vrcp.f32 %v4562_v28  ;;  %v7543_v28 = vld [vmem:[#allocation6 + $0x18] sm:$0xff]  }
 0xcb0   : > { %v4574_v29 = vpop.xlane.xlu0 %4573  ;;  %v4565_v27 = vpop.xlane.xlu1 %4564  ;;  %v4602_v54 = vmul.f32 %v7857_v18, %v9939_v55 }
 0xcb1   : > { %v7859_v24 = vpop.eup %7858  ;;  %7870 = vrcp.f32 %v4565_v27 }
 0xcb2   : > { %v7861_v33 = vpop.eup %7860  ;;  %v4603_v46 = vmul.f32 %v7859_v24, %v9933_v1  ;;  %7872 = vrcp.f32 %v4574_v29  ;;  %v10585_v29 = vld [vmem:[#allocation32_spill] sm:$0xff] }
 0xcb3   : > { %v7863_v6 = vpop.eup %7862  ;;  %v4600_v15 = vmul.f32 %v7861_v33, %v9927_v7  ;;  %v10586_v27 = vpack.i.bf16 %v9447_v31, %v10585_v29  ;;  %v10601_v29 = vld [vmem:[#allocation39_spill] sm:$0xff] }
 0xcb4   : > { %v4807_v38 = vpop.permute.xlu0 %4806  ;;  %v4854_v32 = vpop.permute.xlu1 %4853  ;;  %v4601_v34 = vmul.f32 %v7863_v6, %v9943_v44  ;;  %v4614_v58 = vpack.c.bf16 %v4603_v46, %v4602_v54 }
 0xcb5   : > { %7215 = vmatpush3.bf16.msra.mxu0 %v4807_v38 }
 0xcb6   : > { %7226 = vmatprep.subr.bf16.mxu0 %v10571_v53  ;;  %v4613_v17 = vpack.c.bf16 %v4601_v34, %v4600_v15  ;;  %v10588_v15 = vld [vmem:[#allocation33_spill] sm:$0xff] }
 0xcb7   : > { %v7865_v57 = vpop.eup %7864 }
 0xcb8   : > { %v7867_v36 = vpop.eup %7866  ;;  %7217 = vmatmul.mubr.msk.bf16.vlgmr.msra.gmra.mrb[144].mxu0 %vm1529_vm2, %v4614_v58  ;;  %v4901_v55 = vpop.permute.xlu1 %4900  ;;  %7211 = vmatmul.mubr.msk.bf16.vlgmr.msra.gmra.mrb[140].mxu1 %vm1529_vm2, %v4613_v17  ;;  %v4607_v20 = vmul.f32 %v7865_v57, %v9951_v25 }
 0xcb9   : > { %7227 = vmatpush3.bf16.msra.mxu0 %v4901_v55  ;;  %v7869_v1 = vpop.eup %7868  ;;  %v4606_v7 = vmul.f32 %v7867_v36, %v9953_v19  ;;  %7221 = vmatpush3.bf16.msra.mxu1 %v4854_v32  ;;  %v7390_v38 = vpop.permute.xlu0 %7389  ;;  %v10587_v32 = vld [vmem:[#allocation34_spill] sm:$0xff]  ;;  %v10590_v55 = vld [vmem:[#allocation17_spill] sm:$0xff] }
 0xcba   : > { %7222 = vmatprep.mubr.msk.bf16.mxu1 %vm8220_vm0, %v10571_v53  ;;  %7228 = vmatprep.mubr.msk.bf16.mxu0 %vm8220_vm0, %v10571_v53  ;;  %v4604_v62 = vmul.f32 %v7869_v1, %v9945_v9  ;;  %v10589_v34 = vpack.i.bf16 %v10587_v32, %v10588_v15  ;;  %v7392_v16 = vunpack.i.h.bf16 %v7390_v38  ;;  %v7391_v47 = vunpack.i.l.bf16 %v7390_v38  ;;  %v10605_v32 = vld [vmem:[#allocation18_spill] sm:$0xff] }
 0xcbb   : > { %7232 = vmatprep.subr.bf16.mxu1 %v10571_v53  ;;  %v7871_v44 = vpop.eup %7870  ;;  %v4616_v40 = vpack.c.bf16 %v4607_v20, %v4606_v7  ;;  %v10591_v20 = vld [vmem:[#allocation16_spill] sm:$0xff] }
 0xcbc   : > { %v4605_v26 = vmul.f32 %v7871_v44, %v9959_v42  ;;  %v7873_v4 = vpop.eup %7872  ;;  %v5187_v1 = vsel %vm1152_vm1, %v10590_v55, %v7392_v16  ;;  %v5186_v7 = vsel %vm1152_vm1, %v10591_v20, %v7391_v47 }
 0xcbd   : > { %v4608_v9 = vmul.f32 %v7873_v4, %v9961_v23  ;;  %v7540_v23 = vld [vmem:[#allocation6] sm:$0xff]   ;;  %v7400_v31 = vpop.permute.xlu0 %7399 }
 0xcbe   : > { %v4615_v10 = vpack.c.bf16 %v4605_v26, %v4604_v62  ;;  %7238 = vmatprep.subr.bf16.mxu0 %v7540_v23  ;;  %v7401_v58 = vunpack.i.l.bf16 %v7400_v31 }
 0xcc0   : > { %7229 = vmatmul.mubr.msk.bf16.vlgmr.msra.gmra.mrb[148].mxu0 %vm1529_vm2, %v4616_v40  ;;  %7223 = vmatmul.mubr.msk.bf16.vlgmr.msra.gmra.mrb[144].mxu1 %vm1529_vm2, %v4615_v10  ;;  %v5203_v5 = vsel %vm5202_vm3, %v5186_v7, %v7401_v58 }
 0xcc1   : > { %7234 = vmatprep.mubr.msk.bf16.mxu1 %vm8220_vm0, %v10571_v53  ;;  %7239 = vmatpush3.bf16.msra.mxu0 %v7540_v23  ;;  %v10595_v23 = vld [vmem:[#allocation36_spill] sm:$0xff] }
 0xce9   : > { %v4577_v25 = vpop.xlane.xlu1 %4576 }
 0xcea   : > { %7874 = vrcp.f32 %v4577_v25 }
 0xced   : > { %v4948_v19 = vpop.permute.xlu1 %4947 }
 0xcee   : > { %7233 = vmatpush3.bf16.msra.mxu1 %v4948_v19 }
 0xcf4   : > { %v7875_v37 = vpop.eup %7874 }
 0xcf5   : > { %v4609_v42 = vmul.f32 %v7875_v37, %v9987_v52  ;;  %v7541_v52 = vld [vmem:[#allocation6 + $0x8] sm:$0xff]  }
 0xcf6   : > { %7240 = vmatprep.subr.bf16.mxu0 %v7541_v52 }
 0xcf7   : > { %v4617_v2 = vpack.c.bf16 %v4609_v42, %v4608_v9  ;;  %7241 = vmatpush3.bf16.msra.mxu0 %v7541_v52  ;;  %v10596_v52 = vld [vmem:[#allocation35_spill] sm:$0xff] }
 0xcf8   : > { %7242 = vmatprep.subr.bf16.mxu0 %v7542_v13 }
 0xcf9   : > { %7235 = vmatmul.mubr.msk.bf16.vlgmr.msra.gmra.mrb[148].mxu1 %vm1529_vm2, %v4617_v2 }
 0xcfa   : > { %5798 = vmatprep.mubr.bf16.mxu1 %v10583_v41 }
 0xcfb   : > { %7243 = vmatpush3.bf16.msra.mxu0 %v7542_v13  ;;  %v10597_v13 = vpack.i.bf16 %v10595_v23, %v10596_v52 }
 0xcfc   : > { %7244 = vmatprep.subr.bf16.mxu0 %v7543_v28 }
 0xcff   : > { %7245 = vmatpush3.bf16.msra.mxu0 %v7543_v28 }
 0xd00   : > { %7246 = vmatprep.subr.bf16.mxu0 %v7544_v63 }
 0xd03   : > { %7247 = vmatpush3.bf16.msra.mxu0 %v7544_v63 }
 0xd04   : > { %7248 = vmatprep.subr.bf16.mxu0 %v7545_v30 }
 0xd07   : > { %7249 = vmatpush3.bf16.msra.mxu0 %v7545_v30 }
 0xd08   : > { %7250 = vmatprep.subr.bf16.mxu0 %v7546_v3 }
 0xd0b   : > { %7251 = vmatpush3.bf16.msra.mxu0 %v7546_v3 }
 0xd0c   : > { %7252 = vmatprep.subr.bf16.mxu0 %v7547_v45 }
 0xd0f   : > { %7253 = vmatpush3.bf16.msra.mxu0 %v7547_v45 }
 0xd15   : > { %v4658_v60 = vpop.f32.mrb[136].mxu0 }
 0xd16   : > { %v7194_v35 = vpop.f32.mrb[137].mxu0 }
 0xd17   : > { %v4661_v51 = vpop.f32.mrb[138].mxu0 }
 0xd18   : > { %v7408_v53 = vpack.i.bf16 %v4661_v51, %v4658_v60  ;;  %v7195_v12 = vpop.f32.mrb[139].mxu0  ;;  %v10592_v51 = vld [vmem:[#allocation38_spill] sm:$0xff] }
 0xd1a   : > { %7409 = vrot.lane.b32.xlu0 %v7408_v53, %s8221_s27  ;;  %v10593_v53 = vld [vmem:[#allocation37_spill] sm:$0xff] }
 0xd1b   : > { %v10594_v12 = vpack.i.bf16 %v10592_v51, %v10593_v53 }
 0xd1e   : > { %7419 = vrot.lane.b32.xlu0 %v10584_v11, %s8223_s15 }
 0xd22   : > { %7429 = vrot.lane.b32.xlu0 %v7428_v8, %s8222_s20 }
 0xd4e   : > { %v4705_v39 = vpop.f32.mrb[136].mxu1 }
 0xd4f   : > { %v7200_v8 = vpop.f32.mrb[137].mxu1 }
 0xd50   : > { %v4708_v14 = vpop.f32.mrb[138].mxu1 }
 0xd51   : > { %v7413_v0 = vpack.i.bf16 %v4708_v14, %v4705_v39  ;;  %v7201_v18 = vpop.f32.mrb[139].mxu1  ;;  %v10598_v14 = vpack.i.bf16 %v9808_v21, %v9806_v43  ;;  %v7395_v43 = vpop.permute.xlu1 %7394 }
 0xd52   : > { %v10600_v18 = vld [vmem:[#allocation40_spill] sm:$0xff] }
 0xd53   : > { %7414 = vrot.lane.b32.xlu1 %v7413_v0, %s8221_s27  ;;  %v10599_v0 = vpack.i.bf16 %v9802_v48, %v9800_v22 }
 0xd55   : > { %v7405_v21 = vpop.permute.xlu1 %7404 }
 0xd56   : > { %v7407_v22 = vunpack.i.h.bf16 %v7405_v21  ;;  %v7406_v48 = vunpack.i.l.bf16 %v7405_v21 }
 0xd57   : > { %7424 = vrot.lane.b32.xlu1 %v10586_v27, %s8223_s15  ;;  %v10602_v27 = vpack.i.bf16 %v10600_v18, %v10601_v29  ;;  %v10611_v18 = vld [vmem:[#allocation24_spill] sm:$0xff] }
 0xd5b   : > { %7434 = vrot.lane.b32.xlu1 %v7433_v50, %s8222_s20  ;;  %v7402_v50 = vunpack.i.h.bf16 %v7400_v31 }
 0xd7b   : > { %v4752_v24 = vpop.f32.mrb[140].mxu0 }
 0xd7c   : > { %v7206_v33 = vpop.f32.mrb[141].mxu0 }
 0xd7d   : > { %v4755_v54 = vpop.f32.mrb[142].mxu0  ;;  %v7397_v33 = vunpack.i.h.bf16 %v7395_v43 }
 0xd7e   : > { %v7438_v6 = vpack.i.bf16 %v4755_v54, %v4752_v24  ;;  %v7207_v46 = vpop.f32.mrb[143].mxu0  ;;  %v10603_v24 = vpack.i.bf16 %v9838_v61, %v9836_v59  ;;  %v7396_v54 = vunpack.i.l.bf16 %v7395_v43 }
 0xd7f   : > { %v10604_v46 = vld [vmem:[#allocation19_spill] sm:$0xff] }
 0xd80   : > { %7439 = vrot.lane.b32.xlu0 %v7438_v6, %s8221_s27  ;;  %v5189_v38 = vsel %vm1152_vm1, %v10604_v46, %v7397_v33  ;;  %v5188_v15 = vsel %vm1152_vm1, %v10605_v32, %v7396_v54 }
 0xd81   : > { %v5205_v16 = vsel %vm5202_vm3, %v5188_v15, %v7406_v48  ;;  %v5206_v59 = vsel %vm5202_vm3, %v5189_v38, %v7407_v22 }
 0xd84   : > { %7449 = vrot.lane.b32.xlu0 %v10589_v34, %s8223_s15 }
 0xd88   : > { %7459 = vrot.lane.b32.xlu0 %v7458_v49, %s8222_s20  ;;  %v5204_v49 = vsel %vm5202_vm3, %v5187_v1, %v7402_v50 }
 0xd8b   : > { %v4846_v57 = vpop.f32.mrb[144].mxu0  ;;  %v4799_v17 = vpop.f32.mrb[140].mxu1 }
 0xd8c   : > { %v7410_v36 = vpop.permute.xlu0 %7409  ;;  %v7212_v26 = vpop.f32.mrb[141].mxu1 }
 0xd8d   : > { %v7412_v44 = vunpack.i.h.bf16 %v7410_v36  ;;  %v7411_v62 = vunpack.i.l.bf16 %v7410_v36  ;;  %v7218_v56 = vpop.f32.mrb[145].mxu0  ;;  %v4802_v40 = vpop.f32.mrb[142].mxu1 }
 0xd8e   : > { %v4849_v10 = vpop.f32.mrb[146].mxu0  ;;  %v7443_v25 = vpack.i.bf16 %v4802_v40, %v4799_v17  ;;  %v7213_v4 = vpop.f32.mrb[143].mxu1  ;;  %v10607_v40 = vld [vmem:[#allocation20_spill] sm:$0xff] }
 0xd8f   : > { %v7468_v19 = vpack.i.bf16 %v4849_v10, %v4846_v57  ;;  %v7219_v37 = vpop.f32.mrb[147].mxu0  ;;  %v5220_v9 = vsel %vm5219_vm4, %v5203_v5, %v7411_v62  ;;  %v5221_v42 = vsel %vm5219_vm4, %v5204_v49, %v7412_v44  ;;  %v10606_v5 = vld [vmem:[#allocation21_spill] sm:$0xff] }
 0xd90   : > { %v5236_v2 = vpack.c.bf16 %v5221_v42, %v5220_v9  ;;  %7444 = vrot.lane.b32.xlu1 %v7443_v25, %s8221_s27  ;;  %v7420_v1 = vpop.permute.xlu0 %7419 }
 0xd91   : > { %7469 = vrot.lane.b32.xlu0 %v7468_v19, %s8221_s27  ;;  %v7422_v7 = vunpack.i.h.bf16 %v7420_v1  ;;  %v7421_v44 = vunpack.i.l.bf16 %v7420_v1 }
 0xd92   : > { %7254 = vmatprep.mubr.bf16.mxu0 %v5236_v2 }
 0xd93   : > { %v4940_v60 = vpop.f32.mrb[148].mxu0  ;;  %v4893_v35 = vpop.f32.mrb[144].mxu1  ;;  %v5191_v49 = vsel %vm1152_vm1, %v10606_v5, %v7422_v7  ;;  %v5190_v10 = vsel %vm1152_vm1, %v10607_v40, %v7421_v44  ;;  %v10612_v44 = vld [vmem:[#allocation29_spill] sm:$0xff]  ;;  %v10614_v5 = vld [vmem:[#allocation27_spill] sm:$0xff]  ;;  %v10615_v40 = vld [vmem:[#allocation26_spill] sm:$0xff] }
 0xd94   : > { %v7230_v11 = vpop.f32.mrb[149].mxu0  ;;  %7454 = vrot.lane.b32.xlu1 %v10597_v13, %s8223_s15  ;;  %v7224_v28 = vpop.f32.mrb[145].mxu1 }
 0xd95   : > { %7479 = vrot.lane.b32.xlu0 %v10594_v12, %s8223_s15  ;;  %v4896_v63 = vpop.f32.mrb[146].mxu1  ;;  %v4943_v30 = vpop.f32.mrb[150].mxu0 }
 0xd96   : > { %v7473_v3 = vpack.i.bf16 %v4896_v63, %v4893_v35  ;;  %v7498_v45 = vpack.i.bf16 %v4943_v30, %v4940_v60  ;;  %v7225_v39 = vpop.f32.mrb[147].mxu1  ;;  %v7231_v8 = vpop.f32.mrb[151].mxu0 }
 0xd97   : > { %v7430_v20 = vpop.permute.xlu0 %7429  ;;  %v10609_v39 = vld [vmem:[#allocation22_spill] sm:$0xff] }
 0xd98   : > { %7464 = vrot.lane.b32.xlu1 %v10599_v0, %s8222_s20  ;;  %v7432_v62 = vunpack.i.h.bf16 %v7430_v20  ;;  %v7431_v26 = vunpack.i.l.bf16 %v7430_v20 }
 0xd99   : > { %7489 = vrot.lane.b32.xlu0 %v10598_v14, %s8222_s20  ;;  %v10610_v14 = vld [vmem:[#allocation25_spill] sm:$0xff] }
 0xd9a   : > { %v5207_v4 = vsel %vm5202_vm3, %v5190_v10, %v7431_v26  ;;  %v5208_v37 = vsel %vm5202_vm3, %v5191_v49, %v7432_v62  ;;  %v10613_v26 = vld [vmem:[#allocation28_spill] sm:$0xff] }
 0xd9c   : > { %7474 = vrot.lane.b32.xlu1 %v7473_v3, %s8221_s27  ;;  %v10608_v3 = vld [vmem:[#allocation23_spill] sm:$0xff] }
 0xd9d   : > { %7499 = vrot.lane.b32.xlu0 %v7498_v45, %s8221_s27 }
 0xda0   : > { %7484 = vrot.lane.b32.xlu1 %v10602_v27, %s8223_s15 }
 0xda4   : > { %7494 = vrot.lane.b32.xlu1 %v10603_v24, %s8222_s20 }
 0xdc5   : > { %v7415_v6 = vpop.permute.xlu1 %7414 }
 0xdc6   : > { %v7417_v34 = vunpack.i.h.bf16 %v7415_v6  ;;  %v7416_v31 = vunpack.i.l.bf16 %v7415_v6 }
 0xdc8   : > { %v5223_v61 = vsel %vm5219_vm4, %v5206_v59, %v7417_v34  ;;  %v5222_v47 = vsel %vm5219_vm4, %v5205_v16, %v7416_v31 }
 0xdc9   : > { %v5237_v50 = vpack.c.bf16 %v5223_v61, %v5222_v47  ;;  %v7425_v60 = vpop.permute.xlu1 %7424 }
 0xdca   : > { %v7427_v12 = vunpack.i.h.bf16 %v7425_v60  ;;  %v7426_v11 = vunpack.i.l.bf16 %v7425_v60 }
 0xdcb   : > { %7255 = vmatmul.mubr.bf16.vlgmr.msra.gmra.mrb[152].mxu0 %v5237_v50 }
 0xdcc   : > { %v4987_v58 = vpop.f32.mrb[148].mxu1  ;;  %v5193_v45 = vsel %vm1152_vm1, %v10608_v3, %v7427_v12  ;;  %v5192_v8 = vsel %vm1152_vm1, %v10609_v39, %v7426_v11 }
 0xdcd   : > { %v7236_v57 = vpop.f32.mrb[149].mxu1  ;;  %v7435_v51 = vpop.permute.xlu1 %7434 }
 0xdce   : > { %v4990_v17 = vpop.f32.mrb[150].mxu1  ;;  %v7437_v13 = vunpack.i.h.bf16 %v7435_v51  ;;  %v7436_v28 = vunpack.i.l.bf16 %v7435_v51 }
 0xdcf   : > { %v7503_v36 = vpack.i.bf16 %v4990_v17, %v4987_v58  ;;  %v7237_v55 = vpop.f32.mrb[151].mxu1 }
 0xdd0   : > { %v5209_v22 = vsel %vm5202_vm3, %v5192_v8, %v7436_v28  ;;  %v5210_v48 = vsel %vm5202_vm3, %v5193_v45, %v7437_v13 }
 0xdd1   : > { %7504 = vrot.lane.b32.xlu1 %v7503_v36, %s8221_s27  ;;  %s10622_s27 = sld [smem:[#allocation46_spill]] }
 0xdf2   : > { %v7440_v56 = vpop.permute.xlu0 %7439 }
 0xdf3   : > { %v7442_v25 = vunpack.i.h.bf16 %v7440_v56  ;;  %v7441_v19 = vunpack.i.l.bf16 %v7440_v56 }
 0xdf5   : > { %v5224_v9 = vsel %vm5219_vm4, %v5207_v4, %v7441_v19  ;;  %v5225_v42 = vsel %vm5219_vm4, %v5208_v37, %v7442_v25 }
 0xdf6   : > { %v5238_v2 = vpack.c.bf16 %v5225_v42, %v5224_v9  ;;  %v7450_v35 = vpop.permute.xlu0 %7449 }
 0xdf7   : > { %v7452_v23 = vunpack.i.h.bf16 %v7450_v35  ;;  %v7451_v52 = vunpack.i.l.bf16 %v7450_v35 }
 0xdf8   : > { %7258 = vmatprep.mubr.bf16.mxu0 %v5238_v2 }
 0xdf9   : > { %v5195_v0 = vsel %vm1152_vm1, %v10610_v14, %v7452_v23  ;;  %v5194_v29 = vsel %vm1152_vm1, %v10611_v18, %v7451_v52  ;;  %v10616_v14 = vld [vmem:[#allocation31_spill] sm:$0xff]  ;;  %v10617_v18 = vld [vmem:[#allocation30_spill] sm:$0xff] }
 0xdfa   : > { %v7460_v53 = vpop.permute.xlu0 %7459 }
 0xdfb   : > { %v7462_v63 = vunpack.i.h.bf16 %v7460_v53  ;;  %v7461_v30 = vunpack.i.l.bf16 %v7460_v53 }
 0xdfd   : > { %v5211_v6 = vsel %vm5202_vm3, %v5194_v29, %v7461_v30  ;;  %v5212_v46 = vsel %vm5202_vm3, %v5195_v0, %v7462_v63 }
 0xe02   : > { %v7445_v24 = vpop.permute.xlu1 %7444 }
 0xe03   : > { %v7470_v27 = vpop.permute.xlu0 %7469  ;;  %v7447_v33 = vunpack.i.h.bf16 %v7445_v24  ;;  %v7446_v54 = vunpack.i.l.bf16 %v7445_v24 }
 0xe04   : > { %v7472_v43 = vunpack.i.h.bf16 %v7470_v27  ;;  %v7471_v21 = vunpack.i.l.bf16 %v7470_v27 }
 0xe05   : > { %v5226_v38 = vsel %vm5219_vm4, %v5209_v22, %v7446_v54  ;;  %v5227_v32 = vsel %vm5219_vm4, %v5210_v48, %v7447_v33  ;;  %v10160_v48 = vld [vmem:[%s10509_s5] ss:$0 sm:$0xff] }
 0xe06   : > { %v5228_v15 = vsel %vm5219_vm4, %v5211_v6, %v7471_v21  ;;  %v5229_v34 = vsel %vm5219_vm4, %v5212_v46, %v7472_v43  ;;  %v7455_v16 = vpop.permute.xlu1 %7454  ;;  %v5239_v59 = vpack.c.bf16 %v5227_v32, %v5226_v38 }
 0xe07   : > { %v7480_v31 = vpop.permute.xlu0 %7479  ;;  %v5240_v61 = vpack.c.bf16 %v5229_v34, %v5228_v15  ;;  %v7457_v58 = vunpack.i.h.bf16 %v7455_v16  ;;  %v7456_v57 = vunpack.i.l.bf16 %v7455_v16 }
 0xe08   : > { %7259 = vmatmul.mubr.bf16.gmra.mrb[156].mxu0 %v5239_v59  ;;  %v7482_v47 = vunpack.i.h.bf16 %v7480_v31  ;;  %v7481_v50 = vunpack.i.l.bf16 %v7480_v31  ;;  %v7972_v31 = vld [vmem:[%s8514_s19] sm:$0xff] }
 0xe09   : > { %7262 = vmatprep.mubr.bf16.mxu0 %v5240_v61  ;;  %v5197_v49 = vsel %vm1152_vm1, %v10614_v5, %v7457_v58  ;;  %v5196_v10 = vsel %vm1152_vm1, %v10615_v40, %v7456_v57  ;;  %v7973_v61 = vld [vmem:[%s8514_s19 + $0x8] sm:$0xff] }
 0xe0a   : > { %v7465_v36 = vpop.permute.xlu1 %7464  ;;  %v5199_v62 = vsel %vm1152_vm1, %v10612_v44, %v7482_v47  ;;  %v5198_v56 = vsel %vm1152_vm1, %v10613_v26, %v7481_v50  ;;  %v7974_v50 = vld [vmem:[%s8514_s19 + $0x10] sm:$0xff]  ;;  %v7976_v26 = vld [vmem:[%s8514_s19 + $0x20] sm:$0xff]  ;;  %v7977_v40 = vld [vmem:[%s8514_s19 + $0x28] sm:$0xff] }
 0xe0b   : > { %v7490_v17 = vpop.permute.xlu0 %7489  ;;  %v7467_v20 = vunpack.i.h.bf16 %v7465_v36  ;;  %v7466_v7 = vunpack.i.l.bf16 %v7465_v36 }
 0xe0c   : > { %v7492_v55 = vunpack.i.h.bf16 %v7490_v17  ;;  %v7491_v1 = vunpack.i.l.bf16 %v7490_v17  ;;  %v7975_v17 = vld [vmem:[%s8514_s19 + $0x18] sm:$0xff] }
 0xe0d   : > { %v5213_v35 = vsel %vm5202_vm3, %v5196_v10, %v7466_v7  ;;  %v5214_v51 = vsel %vm5202_vm3, %v5197_v49, %v7467_v20 }
 0xe0e   : > { %v7475_v19 = vpop.permute.xlu1 %7474  ;;  %v5215_v2 = vsel %vm5202_vm3, %v5198_v56, %v7491_v1  ;;  %v5216_v60 = vsel %vm5202_vm3, %v5199_v62, %v7492_v55 }
 0xe0f   : > { %v7500_v25 = vpop.permute.xlu0 %7499  ;;  %v7477_v9 = vunpack.i.h.bf16 %v7475_v19  ;;  %v7476_v42 = vunpack.i.l.bf16 %v7475_v19 }
 0xe10   : > { %v7502_v4 = vunpack.i.h.bf16 %v7500_v25  ;;  %v7501_v37 = vunpack.i.l.bf16 %v7500_v25  ;;  %v7978_v25 = vld [vmem:[%s8514_s19 + $0x30] sm:$0xff] }
 0xe11   : > { %v5230_v53 = vsel %vm5219_vm4, %v5213_v35, %v7476_v42  ;;  %v5231_v12 = vsel %vm5219_vm4, %v5214_v51, %v7477_v9 }
 0xe12   : > { %v5232_v11 = vsel %vm5219_vm4, %v5215_v2, %v7501_v37  ;;  %v5233_v23 = vsel %vm5219_vm4, %v5216_v60, %v7502_v4  ;;  %v5241_v52 = vpack.c.bf16 %v5231_v12, %v5230_v53  ;;  %v7485_v28 = vpop.permute.xlu1 %7484  ;;  %v7979_v4 = vld [vmem:[%s8514_s19 + $0x38] sm:$0xff]  ;;  %v7980_v53 = vld [vmem:[%s8514_s19 + $0x40] sm:$0xff] }
 0xe13   : > { %v5242_v13 = vpack.c.bf16 %v5233_v23, %v5232_v11  ;;  %v7487_v30 = vunpack.i.h.bf16 %v7485_v28  ;;  %v7486_v3 = vunpack.i.l.bf16 %v7485_v28  ;;  %v7982_v28 = vld [vmem:[%s8514_s19 + $0x50] sm:$0xff] }
 0xe14   : > { %7263 = vmatmul.mubr.bf16.gmra.mrb[160].mxu0 %v5241_v52  ;;  %v7981_v52 = vld [vmem:[%s8514_s19 + $0x48] sm:$0xff] }
 0xe15   : > { %7266 = vmatprep.mubr.bf16.mxu0 %v5242_v13  ;;  %v5201_v0 = vsel %vm1152_vm1, %v10616_v14, %v7487_v30  ;;  %v5200_v29 = vsel %vm1152_vm1, %v10617_v18, %v7486_v3  ;;  %v7983_v30 = vld [vmem:[%s8514_s19 + $0x58] sm:$0xff] }
 0xe16   : > { %v7495_v63 = vpop.permute.xlu1 %7494 }
 0xe17   : > { %v7497_v45 = vunpack.i.h.bf16 %v7495_v63  ;;  %v7496_v39 = vunpack.i.l.bf16 %v7495_v63 }
 0xe19   : > { %v5217_v43 = vsel %vm5202_vm3, %v5200_v29, %v7496_v39  ;;  %v5218_v21 = vsel %vm5202_vm3, %v5201_v0, %v7497_v45  ;;  %v7984_v29 = vld [vmem:[%s8514_s19 + $0x60] sm:$0xff] }
 0xe43   : > { %v7505_v8 = vpop.permute.xlu1 %7504 }
 0xe44   : > { %v7507_v27 = vunpack.i.h.bf16 %v7505_v8  ;;  %v7506_v24 = vunpack.i.l.bf16 %v7505_v8 }
 0xe46   : > { %v5234_v33 = vsel %vm5219_vm4, %v5217_v43, %v7506_v24  ;;  %v5235_v54 = vsel %vm5219_vm4, %v5218_v21, %v7507_v27  ;;  %v7985_v21 = vld [vmem:[%s8514_s19 + $0x68] sm:$0xff] }
 0xe47   : > { %v5243_v22 = vpack.c.bf16 %v5235_v54, %v5234_v33  ;;  %v7986_v54 = vld [vmem:[%s8514_s19 + $0x70] sm:$0xff] }
 0xe49   : > { %7267 = vmatmul.mubr.bf16.gmra.mrb[164].mxu0 %v5243_v22 }
 0xe9e   : > { %v7256_v6 = vpop.f32.mrb[152].mxu0 }
 0xe9f   : > { %v5349_v46 = vpop.f32.mrb[153].mxu0  ;;  %v5358_v34 = vadd.f32 %v7256_v6, %v10160_v48  ;;  %v7987_v6 = vld [vmem:[%s8514_s19 + $0x78] sm:$0xff]  ;;  %s10621_s19 = sadd.s32 4294967295, %s8204_s24  }
 0xea0   : > { %v5350_v38 = vadd.f32 %v10160_v48, %v5349_v46  ;;  %v7257_v32 = vpop.f32.mrb[154].mxu0  ;;  %s6456_s28 = sshll.u32 %s10621_s19, 3 }
 0xea1   : > { %v5352_v15 = vpop.f32.mrb[155].mxu0  ;;  %v10173_v58 = vadd.f32 %v7974_v50, %v5358_v34  ;;  %v5361_v57 = vadd.f32 %v7257_v32, %v10160_v48  ;;  %p504_p0 = scmp.lt.s32.totalorder %s6456_s28, 15 }
 0xea2   : > { %v10165_v16 = vadd.f32 %v7972_v31, %v5350_v38  ;;  %v5353_v59 = vadd.f32 %v10160_v48, %v5352_v15 }
 0xea3   : > { %v10179_v36 = vadd.f32 %v7975_v17, %v5361_v57  ;;  %s10628_s28 = smov (!%p504_p0, %s6456_s28), 15 }
 0xea4   : > { %v10169_v47 = vadd.f32 %v7973_v61, %v5353_v59  ;;  %5430 = vadd.xlane.f32.xlu0 %v10165_v16  ;;  %s6597_s29 = sshll.u32 %s10628_s28, 4 }
 0xea5   : > { %s10442_s20 = scalar_lea.vmem %s10622_s27, %s6597_s29 }
 0xea6   : > { %5432 = vadd.xlane.f32.xlu1 %v10169_v47 }
 0xea8   : > { %5434 = vadd.xlane.f32.xlu0 %v10173_v58 }
 0xeac   : > { %5436 = vadd.xlane.f32.xlu0 %v10179_v36 }
 0xedb   : > { %v7260_v55 = vpop.f32.mrb[156].mxu0 }
 0xedc   : > { %v5365_v1 = vpop.f32.mrb[157].mxu0  ;;  %v5374_v62 = vadd.f32 %v7260_v55, %v10160_v48 }
 0xedd   : > { %v5366_v20 = vadd.f32 %v10160_v48, %v5365_v1  ;;  %v7261_v7 = vpop.f32.mrb[158].mxu0 }
 0xede   : > { %v5368_v44 = vpop.f32.mrb[159].mxu0  ;;  %v5377_v49 = vadd.f32 %v7261_v7, %v10160_v48  ;;  %v10194_v19 = vadd.f32 %v7978_v25, %v5374_v62  ;;  %v7550_v62 = vld [vmem:[#allocation7 + $0x4] ss:$8 sps:$4 sm:$0xff]   ;;  %v7554_v25 = vld [vmem:[#allocation7 + $0x20] ss:$8 sps:$4 sm:$0xff]  }
 0xedf   : > { %v10185_v56 = vadd.f32 %v7976_v26, %v5366_v20  ;;  %v5369_v5 = vadd.f32 %v10160_v48, %v5368_v44  ;;  %v7548_v44 = vld [vmem:[#allocation7] ss:$8 sps:$4 sm:$0xff]   ;;  %v7553_v26 = vld [vmem:[#allocation7 + $0x14] ss:$8 sps:$4 sm:$0xff]   ;;  %5766 = vmatprep.subr.bf16.mxu1 %v7550_v62 }
 0xee0   : > { %v10198_v37 = vadd.f32 %v7979_v4, %v5377_v49  ;;  %5767 = vmatpush1.bf16.msra.mxu1 %v7548_v44  ;;  %v7551_v49 = vld [vmem:[#allocation7 + $0x10] ss:$8 sps:$4 sm:$0xff]   ;;  %v7559_v4 = vld [vmem:[#allocation7 + $0x34] ss:$8 sps:$4 sm:$0xff]  }
 0xee1   : > { %v10190_v10 = vadd.f32 %v7977_v40, %v5369_v5  ;;  %5438 = vadd.xlane.f32.xlu0 %v10185_v56  ;;  %5768 = vmatprep.subr.bf16.mxu1 %v7553_v26  ;;  %v7556_v40 = vld [vmem:[#allocation7 + $0x24] ss:$8 sps:$4 sm:$0xff]  }
 0xee3   : > { %5440 = vadd.xlane.f32.xlu1 %v10190_v10 }
 0xee4   : > { %5769 = vmatpush1.bf16.msra.mxu1 %v7551_v49 }
 0xee5   : > { %5442 = vadd.xlane.f32.xlu0 %v10194_v19  ;;  %5770 = vmatprep.subr.bf16.mxu1 %v7556_v40 }
 0xee7   : > { %v7264_v9 = vpop.f32.mrb[160].mxu0  ;;  %5444 = vadd.xlane.f32.xlu1 %v10198_v37 }
 0xee8   : > { %v5381_v42 = vpop.f32.mrb[161].mxu0  ;;  %v5390_v51 = vadd.f32 %v7264_v9, %v10160_v48  ;;  %5771 = vmatpush1.bf16.msra.mxu1 %v7554_v25  ;;  %v7557_v9 = vld [vmem:[#allocation7 + $0x30] ss:$8 sps:$4 sm:$0xff]  }
 0xee9   : > { %v5382_v2 = vadd.f32 %v10160_v48, %v5381_v42  ;;  %v7265_v60 = vpop.f32.mrb[162].mxu0  ;;  %5772 = vmatprep.subr.bf16.mxu1 %v7559_v4  ;;  %v7562_v42 = vld [vmem:[#allocation7 + $0x44] ss:$8 sps:$4 sm:$0xff]  }
 0xeea   : > { %v5384_v35 = vpop.f32.mrb[163].mxu0  ;;  %v5393_v23 = vadd.f32 %v7265_v60, %v10160_v48  ;;  %v10214_v63 = vadd.f32 %v7982_v28, %v5390_v51  ;;  %v7565_v60 = vld [vmem:[#allocation7 + $0x54] ss:$8 sps:$4 sm:$0xff]   ;;  %v7566_v51 = vld [vmem:[#allocation7 + $0x60] ss:$8 sps:$4 sm:$0xff]  }
 0xeeb   : > { %v10205_v12 = vadd.f32 %v7980_v53, %v5382_v2  ;;  %v5385_v11 = vadd.f32 %v10160_v48, %v5384_v35  ;;  %v7560_v2 = vld [vmem:[#allocation7 + $0x40] ss:$8 sps:$4 sm:$0xff]   ;;  %v7563_v35 = vld [vmem:[#allocation7 + $0x50] ss:$8 sps:$4 sm:$0xff]   ;;  %v7568_v53 = vld [vmem:[#allocation7 + $0x64] ss:$8 sps:$4 sm:$0xff]  }
 0xeec   : > { %v10218_v3 = vadd.f32 %v7983_v30, %v5393_v23  ;;  %5773 = vmatpush1.bf16.msra.mxu1 %v7557_v9  ;;  %v7569_v23 = vld [vmem:[#allocation7 + $0x70] ss:$8 sps:$4 sm:$0xff]  }
 0xeed   : > { %v10210_v13 = vadd.f32 %v7981_v52, %v5385_v11  ;;  %5446 = vadd.xlane.f32.xlu0 %v10205_v12  ;;  %5774 = vmatprep.subr.bf16.mxu1 %v7562_v42  ;;  %v7571_v11 = vld [vmem:[#allocation7 + $0x74] ss:$8 sps:$4 sm:$0xff]  }
 0xeef   : > { %5448 = vadd.xlane.f32.xlu1 %v10210_v13 }
 0xef0   : > { %5775 = vmatpush1.bf16.msra.mxu1 %v7560_v2 }
 0xef1   : > { %5450 = vadd.xlane.f32.xlu0 %v10214_v63  ;;  %5776 = vmatprep.subr.bf16.mxu1 %v7565_v60 }
 0xef3   : > { %5452 = vadd.xlane.f32.xlu1 %v10218_v3 }
 0xef4   : > { %5777 = vmatpush1.bf16.msra.mxu1 %v7563_v35 }
 0xef5   : > { %5778 = vmatprep.subr.bf16.mxu1 %v7568_v53 }
 0xef8   : > { %5779 = vmatpush1.bf16.msra.mxu1 %v7566_v51 }
 0xef9   : > { %5780 = vmatprep.subr.bf16.mxu1 %v7571_v11 }
 0xefc   : > { %5781 = vmatpush1.bf16.msra.mxu1 %v7569_v23 }
 0xf1c   : > { %v7268_v45 = vpop.f32.mrb[164].mxu0 }
 0xf1d   : > { %v5397_v39 = vpop.f32.mrb[165].mxu0  ;;  %v5406_v18 = vadd.f32 %v7268_v45, %v10160_v48 }
 0xf1e   : > { %v5398_v8 = vadd.f32 %v10160_v48, %v5397_v39  ;;  %v7269_v14 = vpop.f32.mrb[166].mxu0 }
 0xf1f   : > { %v5400_v0 = vpop.f32.mrb[167].mxu0  ;;  %v5409_v43 = vadd.f32 %v7269_v14, %v10160_v48  ;;  %v10234_v22 = vadd.f32 %v7986_v54, %v5406_v18 }
 0xf20   : > { %v10225_v27 = vadd.f32 %v7984_v29, %v5398_v8  ;;  %v5401_v24 = vadd.f32 %v10160_v48, %v5400_v0 }
 0xf21   : > { %v10238_v46 = vadd.f32 %v7987_v6, %v5409_v43 }
 0xf22   : > { %v10230_v33 = vadd.f32 %v7985_v21, %v5401_v24  ;;  %5454 = vadd.xlane.f32.xlu0 %v10225_v27 }
 0xf24   : > { %5456 = vadd.xlane.f32.xlu1 %v10230_v33 }
 0xf26   : > { %5458 = vadd.xlane.f32.xlu0 %v10234_v22 }
 0xf28   : > { %5460 = vadd.xlane.f32.xlu1 %v10238_v46 }
 0xf31   : > { %v5431_v38 = vpop.xlane.xlu0 %5430 }
 0xf32   : > { %v5462_v32 = vmul.f32 0.0078125, %v5431_v38 }
 0xf33   : > { %v5433_v48 = vpop.xlane.xlu1 %5432 }
 0xf34   : > { %v10243_v15 = vsub.f32 %v10165_v16, %v5462_v32  ;;  %v5463_v34 = vmul.f32 0.0078125, %v5433_v48 }
 0xf35   : > { %v5435_v31 = vpop.xlane.xlu0 %5434 }
 0xf36   : > { %v10246_v59 = vsub.f32 %v10169_v47, %v5463_v34  ;;  %v5464_v61 = vmul.f32 0.0078125, %v5435_v31  ;;  %v5494_v50 = vmul.f32 %v10243_v15, %v10243_v15 }
 0xf38   : > { %v10251_v57 = vsub.f32 %v10173_v58, %v5464_v61  ;;  %5510 = vadd.xlane.f32.xlu0 %v5494_v50  ;;  %v5495_v17 = vmul.f32 %v10246_v59, %v10246_v59 }
 0xf39   : > { %v5437_v55 = vpop.xlane.xlu0 %5436 }
 0xf3a   : > { %v5465_v1 = vmul.f32 0.0078125, %v5437_v55  ;;  %5512 = vadd.xlane.f32.xlu1 %v5495_v17  ;;  %v5496_v20 = vmul.f32 %v10251_v57, %v10251_v57 }
 0xf3c   : > { %v10258_v7 = vsub.f32 %v10179_v36, %v5465_v1  ;;  %5514 = vadd.xlane.f32.xlu0 %v5496_v20 }
 0xf3e   : > { %v5497_v5 = vmul.f32 %v10258_v7, %v10258_v7 }
 0xf40   : > { %5516 = vadd.xlane.f32.xlu1 %v5497_v5 }
 0xf6e   : > { %v5439_v52 = vpop.xlane.xlu0 %5438 }
 0xf6f   : > { %v5466_v28 = vmul.f32 0.0078125, %v5439_v52 }
 0xf70   : > { %v5441_v30 = vpop.xlane.xlu1 %5440 }
 0xf71   : > { %v10263_v45 = vsub.f32 %v10185_v56, %v5466_v28  ;;  %v5467_v39 = vmul.f32 0.0078125, %v5441_v30 }
 0xf72   : > { %v5443_v8 = vpop.xlane.xlu0 %5442 }
 0xf73   : > { %v10266_v14 = vsub.f32 %v10190_v10, %v5467_v39  ;;  %v5468_v0 = vmul.f32 0.0078125, %v5443_v8  ;;  %v5498_v18 = vmul.f32 %v10263_v45, %v10263_v45 }
 0xf74   : > { %v5445_v29 = vpop.xlane.xlu1 %5444 }
 0xf75   : > { %v10271_v24 = vsub.f32 %v10194_v19, %v5468_v0  ;;  %v5469_v43 = vmul.f32 0.0078125, %v5445_v29  ;;  %5518 = vadd.xlane.f32.xlu0 %v5498_v18  ;;  %v5499_v21 = vmul.f32 %v10266_v14, %v10266_v14 }
 0xf77   : > { %v10276_v54 = vsub.f32 %v10198_v37, %v5469_v43  ;;  %5520 = vadd.xlane.f32.xlu1 %v5499_v21  ;;  %v5500_v6 = vmul.f32 %v10271_v24, %v10271_v24 }
 0xf79   : > { %5522 = vadd.xlane.f32.xlu0 %v5500_v6  ;;  %v5501_v38 = vmul.f32 %v10276_v54, %v10276_v54 }
 0xf7a   : > { %v5447_v32 = vpop.xlane.xlu0 %5446 }
 0xf7b   : > { %v5470_v48 = vmul.f32 0.0078125, %v5447_v32  ;;  %5524 = vadd.xlane.f32.xlu1 %v5501_v38 }
 0xf7c   : > { %v5449_v34 = vpop.xlane.xlu1 %5448 }
 0xf7d   : > { %v10283_v31 = vsub.f32 %v10205_v12, %v5470_v48  ;;  %v5471_v61 = vmul.f32 0.0078125, %v5449_v34 }
 0xf7e   : > { %v5451_v50 = vpop.xlane.xlu0 %5450 }
 0xf7f   : > { %v10286_v17 = vsub.f32 %v10210_v13, %v5471_v61  ;;  %v5472_v55 = vmul.f32 0.0078125, %v5451_v50  ;;  %v5502_v1 = vmul.f32 %v10283_v31, %v10283_v31 }
 0xf80   : > { %v5453_v20 = vpop.xlane.xlu1 %5452 }
 0xf81   : > { %v10291_v44 = vsub.f32 %v10214_v63, %v5472_v55  ;;  %v5473_v62 = vmul.f32 0.0078125, %v5453_v20  ;;  %5526 = vadd.xlane.f32.xlu0 %v5502_v1  ;;  %v5503_v26 = vmul.f32 %v10286_v17, %v10286_v17  ;;  %v10325_v1 = vld [vmem:[%s10618_s3] ss:$0 sm:$0xff] }
 0xf83   : > { %v10296_v5 = vsub.f32 %v10218_v3, %v5473_v62  ;;  %5528 = vadd.xlane.f32.xlu1 %v5503_v26  ;;  %v5504_v49 = vmul.f32 %v10291_v44, %v10291_v44 }
 0xf85   : > { %5530 = vadd.xlane.f32.xlu0 %v5504_v49  ;;  %v5505_v40 = vmul.f32 %v10296_v5, %v10296_v5 }
 0xf87   : > { %5532 = vadd.xlane.f32.xlu1 %v5505_v40 }
 0xfaf   : > { %v5455_v25 = vpop.xlane.xlu0 %5454 }
 0xfb0   : > { %v5474_v4 = vmul.f32 0.0078125, %v5455_v25  ;;  %v10333_v25 = vld [vmem:[%s10619_s21] ss:$0 sm:$0xff] }
 0xfb1   : > { %v5457_v9 = vpop.xlane.xlu1 %5456 }
 0xfb2   : > { %v10303_v42 = vsub.f32 %v10225_v27, %v5474_v4  ;;  %v5475_v2 = vmul.f32 0.0078125, %v5457_v9 }
 0xfb3   : > { %v5459_v60 = vpop.xlane.xlu0 %5458 }
 0xfb4   : > { %v10306_v35 = vsub.f32 %v10230_v33, %v5475_v2  ;;  %v5476_v51 = vmul.f32 0.0078125, %v5459_v60  ;;  %v5506_v53 = vmul.f32 %v10303_v42, %v10303_v42 }
 0xfb5   : > { %v5461_v11 = vpop.xlane.xlu1 %5460 }
 0xfb6   : > { %v10311_v23 = vsub.f32 %v10234_v22, %v5476_v51  ;;  %v5477_v52 = vmul.f32 0.0078125, %v5461_v11  ;;  %5534 = vadd.xlane.f32.xlu0 %v5506_v53  ;;  %v5507_v28 = vmul.f32 %v10306_v35, %v10306_v35 }
 0xfb8   : > { %v10316_v30 = vsub.f32 %v10238_v46, %v5477_v52  ;;  %5536 = vadd.xlane.f32.xlu1 %v5507_v28  ;;  %v5508_v39 = vmul.f32 %v10311_v23, %v10311_v23 }
 0xfba   : > { %5538 = vadd.xlane.f32.xlu0 %v5508_v39  ;;  %v5509_v8 = vmul.f32 %v10316_v30, %v10316_v30 }
 0xfbc   : > { %5540 = vadd.xlane.f32.xlu1 %v5509_v8  ;;  %v7572_v8 = vld [vmem:[#allocation9 + $0x40] sm:$0xff]  }
 0xfbd   : > { %6758 = vmatprep.subr.bf16.mxu0 %v7572_v8  ;;  %7270 = vmatprep.subr.bf16.mxu1 %v7572_v8 }
 0xfc5   : > { %v5511_v0 = vpop.xlane.xlu0 %5510 }
 0xfc6   : > { %v5542_v18 = vmul.f32 0.0078125, %v5511_v0  ;;  %v7573_v0 = vld [vmem:[#allocation9] sm:$0xff]  }
 0xfc7   : > { %v5513_v29 = vpop.xlane.xlu1 %5512  ;;  %6759 = vmatpush3.bf16.msra.mxu0 %v7573_v0 }
 0xfc8   : > { %v5558_v43 = vadd.f32 1e-05, %v5542_v18  ;;  %v5543_v21 = vmul.f32 0.0078125, %v5513_v29  ;;  %v7574_v18 = vld [vmem:[#allocation9 + $0x48] sm:$0xff]  }
 0xfc9   : > { %v5515_v6 = vpop.xlane.xlu0 %5514  ;;  %6760 = vmatprep.subr.bf16.mxu0 %v7574_v18 }
 0xfca   : > { %7876 = vrsqrt.f32 %v5558_v43  ;;  %v5559_v38 = vadd.f32 1e-05, %v5543_v21  ;;  %v5544_v32 = vmul.f32 0.0078125, %v5515_v6 }
 0xfcc   : > { %7878 = vrsqrt.f32 %v5559_v38  ;;  %v5560_v48 = vadd.f32 1e-05, %v5544_v32 }
 0xfcd   : > { %v5517_v34 = vpop.xlane.xlu1 %5516 }
 0xfce   : > { %7880 = vrsqrt.f32 %v5560_v48  ;;  %v5545_v61 = vmul.f32 0.0078125, %v5517_v34 }
 0xfd0   : > { %v5561_v50 = vadd.f32 1e-05, %v5545_v61 }
 0xfd2   : > { %7882 = vrsqrt.f32 %v5561_v50 }
 0xfd4   : > { %v7877_v55 = vpop.eup %7876 }
 0xfd5   : > { %v5590_v20 = vmul.f32 %v7877_v55, %v10243_v15 }
 0xfd6   : > { %v7879_v62 = vpop.eup %7878 }
 0xfd7   : > { %v5591_v26 = vmul.f32 %v7879_v62, %v10246_v59  ;;  %v5612_v49 = vmul.f32 %v10325_v1, %v5590_v20 }
 0xfd8   : > { %v7881_v40 = vpop.eup %7880 }
 0xfd9   : > { %v5613_v4 = vmul.f32 %v10325_v1, %v5591_v26  ;;  %v5634_v9 = vadd.f32 %v10333_v25, %v5612_v49  ;;  %v5592_v60 = vmul.f32 %v7881_v40, %v10251_v57  ;;  %v7575_v57 = vld [vmem:[#allocation9 + $0x8] sm:$0xff]  }
 0xfda   : > { %6761 = vmatpush3.bf16.msra.mxu0 %v7575_v57 }
 0xfdb   : > { %v5635_v2 = vadd.f32 %v10333_v25, %v5613_v4  ;;  %v5614_v53 = vmul.f32 %v10325_v1, %v5592_v60 }
 0xfdc   : > { %v7883_v15 = vpop.eup %7882 }
 0xfdd   : > { %v5650_v51 = vpack.c.bf16 %v5635_v2, %v5634_v9  ;;  %v5593_v59 = vmul.f32 %v7883_v15, %v10258_v7  ;;  %v5636_v28 = vadd.f32 %v10333_v25, %v5614_v53 }
 0xfdf   : > { %5799 = vmatmul.mubr.bf16.vlgmr.msra.gmra.mrb[152].mxu1 %v5650_v51  ;;  %v5615_v11 = vmul.f32 %v10325_v1, %v5593_v59 }
 0xfe0   : > { %5808 = vmatprep.mubr.bf16.mxu1 %v10583_v41  ;;  %7278 = vmatpush3.bf16.msra.mxu1 %v7573_v0 }
 0xfe1   : > { %v5637_v52 = vadd.f32 %v10333_v25, %v5615_v11  ;;  %7271 = vmatprep.subr.bf16.mxu1 %v7574_v18 }
 0xfe3   : > { %v5651_v39 = vpack.c.bf16 %v5637_v52, %v5636_v28 }
 0xfe4   : > { %7279 = vmatpush3.bf16.msra.mxu1 %v7575_v57 }
 0xfe7   : > { %5809 = vmatmul.mubr.bf16.gmra.mrb[156].mxu1 %v5651_v39 }
 0xfe8   : > { %5818 = vmatprep.mubr.bf16.mxu1 %v10583_v41 }
0x1002   : > { %v5519_v7 = vpop.xlane.xlu0 %5518 }
0x1003   : > { %v5546_v29 = vmul.f32 0.0078125, %v5519_v7 }
0x1004   : > { %v5521_v43 = vpop.xlane.xlu1 %5520 }
0x1005   : > { %v5562_v21 = vadd.f32 1e-05, %v5546_v29  ;;  %v5547_v6 = vmul.f32 0.0078125, %v5521_v43 }
0x1006   : > { %v5523_v38 = vpop.xlane.xlu0 %5522 }
0x1007   : > { %7884 = vrsqrt.f32 %v5562_v21  ;;  %v5563_v32 = vadd.f32 1e-05, %v5547_v6  ;;  %v5548_v48 = vmul.f32 0.0078125, %v5523_v38 }
0x1008   : > { %v5525_v34 = vpop.xlane.xlu1 %5524 }
0x1009   : > { %7886 = vrsqrt.f32 %v5563_v32  ;;  %v5564_v61 = vadd.f32 1e-05, %v5548_v48  ;;  %v5549_v50 = vmul.f32 0.0078125, %v5525_v34 }
0x100b   : > { %7888 = vrsqrt.f32 %v5564_v61  ;;  %v5565_v55 = vadd.f32 1e-05, %v5549_v50 }
0x100d   : > { %7890 = vrsqrt.f32 %v5565_v55 }
0x100e   : > { %v5527_v20 = vpop.xlane.xlu0 %5526 }
0x100f   : > { %v5550_v62 = vmul.f32 0.0078125, %v5527_v20 }
0x1010   : > { %v5529_v26 = vpop.xlane.xlu1 %5528 }
0x1011   : > { %v7885_v49 = vpop.eup %7884  ;;  %v5566_v40 = vadd.f32 1e-05, %v5550_v62  ;;  %v5551_v4 = vmul.f32 0.0078125, %v5529_v26 }
0x1012   : > { %v5531_v9 = vpop.xlane.xlu0 %5530  ;;  %v5594_v2 = vmul.f32 %v7885_v49, %v10263_v45 }
0x1013   : > { %v7887_v60 = vpop.eup %7886  ;;  %7892 = vrsqrt.f32 %v5566_v40  ;;  %v5567_v15 = vadd.f32 1e-05, %v5551_v4  ;;  %v5552_v51 = vmul.f32 0.0078125, %v5531_v9 }
0x1014   : > { %v5533_v59 = vpop.xlane.xlu1 %5532  ;;  %v5595_v53 = vmul.f32 %v7887_v60, %v10266_v14  ;;  %v5616_v11 = vmul.f32 %v10325_v1, %v5594_v2 }
0x1015   : > { %v7889_v52 = vpop.eup %7888  ;;  %7894 = vrsqrt.f32 %v5567_v15  ;;  %v5553_v28 = vmul.f32 0.0078125, %v5533_v59  ;;  %v5568_v0 = vadd.f32 1e-05, %v5552_v51  ;;  %v7576_v15 = vld [vmem:[#allocation9 + $0x50] sm:$0xff]   ;;  %v7579_v51 = vld [vmem:[#allocation9 + $0x18] sm:$0xff]   ;;  %v7580_v59 = vld [vmem:[#allocation9 + $0x60] sm:$0xff]  }
0x1016   : > { %v5617_v39 = vmul.f32 %v10325_v1, %v5595_v53  ;;  %v5638_v57 = vadd.f32 %v10333_v25, %v5616_v11  ;;  %v5596_v7 = vmul.f32 %v7889_v52, %v10271_v24  ;;  %6762 = vmatprep.subr.bf16.mxu0 %v7576_v15  ;;  %7272 = vmatprep.subr.bf16.mxu1 %v7576_v15  ;;  %v7581_v53 = vld [vmem:[#allocation9 + $0x20] sm:$0xff]   ;;  %v7582_v11 = vld [vmem:[#allocation9 + $0x68] sm:$0xff]  }
0x1017   : > { %v7891_v8 = vpop.eup %7890  ;;  %v5569_v18 = vadd.f32 1e-05, %v5553_v28  ;;  %v7583_v52 = vld [vmem:[#allocation9 + $0x28] sm:$0xff]  }
0x1018   : > { %v5639_v45 = vadd.f32 %v10333_v25, %v5617_v39  ;;  %v5597_v29 = vmul.f32 %v7891_v8, %v10276_v54  ;;  %v5618_v21 = vmul.f32 %v10325_v1, %v5596_v7  ;;  %v7584_v8 = vld [vmem:[#allocation9 + $0x70] sm:$0xff]  }
0x1019   : > { %7896 = vrsqrt.f32 %v5569_v18  ;;  %v7585_v18 = vld [vmem:[#allocation9 + $0x30] sm:$0xff]  }
0x101a   : > { %v5652_v14 = vpack.c.bf16 %v5639_v45, %v5638_v57  ;;  %v5619_v43 = vmul.f32 %v10325_v1, %v5597_v29  ;;  %7898 = vrsqrt.f32 %v5568_v0  ;;  %v5640_v48 = vadd.f32 %v10333_v25, %v5618_v21 }
0x101c   : > { %5819 = vmatmul.mubr.bf16.gmra.mrb[160].mxu1 %v5652_v14  ;;  %v5641_v38 = vadd.f32 %v10333_v25, %v5619_v43  ;;  %v7586_v43 = vld [vmem:[#allocation9 + $0x78] sm:$0xff]  }
0x101d   : > { %v7893_v6 = vpop.eup %7892  ;;  %5828 = vmatprep.mubr.bf16.mxu1 %v10583_v41 }
0x101e   : > { %v5598_v24 = vmul.f32 %v7893_v6, %v10283_v31  ;;  %v5653_v34 = vpack.c.bf16 %v5641_v38, %v5640_v48  ;;  %v7587_v6 = vld [vmem:[#allocation9 + $0x38] sm:$0xff]  }
0x101f   : > { %v7895_v32 = vpop.eup %7894 }
0x1020   : > { %v5599_v54 = vmul.f32 %v7895_v32, %v10286_v17  ;;  %v5620_v55 = vmul.f32 %v10325_v1, %v5598_v24 }
0x1022   : > { %v5621_v61 = vmul.f32 %v10325_v1, %v5599_v54  ;;  %v5642_v49 = vadd.f32 %v10333_v25, %v5620_v55 }
0x1023   : > { %v7897_v50 = vpop.eup %7896 }
0x1024   : > { %5829 = vmatmul.mubr.bf16.gmra.mrb[164].mxu1 %v5653_v34  ;;  %v7899_v20 = vpop.eup %7898  ;;  %v5643_v62 = vadd.f32 %v10333_v25, %v5621_v61  ;;  %v5601_v26 = vmul.f32 %v7897_v50, %v10296_v5  ;;  %v7577_v5 = vld [vmem:[#allocation9 + $0x10] sm:$0xff]  }
0x1025   : > { %5838 = vmatprep.mubr.bf16.mxu1 %v10583_v41  ;;  %v5600_v31 = vmul.f32 %v7899_v20, %v10291_v44  ;;  %6763 = vmatpush3.bf16.msra.mxu0 %v7577_v5  ;;  %v7578_v44 = vld [vmem:[#allocation9 + $0x58] sm:$0xff]  }
0x1026   : > { %v5654_v40 = vpack.c.bf16 %v5643_v62, %v5642_v49  ;;  %v5623_v17 = vmul.f32 %v10325_v1, %v5601_v26  ;;  %7280 = vmatpush3.bf16.msra.mxu1 %v7577_v5  ;;  %6764 = vmatprep.subr.bf16.mxu0 %v7578_v44 }
0x1027   : > { %v5622_v4 = vmul.f32 %v10325_v1, %v5600_v31  ;;  %7273 = vmatprep.subr.bf16.mxu1 %v7578_v44 }
0x1028   : > { %v5645_v9 = vadd.f32 %v10333_v25, %v5623_v17 }
0x1029   : > { %v5644_v2 = vadd.f32 %v10333_v25, %v5622_v4  ;;  %6765 = vmatpush3.bf16.msra.mxu0 %v7579_v51 }
0x102a   : > { %7281 = vmatpush3.bf16.msra.mxu1 %v7579_v51  ;;  %6766 = vmatprep.subr.bf16.mxu0 %v7580_v59 }
0x102b   : > { %v5655_v60 = vpack.c.bf16 %v5645_v9, %v5644_v2  ;;  %7274 = vmatprep.subr.bf16.mxu1 %v7580_v59 }
0x102c   : > { %5839 = vmatmul.mubr.bf16.gmra.mrb[168].mxu1 %v5654_v40 }
0x102d   : > { %5848 = vmatprep.mubr.bf16.mxu1 %v10583_v41  ;;  %6767 = vmatpush3.bf16.msra.mxu0 %v7581_v53 }
0x102e   : > { %7282 = vmatpush3.bf16.msra.mxu1 %v7581_v53  ;;  %6768 = vmatprep.subr.bf16.mxu0 %v7582_v11 }
0x102f   : > { %7275 = vmatprep.subr.bf16.mxu1 %v7582_v11 }
0x1031   : > { %6769 = vmatpush3.bf16.msra.mxu0 %v7583_v52 }
0x1032   : > { %7283 = vmatpush3.bf16.msra.mxu1 %v7583_v52  ;;  %6770 = vmatprep.subr.bf16.mxu0 %v7584_v8 }
0x1033   : > { %7276 = vmatprep.subr.bf16.mxu1 %v7584_v8 }
0x1034   : > { %5849 = vmatmul.mubr.bf16.gmra.mrb[172].mxu1 %v5655_v60  ;;  %v5676_v60 = vlaneseq }
0x1035   : > { %5858 = vmatprep.mubr.bf16.mxu1 %v10583_v41  ;;  %6771 = vmatpush3.bf16.msra.mxu0 %v7585_v18 }
0x1036   : > { %7284 = vmatpush3.bf16.msra.mxu1 %v7585_v18  ;;  %6772 = vmatprep.subr.bf16.mxu0 %v7586_v43  ;;  %v5677_v15 = vshrl.u32 %v5676_v60, 7 }
0x1037   : > { %7277 = vmatprep.subr.bf16.mxu1 %v7586_v43 }
0x1038   : > { %v5678_v5 = vsub.s32 0, %v5677_v15 }
0x1039   : > { %6773 = vmatpush3.bf16.msra.mxu0 %v7587_v6 }
0x103a   : > { %7285 = vmatpush3.bf16.msra.mxu1 %v7587_v6 }
0x1043   : > { %v5535_v28 = vpop.xlane.xlu0 %5534 }
0x1044   : > { %v5554_v39 = vmul.f32 0.0078125, %v5535_v28 }
0x1045   : > { %v5537_v0 = vpop.xlane.xlu1 %5536 }
0x1046   : > { %v5570_v57 = vadd.f32 1e-05, %v5554_v39  ;;  %v5555_v45 = vmul.f32 0.0078125, %v5537_v0 }
0x1047   : > { %v5539_v7 = vpop.xlane.xlu0 %5538 }
0x1048   : > { %7900 = vrsqrt.f32 %v5570_v57  ;;  %v5571_v29 = vadd.f32 1e-05, %v5555_v45  ;;  %v5556_v14 = vmul.f32 0.0078125, %v5539_v7 }
0x1049   : > { %v5541_v21 = vpop.xlane.xlu1 %5540 }
0x104a   : > { %7902 = vrsqrt.f32 %v5571_v29  ;;  %v5572_v38 = vadd.f32 1e-05, %v5556_v14  ;;  %v5557_v32 = vmul.f32 0.0078125, %v5541_v21 }
0x104c   : > { %7904 = vrsqrt.f32 %v5572_v38  ;;  %v5573_v48 = vadd.f32 1e-05, %v5557_v32 }
0x104e   : > { %7906 = vrsqrt.f32 %v5573_v48 }
0x1052   : > { %v7901_v24 = vpop.eup %7900 }
0x1053   : > { %v5602_v54 = vmul.f32 %v7901_v24, %v10303_v42 }
0x1054   : > { %v7903_v34 = vpop.eup %7902 }
0x1055   : > { %v5603_v61 = vmul.f32 %v7903_v34, %v10306_v35  ;;  %v5624_v50 = vmul.f32 %v10325_v1, %v5602_v54 }
0x1056   : > { %v7905_v55 = vpop.eup %7904 }
0x1057   : > { %v5625_v20 = vmul.f32 %v10325_v1, %v5603_v61  ;;  %v5646_v26 = vadd.f32 %v10333_v25, %v5624_v50  ;;  %v5604_v31 = vmul.f32 %v7905_v55, %v10311_v23  ;;  %v5674_v23 = vld [vmem:[%s10620_s9] sm:$0x3] }
0x1058   : > { %v7907_v62 = vpop.eup %7906  ;;  %v10390_v44 = vrot.slane %v5674_v23, %v5678_v5 }
0x1059   : > { %v5647_v49 = vadd.f32 %v10333_v25, %v5625_v20  ;;  %v5605_v40 = vmul.f32 %v7907_v62, %v10316_v30  ;;  %v5626_v35 = vmul.f32 %v10325_v1, %v5604_v31  ;;  %v5682_v30 = vsub.s32 1, %v5677_v15 }
0x105b   : > { %v5656_v17 = vpack.c.bf16 %v5647_v49, %v5646_v26  ;;  %v5627_v42 = vmul.f32 %v10325_v1, %v5605_v40  ;;  %v5648_v9 = vadd.f32 %v10333_v25, %v5626_v35  ;;  %v10392_v51 = vrot.slane %v5674_v23, %v5682_v30 }
0x105d   : > { %5859 = vmatmul.mubr.bf16.gmra.mrb[176].mxu1 %v5656_v17  ;;  %v5649_v4 = vadd.f32 %v10333_v25, %v5627_v42 }
0x105e   : > { %5868 = vmatprep.mubr.bf16.mxu1 %v10583_v41 }
0x105f   : > { %v5657_v2 = vpack.c.bf16 %v5649_v4, %v5648_v9 }
0x1065   : > { %5869 = vmatmul.mubr.bf16.gmra.mrb[180].mxu1 %v5657_v2 }
0x10b2   : > { %v5800_v1 = vpop.f32.mrb[152].mxu1 }
0x10b3   : > { %v5801_v41 = vadd.f32 %v5800_v1, %v10390_v44  ;;  %v5802_v59 = vpop.f32.mrb[153].mxu1 }
0x10b4   : > { %v5803_v25 = vadd.f32 %v5802_v59, %v10392_v51  ;;  %v5804_v53 = vpop.f32.mrb[154].mxu1 }
0x10b5   : > { %v5911_v11 = vmul.f32 0.70710677, %v5801_v41  ;;  %v5805_v52 = vadd.f32 %v5804_v53, %v10390_v44  ;;  %v5806_v28 = vpop.f32.mrb[155].mxu1  ;;  %v5879_v62 = vmul.f32 0.5, %v5801_v41 }
0x10b6   : > { %v5912_v39 = vmul.f32 0.70710677, %v5803_v25  ;;  %v5807_v8 = vadd.f32 %v5806_v28, %v10392_v51  ;;  %v5880_v31 = vmul.f32 0.5, %v5803_v25 }
0x10b7   : > { %7908 = verf.f32 %v5911_v11  ;;  %v5913_v0 = vmul.f32 0.70710677, %v5805_v52  ;;  %v5881_v26 = vmul.f32 0.5, %v5805_v52 }
0x10b8   : > { %7910 = verf.f32 %v5912_v39  ;;  %v5914_v18 = vmul.f32 0.70710677, %v5807_v8  ;;  %v5882_v40 = vmul.f32 0.5, %v5807_v8 }
0x10b9   : > { %7912 = verf.f32 %v5913_v0 }
0x10ba   : > { %7914 = verf.f32 %v5914_v18  ;;  %v5810_v57 = vpop.f32.mrb[156].mxu1 }
0x10bb   : > { %v5811_v45 = vadd.f32 %v5810_v57, %v10390_v44  ;;  %v5812_v7 = vpop.f32.mrb[157].mxu1 }
0x10bc   : > { %v5813_v29 = vadd.f32 %v5812_v7, %v10392_v51  ;;  %v5814_v14 = vpop.f32.mrb[158].mxu1 }
0x10bd   : > { %v5915_v43 = vmul.f32 0.70710677, %v5811_v45  ;;  %v5815_v21 = vadd.f32 %v5814_v14, %v10390_v44  ;;  %v5816_v6 = vpop.f32.mrb[159].mxu1  ;;  %v5883_v53 = vmul.f32 0.5, %v5811_v45 }
0x10be   : > { %v5916_v38 = vmul.f32 0.70710677, %v5813_v29  ;;  %v5817_v32 = vadd.f32 %v5816_v6, %v10392_v51  ;;  %v5884_v25 = vmul.f32 0.5, %v5813_v29 }
0x10bf   : > { %7916 = verf.f32 %v5915_v43  ;;  %v5917_v48 = vmul.f32 0.70710677, %v5815_v21  ;;  %v5885_v41 = vmul.f32 0.5, %v5815_v21 }
0x10c0   : > { %7918 = verf.f32 %v5916_v38  ;;  %v5918_v24 = vmul.f32 0.70710677, %v5817_v32  ;;  %v5886_v52 = vmul.f32 0.5, %v5817_v32 }
0x10c1   : > { %v7909_v54 = vpop.eup %7908  ;;  %7920 = verf.f32 %v5917_v48 }
0x10c2   : > { %v7911_v34 = vpop.eup %7910  ;;  %v5975_v61 = vadd.f32 1.0, %v7909_v54  ;;  %7922 = verf.f32 %v5918_v24 }
0x10c3   : > { %v7913_v50 = vpop.eup %7912  ;;  %v5976_v55 = vadd.f32 1.0, %v7911_v34 }
0x10c4   : > { %v7915_v20 = vpop.eup %7914  ;;  %v5977_v49 = vadd.f32 1.0, %v7913_v50  ;;  %v6007_v42 = vmul.f32 %v5975_v61, %v5879_v62 }
0x10c5   : > { %v5978_v17 = vadd.f32 1.0, %v7915_v20  ;;  %v6008_v4 = vmul.f32 %v5976_v55, %v5880_v31 }
0x10c6   : > { %v6009_v35 = vmul.f32 %v5977_v49, %v5881_v26 }
0x10c7   : > { %v6010_v9 = vmul.f32 %v5978_v17, %v5882_v40 }
0x10c8   : > { %v6039_v2 = vpack.c.bf16 %v6009_v35, %v6007_v42 }
0x10c9   : > { %v7917_v60 = vpop.eup %7916  ;;  %v6040_v15 = vpack.c.bf16 %v6010_v9, %v6008_v4 }
0x10ca   : > { %v7919_v5 = vpop.eup %7918  ;;  %v5979_v23 = vadd.f32 1.0, %v7917_v60 }
0x10cb   : > { %v7921_v30 = vpop.eup %7920  ;;  %v5980_v1 = vadd.f32 1.0, %v7919_v5  ;;  %6222 = vmatprep.mubr.bf16.mxu0 %v6040_v15 }
0x10cc   : > { %v7923_v59 = vpop.eup %7922  ;;  %v5981_v11 = vadd.f32 1.0, %v7921_v30  ;;  %6223 = vmatmul.mubr.bf16.vlgmr.msra.gmra.mrb[168].mxu0 %v6039_v2  ;;  %v6011_v39 = vmul.f32 %v5979_v23, %v5883_v53 }
0x10cd   : > { %v5982_v28 = vadd.f32 1.0, %v7923_v59  ;;  %v6012_v0 = vmul.f32 %v5980_v1, %v5884_v25 }
0x10ce   : > { %v6013_v8 = vmul.f32 %v5981_v11, %v5885_v41 }
0x10cf   : > { %v6014_v18 = vmul.f32 %v5982_v28, %v5886_v52 }
0x10d0   : > { %v6041_v57 = vpack.c.bf16 %v6013_v8, %v6011_v39 }
0x10d1   : > { %v6042_v7 = vpack.c.bf16 %v6014_v18, %v6012_v0 }
0x10d3   : > { %6230 = vmatprep.mubr.bf16.mxu0 %v6042_v7 }
0x10d4   : > { %6231 = vmatmul.mubr.bf16.gmra.mrb[172].mxu0 %v6041_v57 }
0x10ef   : > { %v5820_v14 = vpop.f32.mrb[160].mxu1 }
0x10f0   : > { %v5821_v43 = vadd.f32 %v5820_v14, %v10390_v44  ;;  %v5822_v6 = vpop.f32.mrb[161].mxu1 }
0x10f1   : > { %v5823_v45 = vadd.f32 %v5822_v6, %v10392_v51  ;;  %v5824_v21 = vpop.f32.mrb[162].mxu1 }
0x10f2   : > { %v5919_v38 = vmul.f32 0.70710677, %v5821_v43  ;;  %v5825_v29 = vadd.f32 %v5824_v21, %v10390_v44  ;;  %v5826_v32 = vpop.f32.mrb[163].mxu1  ;;  %v5887_v59 = vmul.f32 0.5, %v5821_v43 }
0x10f3   : > { %v5920_v48 = vmul.f32 0.70710677, %v5823_v45  ;;  %v5827_v24 = vadd.f32 %v5826_v32, %v10392_v51  ;;  %v5888_v52 = vmul.f32 0.5, %v5823_v45 }
0x10f4   : > { %7924 = verf.f32 %v5919_v38  ;;  %v5921_v54 = vmul.f32 0.70710677, %v5825_v29  ;;  %v5889_v53 = vmul.f32 0.5, %v5825_v29 }
0x10f5   : > { %7926 = verf.f32 %v5920_v48  ;;  %v5922_v34 = vmul.f32 0.70710677, %v5827_v24  ;;  %v5890_v28 = vmul.f32 0.5, %v5827_v24 }
0x10f6   : > { %7928 = verf.f32 %v5921_v54 }
0x10f7   : > { %7930 = verf.f32 %v5922_v34  ;;  %v5830_v61 = vpop.f32.mrb[164].mxu1 }
0x10f8   : > { %v5831_v50 = vadd.f32 %v5830_v61, %v10390_v44  ;;  %v5832_v55 = vpop.f32.mrb[165].mxu1 }
0x10f9   : > { %v5833_v20 = vadd.f32 %v5832_v55, %v10392_v51  ;;  %v5834_v62 = vpop.f32.mrb[166].mxu1 }
0x10fa   : > { %v5923_v26 = vmul.f32 0.70710677, %v5831_v50  ;;  %v5835_v49 = vadd.f32 %v5834_v62, %v10390_v44  ;;  %v5836_v31 = vpop.f32.mrb[167].mxu1 }
0x10fb   : > { %v5924_v40 = vmul.f32 0.70710677, %v5833_v20  ;;  %v5837_v17 = vadd.f32 %v5836_v31, %v10392_v51 }
0x10fc   : > { %7932 = verf.f32 %v5923_v26  ;;  %v5925_v42 = vmul.f32 0.70710677, %v5835_v49 }
0x10fd   : > { %7934 = verf.f32 %v5924_v40  ;;  %v5926_v35 = vmul.f32 0.70710677, %v5837_v17  ;;  %v5891_v40 = vmul.f32 0.5, %v5831_v50 }
0x10fe   : > { %v7925_v4 = vpop.eup %7924  ;;  %7936 = verf.f32 %v5925_v42  ;;  %v5893_v42 = vmul.f32 0.5, %v5835_v49 }
0x10ff   : > { %v7927_v9 = vpop.eup %7926  ;;  %v5983_v2 = vadd.f32 1.0, %v7925_v4  ;;  %7938 = verf.f32 %v5926_v35  ;;  %v5840_v60 = vpop.f32.mrb[168].mxu1 }
0x1100   : > { %v7929_v15 = vpop.eup %7928  ;;  %v5984_v5 = vadd.f32 1.0, %v7927_v9  ;;  %v10411_v23 = vadd.f32 %v5840_v60, %v10390_v44  ;;  %v5842_v30 = vpop.f32.mrb[169].mxu1  ;;  %v5894_v60 = vmul.f32 0.5, %v5837_v17 }
0x1101   : > { %v7931_v1 = vpop.eup %7930  ;;  %v5985_v41 = vadd.f32 1.0, %v7929_v15  ;;  %v10414_v11 = vadd.f32 %v5842_v30, %v10392_v51  ;;  %v5844_v25 = vpop.f32.mrb[170].mxu1  ;;  %v6015_v18 = vmul.f32 %v5983_v2, %v5887_v59  ;;  %v5892_v2 = vmul.f32 0.5, %v5833_v20 }
0x1102   : > { %v5986_v39 = vadd.f32 1.0, %v7931_v1  ;;  %v5927_v8 = vmul.f32 0.70710677, %v10411_v23  ;;  %v5846_v0 = vpop.f32.mrb[171].mxu1  ;;  %v5845_v14 = vadd.f32 %v5844_v25, %v10390_v44  ;;  %v6016_v6 = vmul.f32 %v5984_v5, %v5888_v52 }
0x1103   : > { %v6017_v57 = vmul.f32 %v5985_v41, %v5889_v53  ;;  %v5928_v7 = vmul.f32 0.70710677, %v10414_v11  ;;  %v5847_v21 = vadd.f32 %v5846_v0, %v10392_v51 }
0x1104   : > { %v6018_v43 = vmul.f32 %v5986_v39, %v5890_v28  ;;  %7940 = verf.f32 %v5927_v8  ;;  %v5929_v38 = vmul.f32 0.70710677, %v5845_v14 }
0x1105   : > { %7942 = verf.f32 %v5928_v7  ;;  %v6043_v29 = vpack.c.bf16 %v6017_v57, %v6015_v18  ;;  %v5930_v32 = vmul.f32 0.70710677, %v5847_v21 }
0x1106   : > { %v7933_v45 = vpop.eup %7932  ;;  %v6044_v48 = vpack.c.bf16 %v6018_v43, %v6016_v6  ;;  %7944 = verf.f32 %v5929_v38  ;;  %v5895_v6 = vmul.f32 0.5, %v10411_v23  ;;  %v5897_v43 = vmul.f32 0.5, %v5845_v14 }
0x1107   : > { %v7935_v24 = vpop.eup %7934  ;;  %v5987_v54 = vadd.f32 1.0, %v7933_v45  ;;  %v5850_v34 = vpop.f32.mrb[172].mxu1  ;;  %7946 = verf.f32 %v5930_v32  ;;  %v5898_v45 = vmul.f32 0.5, %v5847_v21 }
0x1108   : > { %v7937_v61 = vpop.eup %7936  ;;  %v5988_v55 = vadd.f32 1.0, %v7935_v24  ;;  %v5851_v62 = vadd.f32 %v5850_v34, %v10390_v44  ;;  %v5852_v26 = vpop.f32.mrb[173].mxu1  ;;  %6238 = vmatprep.mubr.bf16.mxu0 %v6044_v48 }
0x1109   : > { %v7939_v31 = vpop.eup %7938  ;;  %v5989_v35 = vadd.f32 1.0, %v7937_v61  ;;  %v5853_v4 = vadd.f32 %v5852_v26, %v10392_v51  ;;  %v5854_v9 = vpop.f32.mrb[174].mxu1  ;;  %6239 = vmatmul.mubr.bf16.gmra.mrb[176].mxu0 %v6043_v29  ;;  %v6019_v1 = vmul.f32 %v5987_v54, %v5891_v40  ;;  %v5896_v29 = vmul.f32 0.5, %v10414_v11 }
0x110a   : > { %v5990_v15 = vadd.f32 1.0, %v7939_v31  ;;  %v5931_v5 = vmul.f32 0.70710677, %v5851_v62  ;;  %v5856_v30 = vpop.f32.mrb[175].mxu1  ;;  %v5855_v41 = vadd.f32 %v5854_v9, %v10390_v44  ;;  %v6020_v25 = vmul.f32 %v5988_v55, %v5892_v2 }
0x110b   : > { %v6021_v59 = vmul.f32 %v5989_v35, %v5893_v42  ;;  %v5932_v53 = vmul.f32 0.70710677, %v5853_v4  ;;  %v5857_v50 = vadd.f32 %v5856_v30, %v10392_v51  ;;  %v5899_v23 = vmul.f32 0.5, %v5851_v62 }
0x110c   : > { %v6022_v52 = vmul.f32 %v5990_v15, %v5894_v60  ;;  %7948 = verf.f32 %v5931_v5  ;;  %v5933_v49 = vmul.f32 0.70710677, %v5855_v41  ;;  %v5901_v14 = vmul.f32 0.5, %v5855_v41 }
0x110d   : > { %7950 = verf.f32 %v5932_v53  ;;  %v6045_v28 = vpack.c.bf16 %v6021_v59, %v6019_v1  ;;  %v5934_v8 = vmul.f32 0.70710677, %v5857_v50  ;;  %v5900_v11 = vmul.f32 0.5, %v5853_v4 }
0x110e   : > { %v7941_v39 = vpop.eup %7940  ;;  %v6046_v20 = vpack.c.bf16 %v6022_v52, %v6020_v25  ;;  %7952 = verf.f32 %v5933_v49  ;;  %v5902_v21 = vmul.f32 0.5, %v5857_v50 }
0x110f   : > { %v7943_v17 = vpop.eup %7942  ;;  %v5991_v0 = vadd.f32 1.0, %v7941_v39  ;;  %7954 = verf.f32 %v5934_v8 }
0x1110   : > { %6246 = vmatprep.mubr.bf16.mxu0 %v6046_v20  ;;  %v7945_v18 = vpop.eup %7944  ;;  %v5992_v57 = vadd.f32 1.0, %v7943_v17 }
0x1111   : > { %6247 = vmatmul.mubr.bf16.gmra.mrb[180].mxu0 %v6045_v28  ;;  %v7947_v7 = vpop.eup %7946  ;;  %v5993_v38 = vadd.f32 1.0, %v7945_v18  ;;  %v6023_v48 = vmul.f32 %v5991_v0, %v5895_v6 }
0x1112   : > { %v5994_v32 = vadd.f32 1.0, %v7947_v7  ;;  %v6024_v54 = vmul.f32 %v5992_v57, %v5896_v29 }
0x1113   : > { %v6025_v24 = vmul.f32 %v5993_v38, %v5897_v43 }
0x1114   : > { %v6026_v34 = vmul.f32 %v5994_v32, %v5898_v45 }
0x1115   : > { %v6047_v55 = vpack.c.bf16 %v6025_v24, %v6023_v48 }
0x1116   : > { %v7949_v61 = vpop.eup %7948  ;;  %v6048_v31 = vpack.c.bf16 %v6026_v34, %v6024_v54 }
0x1117   : > { %v7951_v26 = vpop.eup %7950  ;;  %v5995_v40 = vadd.f32 1.0, %v7949_v61 }
0x1118   : > { %v7953_v42 = vpop.eup %7952  ;;  %v5996_v35 = vadd.f32 1.0, %v7951_v26  ;;  %6254 = vmatprep.mubr.bf16.mxu0 %v6048_v31 }
0x1119   : > { %v7955_v9 = vpop.eup %7954  ;;  %v5997_v2 = vadd.f32 1.0, %v7953_v42  ;;  %6255 = vmatmul.mubr.bf16.gmra.mrb[184].mxu0 %v6047_v55  ;;  %v6027_v15 = vmul.f32 %v5995_v40, %v5899_v23 }
0x111a   : > { %v5998_v60 = vadd.f32 1.0, %v7955_v9  ;;  %v6028_v30 = vmul.f32 %v5996_v35, %v5900_v11 }
0x111b   : > { %v6029_v5 = vmul.f32 %v5997_v2, %v5901_v14 }
0x111c   : > { %v6030_v1 = vmul.f32 %v5998_v60, %v5902_v21 }
0x111d   : > { %v6049_v59 = vpack.c.bf16 %v6029_v5, %v6027_v15 }
0x111e   : > { %v6050_v53 = vpack.c.bf16 %v6030_v1, %v6028_v30 }
0x1120   : > { %6262 = vmatprep.mubr.bf16.mxu0 %v6050_v53 }
0x1121   : > { %6263 = vmatmul.mubr.bf16.gmra.mrb[188].mxu0 %v6049_v59 }
0x1130   : > { %v5860_v25 = vpop.f32.mrb[176].mxu1 }
0x1131   : > { %v5861_v52 = vadd.f32 %v5860_v25, %v10390_v44  ;;  %v5862_v49 = vpop.f32.mrb[177].mxu1 }
0x1132   : > { %v5863_v62 = vadd.f32 %v5862_v49, %v10392_v51  ;;  %v5864_v41 = vpop.f32.mrb[178].mxu1 }
0x1133   : > { %v5935_v28 = vmul.f32 0.70710677, %v5861_v52  ;;  %v5865_v4 = vadd.f32 %v5864_v41, %v10390_v44  ;;  %v5866_v50 = vpop.f32.mrb[179].mxu1  ;;  %v5903_v40 = vmul.f32 0.5, %v5861_v52 }
0x1134   : > { %v5936_v39 = vmul.f32 0.70710677, %v5863_v62  ;;  %v5867_v8 = vadd.f32 %v5866_v50, %v10392_v51 }
0x1135   : > { %7956 = verf.f32 %v5935_v28  ;;  %v5937_v20 = vmul.f32 0.70710677, %v5865_v4  ;;  %v5905_v42 = vmul.f32 0.5, %v5865_v4 }
0x1136   : > { %7958 = verf.f32 %v5936_v39  ;;  %v5938_v17 = vmul.f32 0.70710677, %v5867_v8  ;;  %v5906_v9 = vmul.f32 0.5, %v5867_v8 }
0x1137   : > { %7960 = verf.f32 %v5937_v20 }
0x1138   : > { %7962 = verf.f32 %v5938_v17  ;;  %v5870_v0 = vpop.f32.mrb[180].mxu1 }
0x1139   : > { %v5871_v18 = vadd.f32 %v5870_v0, %v10390_v44  ;;  %v5872_v57 = vpop.f32.mrb[181].mxu1 }
0x113a   : > { %v5873_v7 = vadd.f32 %v5872_v57, %v10392_v51  ;;  %v5874_v6 = vpop.f32.mrb[182].mxu1 }
0x113b   : > { %v5939_v43 = vmul.f32 0.70710677, %v5871_v18  ;;  %v5875_v38 = vadd.f32 %v5874_v6, %v10390_v44  ;;  %v5876_v29 = vpop.f32.mrb[183].mxu1  ;;  %v5904_v44 = vmul.f32 0.5, %v5863_v62  ;;  %v5907_v25 = vmul.f32 0.5, %v5871_v18 }
0x113c   : > { %v5940_v45 = vmul.f32 0.70710677, %v5873_v7  ;;  %v5877_v32 = vadd.f32 %v5876_v29, %v10392_v51  ;;  %v5908_v62 = vmul.f32 0.5, %v5873_v7  ;;  %v10436_v18 = vld [vmem:[#allocation10] ss:$0 sm:$0xff] }
0x113d   : > { %7964 = verf.f32 %v5939_v43  ;;  %v5941_v48 = vmul.f32 0.70710677, %v5875_v38  ;;  %v5909_v52 = vmul.f32 0.5, %v5875_v38 }
0x113e   : > { %7966 = verf.f32 %v5940_v45  ;;  %v5942_v24 = vmul.f32 0.70710677, %v5877_v32  ;;  %v5910_v41 = vmul.f32 0.5, %v5877_v32 }
0x113f   : > { %v7957_v54 = vpop.eup %7956  ;;  %7968 = verf.f32 %v5941_v48 }
0x1140   : > { %v7959_v34 = vpop.eup %7958  ;;  %v5999_v61 = vadd.f32 1.0, %v7957_v54  ;;  %7970 = verf.f32 %v5942_v24 }
0x1141   : > { %v7961_v55 = vpop.eup %7960  ;;  %v6000_v26 = vadd.f32 1.0, %v7959_v34 }
0x1142   : > { %v7963_v31 = vpop.eup %7962  ;;  %v6001_v35 = vadd.f32 1.0, %v7961_v55  ;;  %v6031_v14 = vmul.f32 %v5999_v61, %v5903_v40 }
0x1143   : > { %v6002_v23 = vadd.f32 1.0, %v7963_v31  ;;  %v6032_v2 = vmul.f32 %v6000_v26, %v5904_v44 }
0x1144   : > { %v6033_v51 = vmul.f32 %v6001_v35, %v5905_v42 }
0x1145   : > { %v6034_v11 = vmul.f32 %v6002_v23, %v5906_v9 }
0x1146   : > { %v6051_v21 = vpack.c.bf16 %v6033_v51, %v6031_v14 }
0x1147   : > { %v7965_v60 = vpop.eup %7964  ;;  %v6052_v15 = vpack.c.bf16 %v6034_v11, %v6032_v2 }
0x1148   : > { %v7967_v5 = vpop.eup %7966  ;;  %v6003_v30 = vadd.f32 1.0, %v7965_v60 }
0x1149   : > { %v7969_v1 = vpop.eup %7968  ;;  %v6004_v59 = vadd.f32 1.0, %v7967_v5  ;;  %6270 = vmatprep.mubr.bf16.mxu1 %v6052_v15 }
0x114a   : > { %v7971_v53 = vpop.eup %7970  ;;  %v6005_v49 = vadd.f32 1.0, %v7969_v1  ;;  %6271 = vmatmul.mubr.bf16.vlgmr.msra.gmra.mrb[184].mxu1 %v6051_v21  ;;  %v6035_v4 = vmul.f32 %v6003_v30, %v5907_v25 }
0x114b   : > { %v6006_v28 = vadd.f32 1.0, %v7971_v53  ;;  %v6036_v39 = vmul.f32 %v6004_v59, %v5908_v62 }
0x114c   : > { %v6037_v50 = vmul.f32 %v6005_v49, %v5909_v52 }
0x114d   : > { %v6038_v8 = vmul.f32 %v6006_v28, %v5910_v41 }
0x114e   : > { %v6053_v20 = vpack.c.bf16 %v6037_v50, %v6035_v4 }
0x114f   : > { %v6054_v17 = vpack.c.bf16 %v6038_v8, %v6036_v39 }
0x1151   : > { %6278 = vmatprep.mubr.bf16.mxu1 %v6054_v17 }
0x1152   : > { %6279 = vmatmul.mubr.bf16.gmra.mrb[188].mxu1 %v6053_v20 }
0x119f   : > { %v6774_v0 = vpop.f32.mrb[168].mxu0 }
0x11a0   : > { %v6775_v57 = vpop.f32.mrb[169].mxu0 }
0x11a1   : > { %v6776_v7 = vadd.f32 %v6775_v57, %v6774_v0  ;;  %v6777_v6 = vpop.f32.mrb[170].mxu0 }
0x11a2   : > { %v6778_v43 = vpop.f32.mrb[171].mxu0 }
0x11a3   : > { %v6225_v38 = vadd.f32 %v6776_v7, %v10436_v18  ;;  %v6779_v29 = vadd.f32 %v6778_v43, %v6777_v6 }
0x11a5   : > { %v6287_v45 = vadd.f32 %v6225_v38, %v10165_v16  ;;  %v6228_v32 = vadd.f32 %v6779_v29, %v10436_v18 }
0x11a7   : > { %6303 = vst [vmem:[%s10442_s20] sm:$0xff] %v6287_v45  ;;  %v6288_v48 = vadd.f32 %v6228_v32, %v10169_v47  ;;  %v6780_v24 = vpop.f32.mrb[172].mxu0 }
0x11a8   : > { %v6781_v54 = vpop.f32.mrb[173].mxu0 }
0x11a9   : > { %6304 = vst [vmem:[%s10442_s20 + $0x8] sm:$0xff] %v6288_v48  ;;  %v6782_v34 = vadd.f32 %v6781_v54, %v6780_v24  ;;  %v6783_v61 = vpop.f32.mrb[174].mxu0 }
0x11aa   : > { %v6784_v55 = vpop.f32.mrb[175].mxu0 }
0x11ab   : > { %v6233_v26 = vadd.f32 %v6782_v34, %v10436_v18  ;;  %v6785_v31 = vadd.f32 %v6784_v55, %v6783_v61 }
0x11ad   : > { %v6289_v40 = vadd.f32 %v6233_v26, %v10173_v58  ;;  %v6236_v16 = vadd.f32 %v6785_v31, %v10436_v18 }
0x11af   : > { %6305 = vst [vmem:[%s10442_s20 + $0x10] sm:$0xff] %v6289_v40  ;;  %v6290_v42 = vadd.f32 %v6236_v16, %v10179_v36 }
0x11b1   : > { %6306 = vst [vmem:[%s10442_s20 + $0x18] sm:$0xff] %v6290_v42 }
0x11dc   : > { %v6786_v47 = vpop.f32.mrb[176].mxu0 }
0x11dd   : > { %v6787_v35 = vpop.f32.mrb[177].mxu0 }
0x11de   : > { %v6788_v44 = vadd.f32 %v6787_v35, %v6786_v47  ;;  %v6789_v9 = vpop.f32.mrb[178].mxu0 }
0x11df   : > { %v6790_v23 = vpop.f32.mrb[179].mxu0 }
0x11e0   : > { %v6241_v14 = vadd.f32 %v6788_v44, %v10436_v18  ;;  %v6791_v51 = vadd.f32 %v6790_v23, %v6789_v9 }
0x11e2   : > { %v6291_v2 = vadd.f32 %v6241_v14, %v10185_v56  ;;  %v6244_v58 = vadd.f32 %v6791_v51, %v10436_v18 }
0x11e4   : > { %6307 = vst [vmem:[%s10442_s20 + $0x20] sm:$0xff] %v6291_v2  ;;  %v6292_v11 = vadd.f32 %v6244_v58, %v10190_v10  ;;  %v6792_v21 = vpop.f32.mrb[180].mxu0 }
0x11e5   : > { %v6793_v36 = vpop.f32.mrb[181].mxu0 }
0x11e6   : > { %6308 = vst [vmem:[%s10442_s20 + $0x28] sm:$0xff] %v6292_v11  ;;  %v6794_v60 = vadd.f32 %v6793_v36, %v6792_v21  ;;  %v6795_v15 = vpop.f32.mrb[182].mxu0 }
0x11e7   : > { %v6796_v5 = vpop.f32.mrb[183].mxu0 }
0x11e8   : > { %v6249_v30 = vadd.f32 %v6794_v60, %v10436_v18  ;;  %v6797_v1 = vadd.f32 %v6796_v5, %v6795_v15 }
0x11ea   : > { %v6293_v59 = vadd.f32 %v6249_v30, %v10194_v19  ;;  %v6252_v56 = vadd.f32 %v6797_v1, %v10436_v18 }
0x11ec   : > { %6309 = vst [vmem:[%s10442_s20 + $0x30] sm:$0xff] %v6293_v59  ;;  %v6294_v53 = vadd.f32 %v6252_v56, %v10198_v37  ;;  %v6798_v25 = vpop.f32.mrb[184].mxu0 }
0x11ed   : > { %v6799_v10 = vpop.f32.mrb[185].mxu0 }
0x11ee   : > { %6310 = vst [vmem:[%s10442_s20 + $0x38] sm:$0xff] %v6294_v53  ;;  %v6800_v52 = vadd.f32 %v6799_v10, %v6798_v25  ;;  %v6801_v49 = vpop.f32.mrb[186].mxu0 }
0x11ef   : > { %v6802_v62 = vpop.f32.mrb[187].mxu0 }
0x11f0   : > { %v6257_v41 = vadd.f32 %v6800_v52, %v10436_v18  ;;  %v6803_v28 = vadd.f32 %v6802_v62, %v6801_v49 }
0x11f2   : > { %v6295_v4 = vadd.f32 %v6257_v41, %v10205_v12  ;;  %v6260_v19 = vadd.f32 %v6803_v28, %v10436_v18 }
0x11f4   : > { %6311 = vst [vmem:[%s10442_s20 + $0x40] sm:$0xff] %v6295_v4  ;;  %v6296_v50 = vadd.f32 %v6260_v19, %v10210_v13  ;;  %v6804_v39 = vpop.f32.mrb[188].mxu0 }
0x11f5   : > { %v6805_v37 = vpop.f32.mrb[189].mxu0 }
0x11f6   : > { %6312 = vst [vmem:[%s10442_s20 + $0x48] sm:$0xff] %v6296_v50  ;;  %v6806_v8 = vadd.f32 %v6805_v37, %v6804_v39  ;;  %v6807_v20 = vpop.f32.mrb[190].mxu0 }
0x11f7   : > { %v6808_v17 = vpop.f32.mrb[191].mxu0 }
0x11f8   : > { %v6265_v0 = vadd.f32 %v6806_v8, %v10436_v18  ;;  %v6809_v57 = vadd.f32 %v6808_v17, %v6807_v20 }
0x11fa   : > { %v6297_v7 = vadd.f32 %v6265_v0, %v10214_v63  ;;  %v6268_v12 = vadd.f32 %v6809_v57, %v10436_v18 }
0x11fc   : > { %6313 = vst [vmem:[%s10442_s20 + $0x50] sm:$0xff] %v6297_v7  ;;  %v6298_v6 = vadd.f32 %v6268_v12, %v10218_v3 }
0x11fe   : > { %6314 = vst [vmem:[%s10442_s20 + $0x58] sm:$0xff] %v6298_v6 }
0x121d   : > { %v6810_v13 = vpop.f32.mrb[184].mxu1 }
0x121e   : > { %v6811_v43 = vpop.f32.mrb[185].mxu1 }
0x121f   : > { %v6812_v38 = vadd.f32 %v6811_v43, %v6810_v13  ;;  %v6813_v29 = vpop.f32.mrb[186].mxu1 }
0x1220   : > { %v6814_v45 = vpop.f32.mrb[187].mxu1 }
0x1221   : > { %v6273_v32 = vadd.f32 %v6812_v38, %v10436_v18  ;;  %v6815_v48 = vadd.f32 %v6814_v45, %v6813_v29 }
0x1223   : > { %v6299_v24 = vadd.f32 %v6273_v32, %v10225_v27  ;;  %v6276_v63 = vadd.f32 %v6815_v48, %v10436_v18 }
0x1225   : > { %6315 = vst [vmem:[%s10442_s20 + $0x60] sm:$0xff] %v6299_v24  ;;  %v6300_v54 = vadd.f32 %v6276_v63, %v10230_v33  ;;  %v6816_v34 = vpop.f32.mrb[188].mxu1 }
0x1226   : > { %v6817_v3 = vpop.f32.mrb[189].mxu1 }
0x1227   : > { %6316 = vst [vmem:[%s10442_s20 + $0x68] sm:$0xff] %v6300_v54  ;;  %v6818_v61 = vadd.f32 %v6817_v3, %v6816_v34  ;;  %v6819_v55 = vpop.f32.mrb[190].mxu1 }
0x1228   : > { %v6820_v26 = vpop.f32.mrb[191].mxu1 }
0x1229   : > { %v6281_v31 = vadd.f32 %v6818_v61, %v10436_v18  ;;  %v6821_v40 = vadd.f32 %v6820_v26, %v6819_v55 }
0x122b   : > { %v6301_v16 = vadd.f32 %v6281_v31, %v10234_v22  ;;  %v6284_v42 = vadd.f32 %v6821_v40, %v10436_v18 }
0x122d   : > { %6317 = vst [vmem:[%s10442_s20 + $0x70] sm:$0xff] %v6301_v16  ;;  %v6302_v27 = vadd.f32 %v6284_v42, %v10238_v46 }
0x122f   : > { %6318 = vst [vmem:[%s10442_s20 + $0x78] sm:$0xff] %v6302_v27 }
0x1230 PF: > { %p25_p5 = scmp.ge.s32.totalorder %s8447_s30, 4   ;;  %s10623_s21 = smov %s8196_s22 }
0x1231   : > { %s10624_s22 = smov %s8200_s23  ;;  %s10625_s23 = smov %s8458_s16 }
0x1232   : > { %s10626_s24 = smov %s8447_s30  ;;  %27 = sbr.rel (!%p25_p5) target bundleno = 13 (0xd), region = 128 }
0x1239   :  { %6343 = vsyncpa [#allocation3], 1 }
0x123a   :  { %6345 = vsyncpa [#allocation3 + $0x1], 1 }
0x123b   :  { %6346 = vsyncpa [#allocation5], 1 }
0x123c   :  { %6347 = vsyncpa [#allocation8], 1 }
0x123d   :  { %6348 = vsyncpa [#allocation11], 1 }

</bundles_post_ra>
